<compile_context>
chip_gen: v7x
topology: tpu7x:2x2x1
jax: 0.10.0
libtpu: 0.0.40
codegen_flags: <defaults>
</compile_context>

<pallas_src>
import functools

import jax
import jax.numpy as jnp
import numpy as np
from jax import lax
from jax.experimental import pallas as pl
from jax.experimental.pallas import tpu as pltpu

_EPS = 1e-5


# ------------------------------ fused Pallas kernel ------------------------------

def _mycnn_kernel(x4_ref, w1_ref, b1_ref, g1_ref,
                  ae_ref, ao_ref, b2v_ref, g2_ref, msk_ref, mskt_ref,
                  wfc1_ref, sh1_ref, gfc1_ref, befc1_ref,
                  wfc2_ref, bfc2_ref,
                  o_ref, *, n, eps):
    f32 = jnp.float32

    def sum_all(v):                       # (R, C) -> (1, 1), two single-axis reduces
        return jnp.sum(jnp.sum(v, axis=1, keepdims=True), axis=0, keepdims=True)

    # Phase-split input: xph[r][:, t] == x[:, 4*t + r]   (built in the wrapper)
    xph = [x4_ref[r] for r in range(4)]                       # 4 x (N, 46)

    # -------- conv1 (1->6, k=5) + ReLU, evaluated at output position 4m+s --------
    def conv1_phase(s, count):
        outs = []
        for c in range(6):
            acc = None
            for k in range(5):
                r, q = (s + k) % 4, (s + k) // 4
                term = w1_ref[c * 5 + k] * xph[r][:, q:q + count]
                acc = term if acc is None else acc + term
            outs.append(jnp.maximum(acc + b1_ref[c], 0.0))
        return outs                                           # 6 x (N, count)

    h_p0 = conv1_phase(0, 44)
    h_p1 = conv1_phase(1, 44)
    h_p2 = conv1_phase(2, 43)
    h_p3 = conv1_phase(3, 43)

    # -------- maxpool(2,2): pooled index 2m from (4m,4m+1), 2m+1 from (4m+2,4m+3) --------
    p1_e = [jnp.maximum(a, b) for a, b in zip(h_p0, h_p1)]    # 6 x (N, 44)
    p1_o = [jnp.maximum(a, b) for a, b in zip(h_p2, h_p3)]    # 6 x (N, 43)

    # -------- conv1_bn (batch stats over N*87).  beta1 is folded into b2vec. --------
    cnt1 = float(n * 87)
    ue, uo = [], []
    for c in range(6):
        mean = (sum_all(p1_e[c]) + sum_all(p1_o[c])) / cnt1
        ce, co_ = p1_e[c] - mean, p1_o[c] - mean
        var = (sum_all(ce * ce) + sum_all(co_ * co_)) / cnt1
        a1 = lax.rsqrt(var + eps) * g1_ref[c]
        ue.append(ce * a1)
        uo.append(co_ * a1)

    # Lane-dense packed stream: [even ch0..5 (44 each) | odd ch0..5 (43 each)] = 522 lanes
    u = jnp.concatenate(ue + uo, axis=1)                      # (N, 522)

    # -------- conv2 (6->16, k=5) + bias + ReLU + maxpool(2,2) via structured MXU matmuls --------
    # Output is channel-packed: lane co*44 + j, j<41 valid (3 pad lanes per channel).
    c2e = jnp.maximum(jnp.dot(u, ae_ref[...], preferred_element_type=f32) + b2v_ref[...], 0.0)
    c2o = jnp.maximum(jnp.dot(u, ao_ref[...], preferred_element_type=f32) + b2v_ref[...], 0.0)
    p2 = jnp.maximum(c2e, c2o)                                # (N, 704)

    # -------- conv2_bn: per-channel stats on valid lanes via mask matmuls --------
    cnt2 = float(n * 41)
    rowsum = jnp.sum(p2, axis=0, keepdims=True)                               # (1, 704)
    mean16 = jnp.dot(rowsum, msk_ref[...], preferred_element_type=f32) / cnt2  # (1, 16)
    mean_vec = jnp.dot(mean16, mskt_ref[...], preferred_element_type=f32)      # (1, 704)
    cx = p2 - mean_vec
    ssq16 = jnp.dot(jnp.sum(cx * cx, axis=0, keepdims=True), msk_ref[...],
                    preferred_element_type=f32)                                # (1, 16)
    a16 = g2_ref[...] * lax.rsqrt(ssq16 / cnt2 + eps)                          # (1, 16)
    a_vec = jnp.dot(a16, mskt_ref[...], preferred_element_type=f32)            # (1, 704), 0 on pad lanes
    z2s = cx * a_vec                                                           # scaled, pad lanes -> 0

    # -------- fc1: single (N,704)x(704,128) MXU matmul; beta2 & bfc1 folded into sh1 --------
    h = jnp.maximum(jnp.dot(z2s, wfc1_ref[...], preferred_element_type=f32) + sh1_ref[...], 0.0)

    # -------- fc1_bn (batch stats over the N rows) --------
    mean = jnp.sum(h, axis=0, keepdims=True) / n
    cxh = h - mean
    var = jnp.sum(cxh * cxh, axis=0, keepdims=True) / n
    hbn = cxh * (lax.rsqrt(var + eps) * gfc1_ref[...]) + befc1_ref[...]

    # -------- fc2 (lane-dense 128-wide output; wrapper slices [:, :5]) --------
    out = jnp.dot(hbn, wfc2_ref[...], preferred_element_type=f32) + bfc2_ref[...]
    o_ref[...] = out.astype(o_ref.dtype)


# ----------------------------------- wrapper -----------------------------------

def mycnn_forward(x, p):
    """x: (N, 1, 178) float32 (PyTorch NCL).  Returns (N, 5) logits."""
    n = x.shape[0]
    assert x.shape[1:] == (1, 178), x.shape

    # Lane-dense input, phase-split mod 4:  x4[r, :, t] = x[:, 0, 4t + r].
    xs = x.reshape(n, 178)
    xpad = jnp.pad(xs, ((0, 0), (0, 4 * 46 - 178)))
    x4 = jnp.transpose(xpad.reshape(n, 46, 4), (2, 0, 1))      # (4, N, 46)

    w2 = p['w2']                                               # (16, 6, 5)
    beta1 = p['be1']

    # ---- structured conv2 matrices (built from parameters only) ----
    # De[off] (44,44) / Do[off] (43,44): ones at (j+off, j) for j<41 (pad cols j>=41 are zero).
    De = np.zeros((3, 44, 44), np.float32)
    Do = np.zeros((3, 43, 44), np.float32)
    for off in range(3):
        for j in range(41):
            De[off, j + off, j] = 1.0
            Do[off, j + off, j] = 1.0

    def conv2_mat(e_taps, e_offs, o_taps, o_offs):
        # rows 0..263: even-parity streams (ci*44+m); rows 264..521: odd-parity (264+ci*43+m)
        top = jnp.einsum('oit,tab->iaob', w2[:, :, e_taps], De[e_offs]).reshape(6 * 44, 16 * 44)
        bot = jnp.einsum('oit,tab->iaob', w2[:, :, o_taps], Do[o_offs]).reshape(6 * 43, 16 * 44)
        return jnp.concatenate([top, bot], axis=0)             # (522, 704)

    # conv2 output t=2j   reads even stream at off 0,1,2 (k=0,2,4) and odd at off 0,1 (k=1,3)
    a_even = conv2_mat([0, 2, 4], [0, 1, 2], [1, 3], [0, 1])
    # conv2 output t=2j+1 reads even stream at off 1,2  (k=1,3)  and odd at off 0,1,2 (k=0,2,4)
    a_odd = conv2_mat([1, 3], [1, 2], [0, 2, 4], [0, 1, 2])

    # conv2 bias with conv1_bn's beta folded in (position independent)
    b2eff = p['b2'] + jnp.einsum('oik,i->o', w2, beta1)        # (16,)
    b2vec = jnp.repeat(b2eff, 44)[None, :]                     # (1, 704)

    # per-channel valid-lane mask (704 -> 16 sums, 16 -> 704 expansion)
    mask = np.zeros((704, 16), np.float32)
    for co in range(16):
        mask[co * 44:co * 44 + 41, co] = 1.0
    mmask = jnp.asarray(mask)
    mmaskT = jnp.asarray(mask.T)

    # fc1 weight with the torch flatten (co*41+j) mapped onto packed lane co*44+j (pad rows zero)
    wfc1_blk = p['wfc1'].reshape(16, 41, 128)
    wfc1_pad = jnp.pad(wfc1_blk, ((0, 0), (0, 3), (0, 0))).reshape(704, 128)
    # conv2_bn beta folded into a constant fc1 shift:  sum_co beta2[co]*colsum_co(Wfc1) + bfc1
    shift128 = (jnp.einsum('c,cf->f', p['be2'], wfc1_blk.sum(axis=1)) + p['bfc1'])[None, :]

    # lane-dense fc2 (output padded to 128 wide; wrapper slices [:, :5])
    wfc2_pad = jnp.pad(p['wfc2'], ((0, 0), (0, 123)))          # (128, 128)
    bfc2_pad = jnp.pad(p['bfc2'], (0, 123))[None, :]           # (1, 128)

    smem = pl.BlockSpec(memory_space=pltpu.MemorySpace.SMEM)
    vmem = pl.BlockSpec(memory_space=pltpu.MemorySpace.VMEM)

    args = (
        x4,
        p['w1'].reshape(30), p['b1'], p['g1'],
        a_even, a_odd, b2vec, p['g2'].reshape(1, 16), mmask, mmaskT,
        wfc1_pad, shift128, p['gfc1'].reshape(1, 128), p['befc1'].reshape(1, 128),
        wfc2_pad, bfc2_pad,
    )
    in_specs = [
        vmem,
        smem, smem, smem,
        vmem, vmem, vmem, vmem, vmem, vmem,
        vmem, vmem, vmem, vmem,
        vmem, vmem,
    ]

    flops = int(n) * (2 * 522 * 704 * 2            # conv2 even/odd structured matmuls
                      + 2 * 704 * 128              # fc1
                      + 2 * 128 * 128              # fc2
                      + 6 * 5 * 2 * 174)           # conv1 on the VPU
    bytes_accessed = int(4 * (sum(int(np.prod(a.shape)) for a in args) + n * 128))
    cost = pl.CostEstimate(flops=flops, transcendentals=256, bytes_accessed=bytes_accessed)

    out = pl.pallas_call(
        functools.partial(_mycnn_kernel, n=n, eps=_EPS),
        out_shape=jax.ShapeDtypeStruct((n, 128), jnp.float32),
        in_specs=in_specs,
        out_specs=vmem,
        compiler_params=pltpu.CompilerParams(vmem_limit_bytes=64 * 1024 * 1024),
        cost_estimate=cost,
    )(*args)
    return out[:, :5]


# ------------------------------ pure-JAX reference ------------------------------

def _bn_ref(x, g, b, axes):
    mean = jnp.mean(x, axis=axes, keepdims=True)
    var = jnp.mean((x - mean) ** 2, axis=axes, keepdims=True)
    shp = [1] * x.ndim
    shp[1] = x.shape[1]
    return (x - mean) * lax.rsqrt(var + _EPS) * g.reshape(shp) + b.reshape(shp)


def reference_forward(x, p):
    dn = ('NCH', 'OIH', 'NCH')
    hp = lax.Precision.HIGHEST
    h = lax.conv_general_dilated(x, p['w1'], (1,), 'VALID',
                                 dimension_numbers=dn, precision=hp)
    h = jnp.maximum(h + p['b1'][None, :, None], 0.0)
    n, c, l = h.shape
    h = jnp.max(h[:, :, : l // 2 * 2].reshape(n, c, l // 2, 2), axis=-1)
    h = _bn_ref(h, p['g1'], p['be1'], axes=(0, 2))
    h = lax.conv_general_dilated(h, p['w2'], (1,), 'VALID',
                                 dimension_numbers=dn, precision=hp)
    h = jnp.maximum(h + p['b2'][None, :, None], 0.0)
    n, c, l = h.shape
    h = jnp.max(h[:, :, : l // 2 * 2].reshape(n, c, l // 2, 2), axis=-1)
    h = _bn_ref(h, p['g2'], p['be2'], axes=(0, 2))
    h = h.reshape(n, 16 * 41)
    h = jnp.maximum(jnp.dot(h, p['wfc1'], precision=hp) + p['bfc1'], 0.0)
    h = _bn_ref(h, p['gfc1'], p['befc1'], axes=(0,))
    return jnp.dot(h, p['wfc2'], precision=hp) + p['bfc2']


# ------------------------------------- main -------------------------------------

if __name__ == "__main__":
    f32 = jnp.float32
    ks = jax.random.split(jax.random.PRNGKey(0), 15)
    params = dict(
        w1=0.3 * jax.random.normal(ks[0], (6, 1, 5), f32),      # Conv1d(1, 6, 5)
        b1=0.1 * jax.random.normal(ks[1], (6,), f32),
        g1=1.0 + 0.1 * jax.random.normal(ks[2], (6,), f32),     # BatchNorm1d(6)
        be1=0.1 * jax.random.normal(ks[3], (6,), f32),
        w2=0.2 * jax.random.normal(ks[4], (16, 6, 5), f32),     # Conv1d(6, 16, 5)
        b2=0.1 * jax.random.normal(ks[5], (16,), f32),
        g2=1.0 + 0.1 * jax.random.normal(ks[6], (16,), f32),    # BatchNorm1d(16)
        be2=0.1 * jax.random.normal(ks[7], (16,), f32),
        wfc1=0.05 * jax.random.normal(ks[8], (656, 128), f32),  # Linear(16*41, 128), W^T
        bfc1=0.1 * jax.random.normal(ks[9], (128,), f32),
        gfc1=1.0 + 0.1 * jax.random.normal(ks[10], (128,), f32),  # BatchNorm1d(128)
        befc1=0.1 * jax.random.normal(ks[11], (128,), f32),
        wfc2=0.1 * jax.random.normal(ks[12], (128, 5), f32),    # Linear(128, 5), W^T
        bfc2=0.1 * jax.random.normal(ks[13], (5,), f32),
    )
    # batch=2, 1 input channel, sequence length 178 (so 16*41 features reach fc1)
    x = jax.random.normal(ks[14], (2, 1, 178), f32)

    out = jax.block_until_ready(mycnn_forward(x, params))
    ref = jax.block_until_ready(reference_forward(x, params))

    assert out.shape == (2, 5), out.shape
    np.testing.assert_allclose(np.asarray(out), np.asarray(ref), rtol=1e-3, atol=1e-3)
    print("KERNEL_OK")
</pallas_src>

<mosaic_0001>
module attributes {stable_mosaic.version = 11 : i64} {
  func.func @_mycnn_kernel(%arg0: memref<4x2x46xf32, #tpu.memory_space<vmem>>, %arg1: memref<30xf32, #tpu.memory_space<smem>>, %arg2: memref<6xf32, #tpu.memory_space<smem>>, %arg3: memref<6xf32, #tpu.memory_space<smem>>, %arg4: memref<522x704xf32, #tpu.memory_space<vmem>>, %arg5: memref<522x704xf32, #tpu.memory_space<vmem>>, %arg6: memref<1x704xf32, #tpu.memory_space<vmem>>, %arg7: memref<1x16xf32, #tpu.memory_space<vmem>>, %arg8: memref<704x16xf32, #tpu.memory_space<vmem>>, %arg9: memref<16x704xf32, #tpu.memory_space<vmem>>, %arg10: memref<704x128xf32, #tpu.memory_space<vmem>>, %arg11: memref<1x128xf32, #tpu.memory_space<vmem>>, %arg12: memref<1x128xf32, #tpu.memory_space<vmem>>, %arg13: memref<1x128xf32, #tpu.memory_space<vmem>>, %arg14: memref<128x128xf32, #tpu.memory_space<vmem>>, %arg15: memref<1x128xf32, #tpu.memory_space<vmem>>, %arg16: memref<2x128xf32, #tpu.memory_space<vmem>>) attributes {dimension_semantics = [], scalar_prefetch = 0 : i64, scratch_operands = 0 : i64, tpu.core_type = #tpu.core_type<tc>} {
    %c0 = arith.constant 0 : index
    %c0_0 = arith.constant 0 : index
    %c0_1 = arith.constant 0 : index
    %0 = vector.load %arg0[%c0, %c0_0, %c0_1] : memref<4x2x46xf32, #tpu.memory_space<vmem>>, vector<1x2x46xf32>
    %1 = vector.shape_cast %0 : vector<1x2x46xf32> to vector<2x46xf32>
    %c1 = arith.constant 1 : index
    %c0_2 = arith.constant 0 : index
    %c0_3 = arith.constant 0 : index
    %2 = vector.load %arg0[%c1, %c0_2, %c0_3] : memref<4x2x46xf32, #tpu.memory_space<vmem>>, vector<1x2x46xf32>
    %3 = vector.shape_cast %2 : vector<1x2x46xf32> to vector<2x46xf32>
    %c2 = arith.constant 2 : index
    %c0_4 = arith.constant 0 : index
    %c0_5 = arith.constant 0 : index
    %4 = vector.load %arg0[%c2, %c0_4, %c0_5] : memref<4x2x46xf32, #tpu.memory_space<vmem>>, vector<1x2x46xf32>
    %5 = vector.shape_cast %4 : vector<1x2x46xf32> to vector<2x46xf32>
    %c3 = arith.constant 3 : index
    %c0_6 = arith.constant 0 : index
    %c0_7 = arith.constant 0 : index
    %6 = vector.load %arg0[%c3, %c0_6, %c0_7] : memref<4x2x46xf32, #tpu.memory_space<vmem>>, vector<1x2x46xf32>
    %7 = vector.shape_cast %6 : vector<1x2x46xf32> to vector<2x46xf32>
    %c0_8 = arith.constant 0 : index
    %8 = memref.load %arg1[%c0_8] : memref<30xf32, #tpu.memory_space<smem>>
    %9 = vector.extract_strided_slice %1 {offsets = [0, 0], sizes = [2, 44], strides = [1, 1]} : vector<2x46xf32> to vector<2x44xf32>
    %10 = vector.broadcast %8 : f32 to vector<2x44xf32>
    %11 = arith.mulf %10, %9 : vector<2x44xf32>
    %c1_9 = arith.constant 1 : index
    %12 = memref.load %arg1[%c1_9] : memref<30xf32, #tpu.memory_space<smem>>
    %13 = vector.extract_strided_slice %3 {offsets = [0, 0], sizes = [2, 44], strides = [1, 1]} : vector<2x46xf32> to vector<2x44xf32>
    %14 = vector.broadcast %12 : f32 to vector<2x44xf32>
    %15 = arith.mulf %14, %13 : vector<2x44xf32>
    %16 = arith.addf %11, %15 : vector<2x44xf32>
    %c2_10 = arith.constant 2 : index
    %17 = memref.load %arg1[%c2_10] : memref<30xf32, #tpu.memory_space<smem>>
    %18 = vector.extract_strided_slice %5 {offsets = [0, 0], sizes = [2, 44], strides = [1, 1]} : vector<2x46xf32> to vector<2x44xf32>
    %19 = vector.broadcast %17 : f32 to vector<2x44xf32>
    %20 = arith.mulf %19, %18 : vector<2x44xf32>
    %21 = arith.addf %16, %20 : vector<2x44xf32>
    %c3_11 = arith.constant 3 : index
    %22 = memref.load %arg1[%c3_11] : memref<30xf32, #tpu.memory_space<smem>>
    %23 = vector.extract_strided_slice %7 {offsets = [0, 0], sizes = [2, 44], strides = [1, 1]} : vector<2x46xf32> to vector<2x44xf32>
    %24 = vector.broadcast %22 : f32 to vector<2x44xf32>
    %25 = arith.mulf %24, %23 : vector<2x44xf32>
    %26 = arith.addf %21, %25 : vector<2x44xf32>
    %c4 = arith.constant 4 : index
    %27 = memref.load %arg1[%c4] : memref<30xf32, #tpu.memory_space<smem>>
    %28 = vector.extract_strided_slice %1 {offsets = [0, 1], sizes = [2, 44], strides = [1, 1]} : vector<2x46xf32> to vector<2x44xf32>
    %29 = vector.broadcast %27 : f32 to vector<2x44xf32>
    %30 = arith.mulf %29, %28 : vector<2x44xf32>
    %31 = arith.addf %26, %30 : vector<2x44xf32>
    %c0_12 = arith.constant 0 : index
    %32 = memref.load %arg2[%c0_12] : memref<6xf32, #tpu.memory_space<smem>>
    %33 = vector.broadcast %32 : f32 to vector<2x44xf32>
    %34 = arith.addf %31, %33 : vector<2x44xf32>
    %cst = arith.constant 0.000000e+00 : f32
    %35 = vector.broadcast %cst : f32 to vector<2x44xf32>
    %36 = arith.maximumf %34, %35 : vector<2x44xf32>
    %c5 = arith.constant 5 : index
    %37 = memref.load %arg1[%c5] : memref<30xf32, #tpu.memory_space<smem>>
    %38 = vector.extract_strided_slice %1 {offsets = [0, 0], sizes = [2, 44], strides = [1, 1]} : vector<2x46xf32> to vector<2x44xf32>
    %39 = vector.broadcast %37 : f32 to vector<2x44xf32>
    %40 = arith.mulf %39, %38 : vector<2x44xf32>
    %c6 = arith.constant 6 : index
    %41 = memref.load %arg1[%c6] : memref<30xf32, #tpu.memory_space<smem>>
    %42 = vector.extract_strided_slice %3 {offsets = [0, 0], sizes = [2, 44], strides = [1, 1]} : vector<2x46xf32> to vector<2x44xf32>
    %43 = vector.broadcast %41 : f32 to vector<2x44xf32>
    %44 = arith.mulf %43, %42 : vector<2x44xf32>
    %45 = arith.addf %40, %44 : vector<2x44xf32>
    %c7 = arith.constant 7 : index
    %46 = memref.load %arg1[%c7] : memref<30xf32, #tpu.memory_space<smem>>
    %47 = vector.extract_strided_slice %5 {offsets = [0, 0], sizes = [2, 44], strides = [1, 1]} : vector<2x46xf32> to vector<2x44xf32>
    %48 = vector.broadcast %46 : f32 to vector<2x44xf32>
    %49 = arith.mulf %48, %47 : vector<2x44xf32>
    %50 = arith.addf %45, %49 : vector<2x44xf32>
    %c8 = arith.constant 8 : index
    %51 = memref.load %arg1[%c8] : memref<30xf32, #tpu.memory_space<smem>>
    %52 = vector.extract_strided_slice %7 {offsets = [0, 0], sizes = [2, 44], strides = [1, 1]} : vector<2x46xf32> to vector<2x44xf32>
    %53 = vector.broadcast %51 : f32 to vector<2x44xf32>
    %54 = arith.mulf %53, %52 : vector<2x44xf32>
    %55 = arith.addf %50, %54 : vector<2x44xf32>
    %c9 = arith.constant 9 : index
    %56 = memref.load %arg1[%c9] : memref<30xf32, #tpu.memory_space<smem>>
    %57 = vector.extract_strided_slice %1 {offsets = [0, 1], sizes = [2, 44], strides = [1, 1]} : vector<2x46xf32> to vector<2x44xf32>
    %58 = vector.broadcast %56 : f32 to vector<2x44xf32>
    %59 = arith.mulf %58, %57 : vector<2x44xf32>
    %60 = arith.addf %55, %59 : vector<2x44xf32>
    %c1_13 = arith.constant 1 : index
    %61 = memref.load %arg2[%c1_13] : memref<6xf32, #tpu.memory_space<smem>>
    %62 = vector.broadcast %61 : f32 to vector<2x44xf32>
    %63 = arith.addf %60, %62 : vector<2x44xf32>
    %cst_14 = arith.constant 0.000000e+00 : f32
    %64 = vector.broadcast %cst_14 : f32 to vector<2x44xf32>
    %65 = arith.maximumf %63, %64 : vector<2x44xf32>
    %c10 = arith.constant 10 : index
    %66 = memref.load %arg1[%c10] : memref<30xf32, #tpu.memory_space<smem>>
    %67 = vector.extract_strided_slice %1 {offsets = [0, 0], sizes = [2, 44], strides = [1, 1]} : vector<2x46xf32> to vector<2x44xf32>
    %68 = vector.broadcast %66 : f32 to vector<2x44xf32>
    %69 = arith.mulf %68, %67 : vector<2x44xf32>
    %c11 = arith.constant 11 : index
    %70 = memref.load %arg1[%c11] : memref<30xf32, #tpu.memory_space<smem>>
    %71 = vector.extract_strided_slice %3 {offsets = [0, 0], sizes = [2, 44], strides = [1, 1]} : vector<2x46xf32> to vector<2x44xf32>
    %72 = vector.broadcast %70 : f32 to vector<2x44xf32>
    %73 = arith.mulf %72, %71 : vector<2x44xf32>
    %74 = arith.addf %69, %73 : vector<2x44xf32>
    %c12 = arith.constant 12 : index
    %75 = memref.load %arg1[%c12] : memref<30xf32, #tpu.memory_space<smem>>
    %76 = vector.extract_strided_slice %5 {offsets = [0, 0], sizes = [2, 44], strides = [1, 1]} : vector<2x46xf32> to vector<2x44xf32>
    %77 = vector.broadcast %75 : f32 to vector<2x44xf32>
    %78 = arith.mulf %77, %76 : vector<2x44xf32>
    %79 = arith.addf %74, %78 : vector<2x44xf32>
    %c13 = arith.constant 13 : index
    %80 = memref.load %arg1[%c13] : memref<30xf32, #tpu.memory_space<smem>>
    %81 = vector.extract_strided_slice %7 {offsets = [0, 0], sizes = [2, 44], strides = [1, 1]} : vector<2x46xf32> to vector<2x44xf32>
    %82 = vector.broadcast %80 : f32 to vector<2x44xf32>
    %83 = arith.mulf %82, %81 : vector<2x44xf32>
    %84 = arith.addf %79, %83 : vector<2x44xf32>
    %c14 = arith.constant 14 : index
    %85 = memref.load %arg1[%c14] : memref<30xf32, #tpu.memory_space<smem>>
    %86 = vector.extract_strided_slice %1 {offsets = [0, 1], sizes = [2, 44], strides = [1, 1]} : vector<2x46xf32> to vector<2x44xf32>
    %87 = vector.broadcast %85 : f32 to vector<2x44xf32>
    %88 = arith.mulf %87, %86 : vector<2x44xf32>
    %89 = arith.addf %84, %88 : vector<2x44xf32>
    %c2_15 = arith.constant 2 : index
    %90 = memref.load %arg2[%c2_15] : memref<6xf32, #tpu.memory_space<smem>>
    %91 = vector.broadcast %90 : f32 to vector<2x44xf32>
    %92 = arith.addf %89, %91 : vector<2x44xf32>
    %cst_16 = arith.constant 0.000000e+00 : f32
    %93 = vector.broadcast %cst_16 : f32 to vector<2x44xf32>
    %94 = arith.maximumf %92, %93 : vector<2x44xf32>
    %c15 = arith.constant 15 : index
    %95 = memref.load %arg1[%c15] : memref<30xf32, #tpu.memory_space<smem>>
    %96 = vector.extract_strided_slice %1 {offsets = [0, 0], sizes = [2, 44], strides = [1, 1]} : vector<2x46xf32> to vector<2x44xf32>
    %97 = vector.broadcast %95 : f32 to vector<2x44xf32>
    %98 = arith.mulf %97, %96 : vector<2x44xf32>
    %c16 = arith.constant 16 : index
    %99 = memref.load %arg1[%c16] : memref<30xf32, #tpu.memory_space<smem>>
    %100 = vector.extract_strided_slice %3 {offsets = [0, 0], sizes = [2, 44], strides = [1, 1]} : vector<2x46xf32> to vector<2x44xf32>
    %101 = vector.broadcast %99 : f32 to vector<2x44xf32>
    %102 = arith.mulf %101, %100 : vector<2x44xf32>
    %103 = arith.addf %98, %102 : vector<2x44xf32>
    %c17 = arith.constant 17 : index
    %104 = memref.load %arg1[%c17] : memref<30xf32, #tpu.memory_space<smem>>
    %105 = vector.extract_strided_slice %5 {offsets = [0, 0], sizes = [2, 44], strides = [1, 1]} : vector<2x46xf32> to vector<2x44xf32>
    %106 = vector.broadcast %104 : f32 to vector<2x44xf32>
    %107 = arith.mulf %106, %105 : vector<2x44xf32>
    %108 = arith.addf %103, %107 : vector<2x44xf32>
    %c18 = arith.constant 18 : index
    %109 = memref.load %arg1[%c18] : memref<30xf32, #tpu.memory_space<smem>>
    %110 = vector.extract_strided_slice %7 {offsets = [0, 0], sizes = [2, 44], strides = [1, 1]} : vector<2x46xf32> to vector<2x44xf32>
    %111 = vector.broadcast %109 : f32 to vector<2x44xf32>
    %112 = arith.mulf %111, %110 : vector<2x44xf32>
    %113 = arith.addf %108, %112 : vector<2x44xf32>
    %c19 = arith.constant 19 : index
    %114 = memref.load %arg1[%c19] : memref<30xf32, #tpu.memory_space<smem>>
    %115 = vector.extract_strided_slice %1 {offsets = [0, 1], sizes = [2, 44], strides = [1, 1]} : vector<2x46xf32> to vector<2x44xf32>
    %116 = vector.broadcast %114 : f32 to vector<2x44xf32>
    %117 = arith.mulf %116, %115 : vector<2x44xf32>
    %118 = arith.addf %113, %117 : vector<2x44xf32>
    %c3_17 = arith.constant 3 : index
    %119 = memref.load %arg2[%c3_17] : memref<6xf32, #tpu.memory_space<smem>>
    %120 = vector.broadcast %119 : f32 to vector<2x44xf32>
    %121 = arith.addf %118, %120 : vector<2x44xf32>
    %cst_18 = arith.constant 0.000000e+00 : f32
    %122 = vector.broadcast %cst_18 : f32 to vector<2x44xf32>
    %123 = arith.maximumf %121, %122 : vector<2x44xf32>
    %c20 = arith.constant 20 : index
    %124 = memref.load %arg1[%c20] : memref<30xf32, #tpu.memory_space<smem>>
    %125 = vector.extract_strided_slice %1 {offsets = [0, 0], sizes = [2, 44], strides = [1, 1]} : vector<2x46xf32> to vector<2x44xf32>
    %126 = vector.broadcast %124 : f32 to vector<2x44xf32>
    %127 = arith.mulf %126, %125 : vector<2x44xf32>
    %c21 = arith.constant 21 : index
    %128 = memref.load %arg1[%c21] : memref<30xf32, #tpu.memory_space<smem>>
    %129 = vector.extract_strided_slice %3 {offsets = [0, 0], sizes = [2, 44], strides = [1, 1]} : vector<2x46xf32> to vector<2x44xf32>
    %130 = vector.broadcast %128 : f32 to vector<2x44xf32>
    %131 = arith.mulf %130, %129 : vector<2x44xf32>
    %132 = arith.addf %127, %131 : vector<2x44xf32>
    %c22 = arith.constant 22 : index
    %133 = memref.load %arg1[%c22] : memref<30xf32, #tpu.memory_space<smem>>
    %134 = vector.extract_strided_slice %5 {offsets = [0, 0], sizes = [2, 44], strides = [1, 1]} : vector<2x46xf32> to vector<2x44xf32>
    %135 = vector.broadcast %133 : f32 to vector<2x44xf32>
    %136 = arith.mulf %135, %134 : vector<2x44xf32>
    %137 = arith.addf %132, %136 : vector<2x44xf32>
    %c23 = arith.constant 23 : index
    %138 = memref.load %arg1[%c23] : memref<30xf32, #tpu.memory_space<smem>>
    %139 = vector.extract_strided_slice %7 {offsets = [0, 0], sizes = [2, 44], strides = [1, 1]} : vector<2x46xf32> to vector<2x44xf32>
    %140 = vector.broadcast %138 : f32 to vector<2x44xf32>
    %141 = arith.mulf %140, %139 : vector<2x44xf32>
    %142 = arith.addf %137, %141 : vector<2x44xf32>
    %c24 = arith.constant 24 : index
    %143 = memref.load %arg1[%c24] : memref<30xf32, #tpu.memory_space<smem>>
    %144 = vector.extract_strided_slice %1 {offsets = [0, 1], sizes = [2, 44], strides = [1, 1]} : vector<2x46xf32> to vector<2x44xf32>
    %145 = vector.broadcast %143 : f32 to vector<2x44xf32>
    %146 = arith.mulf %145, %144 : vector<2x44xf32>
    %147 = arith.addf %142, %146 : vector<2x44xf32>
    %c4_19 = arith.constant 4 : index
    %148 = memref.load %arg2[%c4_19] : memref<6xf32, #tpu.memory_space<smem>>
    %149 = vector.broadcast %148 : f32 to vector<2x44xf32>
    %150 = arith.addf %147, %149 : vector<2x44xf32>
    %cst_20 = arith.constant 0.000000e+00 : f32
    %151 = vector.broadcast %cst_20 : f32 to vector<2x44xf32>
    %152 = arith.maximumf %150, %151 : vector<2x44xf32>
    %c25 = arith.constant 25 : index
    %153 = memref.load %arg1[%c25] : memref<30xf32, #tpu.memory_space<smem>>
    %154 = vector.extract_strided_slice %1 {offsets = [0, 0], sizes = [2, 44], strides = [1, 1]} : vector<2x46xf32> to vector<2x44xf32>
    %155 = vector.broadcast %153 : f32 to vector<2x44xf32>
    %156 = arith.mulf %155, %154 : vector<2x44xf32>
    %c26 = arith.constant 26 : index
    %157 = memref.load %arg1[%c26] : memref<30xf32, #tpu.memory_space<smem>>
    %158 = vector.extract_strided_slice %3 {offsets = [0, 0], sizes = [2, 44], strides = [1, 1]} : vector<2x46xf32> to vector<2x44xf32>
    %159 = vector.broadcast %157 : f32 to vector<2x44xf32>
    %160 = arith.mulf %159, %158 : vector<2x44xf32>
    %161 = arith.addf %156, %160 : vector<2x44xf32>
    %c27 = arith.constant 27 : index
    %162 = memref.load %arg1[%c27] : memref<30xf32, #tpu.memory_space<smem>>
    %163 = vector.extract_strided_slice %5 {offsets = [0, 0], sizes = [2, 44], strides = [1, 1]} : vector<2x46xf32> to vector<2x44xf32>
    %164 = vector.broadcast %162 : f32 to vector<2x44xf32>
    %165 = arith.mulf %164, %163 : vector<2x44xf32>
    %166 = arith.addf %161, %165 : vector<2x44xf32>
    %c28 = arith.constant 28 : index
    %167 = memref.load %arg1[%c28] : memref<30xf32, #tpu.memory_space<smem>>
    %168 = vector.extract_strided_slice %7 {offsets = [0, 0], sizes = [2, 44], strides = [1, 1]} : vector<2x46xf32> to vector<2x44xf32>
    %169 = vector.broadcast %167 : f32 to vector<2x44xf32>
    %170 = arith.mulf %169, %168 : vector<2x44xf32>
    %171 = arith.addf %166, %170 : vector<2x44xf32>
    %c29 = arith.constant 29 : index
    %172 = memref.load %arg1[%c29] : memref<30xf32, #tpu.memory_space<smem>>
    %173 = vector.extract_strided_slice %1 {offsets = [0, 1], sizes = [2, 44], strides = [1, 1]} : vector<2x46xf32> to vector<2x44xf32>
    %174 = vector.broadcast %172 : f32 to vector<2x44xf32>
    %175 = arith.mulf %174, %173 : vector<2x44xf32>
    %176 = arith.addf %171, %175 : vector<2x44xf32>
    %c5_21 = arith.constant 5 : index
    %177 = memref.load %arg2[%c5_21] : memref<6xf32, #tpu.memory_space<smem>>
    %178 = vector.broadcast %177 : f32 to vector<2x44xf32>
    %179 = arith.addf %176, %178 : vector<2x44xf32>
    %cst_22 = arith.constant 0.000000e+00 : f32
    %180 = vector.broadcast %cst_22 : f32 to vector<2x44xf32>
    %181 = arith.maximumf %179, %180 : vector<2x44xf32>
    %c0_23 = arith.constant 0 : index
    %182 = memref.load %arg1[%c0_23] : memref<30xf32, #tpu.memory_space<smem>>
    %183 = vector.extract_strided_slice %3 {offsets = [0, 0], sizes = [2, 44], strides = [1, 1]} : vector<2x46xf32> to vector<2x44xf32>
    %184 = vector.broadcast %182 : f32 to vector<2x44xf32>
    %185 = arith.mulf %184, %183 : vector<2x44xf32>
    %c1_24 = arith.constant 1 : index
    %186 = memref.load %arg1[%c1_24] : memref<30xf32, #tpu.memory_space<smem>>
    %187 = vector.extract_strided_slice %5 {offsets = [0, 0], sizes = [2, 44], strides = [1, 1]} : vector<2x46xf32> to vector<2x44xf32>
    %188 = vector.broadcast %186 : f32 to vector<2x44xf32>
    %189 = arith.mulf %188, %187 : vector<2x44xf32>
    %190 = arith.addf %185, %189 : vector<2x44xf32>
    %c2_25 = arith.constant 2 : index
    %191 = memref.load %arg1[%c2_25] : memref<30xf32, #tpu.memory_space<smem>>
    %192 = vector.extract_strided_slice %7 {offsets = [0, 0], sizes = [2, 44], strides = [1, 1]} : vector<2x46xf32> to vector<2x44xf32>
    %193 = vector.broadcast %191 : f32 to vector<2x44xf32>
    %194 = arith.mulf %193, %192 : vector<2x44xf32>
    %195 = arith.addf %190, %194 : vector<2x44xf32>
    %c3_26 = arith.constant 3 : index
    %196 = memref.load %arg1[%c3_26] : memref<30xf32, #tpu.memory_space<smem>>
    %197 = vector.extract_strided_slice %1 {offsets = [0, 1], sizes = [2, 44], strides = [1, 1]} : vector<2x46xf32> to vector<2x44xf32>
    %198 = vector.broadcast %196 : f32 to vector<2x44xf32>
    %199 = arith.mulf %198, %197 : vector<2x44xf32>
    %200 = arith.addf %195, %199 : vector<2x44xf32>
    %c4_27 = arith.constant 4 : index
    %201 = memref.load %arg1[%c4_27] : memref<30xf32, #tpu.memory_space<smem>>
    %202 = vector.extract_strided_slice %3 {offsets = [0, 1], sizes = [2, 44], strides = [1, 1]} : vector<2x46xf32> to vector<2x44xf32>
    %203 = vector.broadcast %201 : f32 to vector<2x44xf32>
    %204 = arith.mulf %203, %202 : vector<2x44xf32>
    %205 = arith.addf %200, %204 : vector<2x44xf32>
    %c0_28 = arith.constant 0 : index
    %206 = memref.load %arg2[%c0_28] : memref<6xf32, #tpu.memory_space<smem>>
    %207 = vector.broadcast %206 : f32 to vector<2x44xf32>
    %208 = arith.addf %205, %207 : vector<2x44xf32>
    %cst_29 = arith.constant 0.000000e+00 : f32
    %209 = vector.broadcast %cst_29 : f32 to vector<2x44xf32>
    %210 = arith.maximumf %208, %209 : vector<2x44xf32>
    %c5_30 = arith.constant 5 : index
    %211 = memref.load %arg1[%c5_30] : memref<30xf32, #tpu.memory_space<smem>>
    %212 = vector.extract_strided_slice %3 {offsets = [0, 0], sizes = [2, 44], strides = [1, 1]} : vector<2x46xf32> to vector<2x44xf32>
    %213 = vector.broadcast %211 : f32 to vector<2x44xf32>
    %214 = arith.mulf %213, %212 : vector<2x44xf32>
    %c6_31 = arith.constant 6 : index
    %215 = memref.load %arg1[%c6_31] : memref<30xf32, #tpu.memory_space<smem>>
    %216 = vector.extract_strided_slice %5 {offsets = [0, 0], sizes = [2, 44], strides = [1, 1]} : vector<2x46xf32> to vector<2x44xf32>
    %217 = vector.broadcast %215 : f32 to vector<2x44xf32>
    %218 = arith.mulf %217, %216 : vector<2x44xf32>
    %219 = arith.addf %214, %218 : vector<2x44xf32>
    %c7_32 = arith.constant 7 : index
    %220 = memref.load %arg1[%c7_32] : memref<30xf32, #tpu.memory_space<smem>>
    %221 = vector.extract_strided_slice %7 {offsets = [0, 0], sizes = [2, 44], strides = [1, 1]} : vector<2x46xf32> to vector<2x44xf32>
    %222 = vector.broadcast %220 : f32 to vector<2x44xf32>
    %223 = arith.mulf %222, %221 : vector<2x44xf32>
    %224 = arith.addf %219, %223 : vector<2x44xf32>
    %c8_33 = arith.constant 8 : index
    %225 = memref.load %arg1[%c8_33] : memref<30xf32, #tpu.memory_space<smem>>
    %226 = vector.extract_strided_slice %1 {offsets = [0, 1], sizes = [2, 44], strides = [1, 1]} : vector<2x46xf32> to vector<2x44xf32>
    %227 = vector.broadcast %225 : f32 to vector<2x44xf32>
    %228 = arith.mulf %227, %226 : vector<2x44xf32>
    %229 = arith.addf %224, %228 : vector<2x44xf32>
    %c9_34 = arith.constant 9 : index
    %230 = memref.load %arg1[%c9_34] : memref<30xf32, #tpu.memory_space<smem>>
    %231 = vector.extract_strided_slice %3 {offsets = [0, 1], sizes = [2, 44], strides = [1, 1]} : vector<2x46xf32> to vector<2x44xf32>
    %232 = vector.broadcast %230 : f32 to vector<2x44xf32>
    %233 = arith.mulf %232, %231 : vector<2x44xf32>
    %234 = arith.addf %229, %233 : vector<2x44xf32>
    %c1_35 = arith.constant 1 : index
    %235 = memref.load %arg2[%c1_35] : memref<6xf32, #tpu.memory_space<smem>>
    %236 = vector.broadcast %235 : f32 to vector<2x44xf32>
    %237 = arith.addf %234, %236 : vector<2x44xf32>
    %cst_36 = arith.constant 0.000000e+00 : f32
    %238 = vector.broadcast %cst_36 : f32 to vector<2x44xf32>
    %239 = arith.maximumf %237, %238 : vector<2x44xf32>
    %c10_37 = arith.constant 10 : index
    %240 = memref.load %arg1[%c10_37] : memref<30xf32, #tpu.memory_space<smem>>
    %241 = vector.extract_strided_slice %3 {offsets = [0, 0], sizes = [2, 44], strides = [1, 1]} : vector<2x46xf32> to vector<2x44xf32>
    %242 = vector.broadcast %240 : f32 to vector<2x44xf32>
    %243 = arith.mulf %242, %241 : vector<2x44xf32>
    %c11_38 = arith.constant 11 : index
    %244 = memref.load %arg1[%c11_38] : memref<30xf32, #tpu.memory_space<smem>>
    %245 = vector.extract_strided_slice %5 {offsets = [0, 0], sizes = [2, 44], strides = [1, 1]} : vector<2x46xf32> to vector<2x44xf32>
    %246 = vector.broadcast %244 : f32 to vector<2x44xf32>
    %247 = arith.mulf %246, %245 : vector<2x44xf32>
    %248 = arith.addf %243, %247 : vector<2x44xf32>
    %c12_39 = arith.constant 12 : index
    %249 = memref.load %arg1[%c12_39] : memref<30xf32, #tpu.memory_space<smem>>
    %250 = vector.extract_strided_slice %7 {offsets = [0, 0], sizes = [2, 44], strides = [1, 1]} : vector<2x46xf32> to vector<2x44xf32>
    %251 = vector.broadcast %249 : f32 to vector<2x44xf32>
    %252 = arith.mulf %251, %250 : vector<2x44xf32>
    %253 = arith.addf %248, %252 : vector<2x44xf32>
    %c13_40 = arith.constant 13 : index
    %254 = memref.load %arg1[%c13_40] : memref<30xf32, #tpu.memory_space<smem>>
    %255 = vector.extract_strided_slice %1 {offsets = [0, 1], sizes = [2, 44], strides = [1, 1]} : vector<2x46xf32> to vector<2x44xf32>
    %256 = vector.broadcast %254 : f32 to vector<2x44xf32>
    %257 = arith.mulf %256, %255 : vector<2x44xf32>
    %258 = arith.addf %253, %257 : vector<2x44xf32>
    %c14_41 = arith.constant 14 : index
    %259 = memref.load %arg1[%c14_41] : memref<30xf32, #tpu.memory_space<smem>>
    %260 = vector.extract_strided_slice %3 {offsets = [0, 1], sizes = [2, 44], strides = [1, 1]} : vector<2x46xf32> to vector<2x44xf32>
    %261 = vector.broadcast %259 : f32 to vector<2x44xf32>
    %262 = arith.mulf %261, %260 : vector<2x44xf32>
    %263 = arith.addf %258, %262 : vector<2x44xf32>
    %c2_42 = arith.constant 2 : index
    %264 = memref.load %arg2[%c2_42] : memref<6xf32, #tpu.memory_space<smem>>
    %265 = vector.broadcast %264 : f32 to vector<2x44xf32>
    %266 = arith.addf %263, %265 : vector<2x44xf32>
    %cst_43 = arith.constant 0.000000e+00 : f32
    %267 = vector.broadcast %cst_43 : f32 to vector<2x44xf32>
    %268 = arith.maximumf %266, %267 : vector<2x44xf32>
    %c15_44 = arith.constant 15 : index
    %269 = memref.load %arg1[%c15_44] : memref<30xf32, #tpu.memory_space<smem>>
    %270 = vector.extract_strided_slice %3 {offsets = [0, 0], sizes = [2, 44], strides = [1, 1]} : vector<2x46xf32> to vector<2x44xf32>
    %271 = vector.broadcast %269 : f32 to vector<2x44xf32>
    %272 = arith.mulf %271, %270 : vector<2x44xf32>
    %c16_45 = arith.constant 16 : index
    %273 = memref.load %arg1[%c16_45] : memref<30xf32, #tpu.memory_space<smem>>
    %274 = vector.extract_strided_slice %5 {offsets = [0, 0], sizes = [2, 44], strides = [1, 1]} : vector<2x46xf32> to vector<2x44xf32>
    %275 = vector.broadcast %273 : f32 to vector<2x44xf32>
    %276 = arith.mulf %275, %274 : vector<2x44xf32>
    %277 = arith.addf %272, %276 : vector<2x44xf32>
    %c17_46 = arith.constant 17 : index
    %278 = memref.load %arg1[%c17_46] : memref<30xf32, #tpu.memory_space<smem>>
    %279 = vector.extract_strided_slice %7 {offsets = [0, 0], sizes = [2, 44], strides = [1, 1]} : vector<2x46xf32> to vector<2x44xf32>
    %280 = vector.broadcast %278 : f32 to vector<2x44xf32>
    %281 = arith.mulf %280, %279 : vector<2x44xf32>
    %282 = arith.addf %277, %281 : vector<2x44xf32>
    %c18_47 = arith.constant 18 : index
    %283 = memref.load %arg1[%c18_47] : memref<30xf32, #tpu.memory_space<smem>>
    %284 = vector.extract_strided_slice %1 {offsets = [0, 1], sizes = [2, 44], strides = [1, 1]} : vector<2x46xf32> to vector<2x44xf32>
    %285 = vector.broadcast %283 : f32 to vector<2x44xf32>
    %286 = arith.mulf %285, %284 : vector<2x44xf32>
    %287 = arith.addf %282, %286 : vector<2x44xf32>
    %c19_48 = arith.constant 19 : index
    %288 = memref.load %arg1[%c19_48] : memref<30xf32, #tpu.memory_space<smem>>
    %289 = vector.extract_strided_slice %3 {offsets = [0, 1], sizes = [2, 44], strides = [1, 1]} : vector<2x46xf32> to vector<2x44xf32>
    %290 = vector.broadcast %288 : f32 to vector<2x44xf32>
    %291 = arith.mulf %290, %289 : vector<2x44xf32>
    %292 = arith.addf %287, %291 : vector<2x44xf32>
    %c3_49 = arith.constant 3 : index
    %293 = memref.load %arg2[%c3_49] : memref<6xf32, #tpu.memory_space<smem>>
    %294 = vector.broadcast %293 : f32 to vector<2x44xf32>
    %295 = arith.addf %292, %294 : vector<2x44xf32>
    %cst_50 = arith.constant 0.000000e+00 : f32
    %296 = vector.broadcast %cst_50 : f32 to vector<2x44xf32>
    %297 = arith.maximumf %295, %296 : vector<2x44xf32>
    %c20_51 = arith.constant 20 : index
    %298 = memref.load %arg1[%c20_51] : memref<30xf32, #tpu.memory_space<smem>>
    %299 = vector.extract_strided_slice %3 {offsets = [0, 0], sizes = [2, 44], strides = [1, 1]} : vector<2x46xf32> to vector<2x44xf32>
    %300 = vector.broadcast %298 : f32 to vector<2x44xf32>
    %301 = arith.mulf %300, %299 : vector<2x44xf32>
    %c21_52 = arith.constant 21 : index
    %302 = memref.load %arg1[%c21_52] : memref<30xf32, #tpu.memory_space<smem>>
    %303 = vector.extract_strided_slice %5 {offsets = [0, 0], sizes = [2, 44], strides = [1, 1]} : vector<2x46xf32> to vector<2x44xf32>
    %304 = vector.broadcast %302 : f32 to vector<2x44xf32>
    %305 = arith.mulf %304, %303 : vector<2x44xf32>
    %306 = arith.addf %301, %305 : vector<2x44xf32>
    %c22_53 = arith.constant 22 : index
    %307 = memref.load %arg1[%c22_53] : memref<30xf32, #tpu.memory_space<smem>>
    %308 = vector.extract_strided_slice %7 {offsets = [0, 0], sizes = [2, 44], strides = [1, 1]} : vector<2x46xf32> to vector<2x44xf32>
    %309 = vector.broadcast %307 : f32 to vector<2x44xf32>
    %310 = arith.mulf %309, %308 : vector<2x44xf32>
    %311 = arith.addf %306, %310 : vector<2x44xf32>
    %c23_54 = arith.constant 23 : index
    %312 = memref.load %arg1[%c23_54] : memref<30xf32, #tpu.memory_space<smem>>
    %313 = vector.extract_strided_slice %1 {offsets = [0, 1], sizes = [2, 44], strides = [1, 1]} : vector<2x46xf32> to vector<2x44xf32>
    %314 = vector.broadcast %312 : f32 to vector<2x44xf32>
    %315 = arith.mulf %314, %313 : vector<2x44xf32>
    %316 = arith.addf %311, %315 : vector<2x44xf32>
    %c24_55 = arith.constant 24 : index
    %317 = memref.load %arg1[%c24_55] : memref<30xf32, #tpu.memory_space<smem>>
    %318 = vector.extract_strided_slice %3 {offsets = [0, 1], sizes = [2, 44], strides = [1, 1]} : vector<2x46xf32> to vector<2x44xf32>
    %319 = vector.broadcast %317 : f32 to vector<2x44xf32>
    %320 = arith.mulf %319, %318 : vector<2x44xf32>
    %321 = arith.addf %316, %320 : vector<2x44xf32>
    %c4_56 = arith.constant 4 : index
    %322 = memref.load %arg2[%c4_56] : memref<6xf32, #tpu.memory_space<smem>>
    %323 = vector.broadcast %322 : f32 to vector<2x44xf32>
    %324 = arith.addf %321, %323 : vector<2x44xf32>
    %cst_57 = arith.constant 0.000000e+00 : f32
    %325 = vector.broadcast %cst_57 : f32 to vector<2x44xf32>
    %326 = arith.maximumf %324, %325 : vector<2x44xf32>
    %c25_58 = arith.constant 25 : index
    %327 = memref.load %arg1[%c25_58] : memref<30xf32, #tpu.memory_space<smem>>
    %328 = vector.extract_strided_slice %3 {offsets = [0, 0], sizes = [2, 44], strides = [1, 1]} : vector<2x46xf32> to vector<2x44xf32>
    %329 = vector.broadcast %327 : f32 to vector<2x44xf32>
    %330 = arith.mulf %329, %328 : vector<2x44xf32>
    %c26_59 = arith.constant 26 : index
    %331 = memref.load %arg1[%c26_59] : memref<30xf32, #tpu.memory_space<smem>>
    %332 = vector.extract_strided_slice %5 {offsets = [0, 0], sizes = [2, 44], strides = [1, 1]} : vector<2x46xf32> to vector<2x44xf32>
    %333 = vector.broadcast %331 : f32 to vector<2x44xf32>
    %334 = arith.mulf %333, %332 : vector<2x44xf32>
    %335 = arith.addf %330, %334 : vector<2x44xf32>
    %c27_60 = arith.constant 27 : index
    %336 = memref.load %arg1[%c27_60] : memref<30xf32, #tpu.memory_space<smem>>
    %337 = vector.extract_strided_slice %7 {offsets = [0, 0], sizes = [2, 44], strides = [1, 1]} : vector<2x46xf32> to vector<2x44xf32>
    %338 = vector.broadcast %336 : f32 to vector<2x44xf32>
    %339 = arith.mulf %338, %337 : vector<2x44xf32>
    %340 = arith.addf %335, %339 : vector<2x44xf32>
    %c28_61 = arith.constant 28 : index
    %341 = memref.load %arg1[%c28_61] : memref<30xf32, #tpu.memory_space<smem>>
    %342 = vector.extract_strided_slice %1 {offsets = [0, 1], sizes = [2, 44], strides = [1, 1]} : vector<2x46xf32> to vector<2x44xf32>
    %343 = vector.broadcast %341 : f32 to vector<2x44xf32>
    %344 = arith.mulf %343, %342 : vector<2x44xf32>
    %345 = arith.addf %340, %344 : vector<2x44xf32>
    %c29_62 = arith.constant 29 : index
    %346 = memref.load %arg1[%c29_62] : memref<30xf32, #tpu.memory_space<smem>>
    %347 = vector.extract_strided_slice %3 {offsets = [0, 1], sizes = [2, 44], strides = [1, 1]} : vector<2x46xf32> to vector<2x44xf32>
    %348 = vector.broadcast %346 : f32 to vector<2x44xf32>
    %349 = arith.mulf %348, %347 : vector<2x44xf32>
    %350 = arith.addf %345, %349 : vector<2x44xf32>
    %c5_63 = arith.constant 5 : index
    %351 = memref.load %arg2[%c5_63] : memref<6xf32, #tpu.memory_space<smem>>
    %352 = vector.broadcast %351 : f32 to vector<2x44xf32>
    %353 = arith.addf %350, %352 : vector<2x44xf32>
    %cst_64 = arith.constant 0.000000e+00 : f32
    %354 = vector.broadcast %cst_64 : f32 to vector<2x44xf32>
    %355 = arith.maximumf %353, %354 : vector<2x44xf32>
    %c0_65 = arith.constant 0 : index
    %356 = memref.load %arg1[%c0_65] : memref<30xf32, #tpu.memory_space<smem>>
    %357 = vector.extract_strided_slice %5 {offsets = [0, 0], sizes = [2, 43], strides = [1, 1]} : vector<2x46xf32> to vector<2x43xf32>
    %358 = vector.broadcast %356 : f32 to vector<2x43xf32>
    %359 = arith.mulf %358, %357 : vector<2x43xf32>
    %c1_66 = arith.constant 1 : index
    %360 = memref.load %arg1[%c1_66] : memref<30xf32, #tpu.memory_space<smem>>
    %361 = vector.extract_strided_slice %7 {offsets = [0, 0], sizes = [2, 43], strides = [1, 1]} : vector<2x46xf32> to vector<2x43xf32>
    %362 = vector.broadcast %360 : f32 to vector<2x43xf32>
    %363 = arith.mulf %362, %361 : vector<2x43xf32>
    %364 = arith.addf %359, %363 : vector<2x43xf32>
    %c2_67 = arith.constant 2 : index
    %365 = memref.load %arg1[%c2_67] : memref<30xf32, #tpu.memory_space<smem>>
    %366 = vector.extract_strided_slice %1 {offsets = [0, 1], sizes = [2, 43], strides = [1, 1]} : vector<2x46xf32> to vector<2x43xf32>
    %367 = vector.broadcast %365 : f32 to vector<2x43xf32>
    %368 = arith.mulf %367, %366 : vector<2x43xf32>
    %369 = arith.addf %364, %368 : vector<2x43xf32>
    %c3_68 = arith.constant 3 : index
    %370 = memref.load %arg1[%c3_68] : memref<30xf32, #tpu.memory_space<smem>>
    %371 = vector.extract_strided_slice %3 {offsets = [0, 1], sizes = [2, 43], strides = [1, 1]} : vector<2x46xf32> to vector<2x43xf32>
    %372 = vector.broadcast %370 : f32 to vector<2x43xf32>
    %373 = arith.mulf %372, %371 : vector<2x43xf32>
    %374 = arith.addf %369, %373 : vector<2x43xf32>
    %c4_69 = arith.constant 4 : index
    %375 = memref.load %arg1[%c4_69] : memref<30xf32, #tpu.memory_space<smem>>
    %376 = vector.extract_strided_slice %5 {offsets = [0, 1], sizes = [2, 43], strides = [1, 1]} : vector<2x46xf32> to vector<2x43xf32>
    %377 = vector.broadcast %375 : f32 to vector<2x43xf32>
    %378 = arith.mulf %377, %376 : vector<2x43xf32>
    %379 = arith.addf %374, %378 : vector<2x43xf32>
    %c0_70 = arith.constant 0 : index
    %380 = memref.load %arg2[%c0_70] : memref<6xf32, #tpu.memory_space<smem>>
    %381 = vector.broadcast %380 : f32 to vector<2x43xf32>
    %382 = arith.addf %379, %381 : vector<2x43xf32>
    %cst_71 = arith.constant 0.000000e+00 : f32
    %383 = vector.broadcast %cst_71 : f32 to vector<2x43xf32>
    %384 = arith.maximumf %382, %383 : vector<2x43xf32>
    %c5_72 = arith.constant 5 : index
    %385 = memref.load %arg1[%c5_72] : memref<30xf32, #tpu.memory_space<smem>>
    %386 = vector.extract_strided_slice %5 {offsets = [0, 0], sizes = [2, 43], strides = [1, 1]} : vector<2x46xf32> to vector<2x43xf32>
    %387 = vector.broadcast %385 : f32 to vector<2x43xf32>
    %388 = arith.mulf %387, %386 : vector<2x43xf32>
    %c6_73 = arith.constant 6 : index
    %389 = memref.load %arg1[%c6_73] : memref<30xf32, #tpu.memory_space<smem>>
    %390 = vector.extract_strided_slice %7 {offsets = [0, 0], sizes = [2, 43], strides = [1, 1]} : vector<2x46xf32> to vector<2x43xf32>
    %391 = vector.broadcast %389 : f32 to vector<2x43xf32>
    %392 = arith.mulf %391, %390 : vector<2x43xf32>
    %393 = arith.addf %388, %392 : vector<2x43xf32>
    %c7_74 = arith.constant 7 : index
    %394 = memref.load %arg1[%c7_74] : memref<30xf32, #tpu.memory_space<smem>>
    %395 = vector.extract_strided_slice %1 {offsets = [0, 1], sizes = [2, 43], strides = [1, 1]} : vector<2x46xf32> to vector<2x43xf32>
    %396 = vector.broadcast %394 : f32 to vector<2x43xf32>
    %397 = arith.mulf %396, %395 : vector<2x43xf32>
    %398 = arith.addf %393, %397 : vector<2x43xf32>
    %c8_75 = arith.constant 8 : index
    %399 = memref.load %arg1[%c8_75] : memref<30xf32, #tpu.memory_space<smem>>
    %400 = vector.extract_strided_slice %3 {offsets = [0, 1], sizes = [2, 43], strides = [1, 1]} : vector<2x46xf32> to vector<2x43xf32>
    %401 = vector.broadcast %399 : f32 to vector<2x43xf32>
    %402 = arith.mulf %401, %400 : vector<2x43xf32>
    %403 = arith.addf %398, %402 : vector<2x43xf32>
    %c9_76 = arith.constant 9 : index
    %404 = memref.load %arg1[%c9_76] : memref<30xf32, #tpu.memory_space<smem>>
    %405 = vector.extract_strided_slice %5 {offsets = [0, 1], sizes = [2, 43], strides = [1, 1]} : vector<2x46xf32> to vector<2x43xf32>
    %406 = vector.broadcast %404 : f32 to vector<2x43xf32>
    %407 = arith.mulf %406, %405 : vector<2x43xf32>
    %408 = arith.addf %403, %407 : vector<2x43xf32>
    %c1_77 = arith.constant 1 : index
    %409 = memref.load %arg2[%c1_77] : memref<6xf32, #tpu.memory_space<smem>>
    %410 = vector.broadcast %409 : f32 to vector<2x43xf32>
    %411 = arith.addf %408, %410 : vector<2x43xf32>
    %cst_78 = arith.constant 0.000000e+00 : f32
    %412 = vector.broadcast %cst_78 : f32 to vector<2x43xf32>
    %413 = arith.maximumf %411, %412 : vector<2x43xf32>
    %c10_79 = arith.constant 10 : index
    %414 = memref.load %arg1[%c10_79] : memref<30xf32, #tpu.memory_space<smem>>
    %415 = vector.extract_strided_slice %5 {offsets = [0, 0], sizes = [2, 43], strides = [1, 1]} : vector<2x46xf32> to vector<2x43xf32>
    %416 = vector.broadcast %414 : f32 to vector<2x43xf32>
    %417 = arith.mulf %416, %415 : vector<2x43xf32>
    %c11_80 = arith.constant 11 : index
    %418 = memref.load %arg1[%c11_80] : memref<30xf32, #tpu.memory_space<smem>>
    %419 = vector.extract_strided_slice %7 {offsets = [0, 0], sizes = [2, 43], strides = [1, 1]} : vector<2x46xf32> to vector<2x43xf32>
    %420 = vector.broadcast %418 : f32 to vector<2x43xf32>
    %421 = arith.mulf %420, %419 : vector<2x43xf32>
    %422 = arith.addf %417, %421 : vector<2x43xf32>
    %c12_81 = arith.constant 12 : index
    %423 = memref.load %arg1[%c12_81] : memref<30xf32, #tpu.memory_space<smem>>
    %424 = vector.extract_strided_slice %1 {offsets = [0, 1], sizes = [2, 43], strides = [1, 1]} : vector<2x46xf32> to vector<2x43xf32>
    %425 = vector.broadcast %423 : f32 to vector<2x43xf32>
    %426 = arith.mulf %425, %424 : vector<2x43xf32>
    %427 = arith.addf %422, %426 : vector<2x43xf32>
    %c13_82 = arith.constant 13 : index
    %428 = memref.load %arg1[%c13_82] : memref<30xf32, #tpu.memory_space<smem>>
    %429 = vector.extract_strided_slice %3 {offsets = [0, 1], sizes = [2, 43], strides = [1, 1]} : vector<2x46xf32> to vector<2x43xf32>
    %430 = vector.broadcast %428 : f32 to vector<2x43xf32>
    %431 = arith.mulf %430, %429 : vector<2x43xf32>
    %432 = arith.addf %427, %431 : vector<2x43xf32>
    %c14_83 = arith.constant 14 : index
    %433 = memref.load %arg1[%c14_83] : memref<30xf32, #tpu.memory_space<smem>>
    %434 = vector.extract_strided_slice %5 {offsets = [0, 1], sizes = [2, 43], strides = [1, 1]} : vector<2x46xf32> to vector<2x43xf32>
    %435 = vector.broadcast %433 : f32 to vector<2x43xf32>
    %436 = arith.mulf %435, %434 : vector<2x43xf32>
    %437 = arith.addf %432, %436 : vector<2x43xf32>
    %c2_84 = arith.constant 2 : index
    %438 = memref.load %arg2[%c2_84] : memref<6xf32, #tpu.memory_space<smem>>
    %439 = vector.broadcast %438 : f32 to vector<2x43xf32>
    %440 = arith.addf %437, %439 : vector<2x43xf32>
    %cst_85 = arith.constant 0.000000e+00 : f32
    %441 = vector.broadcast %cst_85 : f32 to vector<2x43xf32>
    %442 = arith.maximumf %440, %441 : vector<2x43xf32>
    %c15_86 = arith.constant 15 : index
    %443 = memref.load %arg1[%c15_86] : memref<30xf32, #tpu.memory_space<smem>>
    %444 = vector.extract_strided_slice %5 {offsets = [0, 0], sizes = [2, 43], strides = [1, 1]} : vector<2x46xf32> to vector<2x43xf32>
    %445 = vector.broadcast %443 : f32 to vector<2x43xf32>
    %446 = arith.mulf %445, %444 : vector<2x43xf32>
    %c16_87 = arith.constant 16 : index
    %447 = memref.load %arg1[%c16_87] : memref<30xf32, #tpu.memory_space<smem>>
    %448 = vector.extract_strided_slice %7 {offsets = [0, 0], sizes = [2, 43], strides = [1, 1]} : vector<2x46xf32> to vector<2x43xf32>
    %449 = vector.broadcast %447 : f32 to vector<2x43xf32>
    %450 = arith.mulf %449, %448 : vector<2x43xf32>
    %451 = arith.addf %446, %450 : vector<2x43xf32>
    %c17_88 = arith.constant 17 : index
    %452 = memref.load %arg1[%c17_88] : memref<30xf32, #tpu.memory_space<smem>>
    %453 = vector.extract_strided_slice %1 {offsets = [0, 1], sizes = [2, 43], strides = [1, 1]} : vector<2x46xf32> to vector<2x43xf32>
    %454 = vector.broadcast %452 : f32 to vector<2x43xf32>
    %455 = arith.mulf %454, %453 : vector<2x43xf32>
    %456 = arith.addf %451, %455 : vector<2x43xf32>
    %c18_89 = arith.constant 18 : index
    %457 = memref.load %arg1[%c18_89] : memref<30xf32, #tpu.memory_space<smem>>
    %458 = vector.extract_strided_slice %3 {offsets = [0, 1], sizes = [2, 43], strides = [1, 1]} : vector<2x46xf32> to vector<2x43xf32>
    %459 = vector.broadcast %457 : f32 to vector<2x43xf32>
    %460 = arith.mulf %459, %458 : vector<2x43xf32>
    %461 = arith.addf %456, %460 : vector<2x43xf32>
    %c19_90 = arith.constant 19 : index
    %462 = memref.load %arg1[%c19_90] : memref<30xf32, #tpu.memory_space<smem>>
    %463 = vector.extract_strided_slice %5 {offsets = [0, 1], sizes = [2, 43], strides = [1, 1]} : vector<2x46xf32> to vector<2x43xf32>
    %464 = vector.broadcast %462 : f32 to vector<2x43xf32>
    %465 = arith.mulf %464, %463 : vector<2x43xf32>
    %466 = arith.addf %461, %465 : vector<2x43xf32>
    %c3_91 = arith.constant 3 : index
    %467 = memref.load %arg2[%c3_91] : memref<6xf32, #tpu.memory_space<smem>>
    %468 = vector.broadcast %467 : f32 to vector<2x43xf32>
    %469 = arith.addf %466, %468 : vector<2x43xf32>
    %cst_92 = arith.constant 0.000000e+00 : f32
    %470 = vector.broadcast %cst_92 : f32 to vector<2x43xf32>
    %471 = arith.maximumf %469, %470 : vector<2x43xf32>
    %c20_93 = arith.constant 20 : index
    %472 = memref.load %arg1[%c20_93] : memref<30xf32, #tpu.memory_space<smem>>
    %473 = vector.extract_strided_slice %5 {offsets = [0, 0], sizes = [2, 43], strides = [1, 1]} : vector<2x46xf32> to vector<2x43xf32>
    %474 = vector.broadcast %472 : f32 to vector<2x43xf32>
    %475 = arith.mulf %474, %473 : vector<2x43xf32>
    %c21_94 = arith.constant 21 : index
    %476 = memref.load %arg1[%c21_94] : memref<30xf32, #tpu.memory_space<smem>>
    %477 = vector.extract_strided_slice %7 {offsets = [0, 0], sizes = [2, 43], strides = [1, 1]} : vector<2x46xf32> to vector<2x43xf32>
    %478 = vector.broadcast %476 : f32 to vector<2x43xf32>
    %479 = arith.mulf %478, %477 : vector<2x43xf32>
    %480 = arith.addf %475, %479 : vector<2x43xf32>
    %c22_95 = arith.constant 22 : index
    %481 = memref.load %arg1[%c22_95] : memref<30xf32, #tpu.memory_space<smem>>
    %482 = vector.extract_strided_slice %1 {offsets = [0, 1], sizes = [2, 43], strides = [1, 1]} : vector<2x46xf32> to vector<2x43xf32>
    %483 = vector.broadcast %481 : f32 to vector<2x43xf32>
    %484 = arith.mulf %483, %482 : vector<2x43xf32>
    %485 = arith.addf %480, %484 : vector<2x43xf32>
    %c23_96 = arith.constant 23 : index
    %486 = memref.load %arg1[%c23_96] : memref<30xf32, #tpu.memory_space<smem>>
    %487 = vector.extract_strided_slice %3 {offsets = [0, 1], sizes = [2, 43], strides = [1, 1]} : vector<2x46xf32> to vector<2x43xf32>
    %488 = vector.broadcast %486 : f32 to vector<2x43xf32>
    %489 = arith.mulf %488, %487 : vector<2x43xf32>
    %490 = arith.addf %485, %489 : vector<2x43xf32>
    %c24_97 = arith.constant 24 : index
    %491 = memref.load %arg1[%c24_97] : memref<30xf32, #tpu.memory_space<smem>>
    %492 = vector.extract_strided_slice %5 {offsets = [0, 1], sizes = [2, 43], strides = [1, 1]} : vector<2x46xf32> to vector<2x43xf32>
    %493 = vector.broadcast %491 : f32 to vector<2x43xf32>
    %494 = arith.mulf %493, %492 : vector<2x43xf32>
    %495 = arith.addf %490, %494 : vector<2x43xf32>
    %c4_98 = arith.constant 4 : index
    %496 = memref.load %arg2[%c4_98] : memref<6xf32, #tpu.memory_space<smem>>
    %497 = vector.broadcast %496 : f32 to vector<2x43xf32>
    %498 = arith.addf %495, %497 : vector<2x43xf32>
    %cst_99 = arith.constant 0.000000e+00 : f32
    %499 = vector.broadcast %cst_99 : f32 to vector<2x43xf32>
    %500 = arith.maximumf %498, %499 : vector<2x43xf32>
    %c25_100 = arith.constant 25 : index
    %501 = memref.load %arg1[%c25_100] : memref<30xf32, #tpu.memory_space<smem>>
    %502 = vector.extract_strided_slice %5 {offsets = [0, 0], sizes = [2, 43], strides = [1, 1]} : vector<2x46xf32> to vector<2x43xf32>
    %503 = vector.broadcast %501 : f32 to vector<2x43xf32>
    %504 = arith.mulf %503, %502 : vector<2x43xf32>
    %c26_101 = arith.constant 26 : index
    %505 = memref.load %arg1[%c26_101] : memref<30xf32, #tpu.memory_space<smem>>
    %506 = vector.extract_strided_slice %7 {offsets = [0, 0], sizes = [2, 43], strides = [1, 1]} : vector<2x46xf32> to vector<2x43xf32>
    %507 = vector.broadcast %505 : f32 to vector<2x43xf32>
    %508 = arith.mulf %507, %506 : vector<2x43xf32>
    %509 = arith.addf %504, %508 : vector<2x43xf32>
    %c27_102 = arith.constant 27 : index
    %510 = memref.load %arg1[%c27_102] : memref<30xf32, #tpu.memory_space<smem>>
    %511 = vector.extract_strided_slice %1 {offsets = [0, 1], sizes = [2, 43], strides = [1, 1]} : vector<2x46xf32> to vector<2x43xf32>
    %512 = vector.broadcast %510 : f32 to vector<2x43xf32>
    %513 = arith.mulf %512, %511 : vector<2x43xf32>
    %514 = arith.addf %509, %513 : vector<2x43xf32>
    %c28_103 = arith.constant 28 : index
    %515 = memref.load %arg1[%c28_103] : memref<30xf32, #tpu.memory_space<smem>>
    %516 = vector.extract_strided_slice %3 {offsets = [0, 1], sizes = [2, 43], strides = [1, 1]} : vector<2x46xf32> to vector<2x43xf32>
    %517 = vector.broadcast %515 : f32 to vector<2x43xf32>
    %518 = arith.mulf %517, %516 : vector<2x43xf32>
    %519 = arith.addf %514, %518 : vector<2x43xf32>
    %c29_104 = arith.constant 29 : index
    %520 = memref.load %arg1[%c29_104] : memref<30xf32, #tpu.memory_space<smem>>
    %521 = vector.extract_strided_slice %5 {offsets = [0, 1], sizes = [2, 43], strides = [1, 1]} : vector<2x46xf32> to vector<2x43xf32>
    %522 = vector.broadcast %520 : f32 to vector<2x43xf32>
    %523 = arith.mulf %522, %521 : vector<2x43xf32>
    %524 = arith.addf %519, %523 : vector<2x43xf32>
    %c5_105 = arith.constant 5 : index
    %525 = memref.load %arg2[%c5_105] : memref<6xf32, #tpu.memory_space<smem>>
    %526 = vector.broadcast %525 : f32 to vector<2x43xf32>
    %527 = arith.addf %524, %526 : vector<2x43xf32>
    %cst_106 = arith.constant 0.000000e+00 : f32
    %528 = vector.broadcast %cst_106 : f32 to vector<2x43xf32>
    %529 = arith.maximumf %527, %528 : vector<2x43xf32>
    %c0_107 = arith.constant 0 : index
    %530 = memref.load %arg1[%c0_107] : memref<30xf32, #tpu.memory_space<smem>>
    %531 = vector.extract_strided_slice %7 {offsets = [0, 0], sizes = [2, 43], strides = [1, 1]} : vector<2x46xf32> to vector<2x43xf32>
    %532 = vector.broadcast %530 : f32 to vector<2x43xf32>
    %533 = arith.mulf %532, %531 : vector<2x43xf32>
    %c1_108 = arith.constant 1 : index
    %534 = memref.load %arg1[%c1_108] : memref<30xf32, #tpu.memory_space<smem>>
    %535 = vector.extract_strided_slice %1 {offsets = [0, 1], sizes = [2, 43], strides = [1, 1]} : vector<2x46xf32> to vector<2x43xf32>
    %536 = vector.broadcast %534 : f32 to vector<2x43xf32>
    %537 = arith.mulf %536, %535 : vector<2x43xf32>
    %538 = arith.addf %533, %537 : vector<2x43xf32>
    %c2_109 = arith.constant 2 : index
    %539 = memref.load %arg1[%c2_109] : memref<30xf32, #tpu.memory_space<smem>>
    %540 = vector.extract_strided_slice %3 {offsets = [0, 1], sizes = [2, 43], strides = [1, 1]} : vector<2x46xf32> to vector<2x43xf32>
    %541 = vector.broadcast %539 : f32 to vector<2x43xf32>
    %542 = arith.mulf %541, %540 : vector<2x43xf32>
    %543 = arith.addf %538, %542 : vector<2x43xf32>
    %c3_110 = arith.constant 3 : index
    %544 = memref.load %arg1[%c3_110] : memref<30xf32, #tpu.memory_space<smem>>
    %545 = vector.extract_strided_slice %5 {offsets = [0, 1], sizes = [2, 43], strides = [1, 1]} : vector<2x46xf32> to vector<2x43xf32>
    %546 = vector.broadcast %544 : f32 to vector<2x43xf32>
    %547 = arith.mulf %546, %545 : vector<2x43xf32>
    %548 = arith.addf %543, %547 : vector<2x43xf32>
    %c4_111 = arith.constant 4 : index
    %549 = memref.load %arg1[%c4_111] : memref<30xf32, #tpu.memory_space<smem>>
    %550 = vector.extract_strided_slice %7 {offsets = [0, 1], sizes = [2, 43], strides = [1, 1]} : vector<2x46xf32> to vector<2x43xf32>
    %551 = vector.broadcast %549 : f32 to vector<2x43xf32>
    %552 = arith.mulf %551, %550 : vector<2x43xf32>
    %553 = arith.addf %548, %552 : vector<2x43xf32>
    %c0_112 = arith.constant 0 : index
    %554 = memref.load %arg2[%c0_112] : memref<6xf32, #tpu.memory_space<smem>>
    %555 = vector.broadcast %554 : f32 to vector<2x43xf32>
    %556 = arith.addf %553, %555 : vector<2x43xf32>
    %cst_113 = arith.constant 0.000000e+00 : f32
    %557 = vector.broadcast %cst_113 : f32 to vector<2x43xf32>
    %558 = arith.maximumf %556, %557 : vector<2x43xf32>
    %c5_114 = arith.constant 5 : index
    %559 = memref.load %arg1[%c5_114] : memref<30xf32, #tpu.memory_space<smem>>
    %560 = vector.extract_strided_slice %7 {offsets = [0, 0], sizes = [2, 43], strides = [1, 1]} : vector<2x46xf32> to vector<2x43xf32>
    %561 = vector.broadcast %559 : f32 to vector<2x43xf32>
    %562 = arith.mulf %561, %560 : vector<2x43xf32>
    %c6_115 = arith.constant 6 : index
    %563 = memref.load %arg1[%c6_115] : memref<30xf32, #tpu.memory_space<smem>>
    %564 = vector.extract_strided_slice %1 {offsets = [0, 1], sizes = [2, 43], strides = [1, 1]} : vector<2x46xf32> to vector<2x43xf32>
    %565 = vector.broadcast %563 : f32 to vector<2x43xf32>
    %566 = arith.mulf %565, %564 : vector<2x43xf32>
    %567 = arith.addf %562, %566 : vector<2x43xf32>
    %c7_116 = arith.constant 7 : index
    %568 = memref.load %arg1[%c7_116] : memref<30xf32, #tpu.memory_space<smem>>
    %569 = vector.extract_strided_slice %3 {offsets = [0, 1], sizes = [2, 43], strides = [1, 1]} : vector<2x46xf32> to vector<2x43xf32>
    %570 = vector.broadcast %568 : f32 to vector<2x43xf32>
    %571 = arith.mulf %570, %569 : vector<2x43xf32>
    %572 = arith.addf %567, %571 : vector<2x43xf32>
    %c8_117 = arith.constant 8 : index
    %573 = memref.load %arg1[%c8_117] : memref<30xf32, #tpu.memory_space<smem>>
    %574 = vector.extract_strided_slice %5 {offsets = [0, 1], sizes = [2, 43], strides = [1, 1]} : vector<2x46xf32> to vector<2x43xf32>
    %575 = vector.broadcast %573 : f32 to vector<2x43xf32>
    %576 = arith.mulf %575, %574 : vector<2x43xf32>
    %577 = arith.addf %572, %576 : vector<2x43xf32>
    %c9_118 = arith.constant 9 : index
    %578 = memref.load %arg1[%c9_118] : memref<30xf32, #tpu.memory_space<smem>>
    %579 = vector.extract_strided_slice %7 {offsets = [0, 1], sizes = [2, 43], strides = [1, 1]} : vector<2x46xf32> to vector<2x43xf32>
    %580 = vector.broadcast %578 : f32 to vector<2x43xf32>
    %581 = arith.mulf %580, %579 : vector<2x43xf32>
    %582 = arith.addf %577, %581 : vector<2x43xf32>
    %c1_119 = arith.constant 1 : index
    %583 = memref.load %arg2[%c1_119] : memref<6xf32, #tpu.memory_space<smem>>
    %584 = vector.broadcast %583 : f32 to vector<2x43xf32>
    %585 = arith.addf %582, %584 : vector<2x43xf32>
    %cst_120 = arith.constant 0.000000e+00 : f32
    %586 = vector.broadcast %cst_120 : f32 to vector<2x43xf32>
    %587 = arith.maximumf %585, %586 : vector<2x43xf32>
    %c10_121 = arith.constant 10 : index
    %588 = memref.load %arg1[%c10_121] : memref<30xf32, #tpu.memory_space<smem>>
    %589 = vector.extract_strided_slice %7 {offsets = [0, 0], sizes = [2, 43], strides = [1, 1]} : vector<2x46xf32> to vector<2x43xf32>
    %590 = vector.broadcast %588 : f32 to vector<2x43xf32>
    %591 = arith.mulf %590, %589 : vector<2x43xf32>
    %c11_122 = arith.constant 11 : index
    %592 = memref.load %arg1[%c11_122] : memref<30xf32, #tpu.memory_space<smem>>
    %593 = vector.extract_strided_slice %1 {offsets = [0, 1], sizes = [2, 43], strides = [1, 1]} : vector<2x46xf32> to vector<2x43xf32>
    %594 = vector.broadcast %592 : f32 to vector<2x43xf32>
    %595 = arith.mulf %594, %593 : vector<2x43xf32>
    %596 = arith.addf %591, %595 : vector<2x43xf32>
    %c12_123 = arith.constant 12 : index
    %597 = memref.load %arg1[%c12_123] : memref<30xf32, #tpu.memory_space<smem>>
    %598 = vector.extract_strided_slice %3 {offsets = [0, 1], sizes = [2, 43], strides = [1, 1]} : vector<2x46xf32> to vector<2x43xf32>
    %599 = vector.broadcast %597 : f32 to vector<2x43xf32>
    %600 = arith.mulf %599, %598 : vector<2x43xf32>
    %601 = arith.addf %596, %600 : vector<2x43xf32>
    %c13_124 = arith.constant 13 : index
    %602 = memref.load %arg1[%c13_124] : memref<30xf32, #tpu.memory_space<smem>>
    %603 = vector.extract_strided_slice %5 {offsets = [0, 1], sizes = [2, 43], strides = [1, 1]} : vector<2x46xf32> to vector<2x43xf32>
    %604 = vector.broadcast %602 : f32 to vector<2x43xf32>
    %605 = arith.mulf %604, %603 : vector<2x43xf32>
    %606 = arith.addf %601, %605 : vector<2x43xf32>
    %c14_125 = arith.constant 14 : index
    %607 = memref.load %arg1[%c14_125] : memref<30xf32, #tpu.memory_space<smem>>
    %608 = vector.extract_strided_slice %7 {offsets = [0, 1], sizes = [2, 43], strides = [1, 1]} : vector<2x46xf32> to vector<2x43xf32>
    %609 = vector.broadcast %607 : f32 to vector<2x43xf32>
    %610 = arith.mulf %609, %608 : vector<2x43xf32>
    %611 = arith.addf %606, %610 : vector<2x43xf32>
    %c2_126 = arith.constant 2 : index
    %612 = memref.load %arg2[%c2_126] : memref<6xf32, #tpu.memory_space<smem>>
    %613 = vector.broadcast %612 : f32 to vector<2x43xf32>
    %614 = arith.addf %611, %613 : vector<2x43xf32>
    %cst_127 = arith.constant 0.000000e+00 : f32
    %615 = vector.broadcast %cst_127 : f32 to vector<2x43xf32>
    %616 = arith.maximumf %614, %615 : vector<2x43xf32>
    %c15_128 = arith.constant 15 : index
    %617 = memref.load %arg1[%c15_128] : memref<30xf32, #tpu.memory_space<smem>>
    %618 = vector.extract_strided_slice %7 {offsets = [0, 0], sizes = [2, 43], strides = [1, 1]} : vector<2x46xf32> to vector<2x43xf32>
    %619 = vector.broadcast %617 : f32 to vector<2x43xf32>
    %620 = arith.mulf %619, %618 : vector<2x43xf32>
    %c16_129 = arith.constant 16 : index
    %621 = memref.load %arg1[%c16_129] : memref<30xf32, #tpu.memory_space<smem>>
    %622 = vector.extract_strided_slice %1 {offsets = [0, 1], sizes = [2, 43], strides = [1, 1]} : vector<2x46xf32> to vector<2x43xf32>
    %623 = vector.broadcast %621 : f32 to vector<2x43xf32>
    %624 = arith.mulf %623, %622 : vector<2x43xf32>
    %625 = arith.addf %620, %624 : vector<2x43xf32>
    %c17_130 = arith.constant 17 : index
    %626 = memref.load %arg1[%c17_130] : memref<30xf32, #tpu.memory_space<smem>>
    %627 = vector.extract_strided_slice %3 {offsets = [0, 1], sizes = [2, 43], strides = [1, 1]} : vector<2x46xf32> to vector<2x43xf32>
    %628 = vector.broadcast %626 : f32 to vector<2x43xf32>
    %629 = arith.mulf %628, %627 : vector<2x43xf32>
    %630 = arith.addf %625, %629 : vector<2x43xf32>
    %c18_131 = arith.constant 18 : index
    %631 = memref.load %arg1[%c18_131] : memref<30xf32, #tpu.memory_space<smem>>
    %632 = vector.extract_strided_slice %5 {offsets = [0, 1], sizes = [2, 43], strides = [1, 1]} : vector<2x46xf32> to vector<2x43xf32>
    %633 = vector.broadcast %631 : f32 to vector<2x43xf32>
    %634 = arith.mulf %633, %632 : vector<2x43xf32>
    %635 = arith.addf %630, %634 : vector<2x43xf32>
    %c19_132 = arith.constant 19 : index
    %636 = memref.load %arg1[%c19_132] : memref<30xf32, #tpu.memory_space<smem>>
    %637 = vector.extract_strided_slice %7 {offsets = [0, 1], sizes = [2, 43], strides = [1, 1]} : vector<2x46xf32> to vector<2x43xf32>
    %638 = vector.broadcast %636 : f32 to vector<2x43xf32>
    %639 = arith.mulf %638, %637 : vector<2x43xf32>
    %640 = arith.addf %635, %639 : vector<2x43xf32>
    %c3_133 = arith.constant 3 : index
    %641 = memref.load %arg2[%c3_133] : memref<6xf32, #tpu.memory_space<smem>>
    %642 = vector.broadcast %641 : f32 to vector<2x43xf32>
    %643 = arith.addf %640, %642 : vector<2x43xf32>
    %cst_134 = arith.constant 0.000000e+00 : f32
    %644 = vector.broadcast %cst_134 : f32 to vector<2x43xf32>
    %645 = arith.maximumf %643, %644 : vector<2x43xf32>
    %c20_135 = arith.constant 20 : index
    %646 = memref.load %arg1[%c20_135] : memref<30xf32, #tpu.memory_space<smem>>
    %647 = vector.extract_strided_slice %7 {offsets = [0, 0], sizes = [2, 43], strides = [1, 1]} : vector<2x46xf32> to vector<2x43xf32>
    %648 = vector.broadcast %646 : f32 to vector<2x43xf32>
    %649 = arith.mulf %648, %647 : vector<2x43xf32>
    %c21_136 = arith.constant 21 : index
    %650 = memref.load %arg1[%c21_136] : memref<30xf32, #tpu.memory_space<smem>>
    %651 = vector.extract_strided_slice %1 {offsets = [0, 1], sizes = [2, 43], strides = [1, 1]} : vector<2x46xf32> to vector<2x43xf32>
    %652 = vector.broadcast %650 : f32 to vector<2x43xf32>
    %653 = arith.mulf %652, %651 : vector<2x43xf32>
    %654 = arith.addf %649, %653 : vector<2x43xf32>
    %c22_137 = arith.constant 22 : index
    %655 = memref.load %arg1[%c22_137] : memref<30xf32, #tpu.memory_space<smem>>
    %656 = vector.extract_strided_slice %3 {offsets = [0, 1], sizes = [2, 43], strides = [1, 1]} : vector<2x46xf32> to vector<2x43xf32>
    %657 = vector.broadcast %655 : f32 to vector<2x43xf32>
    %658 = arith.mulf %657, %656 : vector<2x43xf32>
    %659 = arith.addf %654, %658 : vector<2x43xf32>
    %c23_138 = arith.constant 23 : index
    %660 = memref.load %arg1[%c23_138] : memref<30xf32, #tpu.memory_space<smem>>
    %661 = vector.extract_strided_slice %5 {offsets = [0, 1], sizes = [2, 43], strides = [1, 1]} : vector<2x46xf32> to vector<2x43xf32>
    %662 = vector.broadcast %660 : f32 to vector<2x43xf32>
    %663 = arith.mulf %662, %661 : vector<2x43xf32>
    %664 = arith.addf %659, %663 : vector<2x43xf32>
    %c24_139 = arith.constant 24 : index
    %665 = memref.load %arg1[%c24_139] : memref<30xf32, #tpu.memory_space<smem>>
    %666 = vector.extract_strided_slice %7 {offsets = [0, 1], sizes = [2, 43], strides = [1, 1]} : vector<2x46xf32> to vector<2x43xf32>
    %667 = vector.broadcast %665 : f32 to vector<2x43xf32>
    %668 = arith.mulf %667, %666 : vector<2x43xf32>
    %669 = arith.addf %664, %668 : vector<2x43xf32>
    %c4_140 = arith.constant 4 : index
    %670 = memref.load %arg2[%c4_140] : memref<6xf32, #tpu.memory_space<smem>>
    %671 = vector.broadcast %670 : f32 to vector<2x43xf32>
    %672 = arith.addf %669, %671 : vector<2x43xf32>
    %cst_141 = arith.constant 0.000000e+00 : f32
    %673 = vector.broadcast %cst_141 : f32 to vector<2x43xf32>
    %674 = arith.maximumf %672, %673 : vector<2x43xf32>
    %c25_142 = arith.constant 25 : index
    %675 = memref.load %arg1[%c25_142] : memref<30xf32, #tpu.memory_space<smem>>
    %676 = vector.extract_strided_slice %7 {offsets = [0, 0], sizes = [2, 43], strides = [1, 1]} : vector<2x46xf32> to vector<2x43xf32>
    %677 = vector.broadcast %675 : f32 to vector<2x43xf32>
    %678 = arith.mulf %677, %676 : vector<2x43xf32>
    %c26_143 = arith.constant 26 : index
    %679 = memref.load %arg1[%c26_143] : memref<30xf32, #tpu.memory_space<smem>>
    %680 = vector.extract_strided_slice %1 {offsets = [0, 1], sizes = [2, 43], strides = [1, 1]} : vector<2x46xf32> to vector<2x43xf32>
    %681 = vector.broadcast %679 : f32 to vector<2x43xf32>
    %682 = arith.mulf %681, %680 : vector<2x43xf32>
    %683 = arith.addf %678, %682 : vector<2x43xf32>
    %c27_144 = arith.constant 27 : index
    %684 = memref.load %arg1[%c27_144] : memref<30xf32, #tpu.memory_space<smem>>
    %685 = vector.extract_strided_slice %3 {offsets = [0, 1], sizes = [2, 43], strides = [1, 1]} : vector<2x46xf32> to vector<2x43xf32>
    %686 = vector.broadcast %684 : f32 to vector<2x43xf32>
    %687 = arith.mulf %686, %685 : vector<2x43xf32>
    %688 = arith.addf %683, %687 : vector<2x43xf32>
    %c28_145 = arith.constant 28 : index
    %689 = memref.load %arg1[%c28_145] : memref<30xf32, #tpu.memory_space<smem>>
    %690 = vector.extract_strided_slice %5 {offsets = [0, 1], sizes = [2, 43], strides = [1, 1]} : vector<2x46xf32> to vector<2x43xf32>
    %691 = vector.broadcast %689 : f32 to vector<2x43xf32>
    %692 = arith.mulf %691, %690 : vector<2x43xf32>
    %693 = arith.addf %688, %692 : vector<2x43xf32>
    %c29_146 = arith.constant 29 : index
    %694 = memref.load %arg1[%c29_146] : memref<30xf32, #tpu.memory_space<smem>>
    %695 = vector.extract_strided_slice %7 {offsets = [0, 1], sizes = [2, 43], strides = [1, 1]} : vector<2x46xf32> to vector<2x43xf32>
    %696 = vector.broadcast %694 : f32 to vector<2x43xf32>
    %697 = arith.mulf %696, %695 : vector<2x43xf32>
    %698 = arith.addf %693, %697 : vector<2x43xf32>
    %c5_147 = arith.constant 5 : index
    %699 = memref.load %arg2[%c5_147] : memref<6xf32, #tpu.memory_space<smem>>
    %700 = vector.broadcast %699 : f32 to vector<2x43xf32>
    %701 = arith.addf %698, %700 : vector<2x43xf32>
    %cst_148 = arith.constant 0.000000e+00 : f32
    %702 = vector.broadcast %cst_148 : f32 to vector<2x43xf32>
    %703 = arith.maximumf %701, %702 : vector<2x43xf32>
    %704 = arith.maximumf %36, %210 : vector<2x44xf32>
    %705 = arith.maximumf %65, %239 : vector<2x44xf32>
    %706 = arith.maximumf %94, %268 : vector<2x44xf32>
    %707 = arith.maximumf %123, %297 : vector<2x44xf32>
    %708 = arith.maximumf %152, %326 : vector<2x44xf32>
    %709 = arith.maximumf %181, %355 : vector<2x44xf32>
    %710 = arith.maximumf %384, %558 : vector<2x43xf32>
    %711 = arith.maximumf %413, %587 : vector<2x43xf32>
    %712 = arith.maximumf %442, %616 : vector<2x43xf32>
    %713 = arith.maximumf %471, %645 : vector<2x43xf32>
    %714 = arith.maximumf %500, %674 : vector<2x43xf32>
    %715 = arith.maximumf %529, %703 : vector<2x43xf32>
    %cst_149 = arith.constant dense<0.000000e+00> : vector<2xf32>
    %716 = vector.multi_reduction <add>, %704, %cst_149 [1] : vector<2x44xf32> to vector<2xf32>
    %717 = vector.shape_cast %716 : vector<2xf32> to vector<2x1xf32>
    %cst_150 = arith.constant dense<0.000000e+00> : vector<1xf32>
    %718 = vector.multi_reduction <add>, %717, %cst_150 [0] : vector<2x1xf32> to vector<1xf32>
    %719 = vector.shape_cast %718 : vector<1xf32> to vector<1x1xf32>
    %cst_151 = arith.constant dense<0.000000e+00> : vector<2xf32>
    %720 = vector.multi_reduction <add>, %710, %cst_151 [1] : vector<2x43xf32> to vector<2xf32>
    %721 = vector.shape_cast %720 : vector<2xf32> to vector<2x1xf32>
    %cst_152 = arith.constant dense<0.000000e+00> : vector<1xf32>
    %722 = vector.multi_reduction <add>, %721, %cst_152 [0] : vector<2x1xf32> to vector<1xf32>
    %723 = vector.shape_cast %722 : vector<1xf32> to vector<1x1xf32>
    %724 = arith.addf %719, %723 : vector<1x1xf32>
    %cst_153 = arith.constant 1.740000e+02 : f32
    %725 = vector.broadcast %cst_153 : f32 to vector<1x1xf32>
    %726 = arith.divf %724, %725 : vector<1x1xf32>
    %727 = vector.broadcast %726 : vector<1x1xf32> to vector<2x44xf32>
    %728 = arith.subf %704, %727 : vector<2x44xf32>
    %729 = vector.broadcast %726 : vector<1x1xf32> to vector<2x43xf32>
    %730 = arith.subf %710, %729 : vector<2x43xf32>
    %731 = arith.mulf %728, %728 : vector<2x44xf32>
    %cst_154 = arith.constant dense<0.000000e+00> : vector<2xf32>
    %732 = vector.multi_reduction <add>, %731, %cst_154 [1] : vector<2x44xf32> to vector<2xf32>
    %733 = vector.shape_cast %732 : vector<2xf32> to vector<2x1xf32>
    %cst_155 = arith.constant dense<0.000000e+00> : vector<1xf32>
    %734 = vector.multi_reduction <add>, %733, %cst_155 [0] : vector<2x1xf32> to vector<1xf32>
    %735 = vector.shape_cast %734 : vector<1xf32> to vector<1x1xf32>
    %736 = arith.mulf %730, %730 : vector<2x43xf32>
    %cst_156 = arith.constant dense<0.000000e+00> : vector<2xf32>
    %737 = vector.multi_reduction <add>, %736, %cst_156 [1] : vector<2x43xf32> to vector<2xf32>
    %738 = vector.shape_cast %737 : vector<2xf32> to vector<2x1xf32>
    %cst_157 = arith.constant dense<0.000000e+00> : vector<1xf32>
    %739 = vector.multi_reduction <add>, %738, %cst_157 [0] : vector<2x1xf32> to vector<1xf32>
    %740 = vector.shape_cast %739 : vector<1xf32> to vector<1x1xf32>
    %741 = arith.addf %735, %740 : vector<1x1xf32>
    %cst_158 = arith.constant 1.740000e+02 : f32
    %742 = vector.broadcast %cst_158 : f32 to vector<1x1xf32>
    %743 = arith.divf %741, %742 : vector<1x1xf32>
    %cst_159 = arith.constant 9.99999974E-6 : f32
    %744 = vector.broadcast %cst_159 : f32 to vector<1x1xf32>
    %745 = arith.addf %743, %744 : vector<1x1xf32>
    %746 = math.rsqrt %745 : vector<1x1xf32>
    %c0_160 = arith.constant 0 : index
    %747 = memref.load %arg3[%c0_160] : memref<6xf32, #tpu.memory_space<smem>>
    %748 = vector.broadcast %747 : f32 to vector<1x1xf32>
    %749 = arith.mulf %746, %748 : vector<1x1xf32>
    %750 = vector.broadcast %749 : vector<1x1xf32> to vector<2x44xf32>
    %751 = arith.mulf %728, %750 : vector<2x44xf32>
    %752 = vector.broadcast %749 : vector<1x1xf32> to vector<2x43xf32>
    %753 = arith.mulf %730, %752 : vector<2x43xf32>
    %cst_161 = arith.constant dense<0.000000e+00> : vector<2xf32>
    %754 = vector.multi_reduction <add>, %705, %cst_161 [1] : vector<2x44xf32> to vector<2xf32>
    %755 = vector.shape_cast %754 : vector<2xf32> to vector<2x1xf32>
    %cst_162 = arith.constant dense<0.000000e+00> : vector<1xf32>
    %756 = vector.multi_reduction <add>, %755, %cst_162 [0] : vector<2x1xf32> to vector<1xf32>
    %757 = vector.shape_cast %756 : vector<1xf32> to vector<1x1xf32>
    %cst_163 = arith.constant dense<0.000000e+00> : vector<2xf32>
    %758 = vector.multi_reduction <add>, %711, %cst_163 [1] : vector<2x43xf32> to vector<2xf32>
    %759 = vector.shape_cast %758 : vector<2xf32> to vector<2x1xf32>
    %cst_164 = arith.constant dense<0.000000e+00> : vector<1xf32>
    %760 = vector.multi_reduction <add>, %759, %cst_164 [0] : vector<2x1xf32> to vector<1xf32>
    %761 = vector.shape_cast %760 : vector<1xf32> to vector<1x1xf32>
    %762 = arith.addf %757, %761 : vector<1x1xf32>
    %cst_165 = arith.constant 1.740000e+02 : f32
    %763 = vector.broadcast %cst_165 : f32 to vector<1x1xf32>
    %764 = arith.divf %762, %763 : vector<1x1xf32>
    %765 = vector.broadcast %764 : vector<1x1xf32> to vector<2x44xf32>
    %766 = arith.subf %705, %765 : vector<2x44xf32>
    %767 = vector.broadcast %764 : vector<1x1xf32> to vector<2x43xf32>
    %768 = arith.subf %711, %767 : vector<2x43xf32>
    %769 = arith.mulf %766, %766 : vector<2x44xf32>
    %cst_166 = arith.constant dense<0.000000e+00> : vector<2xf32>
    %770 = vector.multi_reduction <add>, %769, %cst_166 [1] : vector<2x44xf32> to vector<2xf32>
    %771 = vector.shape_cast %770 : vector<2xf32> to vector<2x1xf32>
    %cst_167 = arith.constant dense<0.000000e+00> : vector<1xf32>
    %772 = vector.multi_reduction <add>, %771, %cst_167 [0] : vector<2x1xf32> to vector<1xf32>
    %773 = vector.shape_cast %772 : vector<1xf32> to vector<1x1xf32>
    %774 = arith.mulf %768, %768 : vector<2x43xf32>
    %cst_168 = arith.constant dense<0.000000e+00> : vector<2xf32>
    %775 = vector.multi_reduction <add>, %774, %cst_168 [1] : vector<2x43xf32> to vector<2xf32>
    %776 = vector.shape_cast %775 : vector<2xf32> to vector<2x1xf32>
    %cst_169 = arith.constant dense<0.000000e+00> : vector<1xf32>
    %777 = vector.multi_reduction <add>, %776, %cst_169 [0] : vector<2x1xf32> to vector<1xf32>
    %778 = vector.shape_cast %777 : vector<1xf32> to vector<1x1xf32>
    %779 = arith.addf %773, %778 : vector<1x1xf32>
    %cst_170 = arith.constant 1.740000e+02 : f32
    %780 = vector.broadcast %cst_170 : f32 to vector<1x1xf32>
    %781 = arith.divf %779, %780 : vector<1x1xf32>
    %cst_171 = arith.constant 9.99999974E-6 : f32
    %782 = vector.broadcast %cst_171 : f32 to vector<1x1xf32>
    %783 = arith.addf %781, %782 : vector<1x1xf32>
    %784 = math.rsqrt %783 : vector<1x1xf32>
    %c1_172 = arith.constant 1 : index
    %785 = memref.load %arg3[%c1_172] : memref<6xf32, #tpu.memory_space<smem>>
    %786 = vector.broadcast %785 : f32 to vector<1x1xf32>
    %787 = arith.mulf %784, %786 : vector<1x1xf32>
    %788 = vector.broadcast %787 : vector<1x1xf32> to vector<2x44xf32>
    %789 = arith.mulf %766, %788 : vector<2x44xf32>
    %790 = vector.broadcast %787 : vector<1x1xf32> to vector<2x43xf32>
    %791 = arith.mulf %768, %790 : vector<2x43xf32>
    %cst_173 = arith.constant dense<0.000000e+00> : vector<2xf32>
    %792 = vector.multi_reduction <add>, %706, %cst_173 [1] : vector<2x44xf32> to vector<2xf32>
    %793 = vector.shape_cast %792 : vector<2xf32> to vector<2x1xf32>
    %cst_174 = arith.constant dense<0.000000e+00> : vector<1xf32>
    %794 = vector.multi_reduction <add>, %793, %cst_174 [0] : vector<2x1xf32> to vector<1xf32>
    %795 = vector.shape_cast %794 : vector<1xf32> to vector<1x1xf32>
    %cst_175 = arith.constant dense<0.000000e+00> : vector<2xf32>
    %796 = vector.multi_reduction <add>, %712, %cst_175 [1] : vector<2x43xf32> to vector<2xf32>
    %797 = vector.shape_cast %796 : vector<2xf32> to vector<2x1xf32>
    %cst_176 = arith.constant dense<0.000000e+00> : vector<1xf32>
    %798 = vector.multi_reduction <add>, %797, %cst_176 [0] : vector<2x1xf32> to vector<1xf32>
    %799 = vector.shape_cast %798 : vector<1xf32> to vector<1x1xf32>
    %800 = arith.addf %795, %799 : vector<1x1xf32>
    %cst_177 = arith.constant 1.740000e+02 : f32
    %801 = vector.broadcast %cst_177 : f32 to vector<1x1xf32>
    %802 = arith.divf %800, %801 : vector<1x1xf32>
    %803 = vector.broadcast %802 : vector<1x1xf32> to vector<2x44xf32>
    %804 = arith.subf %706, %803 : vector<2x44xf32>
    %805 = vector.broadcast %802 : vector<1x1xf32> to vector<2x43xf32>
    %806 = arith.subf %712, %805 : vector<2x43xf32>
    %807 = arith.mulf %804, %804 : vector<2x44xf32>
    %cst_178 = arith.constant dense<0.000000e+00> : vector<2xf32>
    %808 = vector.multi_reduction <add>, %807, %cst_178 [1] : vector<2x44xf32> to vector<2xf32>
    %809 = vector.shape_cast %808 : vector<2xf32> to vector<2x1xf32>
    %cst_179 = arith.constant dense<0.000000e+00> : vector<1xf32>
    %810 = vector.multi_reduction <add>, %809, %cst_179 [0] : vector<2x1xf32> to vector<1xf32>
    %811 = vector.shape_cast %810 : vector<1xf32> to vector<1x1xf32>
    %812 = arith.mulf %806, %806 : vector<2x43xf32>
    %cst_180 = arith.constant dense<0.000000e+00> : vector<2xf32>
    %813 = vector.multi_reduction <add>, %812, %cst_180 [1] : vector<2x43xf32> to vector<2xf32>
    %814 = vector.shape_cast %813 : vector<2xf32> to vector<2x1xf32>
    %cst_181 = arith.constant dense<0.000000e+00> : vector<1xf32>
    %815 = vector.multi_reduction <add>, %814, %cst_181 [0] : vector<2x1xf32> to vector<1xf32>
    %816 = vector.shape_cast %815 : vector<1xf32> to vector<1x1xf32>
    %817 = arith.addf %811, %816 : vector<1x1xf32>
    %cst_182 = arith.constant 1.740000e+02 : f32
    %818 = vector.broadcast %cst_182 : f32 to vector<1x1xf32>
    %819 = arith.divf %817, %818 : vector<1x1xf32>
    %cst_183 = arith.constant 9.99999974E-6 : f32
    %820 = vector.broadcast %cst_183 : f32 to vector<1x1xf32>
    %821 = arith.addf %819, %820 : vector<1x1xf32>
    %822 = math.rsqrt %821 : vector<1x1xf32>
    %c2_184 = arith.constant 2 : index
    %823 = memref.load %arg3[%c2_184] : memref<6xf32, #tpu.memory_space<smem>>
    %824 = vector.broadcast %823 : f32 to vector<1x1xf32>
    %825 = arith.mulf %822, %824 : vector<1x1xf32>
    %826 = vector.broadcast %825 : vector<1x1xf32> to vector<2x44xf32>
    %827 = arith.mulf %804, %826 : vector<2x44xf32>
    %828 = vector.broadcast %825 : vector<1x1xf32> to vector<2x43xf32>
    %829 = arith.mulf %806, %828 : vector<2x43xf32>
    %cst_185 = arith.constant dense<0.000000e+00> : vector<2xf32>
    %830 = vector.multi_reduction <add>, %707, %cst_185 [1] : vector<2x44xf32> to vector<2xf32>
    %831 = vector.shape_cast %830 : vector<2xf32> to vector<2x1xf32>
    %cst_186 = arith.constant dense<0.000000e+00> : vector<1xf32>
    %832 = vector.multi_reduction <add>, %831, %cst_186 [0] : vector<2x1xf32> to vector<1xf32>
    %833 = vector.shape_cast %832 : vector<1xf32> to vector<1x1xf32>
    %cst_187 = arith.constant dense<0.000000e+00> : vector<2xf32>
    %834 = vector.multi_reduction <add>, %713, %cst_187 [1] : vector<2x43xf32> to vector<2xf32>
    %835 = vector.shape_cast %834 : vector<2xf32> to vector<2x1xf32>
    %cst_188 = arith.constant dense<0.000000e+00> : vector<1xf32>
    %836 = vector.multi_reduction <add>, %835, %cst_188 [0] : vector<2x1xf32> to vector<1xf32>
    %837 = vector.shape_cast %836 : vector<1xf32> to vector<1x1xf32>
    %838 = arith.addf %833, %837 : vector<1x1xf32>
    %cst_189 = arith.constant 1.740000e+02 : f32
    %839 = vector.broadcast %cst_189 : f32 to vector<1x1xf32>
    %840 = arith.divf %838, %839 : vector<1x1xf32>
    %841 = vector.broadcast %840 : vector<1x1xf32> to vector<2x44xf32>
    %842 = arith.subf %707, %841 : vector<2x44xf32>
    %843 = vector.broadcast %840 : vector<1x1xf32> to vector<2x43xf32>
    %844 = arith.subf %713, %843 : vector<2x43xf32>
    %845 = arith.mulf %842, %842 : vector<2x44xf32>
    %cst_190 = arith.constant dense<0.000000e+00> : vector<2xf32>
    %846 = vector.multi_reduction <add>, %845, %cst_190 [1] : vector<2x44xf32> to vector<2xf32>
    %847 = vector.shape_cast %846 : vector<2xf32> to vector<2x1xf32>
    %cst_191 = arith.constant dense<0.000000e+00> : vector<1xf32>
    %848 = vector.multi_reduction <add>, %847, %cst_191 [0] : vector<2x1xf32> to vector<1xf32>
    %849 = vector.shape_cast %848 : vector<1xf32> to vector<1x1xf32>
    %850 = arith.mulf %844, %844 : vector<2x43xf32>
    %cst_192 = arith.constant dense<0.000000e+00> : vector<2xf32>
    %851 = vector.multi_reduction <add>, %850, %cst_192 [1] : vector<2x43xf32> to vector<2xf32>
    %852 = vector.shape_cast %851 : vector<2xf32> to vector<2x1xf32>
    %cst_193 = arith.constant dense<0.000000e+00> : vector<1xf32>
    %853 = vector.multi_reduction <add>, %852, %cst_193 [0] : vector<2x1xf32> to vector<1xf32>
    %854 = vector.shape_cast %853 : vector<1xf32> to vector<1x1xf32>
    %855 = arith.addf %849, %854 : vector<1x1xf32>
    %cst_194 = arith.constant 1.740000e+02 : f32
    %856 = vector.broadcast %cst_194 : f32 to vector<1x1xf32>
    %857 = arith.divf %855, %856 : vector<1x1xf32>
    %cst_195 = arith.constant 9.99999974E-6 : f32
    %858 = vector.broadcast %cst_195 : f32 to vector<1x1xf32>
    %859 = arith.addf %857, %858 : vector<1x1xf32>
    %860 = math.rsqrt %859 : vector<1x1xf32>
    %c3_196 = arith.constant 3 : index
    %861 = memref.load %arg3[%c3_196] : memref<6xf32, #tpu.memory_space<smem>>
    %862 = vector.broadcast %861 : f32 to vector<1x1xf32>
    %863 = arith.mulf %860, %862 : vector<1x1xf32>
    %864 = vector.broadcast %863 : vector<1x1xf32> to vector<2x44xf32>
    %865 = arith.mulf %842, %864 : vector<2x44xf32>
    %866 = vector.broadcast %863 : vector<1x1xf32> to vector<2x43xf32>
    %867 = arith.mulf %844, %866 : vector<2x43xf32>
    %cst_197 = arith.constant dense<0.000000e+00> : vector<2xf32>
    %868 = vector.multi_reduction <add>, %708, %cst_197 [1] : vector<2x44xf32> to vector<2xf32>
    %869 = vector.shape_cast %868 : vector<2xf32> to vector<2x1xf32>
    %cst_198 = arith.constant dense<0.000000e+00> : vector<1xf32>
    %870 = vector.multi_reduction <add>, %869, %cst_198 [0] : vector<2x1xf32> to vector<1xf32>
    %871 = vector.shape_cast %870 : vector<1xf32> to vector<1x1xf32>
    %cst_199 = arith.constant dense<0.000000e+00> : vector<2xf32>
    %872 = vector.multi_reduction <add>, %714, %cst_199 [1] : vector<2x43xf32> to vector<2xf32>
    %873 = vector.shape_cast %872 : vector<2xf32> to vector<2x1xf32>
    %cst_200 = arith.constant dense<0.000000e+00> : vector<1xf32>
    %874 = vector.multi_reduction <add>, %873, %cst_200 [0] : vector<2x1xf32> to vector<1xf32>
    %875 = vector.shape_cast %874 : vector<1xf32> to vector<1x1xf32>
    %876 = arith.addf %871, %875 : vector<1x1xf32>
    %cst_201 = arith.constant 1.740000e+02 : f32
    %877 = vector.broadcast %cst_201 : f32 to vector<1x1xf32>
    %878 = arith.divf %876, %877 : vector<1x1xf32>
    %879 = vector.broadcast %878 : vector<1x1xf32> to vector<2x44xf32>
    %880 = arith.subf %708, %879 : vector<2x44xf32>
    %881 = vector.broadcast %878 : vector<1x1xf32> to vector<2x43xf32>
    %882 = arith.subf %714, %881 : vector<2x43xf32>
    %883 = arith.mulf %880, %880 : vector<2x44xf32>
    %cst_202 = arith.constant dense<0.000000e+00> : vector<2xf32>
    %884 = vector.multi_reduction <add>, %883, %cst_202 [1] : vector<2x44xf32> to vector<2xf32>
    %885 = vector.shape_cast %884 : vector<2xf32> to vector<2x1xf32>
    %cst_203 = arith.constant dense<0.000000e+00> : vector<1xf32>
    %886 = vector.multi_reduction <add>, %885, %cst_203 [0] : vector<2x1xf32> to vector<1xf32>
    %887 = vector.shape_cast %886 : vector<1xf32> to vector<1x1xf32>
    %888 = arith.mulf %882, %882 : vector<2x43xf32>
    %cst_204 = arith.constant dense<0.000000e+00> : vector<2xf32>
    %889 = vector.multi_reduction <add>, %888, %cst_204 [1] : vector<2x43xf32> to vector<2xf32>
    %890 = vector.shape_cast %889 : vector<2xf32> to vector<2x1xf32>
    %cst_205 = arith.constant dense<0.000000e+00> : vector<1xf32>
    %891 = vector.multi_reduction <add>, %890, %cst_205 [0] : vector<2x1xf32> to vector<1xf32>
    %892 = vector.shape_cast %891 : vector<1xf32> to vector<1x1xf32>
    %893 = arith.addf %887, %892 : vector<1x1xf32>
    %cst_206 = arith.constant 1.740000e+02 : f32
    %894 = vector.broadcast %cst_206 : f32 to vector<1x1xf32>
    %895 = arith.divf %893, %894 : vector<1x1xf32>
    %cst_207 = arith.constant 9.99999974E-6 : f32
    %896 = vector.broadcast %cst_207 : f32 to vector<1x1xf32>
    %897 = arith.addf %895, %896 : vector<1x1xf32>
    %898 = math.rsqrt %897 : vector<1x1xf32>
    %c4_208 = arith.constant 4 : index
    %899 = memref.load %arg3[%c4_208] : memref<6xf32, #tpu.memory_space<smem>>
    %900 = vector.broadcast %899 : f32 to vector<1x1xf32>
    %901 = arith.mulf %898, %900 : vector<1x1xf32>
    %902 = vector.broadcast %901 : vector<1x1xf32> to vector<2x44xf32>
    %903 = arith.mulf %880, %902 : vector<2x44xf32>
    %904 = vector.broadcast %901 : vector<1x1xf32> to vector<2x43xf32>
    %905 = arith.mulf %882, %904 : vector<2x43xf32>
    %cst_209 = arith.constant dense<0.000000e+00> : vector<2xf32>
    %906 = vector.multi_reduction <add>, %709, %cst_209 [1] : vector<2x44xf32> to vector<2xf32>
    %907 = vector.shape_cast %906 : vector<2xf32> to vector<2x1xf32>
    %cst_210 = arith.constant dense<0.000000e+00> : vector<1xf32>
    %908 = vector.multi_reduction <add>, %907, %cst_210 [0] : vector<2x1xf32> to vector<1xf32>
    %909 = vector.shape_cast %908 : vector<1xf32> to vector<1x1xf32>
    %cst_211 = arith.constant dense<0.000000e+00> : vector<2xf32>
    %910 = vector.multi_reduction <add>, %715, %cst_211 [1] : vector<2x43xf32> to vector<2xf32>
    %911 = vector.shape_cast %910 : vector<2xf32> to vector<2x1xf32>
    %cst_212 = arith.constant dense<0.000000e+00> : vector<1xf32>
    %912 = vector.multi_reduction <add>, %911, %cst_212 [0] : vector<2x1xf32> to vector<1xf32>
    %913 = vector.shape_cast %912 : vector<1xf32> to vector<1x1xf32>
    %914 = arith.addf %909, %913 : vector<1x1xf32>
    %cst_213 = arith.constant 1.740000e+02 : f32
    %915 = vector.broadcast %cst_213 : f32 to vector<1x1xf32>
    %916 = arith.divf %914, %915 : vector<1x1xf32>
    %917 = vector.broadcast %916 : vector<1x1xf32> to vector<2x44xf32>
    %918 = arith.subf %709, %917 : vector<2x44xf32>
    %919 = vector.broadcast %916 : vector<1x1xf32> to vector<2x43xf32>
    %920 = arith.subf %715, %919 : vector<2x43xf32>
    %921 = arith.mulf %918, %918 : vector<2x44xf32>
    %cst_214 = arith.constant dense<0.000000e+00> : vector<2xf32>
    %922 = vector.multi_reduction <add>, %921, %cst_214 [1] : vector<2x44xf32> to vector<2xf32>
    %923 = vector.shape_cast %922 : vector<2xf32> to vector<2x1xf32>
    %cst_215 = arith.constant dense<0.000000e+00> : vector<1xf32>
    %924 = vector.multi_reduction <add>, %923, %cst_215 [0] : vector<2x1xf32> to vector<1xf32>
    %925 = vector.shape_cast %924 : vector<1xf32> to vector<1x1xf32>
    %926 = arith.mulf %920, %920 : vector<2x43xf32>
    %cst_216 = arith.constant dense<0.000000e+00> : vector<2xf32>
    %927 = vector.multi_reduction <add>, %926, %cst_216 [1] : vector<2x43xf32> to vector<2xf32>
    %928 = vector.shape_cast %927 : vector<2xf32> to vector<2x1xf32>
    %cst_217 = arith.constant dense<0.000000e+00> : vector<1xf32>
    %929 = vector.multi_reduction <add>, %928, %cst_217 [0] : vector<2x1xf32> to vector<1xf32>
    %930 = vector.shape_cast %929 : vector<1xf32> to vector<1x1xf32>
    %931 = arith.addf %925, %930 : vector<1x1xf32>
    %cst_218 = arith.constant 1.740000e+02 : f32
    %932 = vector.broadcast %cst_218 : f32 to vector<1x1xf32>
    %933 = arith.divf %931, %932 : vector<1x1xf32>
    %cst_219 = arith.constant 9.99999974E-6 : f32
    %934 = vector.broadcast %cst_219 : f32 to vector<1x1xf32>
    %935 = arith.addf %933, %934 : vector<1x1xf32>
    %936 = math.rsqrt %935 : vector<1x1xf32>
    %c5_220 = arith.constant 5 : index
    %937 = memref.load %arg3[%c5_220] : memref<6xf32, #tpu.memory_space<smem>>
    %938 = vector.broadcast %937 : f32 to vector<1x1xf32>
    %939 = arith.mulf %936, %938 : vector<1x1xf32>
    %940 = vector.broadcast %939 : vector<1x1xf32> to vector<2x44xf32>
    %941 = arith.mulf %918, %940 : vector<2x44xf32>
    %942 = vector.broadcast %939 : vector<1x1xf32> to vector<2x43xf32>
    %943 = arith.mulf %920, %942 : vector<2x43xf32>
    %944 = tpu.concatenate %751, %789, %827, %865, %903, %941, %753, %791, %829, %867, %905, %943 in 1 : vector<2x44xf32>, vector<2x44xf32>, vector<2x44xf32>, vector<2x44xf32>, vector<2x44xf32>, vector<2x44xf32>, vector<2x43xf32>, vector<2x43xf32>, vector<2x43xf32>, vector<2x43xf32>, vector<2x43xf32>, vector<2x43xf32> -> vector<2x522xf32>
    %c0_221 = arith.constant 0 : index
    %c0_222 = arith.constant 0 : index
    %945 = vector.load %arg4[%c0_221, %c0_222] : memref<522x704xf32, #tpu.memory_space<vmem>>, vector<522x704xf32>
    %cst_223 = arith.constant dense<0.000000e+00> : vector<2x704xf32>
    %946 = tpu.matmul %944, %945, %cst_223 {dimension_numbers = #tpu.dot_dimension_numbers<[1], [0], [0], [1], [0, 0, 1, 1], [], []>} : vector<2x522xf32>, vector<522x704xf32>, vector<2x704xf32> -> vector<2x704xf32>
    %c0_224 = arith.constant 0 : index
    %c0_225 = arith.constant 0 : index
    %947 = vector.load %arg6[%c0_224, %c0_225] : memref<1x704xf32, #tpu.memory_space<vmem>>, vector<1x704xf32>
    %948 = vector.broadcast %947 : vector<1x704xf32> to vector<2x704xf32>
    %949 = arith.addf %946, %948 : vector<2x704xf32>
    %cst_226 = arith.constant 0.000000e+00 : f32
    %950 = vector.broadcast %cst_226 : f32 to vector<2x704xf32>
    %951 = arith.maximumf %949, %950 : vector<2x704xf32>
    %c0_227 = arith.constant 0 : index
    %c0_228 = arith.constant 0 : index
    %952 = vector.load %arg5[%c0_227, %c0_228] : memref<522x704xf32, #tpu.memory_space<vmem>>, vector<522x704xf32>
    %cst_229 = arith.constant dense<0.000000e+00> : vector<2x704xf32>
    %953 = tpu.matmul %944, %952, %cst_229 {dimension_numbers = #tpu.dot_dimension_numbers<[1], [0], [0], [1], [0, 0, 1, 1], [], []>} : vector<2x522xf32>, vector<522x704xf32>, vector<2x704xf32> -> vector<2x704xf32>
    %c0_230 = arith.constant 0 : index
    %c0_231 = arith.constant 0 : index
    %954 = vector.load %arg6[%c0_230, %c0_231] : memref<1x704xf32, #tpu.memory_space<vmem>>, vector<1x704xf32>
    %955 = vector.broadcast %954 : vector<1x704xf32> to vector<2x704xf32>
    %956 = arith.addf %953, %955 : vector<2x704xf32>
    %cst_232 = arith.constant 0.000000e+00 : f32
    %957 = vector.broadcast %cst_232 : f32 to vector<2x704xf32>
    %958 = arith.maximumf %956, %957 : vector<2x704xf32>
    %959 = arith.maximumf %951, %958 : vector<2x704xf32>
    %cst_233 = arith.constant dense<0.000000e+00> : vector<704xf32>
    %960 = vector.multi_reduction <add>, %959, %cst_233 [0] : vector<2x704xf32> to vector<704xf32>
    %961 = vector.shape_cast %960 : vector<704xf32> to vector<1x704xf32>
    %c0_234 = arith.constant 0 : index
    %c0_235 = arith.constant 0 : index
    %962 = vector.load %arg8[%c0_234, %c0_235] : memref<704x16xf32, #tpu.memory_space<vmem>>, vector<704x16xf32>
    %cst_236 = arith.constant dense<0.000000e+00> : vector<1x16xf32>
    %963 = tpu.matmul %961, %962, %cst_236 {dimension_numbers = #tpu.dot_dimension_numbers<[1], [0], [0], [1], [0, 0, 1, 1], [], []>} : vector<1x704xf32>, vector<704x16xf32>, vector<1x16xf32> -> vector<1x16xf32>
    %cst_237 = arith.constant 8.200000e+01 : f32
    %964 = vector.broadcast %cst_237 : f32 to vector<1x16xf32>
    %965 = arith.divf %963, %964 : vector<1x16xf32>
    %c0_238 = arith.constant 0 : index
    %c0_239 = arith.constant 0 : index
    %966 = vector.load %arg9[%c0_238, %c0_239] : memref<16x704xf32, #tpu.memory_space<vmem>>, vector<16x704xf32>
    %cst_240 = arith.constant dense<0.000000e+00> : vector<1x704xf32>
    %967 = tpu.matmul %965, %966, %cst_240 {dimension_numbers = #tpu.dot_dimension_numbers<[1], [0], [0], [1], [0, 0, 1, 1], [], []>} : vector<1x16xf32>, vector<16x704xf32>, vector<1x704xf32> -> vector<1x704xf32>
    %968 = vector.broadcast %967 : vector<1x704xf32> to vector<2x704xf32>
    %969 = arith.subf %959, %968 : vector<2x704xf32>
    %970 = arith.mulf %969, %969 : vector<2x704xf32>
    %cst_241 = arith.constant dense<0.000000e+00> : vector<704xf32>
    %971 = vector.multi_reduction <add>, %970, %cst_241 [0] : vector<2x704xf32> to vector<704xf32>
    %972 = vector.shape_cast %971 : vector<704xf32> to vector<1x704xf32>
    %c0_242 = arith.constant 0 : index
    %c0_243 = arith.constant 0 : index
    %973 = vector.load %arg8[%c0_242, %c0_243] : memref<704x16xf32, #tpu.memory_space<vmem>>, vector<704x16xf32>
    %cst_244 = arith.constant dense<0.000000e+00> : vector<1x16xf32>
    %974 = tpu.matmul %972, %973, %cst_244 {dimension_numbers = #tpu.dot_dimension_numbers<[1], [0], [0], [1], [0, 0, 1, 1], [], []>} : vector<1x704xf32>, vector<704x16xf32>, vector<1x16xf32> -> vector<1x16xf32>
    %c0_245 = arith.constant 0 : index
    %c0_246 = arith.constant 0 : index
    %975 = vector.load %arg7[%c0_245, %c0_246] : memref<1x16xf32, #tpu.memory_space<vmem>>, vector<1x16xf32>
    %cst_247 = arith.constant 8.200000e+01 : f32
    %976 = vector.broadcast %cst_247 : f32 to vector<1x16xf32>
    %977 = arith.divf %974, %976 : vector<1x16xf32>
    %cst_248 = arith.constant 9.99999974E-6 : f32
    %978 = vector.broadcast %cst_248 : f32 to vector<1x16xf32>
    %979 = arith.addf %977, %978 : vector<1x16xf32>
    %980 = math.rsqrt %979 : vector<1x16xf32>
    %981 = arith.mulf %975, %980 : vector<1x16xf32>
    %c0_249 = arith.constant 0 : index
    %c0_250 = arith.constant 0 : index
    %982 = vector.load %arg9[%c0_249, %c0_250] : memref<16x704xf32, #tpu.memory_space<vmem>>, vector<16x704xf32>
    %cst_251 = arith.constant dense<0.000000e+00> : vector<1x704xf32>
    %983 = tpu.matmul %981, %982, %cst_251 {dimension_numbers = #tpu.dot_dimension_numbers<[1], [0], [0], [1], [0, 0, 1, 1], [], []>} : vector<1x16xf32>, vector<16x704xf32>, vector<1x704xf32> -> vector<1x704xf32>
    %984 = vector.broadcast %983 : vector<1x704xf32> to vector<2x704xf32>
    %985 = arith.mulf %969, %984 : vector<2x704xf32>
    %c0_252 = arith.constant 0 : index
    %c0_253 = arith.constant 0 : index
    %986 = vector.load %arg10[%c0_252, %c0_253] : memref<704x128xf32, #tpu.memory_space<vmem>>, vector<704x128xf32>
    %cst_254 = arith.constant dense<0.000000e+00> : vector<2x128xf32>
    %987 = tpu.matmul %985, %986, %cst_254 {dimension_numbers = #tpu.dot_dimension_numbers<[1], [0], [0], [1], [0, 0, 1, 1], [], []>} : vector<2x704xf32>, vector<704x128xf32>, vector<2x128xf32> -> vector<2x128xf32>
    %c0_255 = arith.constant 0 : index
    %c0_256 = arith.constant 0 : index
    %988 = vector.load %arg11[%c0_255, %c0_256] : memref<1x128xf32, #tpu.memory_space<vmem>>, vector<1x128xf32>
    %989 = vector.broadcast %988 : vector<1x128xf32> to vector<2x128xf32>
    %990 = arith.addf %987, %989 : vector<2x128xf32>
    %cst_257 = arith.constant 0.000000e+00 : f32
    %991 = vector.broadcast %cst_257 : f32 to vector<2x128xf32>
    %992 = arith.maximumf %990, %991 : vector<2x128xf32>
    %cst_258 = arith.constant dense<0.000000e+00> : vector<128xf32>
    %993 = vector.multi_reduction <add>, %992, %cst_258 [0] : vector<2x128xf32> to vector<128xf32>
    %994 = vector.shape_cast %993 : vector<128xf32> to vector<1x128xf32>
    %cst_259 = arith.constant 2.000000e+00 : f32
    %995 = vector.broadcast %cst_259 : f32 to vector<1x128xf32>
    %996 = arith.divf %994, %995 : vector<1x128xf32>
    %997 = vector.broadcast %996 : vector<1x128xf32> to vector<2x128xf32>
    %998 = arith.subf %992, %997 : vector<2x128xf32>
    %999 = arith.mulf %998, %998 : vector<2x128xf32>
    %cst_260 = arith.constant dense<0.000000e+00> : vector<128xf32>
    %1000 = vector.multi_reduction <add>, %999, %cst_260 [0] : vector<2x128xf32> to vector<128xf32>
    %1001 = vector.shape_cast %1000 : vector<128xf32> to vector<1x128xf32>
    %cst_261 = arith.constant 2.000000e+00 : f32
    %1002 = vector.broadcast %cst_261 : f32 to vector<1x128xf32>
    %1003 = arith.divf %1001, %1002 : vector<1x128xf32>
    %cst_262 = arith.constant 9.99999974E-6 : f32
    %1004 = vector.broadcast %cst_262 : f32 to vector<1x128xf32>
    %1005 = arith.addf %1003, %1004 : vector<1x128xf32>
    %1006 = math.rsqrt %1005 : vector<1x128xf32>
    %c0_263 = arith.constant 0 : index
    %c0_264 = arith.constant 0 : index
    %1007 = vector.load %arg12[%c0_263, %c0_264] : memref<1x128xf32, #tpu.memory_space<vmem>>, vector<1x128xf32>
    %1008 = arith.mulf %1006, %1007 : vector<1x128xf32>
    %1009 = vector.broadcast %1008 : vector<1x128xf32> to vector<2x128xf32>
    %1010 = arith.mulf %998, %1009 : vector<2x128xf32>
    %c0_265 = arith.constant 0 : index
    %c0_266 = arith.constant 0 : index
    %1011 = vector.load %arg13[%c0_265, %c0_266] : memref<1x128xf32, #tpu.memory_space<vmem>>, vector<1x128xf32>
    %1012 = vector.broadcast %1011 : vector<1x128xf32> to vector<2x128xf32>
    %1013 = arith.addf %1010, %1012 : vector<2x128xf32>
    %c0_267 = arith.constant 0 : index
    %c0_268 = arith.constant 0 : index
    %1014 = vector.load %arg14[%c0_267, %c0_268] : memref<128x128xf32, #tpu.memory_space<vmem>>, vector<128x128xf32>
    %cst_269 = arith.constant dense<0.000000e+00> : vector<2x128xf32>
    %1015 = tpu.matmul %1013, %1014, %cst_269 {dimension_numbers = #tpu.dot_dimension_numbers<[1], [0], [0], [1], [0, 0, 1, 1], [], []>} : vector<2x128xf32>, vector<128x128xf32>, vector<2x128xf32> -> vector<2x128xf32>
    %c0_270 = arith.constant 0 : index
    %c0_271 = arith.constant 0 : index
    %1016 = vector.load %arg15[%c0_270, %c0_271] : memref<1x128xf32, #tpu.memory_space<vmem>>, vector<1x128xf32>
    %1017 = vector.broadcast %1016 : vector<1x128xf32> to vector<2x128xf32>
    %1018 = arith.addf %1015, %1017 : vector<2x128xf32>
    %c0_272 = arith.constant 0 : index
    %c0_273 = arith.constant 0 : index
    %1019 = vector.load %arg16[%c0_272, %c0_273] : memref<2x128xf32, #tpu.memory_space<vmem>>, vector<2x128xf32>
    tpu.vector_store %arg16[%c0_272, %c0_273], %1018 {strides = array<i32>} : memref<2x128xf32, #tpu.memory_space<vmem>>, vector<2x128xf32>,
    return
  }
}

</mosaic_0001>

<bundles_post_ra>
// kernel: tpu_custom_call.1
= control target key start
LH: loop header
LB: loop body
LE: loop exit
PB: predicated region body
PF: predicated region fallthrough
CT: control target
= control target key end

     0   :  { %s8352_s0 = inlined_call_operand.hbm [shape: f32[4,2,46], index: 0, kind: input, shape index: {}]   ;;  %s8353_s1 = inlined_call_operand.hbm [shape: f32[30], index: 1, kind: input, shape index: {}]   ;;  %s8354_s2 = inlined_call_operand.hbm [shape: f32[6], index: 2, kind: input, shape index: {}]   ;;  %s8355_s3 = inlined_call_operand.hbm [shape: f32[6], index: 3, kind: input, shape index: {}]   ;;  %s8356_s4 = inlined_call_operand.hbm [shape: f32[522,704], index: 4, kind: input, shape index: {}]   ;;  %s8357_s5 = inlined_call_operand.hbm [shape: f32[522,704], index: 5, kind: input, shape index: {}]   ;;  %s8358_s6 = inlined_call_operand.hbm [shape: f32[1,704], index: 6, kind: input, shape index: {}]   ;;  %s8359_s7 = inlined_call_operand.hbm [shape: f32[1,16], index: 7, kind: input, shape index: {}]   ;;  %s8360_s8 = inlined_call_operand.hbm [shape: f32[704,16], index: 8, kind: input, shape index: {}]   ;;  %s8361_s9 = inlined_call_operand.hbm [shape: f32[16,704], index: 9, kind: input, shape index: {}]   ;;  %s8362_s10 = inlined_call_operand.hbm [shape: f32[704,128], index: 10, kind: input, shape index: {}]   ;;  %s8363_s11 = inlined_call_operand.hbm [shape: f32[1,128], index: 11, kind: input, shape index: {}]   ;;  %s8364_s12 = inlined_call_operand.hbm [shape: f32[1,128], index: 12, kind: input, shape index: {}]   ;;  %s8365_s13 = inlined_call_operand.hbm [shape: f32[1,128], index: 13, kind: input, shape index: {}]   ;;  %s8366_s14 = inlined_call_operand.hbm [shape: f32[128,128], index: 14, kind: input, shape index: {}]   ;;  %s8367_s15 = inlined_call_operand.hbm [shape: f32[1,128], index: 15, kind: input, shape index: {}]   ;;  %s8368_s16 = inlined_call_operand.hbm [shape: f32[2,128], index: 16, kind: output, shape index: {}]  }
   0x1   :  { %8383 = sst [smem:[#allocation47_spill]] %s8352_s0 }
   0x2   :  { %21 = vsyncpa [#allocation3], 0 }
   0x3   :  { %22 = vsyncpa [#allocation5], 0 }
   0x4   :  { %23 = vsyncpa [#allocation8], 0 }
   0x5   :  { %24 = vsyncpa [#allocation11], 0 }
   0x6   :  { %25 = vsyncpa [#allocation14], 0 }
   0x7   :  { %26 = vsyncpa [#allocation17], 0 }
   0x8   :  { %27 = vsyncpa [#allocation20], 0 }
   0x9   :  { %28 = vsyncpa [#allocation23], 0 }
   0xa   :  { %29 = vsyncpa [#allocation26], 0 }
   0xb   :  { %30 = vsyncpa [#allocation4], 0  ;;  %s6554_s23 = scalar_lea.hbm %s8354_s2, 16 }
   0xc   :  { %p6555_p0 = scmp.ne.s32.totalorder %s8354_s2, %s6554_s23  ;;  %p6558_p1 = scmp.lt.u32.totalorder %s6554_s23, %s8354_s2 }
   0xe   :  { %p6560_p2 = pnand %p6558_p1, %p6555_p0 }
  0x10   :  { %6563 = shalt.err (!%p6560_p2)
}
  0x11   :  { %s6912_s28 = smov [#allocation7]   ;;  %s6913_s0 = smov [#allocation10]  }
  0x12   :  { %58 = dma.hbm_to_smem %s8354_s2, 16, %s6912_s28, [#allocation8]  }
  0x13   :  { %s72_s17 = sshll.u32 %s6913_s0, 4  ;;  %s6564_s20 = scalar_lea.hbm %s8356_s4, 50688  ;;  %s73_s17 = int_to_ptr.vmem [resolvable:$true] %s72_s17 }
  0x14   :  { %p6565_p3 = scmp.ne.s32.totalorder %s8356_s4, %s6564_s20  ;;  %p6568_p4 = scmp.lt.u32.totalorder %s6564_s20, %s8356_s4 }
  0x16   :  { %p6570_p5 = pnand %p6568_p4, %p6565_p3 }
  0x18   :  { %6573 = shalt.err (!%p6570_p5)
}
  0x19   :  { %s6574_s25 = scalar_lea.vmem %s73_s17, 50688  ;;  %p6579_p7 = scmp.lt.s32.totalorder %s73_s17, %s73_s17 }
  0x1a   :  { %p6575_p6 = scmp.ne.s32.totalorder %s73_s17, %s6574_s25  ;;  %p6580_p8 = scmp.lt.s32.totalorder %s6574_s25, %s6574_s25 }
  0x1c   :  { %p6581_p9 = por %p6580_p8, %p6579_p7 }
  0x1e   :  { %p6582_p10 = pnand %p6581_p9, %p6575_p6 }
  0x20   :  { %6585 = shalt.err (!%p6582_p10)
}
  0x21   :  { %s6914_s2 = smov 768   ;;  %s6915_s26 = smov 48  }
  0x22   :  { %78 = dma.hbm_to_vmem [thread:$0]  %s8356_s4, 50688, %s73_s17, [#allocation11], %s6914_s2, %s6914_s2, %s6915_s26  }
  0x23   :  { %s6916_s29 = smov [#allocation13]   ;;  %s6917_s0 = smov [#allocation16]  }
  0x24   :  { %s97_s30 = sshll.u32 %s6916_s29, 4  ;;  %s116_s18 = sshll.u32 %s6917_s0, 4  ;;  %s98_s30 = int_to_ptr.vmem [resolvable:$true] %s97_s30  ;;  %s7061_s18 = int_to_ptr.vmem [resolvable:$true] %s116_s18 }
  0x25   :  { %s6586_s21 = scalar_lea.hbm %s8358_s6, 96 }
  0x26   :  { %p6587_p11 = scmp.ne.s32.totalorder %s8358_s6, %s6586_s21  ;;  %p6590_p12 = scmp.lt.u32.totalorder %s6586_s21, %s8358_s6 }
  0x28   :  { %p6592_p13 = pnand %p6590_p12, %p6587_p11 }
  0x2a   :  { %6595 = shalt.err (!%p6592_p13)
}
  0x2b   :  { %s6596_s4 = scalar_lea.vmem %s98_s30, 96  ;;  %p6601_p1 = scmp.lt.s32.totalorder %s98_s30, %s98_s30 }
  0x2c   :  { %p6597_p0 = scmp.ne.s32.totalorder %s98_s30, %s6596_s4  ;;  %p6602_p2 = scmp.lt.s32.totalorder %s6596_s4, %s6596_s4 }
  0x2e   :  { %p6603_p3 = por %p6602_p2, %p6601_p1 }
  0x30   :  { %p6604_p4 = pnand %p6603_p3, %p6597_p0 }
  0x32   :  { %6607 = shalt.err (!%p6604_p4)
}
  0x33   :  { %100 = dma.hbm_to_vmem [thread:$0]  %s8358_s6, 96, %s98_s30, [#allocation14]  }
  0x34   :  { %s6608_s0 = scalar_lea.hbm %s8360_s8, 11264 }
  0x35   :  { %p6609_p5 = scmp.ne.s32.totalorder %s8360_s8, %s6608_s0  ;;  %p6612_p6 = scmp.lt.u32.totalorder %s6608_s0, %s8360_s8 }
  0x37   :  { %p6614_p7 = pnand %p6612_p6, %p6609_p5 }
  0x39   :  { %6617 = shalt.err (!%p6614_p7)
}
  0x3a   :  { %s6618_s24 = scalar_lea.vmem %s7061_s18, 11264  ;;  %p6623_p9 = scmp.lt.s32.totalorder %s7061_s18, %s7061_s18 }
  0x3b   :  { %p6619_p8 = scmp.ne.s32.totalorder %s7061_s18, %s6618_s24  ;;  %p6624_p10 = scmp.lt.s32.totalorder %s6618_s24, %s6618_s24 }
  0x3d   :  { %p6625_p11 = por %p6624_p10, %p6623_p9 }
  0x3f   :  { %p6626_p12 = pnand %p6625_p11, %p6619_p8 }
  0x41   :  { %6629 = shalt.err (!%p6626_p12)
}
  0x42   :  { %s6918_s6 = smov 128   ;;  %s6919_s30 = smov 8  }
  0x43   :  { %122 = dma.hbm_to_vmem [thread:$0]  %s8360_s8, 11264, %s7061_s18, [#allocation17], %s6918_s6, %s6918_s6, %s6919_s30  }
  0x44   :  { %s6920_s4 = smov [#allocation19]   ;;  %s6921_s27 = smov [#allocation22]  }
  0x45   :  { %s140_s17 = sshll.u32 %s6920_s4, 4  ;;  %s163_s28 = sshll.u32 %s6921_s27, 4  ;;  %s141_s17 = int_to_ptr.vmem [resolvable:$true] %s140_s17  ;;  %s164_s28 = int_to_ptr.vmem [resolvable:$true] %s163_s28 }
  0x46   :  { %s6630_s19 = scalar_lea.hbm %s8362_s10, 11264 }
  0x47   :  { %p6631_p13 = scmp.ne.s32.totalorder %s8362_s10, %s6630_s19  ;;  %p6634_p0 = scmp.lt.u32.totalorder %s6630_s19, %s8362_s10 }
  0x49   :  { %p6636_p1 = pnand %p6634_p0, %p6631_p13 }
  0x4b   :  { %6639 = shalt.err (!%p6636_p1)
}
  0x4c   :  { %s6640_s8 = scalar_lea.vmem %s141_s17, 11264  ;;  %p6645_p3 = scmp.lt.s32.totalorder %s141_s17, %s141_s17 }
  0x4d   :  { %p6641_p2 = scmp.ne.s32.totalorder %s141_s17, %s6640_s8  ;;  %p6646_p4 = scmp.lt.s32.totalorder %s6640_s8, %s6640_s8 }
  0x4f   :  { %p6647_p5 = por %p6646_p4, %p6645_p3 }
  0x51   :  { %p6648_p6 = pnand %p6647_p5, %p6641_p2 }
  0x53   :  { %6651 = shalt.err (!%p6648_p6)
}
  0x54   :  { %146 = dma.hbm_to_vmem [thread:$0]  %s8362_s10, 11264, %s141_s17, [#allocation20], %s6918_s6, %s6918_s6, %s6919_s30  }
  0x55   :  { %s6652_s27 = scalar_lea.hbm %s8364_s12, 16 }
  0x56   :  { %p6653_p7 = scmp.ne.s32.totalorder %s8364_s12, %s6652_s27  ;;  %p6656_p8 = scmp.lt.u32.totalorder %s6652_s27, %s8364_s12 }
  0x58   :  { %p6658_p9 = pnand %p6656_p8, %p6653_p7 }
  0x5a   :  { %6661 = shalt.err (!%p6658_p9)
}
  0x5b   :  { %s6662_s21 = scalar_lea.vmem %s164_s28, 16  ;;  %s6666_s22 = scalar_lea.vmem %s164_s28, 32 }
  0x5c   :  { %p6663_p10 = scmp.ne.s32.totalorder %s164_s28, %s6662_s21  ;;  %p6667_p11 = scmp.lt.s32.totalorder %s164_s28, %s164_s28 }
  0x5d   :  { %p6668_p12 = scmp.lt.s32.totalorder %s6666_s22, %s6662_s21 }
  0x5f   :  { %p6669_p13 = por %p6668_p12, %p6667_p11 }
  0x61   :  { %p6670_p0 = pnand %p6669_p13, %p6663_p10 }
  0x63   :  { %6673 = shalt.err (!%p6670_p0)
}
  0x64   :  { %166 = dma.hbm_to_vmem [thread:$0]  %s8364_s12, 16, %s164_s28, [#allocation23]  }
  0x65   :  { %s6922_s24 = smov [#allocation25]   ;;  %s6923_s18 = smov [#allocation2]  }
  0x66   :  { %s182_s8 = sshll.u32 %s6922_s24, 4  ;;  %s36_s23 = sshll.u32 %s6923_s18, 4  ;;  %s183_s8 = int_to_ptr.vmem [resolvable:$true] %s182_s8  ;;  %s7122_s23 = int_to_ptr.vmem [resolvable:$true] %s36_s23 }
  0x67   :  { %s6674_s27 = scalar_lea.hbm %s8366_s14, 2048 }
  0x68   :  { %p6675_p1 = scmp.ne.s32.totalorder %s8366_s14, %s6674_s27  ;;  %p6678_p2 = scmp.lt.u32.totalorder %s6674_s27, %s8366_s14 }
  0x6a   :  { %p6680_p3 = pnand %p6678_p2, %p6675_p1 }
  0x6c   :  { %6683 = shalt.err (!%p6680_p3)
}
  0x6d   :  { %s6684_s12 = scalar_lea.vmem %s183_s8, 2048  ;;  %p6689_p5 = scmp.lt.s32.totalorder %s183_s8, %s183_s8 }
  0x6e   :  { %p6685_p4 = scmp.ne.s32.totalorder %s183_s8, %s6684_s12  ;;  %p6690_p6 = scmp.lt.s32.totalorder %s6684_s12, %s6684_s12 }
  0x70   :  { %p6691_p7 = por %p6690_p6, %p6689_p5 }
  0x72   :  { %p6692_p8 = pnand %p6691_p7, %p6685_p4 }
  0x74   :  { %6695 = shalt.err (!%p6692_p8)
}
  0x75   :  { %188 = dma.hbm_to_vmem [thread:$0]  %s8366_s14, 2048, %s183_s8, [#allocation26], %s6918_s6, %s6918_s6, %s6919_s30  }
  0x76   :  { %s8384_s17 = sld [smem:[#allocation47_spill]] }
  0x7c   :  { %s6696_s24 = scalar_lea.hbm %s8384_s17, 128 }
  0x7d   :  { %p6697_p9 = scmp.ne.s32.totalorder %s8384_s17, %s6696_s24  ;;  %p6700_p10 = scmp.lt.u32.totalorder %s6696_s24, %s8384_s17 }
  0x7f   :  { %p6702_p11 = pnand %p6700_p10, %p6697_p9 }
  0x81   :  { %6705 = shalt.err (!%p6702_p11)
}
  0x82   :  { %s6706_s29 = scalar_lea.vmem %s7122_s23, 128  ;;  %p6711_p13 = scmp.lt.s32.totalorder %s7122_s23, %s7122_s23 }
  0x83   :  { %p6707_p12 = scmp.ne.s32.totalorder %s7122_s23, %s6706_s29  ;;  %p6712_p0 = scmp.lt.s32.totalorder %s6706_s29, %s6706_s29 }
  0x85   :  { %p6713_p1 = por %p6712_p0, %p6711_p13 }
  0x87   :  { %p6714_p2 = pnand %p6713_p1, %p6707_p12 }
  0x89   :  { %6717 = shalt.err (!%p6714_p2)
}
  0x8a   :  { %s6924_s14 = smov 32   ;;  %s6925_s6 = smov 2  }
  0x8b   :  { %42 = dma.hbm_to_vmem [thread:$0]  %s8384_s17, 128, %s7122_s23, [#allocation3], %s6924_s14, %s6924_s14, %s6925_s6  }
  0x8c   :  { %s6718_s12 = scalar_lea.hbm %s8353_s1, 16 }
  0x8d   :  { %p6719_p3 = scmp.ne.s32.totalorder %s8353_s1, %s6718_s12  ;;  %p6722_p4 = scmp.lt.u32.totalorder %s6718_s12, %s8353_s1 }
  0x8f   :  { %p6724_p5 = pnand %p6722_p4, %p6719_p3 }
  0x91   :  { %6727 = shalt.err (!%p6724_p5)
}
  0x92   :  { %s6926_s24 = smov [#allocation6]   ;;  %s6728_s4 = scalar_lea.hbm %s8355_s3, 16 }
  0x93   :  { %50 = dma.hbm_to_smem %s8353_s1, 16, %s6926_s24, [#allocation5]  }
  0x94   :  { %p6729_p6 = scmp.ne.s32.totalorder %s8355_s3, %s6728_s4  ;;  %p6732_p7 = scmp.lt.u32.totalorder %s6728_s4, %s8355_s3 }
  0x96   :  { %p6734_p8 = pnand %p6732_p7, %p6729_p6 }
  0x98   :  { %6737 = shalt.err (!%p6734_p8)
}
  0x99   :  { %s6927_s8 = smov [#allocation9]   ;;  %s6928_s1 = smov [#allocation12]  }
  0x9a   :  { %66 = dma.hbm_to_smem %s8355_s3, 16, %s6927_s8, [#allocation8]  }
  0x9b   :  { %s84_s20 = sshll.u32 %s6928_s1, 4  ;;  %s6929_s12 = smov [#allocation15]   ;;  %s85_s20 = int_to_ptr.vmem [resolvable:$true] %s84_s20 }
  0x9c   :  { %s107_s28 = sshll.u32 %s6929_s12, 4  ;;  %s6738_s10 = scalar_lea.hbm %s8357_s5, 50688  ;;  %s108_s28 = int_to_ptr.vmem [resolvable:$true] %s107_s28 }
  0x9d   :  { %p6739_p9 = scmp.ne.s32.totalorder %s8357_s5, %s6738_s10  ;;  %p6742_p10 = scmp.lt.u32.totalorder %s6738_s10, %s8357_s5 }
  0x9f   :  { %p6744_p11 = pnand %p6742_p10, %p6739_p9 }
  0xa1   :  { %6747 = shalt.err (!%p6744_p11)
}
  0xa2   :  { %s6748_s3 = scalar_lea.vmem %s85_s20, 50688  ;;  %p6753_p13 = scmp.lt.s32.totalorder %s85_s20, %s85_s20 }
  0xa3   :  { %p6749_p12 = scmp.ne.s32.totalorder %s85_s20, %s6748_s3  ;;  %p6754_p0 = scmp.lt.s32.totalorder %s6748_s3, %s6748_s3 }
  0xa5   :  { %p6755_p1 = por %p6754_p0, %p6753_p13 }
  0xa7   :  { %p6756_p2 = pnand %p6755_p1, %p6749_p12 }
  0xa9   :  { %6759 = shalt.err (!%p6756_p2)
}
  0xaa   :  { %90 = dma.hbm_to_vmem [thread:$0]  %s8357_s5, 50688, %s85_s20, [#allocation11], %s6914_s2, %s6914_s2, %s6915_s26  }
  0xab   :  { %s6760_s14 = scalar_lea.hbm %s8359_s7, 16 }
  0xac   :  { %p6761_p3 = scmp.ne.s32.totalorder %s8359_s7, %s6760_s14  ;;  %p6764_p4 = scmp.lt.u32.totalorder %s6760_s14, %s8359_s7 }
  0xae   :  { %p6766_p5 = pnand %p6764_p4, %p6761_p3 }
  0xb0   :  { %6769 = shalt.err (!%p6766_p5)
}
  0xb1   :  { %s6770_s1 = scalar_lea.vmem %s108_s28, 16  ;;  %s6774_s12 = scalar_lea.vmem %s108_s28, 32 }
  0xb2   :  { %p6771_p6 = scmp.ne.s32.totalorder %s108_s28, %s6770_s1  ;;  %p6775_p7 = scmp.lt.s32.totalorder %s108_s28, %s108_s28 }
  0xb3   :  { %p6776_p8 = scmp.lt.s32.totalorder %s6774_s12, %s6770_s1 }
  0xb5   :  { %p6777_p9 = por %p6776_p8, %p6775_p7 }
  0xb7   :  { %p6778_p10 = pnand %p6777_p9, %p6771_p6 }
  0xb9   :  { %6781 = shalt.err (!%p6778_p10)
}
  0xba   :  { %110 = dma.hbm_to_vmem [thread:$0]  %s8359_s7, 16, %s108_s28, [#allocation14]  }
  0xbb   :  { %s6930_s21 = smov [#allocation18]   ;;  %s6931_s10 = smov [#allocation21]  }
  0xbc   :  { %s128_s22 = sshll.u32 %s6930_s21, 4  ;;  %s153_s24 = sshll.u32 %s6931_s10, 4  ;;  %s129_s22 = int_to_ptr.vmem [resolvable:$true] %s128_s22  ;;  %s154_s24 = int_to_ptr.vmem [resolvable:$true] %s153_s24 }
  0xbd   :  { %s6782_s23 = scalar_lea.hbm %s8361_s9, 1536 }
  0xbe   :  { %p6783_p11 = scmp.ne.s32.totalorder %s8361_s9, %s6782_s23  ;;  %p6786_p12 = scmp.lt.u32.totalorder %s6782_s23, %s8361_s9 }
  0xc0   :  { %p6788_p13 = pnand %p6786_p12, %p6783_p11 }
  0xc2   :  { %6791 = shalt.err (!%p6788_p13)
}
  0xc3   :  { %s6792_s7 = scalar_lea.vmem %s129_s22, 1536  ;;  %p6797_p1 = scmp.lt.s32.totalorder %s129_s22, %s129_s22 }
  0xc4   :  { %p6793_p0 = scmp.ne.s32.totalorder %s129_s22, %s6792_s7  ;;  %p6798_p2 = scmp.lt.s32.totalorder %s6792_s7, %s6792_s7 }
  0xc6   :  { %p6799_p3 = por %p6798_p2, %p6797_p1 }
  0xc8   :  { %p6800_p4 = pnand %p6799_p3, %p6793_p0 }
  0xca   :  { %6803 = shalt.err (!%p6800_p4)
}
  0xcb   :  { %134 = dma.hbm_to_vmem [thread:$0]  %s8361_s9, 1536, %s129_s22, [#allocation17], %s6914_s2, %s6914_s2, %s6915_s26  }
  0xcc   :  { %s6804_s8 = scalar_lea.hbm %s8363_s11, 16 }
  0xcd   :  { %p6805_p5 = scmp.ne.s32.totalorder %s8363_s11, %s6804_s8  ;;  %p6808_p6 = scmp.lt.u32.totalorder %s6804_s8, %s8363_s11 }
  0xcf   :  { %p6810_p7 = pnand %p6808_p6, %p6805_p5 }
  0xd1   :  { %6813 = shalt.err (!%p6810_p7)
}
  0xd2   :  { %s6814_s5 = scalar_lea.vmem %s154_s24, 16  ;;  %s6818_s20 = scalar_lea.vmem %s154_s24, 32 }
  0xd3   :  { %p6815_p8 = scmp.ne.s32.totalorder %s154_s24, %s6814_s5  ;;  %p6819_p9 = scmp.lt.s32.totalorder %s154_s24, %s154_s24 }
  0xd4   :  { %p6820_p10 = scmp.lt.s32.totalorder %s6818_s20, %s6814_s5 }
  0xd6   :  { %p6821_p11 = por %p6820_p10, %p6819_p9 }
  0xd8   :  { %p6822_p12 = pnand %p6821_p11, %p6815_p8 }
  0xda   :  { %6825 = shalt.err (!%p6822_p12)
}
  0xdb   :  { %156 = dma.hbm_to_vmem [thread:$0]  %s8363_s11, 16, %s154_s24, [#allocation20]  }
  0xdc   :  { %s6932_s21 = smov [#allocation24]   ;;  %s6933_s10 = smov [#allocation27]  }
  0xdd   :  { %s173_s22 = sshll.u32 %s6932_s21, 4  ;;  %s195_s18 = sshll.u32 %s6933_s10, 4  ;;  %s174_s22 = int_to_ptr.vmem [resolvable:$true] %s173_s22  ;;  %s196_s18 = int_to_ptr.vmem [resolvable:$true] %s195_s18 }
  0xde   :  { %s6826_s3 = scalar_lea.hbm %s8365_s13, 16 }
  0xdf   :  { %p6827_p13 = scmp.ne.s32.totalorder %s8365_s13, %s6826_s3  ;;  %p6830_p0 = scmp.lt.u32.totalorder %s6826_s3, %s8365_s13 }
  0xe1   :  { %p6832_p1 = pnand %p6830_p0, %p6827_p13 }
  0xe3   :  { %6835 = shalt.err (!%p6832_p1)
}
  0xe4   :  { %s6836_s11 = scalar_lea.vmem %s174_s22, 16  ;;  %s6840_s24 = scalar_lea.vmem %s174_s22, 32 }
  0xe5   :  { %p6837_p2 = scmp.ne.s32.totalorder %s174_s22, %s6836_s11  ;;  %p6841_p3 = scmp.lt.s32.totalorder %s174_s22, %s174_s22 }
  0xe6   :  { %p6842_p4 = scmp.lt.s32.totalorder %s6840_s24, %s6836_s11 }
  0xe8   :  { %p6843_p5 = por %p6842_p4, %p6841_p3 }
  0xea   :  { %p6844_p6 = pnand %p6843_p5, %p6837_p2 }
  0xec   :  { %6847 = shalt.err (!%p6844_p6)
}
  0xed   :  { %176 = dma.hbm_to_vmem [thread:$0]  %s8365_s13, 16, %s174_s22, [#allocation23]  }
  0xee   :  { %s6848_s8 = scalar_lea.hbm %s8367_s15, 16 }
  0xef   :  { %p6849_p7 = scmp.ne.s32.totalorder %s8367_s15, %s6848_s8  ;;  %p6852_p8 = scmp.lt.u32.totalorder %s6848_s8, %s8367_s15 }
  0xf1   :  { %p6854_p9 = pnand %p6852_p8, %p6849_p7 }
  0xf3   :  { %6857 = shalt.err (!%p6854_p9)
}
  0xf4   :  { %s6858_s5 = scalar_lea.vmem %s196_s18, 16  ;;  %s6862_s20 = scalar_lea.vmem %s196_s18, 32 }
  0xf5   :  { %p6859_p10 = scmp.ne.s32.totalorder %s196_s18, %s6858_s5  ;;  %p6863_p11 = scmp.lt.s32.totalorder %s196_s18, %s196_s18 }
  0xf6   :  { %p6864_p12 = scmp.lt.s32.totalorder %s6862_s20, %s6858_s5 }
  0xf8   :  { %p6865_p13 = por %p6864_p12, %p6863_p11 }
  0xfa   :  { %p6866_p0 = pnand %p6865_p13, %p6859_p10 }
  0xfc   :  { %6869 = shalt.err (!%p6866_p0)
}
  0xfd   :  { %198 = dma.hbm_to_vmem [thread:$0]  %s8367_s15, 16, %s196_s18, [#allocation26]  }
  0xfe   :  { %6892 = dma.done.wait [#allocation3], 128  }
  0xff   :  { %6893 = vsyncadd [#allocation3], 4294967168 }
 0x100   :  { %6894 = dma.done.wait [#allocation5], 16  }
 0x101   :  { %6895 = vsyncadd [#allocation5], 4294967280 }
 0x102   :  { %6896 = dma.done.wait [#allocation8], 32  }
 0x103   :  { %6897 = vsyncadd [#allocation8], 4294967264 }
 0x104   :  { %6898 = dma.done.wait [#allocation11], 101376  }
 0x105   :  { %6899 = vsyncadd [#allocation11], 4294865920 }
 0x106   :  { %6900 = dma.done.wait [#allocation14], 112  }
 0x107   :  { %6901 = vsyncadd [#allocation14], 4294967184 }
 0x108   :  { %6902 = dma.done.wait [#allocation17], 12800  }
 0x109   :  { %6903 = vsyncadd [#allocation17], 4294954496 }
 0x10a   :  { %6904 = dma.done.wait [#allocation20], 11280  }
 0x10b   :  { %6905 = vsyncadd [#allocation20], 4294956016 }
 0x10c   :  { %6906 = dma.done.wait [#allocation23], 32  }
 0x10d   :  { %6907 = vsyncadd [#allocation23], 4294967264 }
 0x10e   :  { %6908 = dma.done.wait [#allocation26], 2064  }
 0x10f   :  { %6909 = vsyncadd [#allocation26], 4294965232 }
 0x110   :  { %247 = sfence }
 0x111   :  { %s5005_s15 = sld [smem:[#allocation6 + $0x15]]  ;;  %s4993_s2 = sld [smem:[#allocation6 + $0xb]]  ;;  %v7258_v0 = vld [vmem:[#allocation2] sm:$0x3]  ;;  %v7288_v13 = vld [vmem:[#allocation2 + $0x2] sm:$0x3] }
 0x112   :  { %s4999_s21 = sld [smem:[#allocation6 + $0x10]]  ;;  %s4994_s22 = sld [smem:[#allocation6 + $0xc]]  ;;  %v7318_v27 = vld [vmem:[#allocation2 + $0x4] sm:$0x3]  ;;  %v7323_v30 = vld [vmem:[#allocation2 + $0x6] sm:$0x3] }
 0x113   :  { %s5000_s10 = sld [smem:[#allocation6 + $0x11]]  ;;  %s4987_s18 = sld [smem:[#allocation6 + $0x6]]  ;;  %vm843_vm0 = vcmask 353280   ;;  %vm855_vm1 = vcmask 345088   ;;  %vm847_vm2 = vcmask 1041408   ;;  %vm1225_vm3 = vcmask 31744  }
 0x114   :  { %s6934_s25 = smov 127   ;;  %s5006_s23 = sld [smem:[#allocation6 + $0x16]]  ;;  %vm1221_vm4 = vcmask 359424   ;;  %vm1227_vm5 = vcmask 392192   ;;  %vm1229_vm6 = vcmask 752640   ;;  %vm1223_vm7 = vcmask 719872  }
 0x115   :  { %s5011_s3 = sld [smem:[#allocation6 + $0x1a]]  ;;  %s4995_s17 = sld [smem:[#allocation6 + $0xd]]  ;;  %vm1237_vm8 = vcmask 72704   ;;  %vm1239_vm9 = vcmask 424960   ;;  %vm1241_vm10 = vcmask 777216   ;;  %vm1231_vm11 = vcmask 64512  }
 0x116   :  { %s4988_s4 = sld [smem:[#allocation6 + $0x7]]  ;;  %s5001_s27 = sld [smem:[#allocation6 + $0x12]]  ;;  %vm1233_vm12 = vcmask 416768   ;;  %vm6944_vm13 = vmmov 1   ;;  %vm1235_vm15 = vcmask 769024  }
 0x117   :  { %v7260_v1 = vstv %s5005_s15  ;;  %v7264_v3 = vstv %s4993_s2  ;;  %s4992_s7 = sld [smem:[#allocation6 + $0xa]]  ;;  %s4998_s11 = sld [smem:[#allocation6 + $0xf]]  ;;  %vm7883_vm14 = vmpackc.low %vm847_vm2, %vm6944_vm13 }
 0x118   :  { %v778_v2 = vmul.f32 %v7260_v1, %v7258_v0  ;;  %v7266_v4 = vstv %s4999_s21  ;;  %v724_v5 = vmul.f32 %v7264_v3, %v7258_v0  ;;  %v7270_v6 = vstv %s4994_s22  ;;  %s5004_s24 = sld [smem:[#allocation6 + $0x14]]  ;;  %s5012_s28 = sld [smem:[#allocation6 + $0x1b]] }
 0x119   :  { %v580_v7 = vmul.f32 %v7270_v6, %v7258_v0  ;;  %v751_v8 = vmul.f32 %v7266_v4, %v7258_v0  ;;  %v7278_v9 = vstv %s4987_s18  ;;  %v7280_v10 = vstv %s5000_s10  ;;  %s5007_s29 = sld [smem:[#allocation6 + $0x17]]  ;;  %s4986_s14 = sld [smem:[#allocation6 + $0x5]] }
 0x11a   :  { %780 = vrot.lane.b32.xlu1 %v778_v2, %s6934_s25  ;;  %726 = vrot.lane.b32.xlu0 %v724_v5, %s6934_s25  ;;  %v697_v11 = vmul.f32 %v7278_v9, %v7258_v0  ;;  %v603_v12 = vmul.f32 %v7280_v10, %v7258_v0  ;;  %v757_v14 = vmul.f32 %v7280_v10, %v7288_v13  ;;  %v7296_v16 = vstv %s5006_s23  ;;  %s5002_s6 = sld [smem:[#allocation6 + $0x13]]  ;;  %s4996_s8 = sld [smem:[#allocation6 + $0xe]] }
 0x11b   :  { %v730_v15 = vmul.f32 %v7270_v6, %v7288_v13  ;;  %v7298_v17 = vstv %s5011_s3  ;;  %v626_v18 = vmul.f32 %v7296_v16, %v7258_v0  ;;  %v321_v20 = vstv %s4995_s17  ;;  %s4989_s0 = sld [smem:[#allocation6 + $0x8]]  ;;  %s5013_s19 = sld [smem:[#allocation6 + $0x1c]] }
 0x11c   :  { %v805_v19 = vmul.f32 %v7298_v17, %v7258_v0  ;;  %v460_v21 = vmul.f32 %v321_v20, %v7258_v0  ;;  %v784_v22 = vmul.f32 %v7296_v16, %v7288_v13  ;;  %v7311_v23 = vstv %s4988_s4  ;;  %s5008_s1 = sld [smem:[#allocation6 + $0x18]]  ;;  %s5014_s12 = sld [smem:[#allocation6 + $0x1d]] }
 0x11d   :  { %v348_v24 = vstv %s5001_s27  ;;  %v557_v25 = vmul.f32 %v7311_v23, %v7258_v0  ;;  %v7320_v28 = vstv %s4992_s7  ;;  %v7325_v31 = vstv %s4998_s11  ;;  %s4990_s5 = sld [smem:[#allocation6 + $0x9]]  ;;  %s4983_s20 = sld [smem:[#allocation6 + $0x2]] }
 0x11e   :  { %582 = vrot.lane.b32.xlu1 %v580_v7, %s6934_s25  ;;  %753 = vrot.lane.b32.xlu0 %v751_v8, %s6934_s25  ;;  %v479_v26 = vmul.f32 %v348_v24, %v7258_v0  ;;  %v609_v29 = vmul.f32 %v348_v24, %v7288_v13  ;;  %v455_v32 = vmul.f32 %v7320_v28, %v7288_v13  ;;  %v7342_v39 = vstv %s5004_s24  ;;  %s4982_s13 = sld [smem:[#allocation6 + $0x1]]  ;;  %s4984_s9 = sld [smem:[#allocation6 + $0x3]] }
 0x11f   :  { %v456_v33 = vmul.f32 %v7264_v3, %v7318_v27  ;;  %v458_v34 = vmul.f32 %v7270_v6, %v7323_v30  ;;  %v474_v35 = vmul.f32 %v7325_v31, %v7288_v13  ;;  %v475_v36 = vmul.f32 %v7266_v4, %v7318_v27  ;;  %s4985_s15 = sld [smem:[#allocation6 + $0x4]]  ;;  %s4997_s2 = sld [smem:[#allocation7 + $0x2]] }
 0x120   :  { %v477_v37 = vmul.f32 %v7280_v10, %v7323_v30  ;;  %v586_v38 = vmul.f32 %v321_v20, %v7288_v13  ;;  %v7344_v41 = vstv %s5012_s28  ;;  %v493_v43 = vmul.f32 %v7342_v39, %v7288_v13  ;;  %s5003_s21 = sld [smem:[#allocation7 + $0x3]]  ;;  %s5010_s22 = sld [smem:[#allocation6 + $0x19]] }
 0x121   :  { %v457_v40 = vadd.f32 %v456_v33, %v455_v32  ;;  %v476_v42 = vadd.f32 %v475_v36, %v474_v35  ;;  %v494_v45 = vmul.f32 %v7260_v1, %v7318_v27  ;;  %v703_v46 = vmul.f32 %v7311_v23, %v7288_v13  ;;  %s5009_s10 = sld [smem:[#allocation7 + $0x4]]  ;;  %s7635_s18 = sld [smem:[#allocation7 + $0x5]] }
 0x122   :  { %699 = vrot.lane.b32.xlu1 %v697_v11, %s6934_s25  ;;  %605 = vrot.lane.b32.xlu0 %v603_v12, %s6934_s25  ;;  %v496_v48 = vmul.f32 %v7296_v16, %v7323_v30  ;;  %v314_v49 = vmul.f32 %v7264_v3, %v7288_v13  ;;  %v649_v50 = vmul.f32 %v7344_v41, %v7258_v0  ;;  %v375_v61 = vstv %s5007_s29  ;;  %s7653_s23 = sld [smem:[#allocation6]]  ;;  %s7812_s17 = sld [smem:[#allocation9 + $0x2]] }
 0x123   :  { %v7348_v44 = vadd.f32 %v458_v34, %v457_v40  ;;  %v7355_v47 = vadd.f32 %v477_v37, %v476_v42  ;;  %v495_v51 = vadd.f32 %v494_v45, %v493_v43  ;;  %v311_v52 = vmul.f32 %v7320_v28, %v7258_v0  ;;  %s278_s3 = sld [smem:[#allocation7]]  ;;  %s7814_s4 = sld [smem:[#allocation9 + $0x3]] }
 0x124   :  { %v318_v53 = vmul.f32 %v7270_v6, %v7318_v27  ;;  %v736_v54 = vmul.f32 %v321_v20, %v7318_v27  ;;  %v763_v57 = vmul.f32 %v348_v24, %v7318_v27  ;;  %v341_v58 = vmul.f32 %v7266_v4, %v7288_v13  ;;  %s7824_s27 = sld [smem:[#allocation9 + $0x4]]  ;;  %s6935_s7 = smov 88  }
 0x125   :  { %v7369_v55 = vadd.f32 %v496_v48, %v495_v51  ;;  %v315_v56 = vadd.f32 %v314_v49, %v311_v52  ;;  %v345_v59 = vmul.f32 %v7280_v10, %v7318_v27  ;;  %v338_v60 = vmul.f32 %v7325_v31, %v7258_v0  ;;  %s6936_s11 = smov 4   ;;  %s7838_s24 = sld [smem:[#allocation9 + $0x1]] }
 0x126   :  { %759 = vrot.lane.b32.xlu1 %v757_v14, %s6934_s25  ;;  %732 = vrot.lane.b32.xlu0 %v730_v15, %s6934_s25  ;;  %v7380_v62 = vstv %s4986_s14  ;;  %v322_v63 = vmul.f32 %v321_v20, %v7323_v30  ;;  %v349_v5 = vmul.f32 %v348_v24, %v7323_v30  ;;  %v437_v8 = vmul.f32 %v7278_v9, %v7318_v27  ;;  %s6937_s28 = smov 44   ;;  %s6938_s29 = smov 94  }
 0x127   :  { %v319_v2 = vadd.f32 %v318_v53, %v315_v56  ;;  %v342_v6 = vadd.f32 %v341_v58, %v338_v60  ;;  %v436_v7 = vmul.f32 %v7380_v62, %v7288_v13  ;;  %v498_v11 = vmul.f32 %v375_v61, %v7258_v0  ;;  %s6939_s14 = smov 92  }
 0x128   :  { %v439_v15 = vmul.f32 %v7311_v23, %v7323_v30  ;;  %v352_v24 = vstv %s5002_s6  ;;  %v294_v32 = vstv %s4989_s0  ;;  %v7413_v35 = vstv %s5013_s19  ;;  %s897_s6 = sld [smem:[#allocation9]]  ;;  %s6941_s0 = smov 52  }
 0x129   :  { %v7388_v10 = vadd.f32 %v322_v63, %v319_v2  ;;  %v346_v12 = vadd.f32 %v345_v59, %v342_v6  ;;  %v438_v14 = vadd.f32 %v437_v8, %v436_v7  ;;  %v441_v34 = vmul.f32 %v294_v32, %v7258_v0  ;;  %s6942_s19 = smov 95  }
 0x12a   :  { %628 = vrot.lane.b32.xlu1 %v626_v18, %s6934_s25  ;;  %807 = vrot.lane.b32.xlu0 %v805_v19, %s6934_s25  ;;  %v811_v18 = vmul.f32 %v7344_v41, %v7288_v13  ;;  %v517_v36 = vmul.f32 %v7413_v35, %v7258_v0  ;;  %v485_v37 = vmul.f32 %v352_v24, %v7288_v13  ;;  %v379_v2 = vstv %s5008_s1  ;;  %s6943_s1 = smov 51  }
 0x12b   :  { %v7397_v19 = vadd.f32 %v349_v5, %v346_v12  ;;  %v7399_v20 = vadd.f32 %v439_v15, %v438_v14  ;;  %v365_v40 = vmul.f32 %v7342_v39, %v7258_v0  ;;  %v368_v42 = vmul.f32 %v7260_v1, %v7288_v13 }
 0x12c   :  { %v563_v43 = vmul.f32 %v294_v32, %v7288_v13  ;;  %v655_v48 = vmul.f32 %v7413_v35, %v7288_v13  ;;  %v615_v51 = vmul.f32 %v352_v24, %v7318_v27  ;;  %v709_v56 = vmul.f32 %v294_v32, %v7318_v27 }
 0x12d   :  { %v369_v45 = vadd.f32 %v368_v42, %v365_v40  ;;  %v817_v59 = vmul.f32 %v7413_v35, %v7318_v27  ;;  %v295_v60 = vmul.f32 %v294_v32, %v7323_v30  ;;  %v769_v63 = vmul.f32 %v352_v24, %v7323_v30 }
 0x12e   :  { %462 = vrot.lane.b32.xlu1 %v460_v21, %s6934_s25  ;;  %786 = vrot.lane.b32.xlu0 %v784_v22, %s6934_s25  ;;  %v790_v21 = vmul.f32 %v375_v61, %v7318_v27  ;;  %v632_v22 = vmul.f32 %v375_v61, %v7288_v13  ;;  %v380_v6 = vmul.f32 %v379_v2, %v7258_v0  ;;  %v298_v12 = vstv %s4990_s5 }
 0x12f   :  { %v796_v7 = vmul.f32 %v379_v2, %v7323_v30  ;;  %v638_v8 = vmul.f32 %v379_v2, %v7318_v27  ;;  %v299_v15 = vmul.f32 %v298_v12, %v7258_v0  ;;  %v7482_v32 = vstv %s4982_s13 }
 0x132   :  { %559 = vrot.lane.b32.xlu1 %v557_v25, %s6934_s25  ;;  %481 = vrot.lane.b32.xlu0 %v479_v26, %s6934_s25  ;;  %v325_v25 = vstv %s4996_s8  ;;  %v353_v26 = vmul.f32 %v352_v24, %v7258_v0  ;;  %v569_v24 = vmul.f32 %v298_v12, %v7318_v27  ;;  %s6940_s8 = smov 9  }
 0x133   :  { %v466_v33 = vmul.f32 %v325_v25, %v7288_v13  ;;  %v742_v53 = vmul.f32 %v325_v25, %v7323_v30 }
 0x136   :  { %611 = vrot.lane.b32.xlu1 %v609_v29, %s6934_s25  ;;  %588 = vrot.lane.b32.xlu0 %v586_v38, %s6934_s25  ;;  %v326_v29 = vmul.f32 %v325_v25, %v7258_v0  ;;  %v592_v38 = vmul.f32 %v325_v25, %v7318_v27 }
 0x13a   :  { %705 = vrot.lane.b32.xlu1 %v703_v46, %s6934_s25  ;;  %651 = vrot.lane.b32.xlu0 %v649_v50, %s6934_s25  ;;  %v372_v46 = vmul.f32 %v7296_v16, %v7318_v27  ;;  %v376_v50 = vmul.f32 %v375_v61, %v7323_v30  ;;  %v287_v16 = vmul.f32 %v7278_v9, %v7288_v13 }
 0x13c   :  { %v373_v49 = vadd.f32 %v372_v46, %v369_v45 }
 0x13e   :  { %765 = vrot.lane.b32.xlu1 %v763_v57, %s6934_s25  ;;  %738 = vrot.lane.b32.xlu0 %v736_v54, %s6934_s25  ;;  %v7436_v52 = vadd.f32 %v376_v50, %v373_v49  ;;  %v284_v54 = vmul.f32 %v7380_v62, %v7258_v0  ;;  %v291_v57 = vmul.f32 %v7311_v23, %v7318_v27 }
 0x13f   :  { %v504_v23 = vmul.f32 %v379_v2, %v7288_v13 }
 0x140   :  { %v288_v58 = vadd.f32 %v287_v16, %v284_v54 }
 0x142   :  { %500 = vrot.lane.b32.xlu1 %v498_v11, %s6934_s25  ;;  %813 = vrot.lane.b32.xlu0 %v811_v18, %s6934_s25  ;;  %v292_v61 = vadd.f32 %v291_v57, %v288_v58  ;;  %v406_v11 = vstv %s5014_s12 }
 0x143   :  { %v407_v14 = vmul.f32 %v406_v11, %v7258_v0  ;;  %v523_v18 = vmul.f32 %v406_v11, %v7288_v13  ;;  %v823_v25 = vmul.f32 %v406_v11, %v7323_v30 }
 0x144   :  { %v7454_v5 = vadd.f32 %v295_v60, %v292_v61  ;;  %v554_v61 = vmul.f32 %v7380_v62, %v7318_v27 }
 0x146   :  { %792 = vrot.lane.b32.xlu1 %v790_v21, %s6934_s25  ;;  %634 = vrot.lane.b32.xlu0 %v632_v22, %s6934_s25  ;;  %v447_v21 = vmul.f32 %v298_v12, %v7288_v13  ;;  %v661_v22 = vmul.f32 %v406_v11, %v7318_v27 }
 0x14a   :  { %355 = vrot.lane.b32.xlu1 %v353_v26, %s6934_s25  ;;  %328 = vrot.lane.b32.xlu0 %v326_v29, %s6934_s25  ;;  %v715_v26 = vmul.f32 %v298_v12, %v7323_v30  ;;  %v7480_v29 = vstv %s4983_s20 }
 0x14e   :  { %468 = vrot.lane.b32.xlu1 %v466_v33, %s6934_s25  ;;  %443 = vrot.lane.b32.xlu0 %v441_v34, %s6934_s25  ;;  %v534_v33 = vmul.f32 %v7480_v29, %v7258_v0  ;;  %v670_v34 = vmul.f32 %v7482_v32, %v7258_v0 }
 0x152   :  { %519 = vrot.lane.b32.xlu1 %v517_v36, %s6934_s25  ;;  %487 = vrot.lane.b32.xlu0 %v485_v37, %s6934_s25  ;;  %v7490_v36 = vstv %s4984_s9 }
 0x153   :  { %8385 = vst [vmem:[#allocation39_spill] sm:$0xff] %v7490_v36  ;;  %v422_v37 = vmul.f32 %v7490_v36, %v7258_v0  ;;  %v682_v40 = vmul.f32 %v7490_v36, %v7318_v27  ;;  %v540_v42 = vmul.f32 %v7490_v36, %v7288_v13 }
 0x156   :  { %594 = vrot.lane.b32.xlu1 %v592_v38, %s6934_s25  ;;  %565 = vrot.lane.b32.xlu0 %v563_v43, %s6934_s25  ;;  %v676_v38 = vmul.f32 %v7480_v29, %v7288_v13  ;;  %v271_v43 = vstv %s4985_s15 }
 0x157   :  { %v428_v45 = vmul.f32 %v271_v43, %v7288_v13  ;;  %v272_v46 = vmul.f32 %v271_v43, %v7258_v0  ;;  %v546_v49 = vmul.f32 %v271_v43, %v7318_v27 }
 0x15a   :  { %657 = vrot.lane.b32.xlu1 %v655_v48, %s6934_s25  ;;  %617 = vrot.lane.b32.xlu0 %v615_v51, %s6934_s25  ;;  %v688_v48 = vmul.f32 %v271_v43, %v7323_v30  ;;  %v577_v43 = vmul.f32 %v7320_v28, %v7318_v27 }
 0x15e   :  { %744 = vrot.lane.b32.xlu1 %v742_v53, %s6934_s25  ;;  %711 = vrot.lane.b32.xlu0 %v709_v56, %s6934_s25 }
 0x162   :  { %819 = vrot.lane.b32.xlu1 %v817_v59, %s6934_s25  ;;  %771 = vrot.lane.b32.xlu0 %v769_v63, %s6934_s25  ;;  %v555_v63 = vmul.f32 %v7278_v9, %v7323_v30 }
 0x166   :  { %506 = vrot.lane.b32.xlu1 %v504_v23, %s6934_s25  ;;  %382 = vrot.lane.b32.xlu0 %v380_v6, %s6934_s25  ;;  %v556_v6 = vadd.f32 %v555_v63, %v554_v61  ;;  %v7565_v63 = vstv %s5003_s21 }
 0x16a   :  { %798 = vrot.lane.b32.xlu1 %v796_v7, %s6934_s25  ;;  %640 = vrot.lane.b32.xlu0 %v638_v8, %s6934_s25 }
 0x16e   :  { %409 = vrot.lane.b32.xlu1 %v407_v14, %s6934_s25  ;;  %301 = vrot.lane.b32.xlu0 %v299_v15, %s6934_s25 }
 0x172   :  { %525 = vrot.lane.b32.xlu1 %v523_v18, %s6934_s25  ;;  %449 = vrot.lane.b32.xlu0 %v447_v21, %s6934_s25 }
 0x176   :  { %663 = vrot.lane.b32.xlu1 %v661_v22, %s6934_s25  ;;  %571 = vrot.lane.b32.xlu0 %v569_v24, %s6934_s25 }
 0x17a   :  { %825 = vrot.lane.b32.xlu1 %v823_v25, %s6934_s25  ;;  %717 = vrot.lane.b32.xlu0 %v715_v26, %s6934_s25 }
 0x17e   :  { %536 = vrot.lane.b32.xlu1 %v534_v33, %s6934_s25  ;;  %672 = vrot.lane.b32.xlu0 %v670_v34, %s6934_s25 }
 0x182   :  { %424 = vrot.lane.b32.xlu1 %v422_v37, %s6934_s25  ;;  %678 = vrot.lane.b32.xlu0 %v676_v38, %s6934_s25  ;;  %v333_v37 = vstv %s4997_s2 }
 0x186   :  { %684 = vrot.lane.b32.xlu1 %v682_v40, %s6934_s25  ;;  %542 = vrot.lane.b32.xlu0 %v540_v42, %s6934_s25 }
 0x18a   :  { %430 = vrot.lane.b32.xlu1 %v428_v45, %s6934_s25  ;;  %274 = vrot.lane.b32.xlu0 %v272_v46, %s6934_s25  ;;  %v578_v45 = vmul.f32 %v7264_v3, %v7323_v30 }
 0x18c   :  { %v7512_v50 = vpop.permute.xlu1 %780  ;;  %v7514_v51 = vpop.permute.xlu0 %726 }
 0x18e   :  { %690 = vrot.lane.b32.xlu1 %v688_v48, %s6934_s25  ;;  %548 = vrot.lane.b32.xlu0 %v546_v49, %s6934_s25  ;;  %s7640_s25 = sld [smem:[#allocation7 + $0x1]] }
 0x190   :  { %v583_v53 = vpop.permute.xlu1 %582  ;;  %v7518_v16 = vpop.permute.xlu0 %753 }
 0x194   :  { %v7520_v54 = vpop.permute.xlu1 %699  ;;  %v7522_v56 = vpop.permute.xlu0 %605 }
 0x198   :  { %v7524_v57 = vpop.permute.xlu1 %759  ;;  %v7526_v58 = vpop.permute.xlu0 %732 }
 0x19c   :  { %v7528_v59 = vpop.permute.xlu1 %628  ;;  %v7530_v60 = vpop.permute.xlu0 %807 }
 0x1a0   :  { %v463_v2 = vpop.permute.xlu1 %462  ;;  %v7536_v23 = vpop.permute.xlu0 %786 }
 0x1a1   :  { %v465_v40 = vadd.f32 %v463_v2, %v7348_v44  ;;  %v579_v44 = vadd.f32 %v578_v45, %v577_v43  ;;  %v600_v2 = vmul.f32 %v7325_v31, %v7318_v27 }
 0x1a3   :  { %v585_v43 = vadd.f32 %v583_v53, %v579_v44 }
 0x1a4   :  { %v560_v7 = vpop.permute.xlu1 %559  ;;  %v482_v8 = vpop.permute.xlu0 %481 }
 0x1a5   :  { %v7538_v11 = vadd.f32 %v560_v7, %v556_v6 }
 0x1a8   :  { %v7540_v12 = vpop.permute.xlu1 %611  ;;  %v589_v14 = vpop.permute.xlu0 %588 }
 0x1ac   :  { %v7542_v15 = vpop.permute.xlu1 %705  ;;  %v7544_v18 = vpop.permute.xlu0 %651 }
 0x1b0   :  { %v7546_v21 = vpop.permute.xlu1 %765  ;;  %v739_v22 = vpop.permute.xlu0 %738 }
 0x1b4   :  { %v7548_v24 = vpop.permute.xlu1 %500  ;;  %v7550_v9 = vpop.permute.xlu0 %813 }
 0x1b8   :  { %v7552_v25 = vpop.permute.xlu1 %792  ;;  %v7554_v26 = vpop.permute.xlu0 %634 }
 0x1bc   :  { %v356_v33 = vpop.permute.xlu1 %355  ;;  %v329_v34 = vpop.permute.xlu0 %328 }
 0x1bd   :  { %v331_v38 = vadd.f32 %v329_v34, %v7388_v10  ;;  %v358_v61 = vadd.f32 %v356_v33, %v7397_v19  ;;  %v484_v10 = vadd.f32 %v482_v8, %v7355_v47  ;;  %v723_v33 = vmul.f32 %v7320_v28, %v7323_v30 }
 0x1be   :  { %v750_v28 = vmul.f32 %v7325_v31, %v7323_v30 }
 0x1bf   :  { %v334_v46 = vadd.f32 %v333_v37, %v331_v38  ;;  %v601_v38 = vmul.f32 %v7266_v4, %v7323_v30 }
 0x1c0   :  { %v469_v42 = vpop.permute.xlu1 %468  ;;  %v7562_v49 = vpop.permute.xlu0 %443 }
 0x1c1   :  { %v471_v48 = vadd.f32 %v469_v42, %v465_v40  ;;  %v335_v34 = vmax.f32 %v334_v46, 0.0  ;;  %v361_v40 = vadd.f32 %v7565_v63, %v358_v61  ;;  %v602_v4 = vadd.f32 %v601_v38, %v600_v2 }
 0x1c2   :  { %v7595_v38 = vstv %s5010_s22 }
 0x1c3   :  { %v472_v6 = vadd.f32 %v471_v48, %v333_v37  ;;  %v362_v48 = vmax.f32 %v361_v40, 0.0 }
 0x1c4   :  { %v7568_v7 = vpop.permute.xlu1 %519  ;;  %v488_v3 = vpop.permute.xlu0 %487 }
 0x1c5   :  { %v473_v36 = vmax.f32 %v472_v6, 0.0  ;;  %v490_v19 = vadd.f32 %v488_v3, %v484_v10  ;;  %v729_v6 = vadd.f32 %v7514_v51, %v723_v33  ;;  %v591_v10 = vadd.f32 %v589_v14, %v585_v43 }
 0x1c6   :  { %v756_v14 = vadd.f32 %v7518_v16, %v750_v28  ;;  %v395_v33 = vmul.f32 %v7298_v17, %v7288_v13 }
 0x1c7   :  { %v7577_v47 = vmax.f32 %v335_v34, %v473_v36  ;;  %v491_v8 = vadd.f32 %v490_v19, %v7565_v63  ;;  %v735_v53 = vadd.f32 %v7526_v58, %v729_v6  ;;  %v608_v19 = vadd.f32 %v7522_v56, %v602_v4 }
 0x1c8   :  { %v595_v42 = vpop.permute.xlu1 %594  ;;  %v7580_v45 = vpop.permute.xlu0 %565  ;;  %v392_v58 = vmul.f32 %v7595_v38, %v7258_v0  ;;  %v623_v56 = vmul.f32 %v7342_v39, %v7318_v27  ;;  %v762_v16 = vadd.f32 %v7524_v57, %v756_v14  ;;  %v512_v57 = vmul.f32 %v7595_v38, %v7288_v13 }
 0x1c9   :  { %v957_v46 = vsel %vm843_vm0, %v7577_v47, 0.0  ;;  %v492_v61 = vmax.f32 %v491_v8, 0.0  ;;  %v597_v44 = vadd.f32 %v595_v42, %v591_v10  ;;  %v741_v51 = vadd.f32 %v739_v22, %v735_v53 }
 0x1ca   :  { %958 = vadd.xlane.f32.xlu0 %v957_v46  ;;  %v614_v31 = vadd.f32 %v7540_v12, %v608_v19  ;;  %v624_v8 = vmul.f32 %v7260_v1, %v7323_v30  ;;  %v777_v46 = vmul.f32 %v7342_v39, %v7323_v30  ;;  %v396_v6 = vadd.f32 %v395_v33, %v392_v58 }
 0x1cb   :  { %v7589_v34 = vmax.f32 %v362_v48, %v492_v61  ;;  %v598_v22 = vadd.f32 %v597_v44, %v333_v37  ;;  %v768_v48 = vadd.f32 %v7546_v21, %v762_v16  ;;  %v399_v10 = vmul.f32 %v7344_v41, %v7318_v27 }
 0x1cc   :  { %v7587_v36 = vpop.permute.xlu1 %657  ;;  %v618_v3 = vpop.permute.xlu0 %617  ;;  %v625_v1 = vadd.f32 %v624_v8, %v623_v56  ;;  %v783_v39 = vadd.f32 %v7512_v50, %v777_v46  ;;  %v503_v21 = vadd.f32 %v7548_v24, %v7369_v55  ;;  %v387_v14 = vstv %s5009_s10 }
 0x1cd   :  { %v1012_v2 = vsel %vm843_vm0, %v7589_v34, 0.0  ;;  %v620_v12 = vadd.f32 %v618_v3, %v614_v31  ;;  %v599_v28 = vmax.f32 %v598_v22, 0.0  ;;  %v403_v55 = vmul.f32 %v7413_v35, %v7323_v30 }
 0x1ce   :  { %1013 = vadd.xlane.f32.xlu0 %v1012_v2  ;;  %v789_v58 = vadd.f32 %v7536_v23, %v783_v39  ;;  %v631_v24 = vadd.f32 %v7528_v59, %v625_v1  ;;  %v515_v16 = vmul.f32 %v7344_v41, %v7323_v30  ;;  %v646_v35 = vmul.f32 %v7595_v38, %v7318_v27 }
 0x1cf   :  { %v621_v3 = vadd.f32 %v620_v12, %v7565_v63 }
 0x1d0   :  { %v745_v40 = vpop.permute.xlu1 %744  ;;  %v7607_v43 = vpop.permute.xlu0 %711  ;;  %v637_v59 = vadd.f32 %v7554_v26, %v631_v24 }
 0x1d1   :  { %v747_v42 = vadd.f32 %v745_v40, %v741_v51  ;;  %v400_v40 = vadd.f32 %v399_v10, %v396_v6  ;;  %v622_v8 = vmax.f32 %v621_v3, 0.0 }
 0x1d3   :  { %v748_v4 = vadd.f32 %v747_v42, %v333_v37  ;;  %v513_v37 = vmul.f32 %v7298_v17, %v7318_v27  ;;  %v404_v1 = vadd.f32 %v403_v55, %v400_v40  ;;  %v446_v55 = vadd.f32 %v7562_v49, %v7399_v20 }
 0x1d4   :  { %v7613_v61 = vpop.permute.xlu1 %819  ;;  %v772_v44 = vpop.permute.xlu0 %771 }
 0x1d5   :  { %v749_v53 = vmax.f32 %v748_v4, 0.0  ;;  %v774_v19 = vadd.f32 %v772_v44, %v768_v48  ;;  %v514_v23 = vadd.f32 %v513_v37, %v512_v57  ;;  %v647_v48 = vmul.f32 %v7298_v17, %v7323_v30 }
 0x1d7   :  { %v7625_v2 = vmax.f32 %v599_v28, %v749_v53  ;;  %v775_v51 = vadd.f32 %v774_v19, %v7565_v63  ;;  %v795_v63 = vadd.f32 %v7552_v25, %v789_v58  ;;  %v516_v44 = vadd.f32 %v515_v16, %v514_v23 }
 0x1d8   :  { %v507_v31 = vpop.permute.xlu1 %506  ;;  %v383_v56 = vpop.permute.xlu0 %382  ;;  %v648_v17 = vadd.f32 %v647_v48, %v646_v35 }
 0x1d9   :  { %v509_v33 = vadd.f32 %v507_v31, %v503_v21  ;;  %v967_v50 = vsel %vm855_vm1, %v7625_v2, 0.0  ;;  %v776_v22 = vmax.f32 %v775_v51, 0.0  ;;  %v385_v42 = vadd.f32 %v383_v56, %v7436_v52 }
 0x1da   :  { %968 = vadd.xlane.f32.xlu1 %v967_v50  ;;  %v414_v31 = vstv %s7635_s18  ;;  %v522_v56 = vadd.f32 %v7568_v7, %v516_v44  ;;  %v306_v50 = vstv %s7640_s25 }
 0x1db   :  { %v510_v12 = vadd.f32 %v509_v33, %v387_v14  ;;  %v388_v46 = vadd.f32 %v387_v14, %v385_v42  ;;  %v7645_v52 = vmax.f32 %v622_v8, %v776_v22  ;;  %v696_v33 = vmul.f32 %v7380_v62, %v7323_v30 }
 0x1dc   :  { %v799_v4 = vpop.permute.xlu1 %798  ;;  %v641_v10 = vpop.permute.xlu0 %640 }
 0x1dd   :  { %v511_v25 = vmax.f32 %v510_v12, 0.0  ;;  %v801_v6 = vadd.f32 %v799_v4, %v795_v63  ;;  %v389_v41 = vmax.f32 %v388_v46, 0.0  ;;  %v643_v28 = vadd.f32 %v641_v10, %v637_v59 }
 0x1de   :  { %v1022_v53 = vsel %vm855_vm1, %v7645_v52, 0.0  ;;  %v702_v7 = vadd.f32 %v7520_v54, %v696_v33  ;;  %v568_v12 = vadd.f32 %v7580_v45, %v7538_v11  ;;  %v256_v59 = vstv %s7653_s23 }
 0x1df   :  { %v802_v57 = vadd.f32 %v801_v6, %v387_v14  ;;  %1023 = vadd.xlane.f32.xlu0 %v1022_v53  ;;  %v644_v26 = vadd.f32 %v643_v28, %v387_v14  ;;  %v7651_v19 = vmax.f32 %v389_v41, %v511_v25  ;;  %v804_v14 = vmul.f32 %v7595_v38, %v7323_v30 }
 0x1e0   :  { %v410_v3 = vpop.permute.xlu1 %409  ;;  %v302_v37 = vpop.permute.xlu0 %301  ;;  %v708_v46 = vadd.f32 %v7542_v15, %v702_v7  ;;  %v417_v45 = vmul.f32 %v256_v59, %v7288_v13  ;;  %v418_v15 = vmul.f32 %v7482_v32, %v7318_v27 }
 0x1e1   :  { %v803_v39 = vmax.f32 %v802_v57, 0.0  ;;  %v412_v21 = vadd.f32 %v410_v3, %v404_v1  ;;  %v645_v51 = vmax.f32 %v644_v26, 0.0  ;;  %v304_v40 = vadd.f32 %v302_v37, %v7454_v5 }
 0x1e2   :  { %v1067_v58 = vsel %vm843_vm0, %v7651_v19, 0.0  ;;  %v654_v5 = vadd.f32 %v7544_v18, %v648_v17  ;;  %v810_v16 = vadd.f32 %v7530_v60, %v804_v14  ;;  %v714_v41 = vadd.f32 %v7607_v43, %v708_v46 }
 0x1e3   :  { %1068 = vadd.xlane.f32.xlu1 %v1067_v58  ;;  %v7667_v8 = vmax.f32 %v645_v51, %v803_v39  ;;  %v415_v22 = vadd.f32 %v414_v31, %v412_v21  ;;  %v307_v62 = vadd.f32 %v306_v50, %v304_v40  ;;  %v260_v57 = vmul.f32 %v7482_v32, %v7288_v13 }
 0x1e4   :  { %v526_v24 = vpop.permute.xlu1 %525  ;;  %v450_v63 = vpop.permute.xlu0 %449  ;;  %v660_v20 = vadd.f32 %v7587_v36, %v654_v5  ;;  %v816_v4 = vadd.f32 %v7550_v9, %v810_v16  ;;  %v257_v26 = vmul.f32 %v256_v59, %v7258_v0  ;;  %v532_v21 = vmul.f32 %v7482_v32, %v7323_v30 }
 0x1e5   :  { %v528_v42 = vadd.f32 %v526_v24, %v522_v56  ;;  %v452_v23 = vadd.f32 %v450_v63, %v446_v55  ;;  %v1077_v38 = vsel %vm855_vm1, %v7667_v8, 0.0  ;;  %v416_v48 = vmax.f32 %v415_v22, 0.0 }
 0x1e6   :  { %1078 = vadd.xlane.f32.xlu0 %v1077_v38  ;;  %v308_v54 = vmax.f32 %v307_v62, 0.0  ;;  %v822_v36 = vadd.f32 %v7613_v61, %v816_v4  ;;  %v531_v51 = vmul.f32 %v256_v59, %v7318_v27  ;;  %v669_v13 = vmul.f32 %v256_v59, %v7323_v30 }
 0x1e7   :  { %v529_v49 = vadd.f32 %v528_v42, %v414_v31  ;;  %v453_v18 = vadd.f32 %v452_v23, %v306_v50  ;;  %v420_v0 = vmul.f32 %v7480_v29, %v7323_v30  ;;  %v419_v56 = vadd.f32 %v418_v15, %v417_v45 }
 0x1e8   :  { %v664_v35 = vpop.permute.xlu1 %663  ;;  %v572_v6 = vpop.permute.xlu0 %571  ;;  %v533_v38 = vadd.f32 %v532_v21, %v531_v51  ;;  %v279_v4 = vstv %s278_s3 }
 0x1e9   :  { %v666_v25 = vadd.f32 %v664_v35, %v660_v20  ;;  %v530_v10 = vmax.f32 %v529_v49, 0.0  ;;  %v454_v60 = vmax.f32 %v453_v18, 0.0  ;;  %v574_v1 = vadd.f32 %v572_v6, %v568_v12 }
 0x1ea   :  { %v421_v62 = vadd.f32 %v420_v0, %v419_v56 }
 0x1eb   :  { %v7682_v11 = vmax.f32 %v308_v54, %v454_v60  ;;  %v667_v9 = vadd.f32 %v666_v25, %v414_v31  ;;  %v575_v3 = vadd.f32 %v574_v1, %v306_v50  ;;  %v7692_v17 = vmax.f32 %v416_v48, %v530_v10 }
 0x1ec   :  { %v826_v28 = vpop.permute.xlu1 %825  ;;  %v718_v44 = vpop.permute.xlu0 %717 }
 0x1ed   :  { %v828_v53 = vadd.f32 %v826_v28, %v822_v36  ;;  %v720_v61 = vadd.f32 %v718_v44, %v714_v41  ;;  %v902_v43 = vsel %vm843_vm0, %v7682_v11, 0.0  ;;  %v668_v58 = vmax.f32 %v667_v9, 0.0 }
 0x1ee   :  { %903 = vadd.xlane.f32.xlu1 %v902_v43  ;;  %v576_v55 = vmax.f32 %v575_v3, 0.0  ;;  %v1122_v32 = vsel %vm843_vm0, %v7692_v17, 0.0 }
 0x1ef   :  { %v829_v39 = vadd.f32 %v828_v53, %v414_v31  ;;  %v721_v37 = vadd.f32 %v720_v61, %v306_v50  ;;  %v264_v31 = vmul.f32 %v7480_v29, %v7318_v27  ;;  %v261_v50 = vadd.f32 %v260_v57, %v257_v26  ;;  %v8386_v29 = vld [vmem:[#allocation39_spill] sm:$0xff] }
 0x1f0   :  { %v537_v40 = vpop.permute.xlu1 %536  ;;  %v673_v14 = vpop.permute.xlu0 %672  ;;  %v268_v7 = vmul.f32 %v8386_v29, %v7323_v30 }
 0x1f1   :  { %v830_v33 = vmax.f32 %v829_v39, 0.0  ;;  %v722_v24 = vmax.f32 %v721_v37, 0.0  ;;  %v675_v63 = vadd.f32 %v673_v14, %v669_v13  ;;  %v265_v16 = vadd.f32 %v264_v31, %v261_v50 }
 0x1f2   :  { %1123 = vadd.xlane.f32.xlu1 %v1122_v32  ;;  %v539_v35 = vadd.f32 %v537_v40, %v533_v38 }
 0x1f3   :  { %v7704_v5 = vmax.f32 %v668_v58, %v830_v33  ;;  %v7706_v42 = vmax.f32 %v576_v55, %v722_v24  ;;  %v269_v46 = vadd.f32 %v268_v7, %v265_v16 }
 0x1f4   :  { %v425_v22 = vpop.permute.xlu1 %424  ;;  %v679_v23 = vpop.permute.xlu0 %678 }
 0x1f5   :  { %v912_v27 = vsel %vm855_vm1, %v7706_v42, 0.0  ;;  %v427_v49 = vadd.f32 %v425_v22, %v421_v62  ;;  %v681_v12 = vadd.f32 %v679_v23, %v675_v63  ;;  %v1132_v59 = vsel %vm855_vm1, %v7704_v5, 0.0 }
 0x1f6   :  { %913 = vadd.xlane.f32.xlu0 %v912_v27 }
 0x1f8   :  { %v685_v20 = vpop.permute.xlu1 %684  ;;  %v543_v18 = vpop.permute.xlu0 %542 }
 0x1f9   :  { %v687_v25 = vadd.f32 %v685_v20, %v681_v12  ;;  %v545_v10 = vadd.f32 %v543_v18, %v539_v35 }
 0x1fa   :  { %1133 = vadd.xlane.f32.xlu0 %v1132_v59 }
 0x1fc   :  { %v431_v48 = vpop.permute.xlu1 %430  ;;  %v275_v54 = vpop.permute.xlu0 %274 }
 0x1fd   :  { %v433_v6 = vadd.f32 %v431_v48, %v427_v49  ;;  %v277_v60 = vadd.f32 %v275_v54, %v269_v46 }
 0x1ff   :  { %v434_v30 = vadd.f32 %v433_v6, %v279_v4  ;;  %v280_v1 = vadd.f32 %v279_v4, %v277_v60 }
 0x200   :  { %v691_v36 = vpop.permute.xlu1 %690  ;;  %v549_v45 = vpop.permute.xlu0 %548 }
 0x201   :  { %v435_v41 = vmax.f32 %v434_v30, 0.0  ;;  %v693_v28 = vadd.f32 %v691_v36, %v687_v25  ;;  %v281_v15 = vmax.f32 %v280_v1, 0.0  ;;  %v551_v9 = vadd.f32 %v549_v45, %v545_v10 }
 0x203   :  { %v694_v53 = vadd.f32 %v693_v28, %v279_v4  ;;  %v552_v44 = vadd.f32 %v551_v9, %v279_v4  ;;  %v7714_v57 = vmax.f32 %v281_v15, %v435_v41 }
 0x205   :  { %v695_v26 = vmax.f32 %v694_v53, 0.0  ;;  %v553_v3 = vmax.f32 %v552_v44, 0.0  ;;  %v844_v61 = vsel %vm843_vm0, %v7714_v57, 0.0 }
 0x206   :  { %845 = vadd.xlane.f32.xlu1 %v844_v61 }
 0x207   :  { %v7718_v43 = vmax.f32 %v553_v3, %v695_v26 }
 0x209   :  { %v856_v39 = vsel %vm855_vm1, %v7718_v43, 0.0 }
 0x20a   :  { %857 = vadd.xlane.f32.xlu0 %v856_v39 }
 0x257   :  { %v959_v21 = vpop.xlane.xlu0 %958 }
 0x258   :  { %v960_v37 = vsel %vm847_vm2, %v959_v21, 0.0 }
 0x259   :  { %v961_v40 = vrot.slane %v960_v37, 4 }
 0x25b   :  { %v1014_v51 = vpop.xlane.xlu0 %1013  ;;  %v962_v0 = vadd.f32 %v961_v40, %v960_v37 }
 0x25c   :  { %v1015_v13 = vsel %vm847_vm2, %v1014_v51, 0.0 }
 0x25d   :  { %v1016_v58 = vrot.slane %v1015_v13, 4  ;;  %v963_v33 = vrot.slane %v962_v0, 2 }
 0x25f   :  { %v1017_v56 = vadd.f32 %v1016_v58, %v1015_v13  ;;  %v964_v24 = vadd.f32 %v963_v33, %v962_v0 }
 0x261   :  { %v1018_v50 = vrot.slane %v1017_v56, 2  ;;  %v965_v38 = vrot.slane %v964_v24, 1 }
 0x263   :  { %v1019_v29 = vadd.f32 %v1018_v50, %v1017_v56  ;;  %v966_v35 = vadd.f32 %v965_v38, %v964_v24 }
 0x265   :  { %v1020_v46 = vrot.slane %v1019_v29, 1 }
 0x267   :  { %v969_v14 = vpop.xlane.xlu1 %968  ;;  %v1021_v36 = vadd.f32 %v1020_v46, %v1019_v29 }
 0x268   :  { %v970_v31 = vsel %vm847_vm2, %v969_v14, 0.0 }
 0x269   :  { %v971_v55 = vrot.slane %v970_v31, 4 }
 0x26b   :  { %v972_v32 = vadd.f32 %v971_v55, %v970_v31 }
 0x26c   :  { %v1024_v22 = vpop.xlane.xlu0 %1023 }
 0x26d   :  { %v973_v63 = vrot.slane %v972_v32, 2  ;;  %v1025_v62 = vsel %vm847_vm2, %v1024_v22, 0.0 }
 0x26e   :  { %v1026_v23 = vrot.slane %v1025_v62, 4 }
 0x26f   :  { %v974_v27 = vadd.f32 %v973_v63, %v972_v32 }
 0x270   :  { %v1027_v7 = vadd.f32 %v1026_v23, %v1025_v62  ;;  %v1069_v16 = vpop.xlane.xlu1 %1068 }
 0x271   :  { %v975_v20 = vrot.slane %v974_v27, 1  ;;  %v1070_v49 = vsel %vm847_vm2, %v1069_v16, 0.0 }
 0x272   :  { %v1028_v12 = vrot.slane %v1027_v7, 2  ;;  %v1071_v18 = vrot.slane %v1070_v49, 4 }
 0x273   :  { %v976_v59 = vadd.f32 %v975_v20, %v974_v27  ;;  %v1079_v25 = vpop.xlane.xlu0 %1078 }
 0x274   :  { %v1029_v4 = vadd.f32 %v1028_v12, %v1027_v7  ;;  %v1072_v48 = vadd.f32 %v1071_v18, %v1070_v49  ;;  %v1080_v6 = vsel %vm847_vm2, %v1079_v25, 0.0 }
 0x275   :  { %v977_v54 = vadd.f32 %v976_v59, %v966_v35  ;;  %v1081_v30 = vrot.slane %v1080_v6, 4 }
 0x276   :  { %v1030_v10 = vrot.slane %v1029_v4, 1  ;;  %v1073_v60 = vrot.slane %v1072_v48, 2 }
 0x277   :  { %v978_v1 = vmul.f32 0.0057471264, %v977_v54  ;;  %v1082_v28 = vadd.f32 %v1081_v30, %v1080_v6 }
 0x278   :  { %v1031_v41 = vadd.f32 %v1030_v10, %v1029_v4  ;;  %v1074_v45 = vadd.f32 %v1073_v60, %v1072_v48 }
 0x279   :  { %v7729_v15 = vsub.f32 %v7625_v2, %v978_v1  ;;  %v7732_v9 = vsub.f32 %v7577_v47, %v978_v1  ;;  %v1083_v53 = vrot.slane %v1082_v28, 2 }
 0x27a   :  { %v1032_v44 = vadd.f32 %v1031_v41, %v1021_v36  ;;  %v1075_v37 = vrot.slane %v1074_v45, 1 }
 0x27b   :  { %v992_v26 = vmul.f32 %v7729_v15, %v7729_v15  ;;  %v981_v3 = vmul.f32 %v7732_v9, %v7732_v9  ;;  %v1084_v61 = vadd.f32 %v1083_v53, %v1082_v28  ;;  %v904_v39 = vpop.xlane.xlu1 %903 }
 0x27c   :  { %v1033_v21 = vmul.f32 0.0057471264, %v1032_v44  ;;  %v905_v51 = vsel %vm847_vm2, %v904_v39, 0.0  ;;  %v1076_v24 = vadd.f32 %v1075_v37, %v1074_v45 }
 0x27d   :  { %v993_v2 = vsel %vm855_vm1, %v992_v26, 0.0  ;;  %v982_v40 = vsel %vm843_vm0, %v981_v3, 0.0  ;;  %v1085_v47 = vrot.slane %v1084_v61, 1  ;;  %v906_v13 = vrot.slane %v905_v51, 4 }
 0x27e   :  { %994 = vadd.xlane.f32.xlu0 %v993_v2  ;;  %983 = vadd.xlane.f32.xlu1 %v982_v40  ;;  %v7742_v0 = vsub.f32 %v7645_v52, %v1033_v21  ;;  %v7745_v58 = vsub.f32 %v7589_v34, %v1033_v21 }
 0x27f   :  { %v1086_v33 = vadd.f32 %v1085_v47, %v1084_v61  ;;  %v907_v14 = vadd.f32 %v906_v13, %v905_v51  ;;  %v1124_v56 = vpop.xlane.xlu1 %1123 }
 0x280   :  { %v1047_v31 = vmul.f32 %v7742_v0, %v7742_v0  ;;  %v1036_v55 = vmul.f32 %v7745_v58, %v7745_v58  ;;  %v1125_v32 = vsel %vm847_vm2, %v1124_v56, 0.0 }
 0x281   :  { %v1126_v50 = vrot.slane %v1125_v32, 4  ;;  %v1087_v34 = vadd.f32 %v1086_v33, %v1076_v24  ;;  %v908_v63 = vrot.slane %v907_v14, 2 }
 0x282   :  { %v1048_v22 = vsel %vm855_vm1, %v1047_v31, 0.0  ;;  %v1037_v52 = vsel %vm843_vm0, %v1036_v55, 0.0 }
 0x283   :  { %1049 = vadd.xlane.f32.xlu0 %v1048_v22  ;;  %1038 = vadd.xlane.f32.xlu1 %v1037_v52  ;;  %v1127_v62 = vadd.f32 %v1126_v50, %v1125_v32  ;;  %v914_v23 = vpop.xlane.xlu0 %913  ;;  %v1088_v27 = vmul.f32 0.0057471264, %v1087_v34  ;;  %v909_v20 = vadd.f32 %v908_v63, %v907_v14 }
 0x284   :  { %v915_v38 = vsel %vm847_vm2, %v914_v23, 0.0 }
 0x285   :  { %v916_v29 = vrot.slane %v915_v38, 4  ;;  %v7756_v7 = vsub.f32 %v7667_v8, %v1088_v27  ;;  %v7759_v16 = vsub.f32 %v7651_v19, %v1088_v27  ;;  %v1128_v49 = vrot.slane %v1127_v62, 2 }
 0x286   :  { %v910_v19 = vrot.slane %v909_v20, 1 }
 0x287   :  { %v917_v12 = vadd.f32 %v916_v29, %v915_v38  ;;  %v1134_v18 = vpop.xlane.xlu0 %1133  ;;  %v1102_v59 = vmul.f32 %v7756_v7, %v7756_v7  ;;  %v1091_v46 = vmul.f32 %v7759_v16, %v7759_v16  ;;  %v1129_v6 = vadd.f32 %v1128_v49, %v1127_v62 }
 0x288   :  { %v1135_v35 = vsel %vm847_vm2, %v1134_v18, 0.0  ;;  %v911_v1 = vadd.f32 %v910_v19, %v909_v20  ;;  %v1252_v19 = vld [vmem:[#allocation10 + $0x48] sm:$0xff] }
 0x289   :  { %v918_v4 = vrot.slane %v917_v12, 2  ;;  %v1136_v48 = vrot.slane %v1135_v35, 4  ;;  %v1103_v8 = vsel %vm855_vm1, %v1102_v59, 0.0  ;;  %v1092_v25 = vsel %vm843_vm0, %v1091_v46, 0.0 }
 0x28a   :  { %1104 = vadd.xlane.f32.xlu0 %v1103_v8  ;;  %1093 = vadd.xlane.f32.xlu1 %v1092_v25  ;;  %v1130_v36 = vrot.slane %v1129_v6, 1  ;;  %v1250_v8 = vld [vmem:[#allocation10 + $0x38] sm:$0xff] }
 0x28b   :  { %v919_v54 = vadd.f32 %v918_v4, %v917_v12  ;;  %v1137_v10 = vadd.f32 %v1136_v48, %v1135_v35  ;;  %v1244_v48 = vld [vmem:[#allocation10 + $0x8] sm:$0xff]  ;;  %v1246_v25 = vld [vmem:[#allocation10 + $0x18] sm:$0xff] }
 0x28c   :  { %v1131_v44 = vadd.f32 %v1130_v36, %v1129_v6  ;;  %v1243_v6 = vld [vmem:[#allocation10] sm:$0xff] }
 0x28d   :  { %v920_v60 = vrot.slane %v919_v54, 1  ;;  %v1138_v30 = vrot.slane %v1137_v10, 2 }
 0x28f   :  { %v921_v41 = vadd.f32 %v920_v60, %v919_v54  ;;  %v1139_v28 = vadd.f32 %v1138_v30, %v1137_v10  ;;  %v5447_v54 = vpack.c.bf16 %v1252_v19, %v1246_v25  ;;  %v1245_v60 = vld [vmem:[#allocation10 + $0x10] sm:$0xff]  ;;  %v1251_v30 = vld [vmem:[#allocation10 + $0x40] sm:$0xff] }
 0x290   :  { %v5449_v36 = vpack.c.bf16 %v1251_v30, %v1245_v60  ;;  %v1297_v25 = vld [vmem:[#allocation10 + $0x1b0] sm:$0xff]  ;;  %v1312_v60 = vld [vmem:[#allocation10 + $0x228] sm:$0xff] }
 0x291   :  { %v1140_v45 = vrot.slane %v1139_v28, 1  ;;  %v922_v53 = vadd.f32 %v921_v41, %v911_v1  ;;  %v1256_v1 = vld [vmem:[#allocation10 + $0x68] sm:$0xff]  ;;  %v1262_v41 = vld [vmem:[#allocation10 + $0x98] sm:$0xff]  ;;  %5448 = vmatprep.subr.bf16.mxu1 %v5447_v54 }
 0x292   :  { %5450 = vmatpush1.bf16.msra.mxu1 %v5449_v36  ;;  %v1310_v54 = vld [vmem:[#allocation10 + $0x218] sm:$0xff] }
 0x293   :  { %v1141_v26 = vadd.f32 %v1140_v45, %v1139_v28  ;;  %v846_v3 = vpop.xlane.xlu1 %845  ;;  %v923_v61 = vmul.f32 0.0057471264, %v922_v53  ;;  %v1258_v28 = vld [vmem:[#allocation10 + $0x78] sm:$0xff]  ;;  %v1264_v45 = vld [vmem:[#allocation10 + $0xa8] sm:$0xff]  ;;  %v5317_v53 = vpack.c.bf16 %v1262_v41, %v1256_v1  ;;  %v1303_v41 = vld [vmem:[#allocation10 + $0x1e0] sm:$0xff] }
 0x294   :  { %v848_v39 = vsel %vm847_vm2, %v846_v3, 0.0  ;;  %v1261_v3 = vld [vmem:[#allocation10 + $0x90] sm:$0xff] }
 0x295   :  { %v849_v21 = vrot.slane %v848_v39, 4  ;;  %v7770_v37 = vsub.f32 %v7706_v42, %v923_v61  ;;  %v7773_v51 = vsub.f32 %v7682_v11, %v923_v61  ;;  %v1142_v2 = vadd.f32 %v1141_v26, %v1131_v44  ;;  %v1255_v26 = vld [vmem:[#allocation10 + $0x60] sm:$0xff]  ;;  %v1257_v61 = vld [vmem:[#allocation10 + $0x70] sm:$0xff] }
 0x296   :  { %v5451_v44 = vpack.c.bf16 %v1264_v45, %v1258_v28  ;;  %v1309_v28 = vld [vmem:[#allocation10 + $0x210] sm:$0xff] }
 0x297   :  { %v858_v40 = vpop.xlane.xlu0 %857  ;;  %v850_v47 = vadd.f32 %v849_v21, %v848_v39  ;;  %v937_v13 = vmul.f32 %v7770_v37, %v7770_v37  ;;  %v926_v33 = vmul.f32 %v7773_v51, %v7773_v51  ;;  %v1143_v14 = vmul.f32 0.0057471264, %v1142_v2  ;;  %v1263_v21 = vld [vmem:[#allocation10 + $0xa0] sm:$0xff]  ;;  %v1268_v2 = vld [vmem:[#allocation10 + $0xc8] sm:$0xff]  ;;  %v1305_v45 = vld [vmem:[#allocation10 + $0x1f0] sm:$0xff] }
 0x298   :  { %v859_v56 = vsel %vm847_vm2, %v858_v40, 0.0  ;;  %v5319_v39 = vpack.c.bf16 %v1261_v3, %v1255_v26  ;;  %v1274_v40 = vld [vmem:[#allocation10 + $0xf8] sm:$0xff]  ;;  %5452 = vmatprep.subr.bf16.mxu1 %v5451_v44  ;;  %v1311_v44 = vld [vmem:[#allocation10 + $0x220] sm:$0xff]  ;;  %v1316_v26 = vld [vmem:[#allocation10 + $0x248] sm:$0xff] }
 0x299   :  { %v860_v31 = vrot.slane %v859_v56, 4  ;;  %v851_v55 = vrot.slane %v850_v47, 2  ;;  %v938_v42 = vsel %vm855_vm1, %v937_v13, 0.0  ;;  %v927_v24 = vsel %vm843_vm0, %v926_v33, 0.0  ;;  %v1270_v33 = vld [vmem:[#allocation10 + $0xd8] sm:$0xff] }
 0x29a   :  { %939 = vadd.xlane.f32.xlu0 %v938_v42  ;;  %928 = vadd.xlane.f32.xlu1 %v927_v24  ;;  %v7783_v11 = vsub.f32 %v7704_v5, %v1143_v14  ;;  %v7786_v32 = vsub.f32 %v7692_v17, %v1143_v14  ;;  %v5321_v13 = vpack.c.bf16 %v1274_v40, %v1268_v2  ;;  %v1276_v14 = vld [vmem:[#allocation10 + $0x108] sm:$0xff]  ;;  %v1269_v42 = vld [vmem:[#allocation10 + $0xd0] sm:$0xff]  ;;  %v1275_v24 = vld [vmem:[#allocation10 + $0x100] sm:$0xff] }
 0x29b   :  { %v861_v50 = vadd.f32 %v860_v31, %v859_v56  ;;  %v852_v22 = vadd.f32 %v851_v55, %v850_v47  ;;  %v5453_v47 = vpack.c.bf16 %v1263_v21, %v1257_v61  ;;  %v1267_v56 = vld [vmem:[#allocation10 + $0xc0] sm:$0xff]  ;;  %v5455_v31 = vpack.c.bf16 %v1276_v14, %v1270_v33  ;;  %v1273_v55 = vld [vmem:[#allocation10 + $0xf0] sm:$0xff]  ;;  %v1322_v3 = vld [vmem:[#allocation10 + $0x278] sm:$0xff] }
 0x29c   :  { %v1157_v52 = vmul.f32 %v7783_v11, %v7783_v11  ;;  %v1146_v34 = vmul.f32 %v7786_v32, %v7786_v32  ;;  %v1318_v61 = vld [vmem:[#allocation10 + $0x258] sm:$0xff]  ;;  %v5335_v21 = vpack.c.bf16 %v1309_v28, %v1303_v41  ;;  %v5469_v2 = vpack.c.bf16 %v1311_v44, %v1305_v45  ;;  %v1317_v33 = vld [vmem:[#allocation10 + $0x250] sm:$0xff] }
 0x29d   :  { %v862_v63 = vrot.slane %v861_v50, 2  ;;  %v853_v62 = vrot.slane %v852_v22, 1  ;;  %5454 = vmatpush1.bf16.msra.mxu1 %v5453_v47  ;;  %v5337_v40 = vpack.c.bf16 %v1322_v3, %v1316_v26  ;;  %v1315_v47 = vld [vmem:[#allocation10 + $0x240] sm:$0xff] }
 0x29e   :  { %v1158_v23 = vsel %vm855_vm1, %v1157_v52, 0.0  ;;  %v1147_v38 = vsel %vm843_vm0, %v1146_v34, 0.0  ;;  %v1286_v52 = vld [vmem:[#allocation10 + $0x158] sm:$0xff]  ;;  %5456 = vmatprep.subr.bf16.mxu1 %v5455_v31  ;;  %v1328_v31 = vld [vmem:[#allocation10 + $0x2a8] sm:$0xff] }
 0x29f   :  { %v863_v27 = vadd.f32 %v862_v63, %v861_v50  ;;  %1159 = vadd.xlane.f32.xlu0 %v1158_v23  ;;  %1148 = vadd.xlane.f32.xlu1 %v1147_v38  ;;  %v854_v17 = vadd.f32 %v853_v62, %v852_v22  ;;  %v5323_v50 = vpack.c.bf16 %v1273_v55, %v1267_v56  ;;  %v1280_v22 = vld [vmem:[#allocation10 + $0x128] sm:$0xff]  ;;  %v1282_v34 = vld [vmem:[#allocation10 + $0x138] sm:$0xff]  ;;  %v1279_v38 = vld [vmem:[#allocation10 + $0x120] sm:$0xff] }
 0x2a0   :  { %v5457_v63 = vpack.c.bf16 %v1275_v24, %v1269_v42  ;;  %v5325_v62 = vpack.c.bf16 %v1286_v52, %v1280_v22  ;;  %v1288_v23 = vld [vmem:[#allocation10 + $0x168] sm:$0xff]  ;;  %v1323_v56 = vld [vmem:[#allocation10 + $0x280] sm:$0xff]  ;;  %v1334_v55 = vld [vmem:[#allocation10 + $0x2d8] sm:$0xff] }
 0x2a1   :  { %v864_v5 = vrot.slane %v863_v27, 1  ;;  %v1330_v42 = vld [vmem:[#allocation10 + $0x2b8] sm:$0xff]  ;;  %v1336_v24 = vld [vmem:[#allocation10 + $0x2e8] sm:$0xff]  ;;  %v5473_v22 = vpack.c.bf16 %v1323_v56, %v1317_v33  ;;  %v5341_v52 = vpack.c.bf16 %v1334_v55, %v1328_v31 }
 0x2a2   :  { %5458 = vmatpush1.bf16.msra.mxu1 %v5457_v63  ;;  %v1333_v63 = vld [vmem:[#allocation10 + $0x2d0] sm:$0xff] }
 0x2a3   :  { %v865_v29 = vadd.f32 %v864_v5, %v863_v27  ;;  %v1285_v27 = vld [vmem:[#allocation10 + $0x150] sm:$0xff]  ;;  %v5459_v5 = vpack.c.bf16 %v1288_v23, %v1282_v34  ;;  %v1327_v34 = vld [vmem:[#allocation10 + $0x2a0] sm:$0xff] }
 0x2a4   :  { %v1329_v23 = vld [vmem:[#allocation10 + $0x2b0] sm:$0xff] }
 0x2a5   :  { %v866_v20 = vadd.f32 %v865_v29, %v854_v17  ;;  %v1281_v17 = vld [vmem:[#allocation10 + $0x130] sm:$0xff]  ;;  %v1287_v29 = vld [vmem:[#allocation10 + $0x160] sm:$0xff]  ;;  %5460 = vmatprep.subr.bf16.mxu1 %v5459_v5 }
 0x2a7   :  { %v868_v49 = vmul.f32 0.0057471264, %v866_v20  ;;  %v1292_v20 = vld [vmem:[#allocation10 + $0x188] sm:$0xff] }
 0x2a9   :  { %v7795_v12 = vsub.f32 %v7718_v43, %v868_v49  ;;  %v7798_v18 = vsub.f32 %v7714_v57, %v868_v49  ;;  %v5313_v43 = vpack.c.bf16 %v1250_v8, %v1244_v48  ;;  %v1249_v57 = vld [vmem:[#allocation10 + $0x30] sm:$0xff]  ;;  %v1298_v49 = vld [vmem:[#allocation10 + $0x1b8] sm:$0xff]  ;;  %v1291_v8 = vld [vmem:[#allocation10 + $0x180] sm:$0xff] }
 0x2aa   :  { %v5315_v10 = vpack.c.bf16 %v1249_v57, %v1243_v6  ;;  %v5329_v48 = vpack.c.bf16 %v1298_v49, %v1292_v20  ;;  %v1299_v6 = vld [vmem:[#allocation10 + $0x1c0] sm:$0xff]  ;;  %v1304_v57 = vld [vmem:[#allocation10 + $0x1e8] sm:$0xff]  ;;  %v5331_v30 = vpack.c.bf16 %v1297_v25, %v1291_v8 }
 0x2ab   :  { %v882_v35 = vmul.f32 %v7795_v12, %v7795_v12  ;;  %v871_v59 = vmul.f32 %v7798_v18, %v7798_v18  ;;  %5314 = vmatprep.subr.bf16.mxu0 %v5313_v43  ;;  %v1293_v43 = vld [vmem:[#allocation10 + $0x190] sm:$0xff]  ;;  %v5333_v36 = vpack.c.bf16 %v1310_v54, %v1304_v57 }
 0x2ac   :  { %5316 = vmatpush1.bf16.msra.mxu0 %v5315_v10  ;;  %v1306_v10 = vld [vmem:[#allocation10 + $0x1f8] sm:$0xff]  ;;  %v5465_v1 = vpack.c.bf16 %v1299_v6, %v1293_v43 }
 0x2ad   :  { %v883_v46 = vsel %vm855_vm1, %v882_v35, 0.0  ;;  %v872_v4 = vsel %vm843_vm0, %v871_v59, 0.0  ;;  %5318 = vmatprep.subr.bf16.mxu0 %v5317_v53  ;;  %v1294_v35 = vld [vmem:[#allocation10 + $0x198] sm:$0xff]  ;;  %v1300_v59 = vld [vmem:[#allocation10 + $0x1c8] sm:$0xff]  ;;  %v5467_v53 = vpack.c.bf16 %v1312_v60, %v1306_v10  ;;  %vm1671_vm0 = vcmask 80896  }
 0x2ae   :  { %884 = vadd.xlane.f32.xlu0 %v883_v46  ;;  %873 = vadd.xlane.f32.xlu1 %v872_v4  ;;  %v5327_v46 = vpack.c.bf16 %v1285_v27, %v1279_v38  ;;  %v5461_v4 = vpack.c.bf16 %v1287_v29, %v1281_v17  ;;  %v5463_v19 = vpack.c.bf16 %v1300_v59, %v1294_v35  ;;  %v1335_v38 = vld [vmem:[#allocation10 + $0x2e0] sm:$0xff]  ;;  %vm3437_vm1 = vcmask 517120  }
 0x2af   :  { %v5343_v27 = vpack.c.bf16 %v1333_v63, %v1327_v34  ;;  %v5477_v5 = vpack.c.bf16 %v1335_v38, %v1329_v23  ;;  %v1346_v23 = vld [vmem:[#allocation10 + $0x338] sm:$0xff] }
 0x2b0   :  { %5320 = vmatpush1.bf16.msra.mxu0 %v5319_v39  ;;  %5462 = vmatpush1.bf16.msra.mxu1 %v5461_v4  ;;  %v1324_v39 = vld [vmem:[#allocation10 + $0x288] sm:$0xff]  ;;  %v1342_v38 = vld [vmem:[#allocation10 + $0x318] sm:$0xff] }
 0x2b1   :  { %5322 = vmatprep.subr.bf16.mxu0 %v5321_v13  ;;  %5464 = vmatprep.subr.bf16.mxu1 %v5463_v19  ;;  %v1321_v13 = vld [vmem:[#allocation10 + $0x270] sm:$0xff]  ;;  %v5471_v14 = vpack.c.bf16 %v1324_v39, %v1318_v61 }
 0x2b4   :  { %5324 = vmatpush1.bf16.msra.mxu0 %v5323_v50  ;;  %5466 = vmatpush1.bf16.msra.mxu1 %v5465_v1  ;;  %v5339_v50 = vpack.c.bf16 %v1321_v13, %v1315_v47 }
 0x2b5   :  { %5326 = vmatprep.subr.bf16.mxu0 %v5325_v62  ;;  %5468 = vmatprep.subr.bf16.mxu1 %v5467_v53  ;;  %v5475_v62 = vpack.c.bf16 %v1336_v24, %v1330_v42 }
 0x2b8   :  { %5328 = vmatpush1.bf16.msra.mxu0 %v5327_v46  ;;  %5470 = vmatpush1.bf16.msra.mxu1 %v5469_v2 }
 0x2b9   :  { %5330 = vmatprep.subr.bf16.mxu0 %v5329_v48  ;;  %5472 = vmatprep.subr.bf16.mxu1 %v5471_v14 }
 0x2bc   :  { %5332 = vmatpush1.bf16.msra.mxu0 %v5331_v30  ;;  %5474 = vmatpush1.bf16.msra.mxu1 %v5473_v22 }
 0x2bd   :  { %5334 = vmatprep.subr.bf16.mxu0 %v5333_v36  ;;  %5476 = vmatprep.subr.bf16.mxu1 %v5475_v62  ;;  %v1340_v62 = vld [vmem:[#allocation10 + $0x308] sm:$0xff] }
 0x2c0   :  { %5336 = vmatpush1.bf16.msra.mxu0 %v5335_v21  ;;  %5478 = vmatpush1.bf16.msra.mxu1 %v5477_v5 }
 0x2c1   :  { %5338 = vmatprep.subr.bf16.mxu0 %v5337_v40 }
 0x2c4   :  { %5340 = vmatpush1.bf16.msra.mxu0 %v5339_v50 }
 0x2c5   :  { %5342 = vmatprep.subr.bf16.mxu0 %v5341_v52 }
 0x2c8   :  { %5344 = vmatpush1.bf16.msra.mxu0 %v5343_v27 }
 0x30b   :  { %v995_v17 = vpop.xlane.xlu0 %994  ;;  %v984_v29 = vpop.xlane.xlu1 %983 }
 0x30c   :  { %v996_v20 = vsel %vm847_vm2, %v995_v17, 0.0  ;;  %v985_v49 = vsel %vm847_vm2, %v984_v29, 0.0  ;;  %v5345_v17 = vpack.c.bf16 %v1346_v23, %v1340_v62  ;;  %v1348_v29 = vld [vmem:[#allocation10 + $0x348] sm:$0xff] }
 0x30d   :  { %v997_v35 = vrot.slane %v996_v20, 4  ;;  %v986_v59 = vrot.slane %v985_v49, 4 }
 0x30e   :  { %5346 = vmatprep.subr.bf16.mxu0 %v5345_v17 }
 0x30f   :  { %v998_v46 = vadd.f32 %v997_v35, %v996_v20  ;;  %v987_v4 = vadd.f32 %v986_v59, %v985_v49  ;;  %v1339_v20 = vld [vmem:[#allocation10 + $0x300] sm:$0xff]  ;;  %v1345_v49 = vld [vmem:[#allocation10 + $0x330] sm:$0xff]  ;;  %v5479_v59 = vpack.c.bf16 %v1348_v29, %v1342_v38  ;;  %v1063_v29 = vstv %s7814_s4 }
 0x310   :  { %v1050_v48 = vpop.xlane.xlu0 %1049  ;;  %v1039_v8 = vpop.xlane.xlu1 %1038 }
 0x311   :  { %v999_v25 = vrot.slane %v998_v46, 2  ;;  %v988_v43 = vrot.slane %v987_v4, 2  ;;  %v1051_v19 = vsel %vm847_vm2, %v1050_v48, 0.0  ;;  %v1040_v6 = vsel %vm847_vm2, %v1039_v8, 0.0  ;;  %v1347_v48 = vld [vmem:[#allocation10 + $0x340] sm:$0xff]  ;;  %5480 = vmatprep.subr.bf16.mxu1 %v5479_v59  ;;  %v1382_v59 = vld [vmem:[#allocation10 + $0x458] sm:$0xff] }
 0x312   :  { %v1052_v57 = vrot.slane %v1051_v19, 4  ;;  %v1041_v54 = vrot.slane %v1040_v6, 4 }
 0x313   :  { %v1000_v10 = vadd.f32 %v999_v25, %v998_v46  ;;  %v989_v60 = vadd.f32 %v988_v43, %v987_v4  ;;  %v5347_v46 = vpack.c.bf16 %v1345_v49, %v1339_v20  ;;  %v1341_v4 = vld [vmem:[#allocation10 + $0x310] sm:$0xff] }
 0x314   :  { %v1053_v30 = vadd.f32 %v1052_v57, %v1051_v19  ;;  %v1042_v1 = vadd.f32 %v1041_v54, %v1040_v6  ;;  %v5481_v43 = vpack.c.bf16 %v1347_v48, %v1341_v4  ;;  %v1352_v57 = vld [vmem:[#allocation10 + $0x368] sm:$0xff]  ;;  %v1358_v54 = vld [vmem:[#allocation10 + $0x398] sm:$0xff] }
 0x315   :  { %v1001_v36 = vrot.slane %v1000_v10, 1  ;;  %v990_v41 = vrot.slane %v989_v60, 1  ;;  %5348 = vmatpush1.bf16.msra.mxu0 %v5347_v46  ;;  %v1378_v46 = vld [vmem:[#allocation10 + $0x438] sm:$0xff] }
 0x316   :  { %v1054_v28 = vrot.slane %v1053_v30, 2  ;;  %v1043_v45 = vrot.slane %v1042_v1, 2  ;;  %5482 = vmatpush1.bf16.msra.mxu1 %v5481_v43 }
 0x317   :  { %v1002_v53 = vadd.f32 %v1001_v36, %v1000_v10  ;;  %v991_v44 = vadd.f32 %v990_v41, %v989_v60  ;;  %v1105_v39 = vpop.xlane.xlu0 %1104  ;;  %v1094_v21 = vpop.xlane.xlu1 %1093  ;;  %v1354_v10 = vld [vmem:[#allocation10 + $0x378] sm:$0xff]  ;;  %v5349_v60 = vpack.c.bf16 %v1358_v54, %v1352_v57  ;;  %v1357_v36 = vld [vmem:[#allocation10 + $0x390] sm:$0xff] }
 0x318   :  { %v1055_v26 = vadd.f32 %v1054_v28, %v1053_v30  ;;  %v1044_v3 = vadd.f32 %v1043_v45, %v1042_v1  ;;  %v1106_v47 = vsel %vm847_vm2, %v1105_v39, 0.0  ;;  %v1095_v13 = vsel %vm847_vm2, %v1094_v21, 0.0  ;;  %v1360_v30 = vld [vmem:[#allocation10 + $0x3a8] sm:$0xff]  ;;  %v1351_v1 = vld [vmem:[#allocation10 + $0x360] sm:$0xff] }
 0x319   :  { %v1003_v61 = vadd.f32 %v1002_v53, %v991_v44  ;;  %v1107_v14 = vrot.slane %v1106_v47, 4  ;;  %v1096_v56 = vrot.slane %v1095_v13, 4  ;;  %v1008_v28 = vstv %s7812_s17  ;;  %v1353_v44 = vld [vmem:[#allocation10 + $0x370] sm:$0xff]  ;;  %5350 = vmatprep.subr.bf16.mxu0 %v5349_v60 }
 0x31a   :  { %v1056_v2 = vrot.slane %v1055_v26, 1  ;;  %v1045_v40 = vrot.slane %v1044_v3, 1  ;;  %v5483_v45 = vpack.c.bf16 %v1360_v30, %v1354_v10  ;;  %v5351_v53 = vpack.c.bf16 %v1357_v36, %v1351_v1  ;;  %v1381_v60 = vld [vmem:[#allocation10 + $0x450] sm:$0xff]  ;;  %v1383_v1 = vld [vmem:[#allocation10 + $0x460] sm:$0xff] }
 0x31b   :  { %v1004_v33 = vmul.f32 0.0057471264, %v1003_v61  ;;  %v1108_v24 = vadd.f32 %v1107_v14, %v1106_v47  ;;  %v1097_v50 = vadd.f32 %v1096_v56, %v1095_v13  ;;  %v1372_v47 = vld [vmem:[#allocation10 + $0x408] sm:$0xff]  ;;  %v1377_v30 = vld [vmem:[#allocation10 + $0x430] sm:$0xff] }
 0x31c   :  { %v1057_v31 = vadd.f32 %v1056_v2, %v1055_v26  ;;  %v1046_v55 = vadd.f32 %v1045_v40, %v1044_v3  ;;  %v1359_v26 = vld [vmem:[#allocation10 + $0x3a0] sm:$0xff]  ;;  %v1364_v3 = vld [vmem:[#allocation10 + $0x3c8] sm:$0xff]  ;;  %v1370_v2 = vld [vmem:[#allocation10 + $0x3f8] sm:$0xff]  ;;  %5484 = vmatprep.subr.bf16.mxu1 %v5483_v45  ;;  %5352 = vmatpush1.bf16.msra.mxu0 %v5351_v53 }
 0x31d   :  { %v1005_v42 = vadd.f32 1e-05, %v1004_v33  ;;  %v1109_v52 = vrot.slane %v1108_v24, 2  ;;  %v1098_v34 = vrot.slane %v1097_v50, 2  ;;  %v5485_v21 = vpack.c.bf16 %v1359_v26, %v1353_v44  ;;  %v1366_v40 = vld [vmem:[#allocation10 + $0x3d8] sm:$0xff]  ;;  %v1388_v53 = vld [vmem:[#allocation10 + $0x488] sm:$0xff] }
 0x31e   :  { %v1058_v22 = vadd.f32 %v1057_v31, %v1046_v55  ;;  %v5353_v31 = vpack.c.bf16 %v1370_v2, %v1364_v3  ;;  %v1363_v55 = vld [vmem:[#allocation10 + $0x3c0] sm:$0xff]  ;;  %v1394_v44 = vld [vmem:[#allocation10 + $0x4b8] sm:$0xff] }
 0x31f   :  { %6538 = vrsqrt.f32 %v1005_v42  ;;  %v1110_v27 = vadd.f32 %v1109_v52, %v1108_v24  ;;  %v1099_v5 = vadd.f32 %v1098_v34, %v1097_v50  ;;  %v1369_v42 = vld [vmem:[#allocation10 + $0x3f0] sm:$0xff]  ;;  %5486 = vmatpush1.bf16.msra.mxu1 %v5485_v21  ;;  %v5487_v52 = vpack.c.bf16 %v1372_v47, %v1366_v40  ;;  %v1390_v26 = vld [vmem:[#allocation10 + $0x498] sm:$0xff]  ;;  %v1396_v21 = vld [vmem:[#allocation10 + $0x4c8] sm:$0xff] }
 0x320   :  { %v1059_v63 = vmul.f32 0.0057471264, %v1058_v22  ;;  %v1365_v34 = vld [vmem:[#allocation10 + $0x3d0] sm:$0xff]  ;;  %5354 = vmatprep.subr.bf16.mxu0 %v5353_v31  ;;  %v5355_v23 = vpack.c.bf16 %v1369_v42, %v1363_v55  ;;  %v1387_v2 = vld [vmem:[#allocation10 + $0x480] sm:$0xff]  ;;  %v1400_v55 = vld [vmem:[#allocation10 + $0x4e8] sm:$0xff] }
 0x321   :  { %v1111_v8 = vrot.slane %v1110_v27, 1  ;;  %v1100_v25 = vrot.slane %v1099_v5, 1  ;;  %5488 = vmatprep.subr.bf16.mxu1 %v5487_v52  ;;  %v1393_v40 = vld [vmem:[#allocation10 + $0x4b0] sm:$0xff]  ;;  %v1395_v31 = vld [vmem:[#allocation10 + $0x4c0] sm:$0xff]  ;;  %v1406_v52 = vld [vmem:[#allocation10 + $0x518] sm:$0xff] }
 0x322   :  { %v1060_v35 = vadd.f32 1e-05, %v1059_v63  ;;  %v1371_v63 = vld [vmem:[#allocation10 + $0x400] sm:$0xff]  ;;  %5356 = vmatpush1.bf16.msra.mxu0 %v5355_v23 }
 0x323   :  { %v1112_v19 = vadd.f32 %v1111_v8, %v1110_v27  ;;  %v1101_v6 = vadd.f32 %v1100_v25, %v1099_v5  ;;  %v5489_v38 = vpack.c.bf16 %v1371_v63, %v1365_v34  ;;  %v1402_v34 = vld [vmem:[#allocation10 + $0x4f8] sm:$0xff]  ;;  %v1408_v63 = vld [vmem:[#allocation10 + $0x528] sm:$0xff] }
 0x324   :  { %6540 = vrsqrt.f32 %v1060_v35  ;;  %v1376_v35 = vld [vmem:[#allocation10 + $0x428] sm:$0xff] }
 0x325   :  { %v1113_v41 = vadd.f32 %v1112_v19, %v1101_v6  ;;  %5490 = vmatpush1.bf16.msra.mxu1 %v5489_v38  ;;  %v1375_v19 = vld [vmem:[#allocation10 + $0x420] sm:$0xff]  ;;  %v5357_v10 = vpack.c.bf16 %v1382_v59, %v1376_v35  ;;  %v1118_v38 = vstv %s7824_s27  ;;  %v5365_v35 = vpack.c.bf16 %v1406_v52, %v1400_v55 }
 0x326   :  { %v5359_v45 = vpack.c.bf16 %v1381_v60, %v1375_v19  ;;  %v5499_v59 = vpack.c.bf16 %v1408_v63, %v1402_v34  ;;  %v1411_v60 = vld [vmem:[#allocation10 + $0x540] sm:$0xff]  ;;  %v1429_v63 = vld [vmem:[#allocation10 + $0x5d0] sm:$0xff] }
 0x327   :  { %v940_v61 = vpop.xlane.xlu0 %939  ;;  %v929_v39 = vpop.xlane.xlu1 %928  ;;  %v1114_v33 = vmul.f32 0.0057471264, %v1113_v41  ;;  %5358 = vmatprep.subr.bf16.mxu0 %v5357_v10 }
 0x328   :  { %v941_v14 = vsel %vm847_vm2, %v940_v61, 0.0  ;;  %v930_v56 = vsel %vm847_vm2, %v929_v39, 0.0  ;;  %5360 = vmatpush1.bf16.msra.mxu0 %v5359_v45 }
 0x329   :  { %v6539_v13 = vpop.eup %6538  ;;  %v942_v24 = vrot.slane %v941_v14, 4  ;;  %v931_v50 = vrot.slane %v930_v56, 4  ;;  %v1115_v62 = vadd.f32 1e-05, %v1114_v33  ;;  %v5493_v33 = vpack.c.bf16 %v1383_v1, %v1377_v30  ;;  %v1417_v30 = vld [vmem:[#allocation10 + $0x570] sm:$0xff] }
 0x32a   :  { %v7819_v22 = vmul.f32 %v6539_v13, %v1008_v28 }
 0x32b   :  { %v943_v27 = vadd.f32 %v942_v24, %v941_v14  ;;  %v932_v5 = vadd.f32 %v931_v50, %v930_v56  ;;  %6542 = vrsqrt.f32 %v1115_v62  ;;  %v5361_v14 = vpack.c.bf16 %v1394_v44, %v1388_v53  ;;  %v1389_v56 = vld [vmem:[#allocation10 + $0x490] sm:$0xff] }
 0x32c   :  { %v1010_v17 = vmul.f32 %v7819_v22, %v7732_v9  ;;  %v1160_v20 = vpop.xlane.xlu0 %1159  ;;  %v1149_v49 = vpop.xlane.xlu1 %1148  ;;  %v1384_v9 = vld [vmem:[#allocation10 + $0x468] sm:$0xff]  ;;  %v5495_v50 = vpack.c.bf16 %v1396_v21, %v1390_v26  ;;  %v1413_v44 = vld [vmem:[#allocation10 + $0x550] sm:$0xff]  ;;  %v1419_v26 = vld [vmem:[#allocation10 + $0x580] sm:$0xff] }
 0x32d   :  { %v944_v48 = vrot.slane %v943_v27, 2  ;;  %v933_v8 = vrot.slane %v932_v5, 2  ;;  %v1161_v25 = vsel %vm847_vm2, %v1160_v20, 0.0  ;;  %v1150_v43 = vsel %vm847_vm2, %v1149_v49, 0.0  ;;  %5362 = vmatprep.subr.bf16.mxu0 %v5361_v14 }
 0x32e   :  { %v6541_v4 = vpop.eup %6540  ;;  %1182 = vrot.lane.b32.xlu1 %v1010_v17, %s6935_s7  ;;  %v1162_v6 = vrot.slane %v1161_v25, 4  ;;  %v1151_v57 = vrot.slane %v1150_v43, 4  ;;  %v5491_v28 = vpack.c.bf16 %v1384_v9, %v1378_v46  ;;  %v1405_v17 = vld [vmem:[#allocation10 + $0x510] sm:$0xff]  ;;  %v1407_v46 = vld [vmem:[#allocation10 + $0x520] sm:$0xff]  ;;  %v1420_v9 = vld [vmem:[#allocation10 + $0x588] sm:$0xff] }
 0x32f   :  { %v7828_v54 = vmul.f32 %v6541_v4, %v1063_v29  ;;  %v945_v36 = vadd.f32 %v944_v48, %v943_v27  ;;  %v934_v41 = vadd.f32 %v933_v8, %v932_v5  ;;  %v5497_v27 = vpack.c.bf16 %v1395_v31, %v1389_v56  ;;  %v1399_v5 = vld [vmem:[#allocation10 + $0x4e0] sm:$0xff]  ;;  %v1401_v29 = vld [vmem:[#allocation10 + $0x4f0] sm:$0xff]  ;;  %v1412_v4 = vld [vmem:[#allocation10 + $0x548] sm:$0xff] }
 0x330   :  { %v1163_v3 = vadd.f32 %v1162_v6, %v1161_v25  ;;  %v1152_v61 = vadd.f32 %v1151_v57, %v1150_v43  ;;  %5492 = vmatprep.subr.bf16.mxu1 %v5491_v28  ;;  %v1418_v48 = vld [vmem:[#allocation10 + $0x578] sm:$0xff]  ;;  %v5367_v25 = vpack.c.bf16 %v1405_v17, %v1399_v5 }
 0x331   :  { %v1065_v39 = vmul.f32 %v7828_v54, %v7745_v58  ;;  %v946_v47 = vrot.slane %v945_v36, 1  ;;  %v935_v13 = vrot.slane %v934_v41, 1  ;;  %v5363_v58 = vpack.c.bf16 %v1393_v40, %v1387_v2  ;;  %5494 = vmatpush1.bf16.msra.mxu1 %v5493_v33  ;;  %v1414_v43 = vld [vmem:[#allocation10 + $0x558] sm:$0xff] }
 0x332   :  { %v1164_v42 = vrot.slane %v1163_v3, 2  ;;  %v1153_v24 = vrot.slane %v1152_v61, 2  ;;  %5496 = vmatprep.subr.bf16.mxu1 %v5495_v50  ;;  %v5369_v10 = vpack.c.bf16 %v1418_v48, %v1412_v4  ;;  %v5503_v53 = vpack.c.bf16 %v1420_v9, %v1414_v43  ;;  %v1430_v56 = vld [vmem:[#allocation10 + $0x5d8] sm:$0xff]  ;;  %v1432_v50 = vld [vmem:[#allocation10 + $0x5e8] sm:$0xff] }
 0x333   :  { %1186 = vrot.lane.b32.xlu0 %v1065_v39, %s6936_s11  ;;  %v947_v62 = vadd.f32 %v946_v47, %v945_v36  ;;  %v936_v23 = vadd.f32 %v935_v13, %v934_v41  ;;  %5364 = vmatpush1.bf16.msra.mxu0 %v5363_v58  ;;  %v5501_v41 = vpack.c.bf16 %v1407_v46, %v1401_v29  ;;  %v1423_v58 = vld [vmem:[#allocation10 + $0x5a0] sm:$0xff]  ;;  %v1436_v29 = vld [vmem:[#allocation10 + $0x608] sm:$0xff]  ;;  %v953_v43 = vstv %s7838_s24 }
 0x334   :  { %v1165_v20 = vadd.f32 %v1164_v42, %v1163_v3  ;;  %v1154_v49 = vadd.f32 %v1153_v24, %v1152_v61  ;;  %5366 = vmatprep.subr.bf16.mxu0 %v5365_v35  ;;  %v5371_v39 = vpack.c.bf16 %v1417_v30, %v1411_v60  ;;  %v5505_v47 = vpack.c.bf16 %v1419_v26, %v1413_v44  ;;  %v1426_v24 = vld [vmem:[#allocation10 + $0x5b8] sm:$0xff]  ;;  %v1444_v4 = vld [vmem:[#allocation10 + $0x648] sm:$0xff] }
 0x335   :  { %v948_v8 = vadd.f32 %v947_v62, %v936_v23  ;;  %v6543_v19 = vpop.eup %6542  ;;  %5498 = vmatpush1.bf16.msra.mxu1 %v5497_v27  ;;  %v5507_v34 = vpack.c.bf16 %v1432_v50, %v1426_v24  ;;  %v1425_v62 = vld [vmem:[#allocation10 + $0x5b0] sm:$0xff]  ;;  %v1431_v23 = vld [vmem:[#allocation10 + $0x5e0] sm:$0xff]  ;;  %v5375_v5 = vpack.c.bf16 %v1429_v63, %v1423_v58  ;;  %v1011_v44 = vmul.f32 %v7819_v22, %v7729_v15 }
 0x336   :  { %v1166_v6 = vrot.slane %v1165_v20, 1  ;;  %v1155_v57 = vrot.slane %v1154_v49, 1  ;;  %v7833_v36 = vmul.f32 %v6543_v19, %v1118_v38  ;;  %5500 = vmatprep.subr.bf16.mxu1 %v5499_v59  ;;  %v5509_v17 = vpack.c.bf16 %v1431_v23, %v1425_v62  ;;  %v1447_v58 = vld [vmem:[#allocation10 + $0x660] sm:$0xff]  ;;  %v1449_v62 = vld [vmem:[#allocation10 + $0x670] sm:$0xff] }
 0x337   :  { %v949_v1 = vmul.f32 0.0057471264, %v948_v8  ;;  %5368 = vmatpush1.bf16.msra.mxu0 %v5367_v25  ;;  %v898_v15 = vstv %s897_s6  ;;  %v1455_v23 = vld [vmem:[#allocation10 + $0x6a0] sm:$0xff] }
 0x338   :  { %v1167_v28 = vadd.f32 %v1166_v6, %v1165_v20  ;;  %v1156_v45 = vadd.f32 %v1155_v57, %v1154_v49  ;;  %v1120_v61 = vmul.f32 %v7833_v36, %v7759_v16  ;;  %5370 = vmatprep.subr.bf16.mxu0 %v5369_v10  ;;  %v1424_v16 = vld [vmem:[#allocation10 + $0x5a8] sm:$0xff]  ;;  %v1442_v20 = vld [vmem:[#allocation10 + $0x638] sm:$0xff] }
 0x339   :  { %v950_v3 = vadd.f32 1e-05, %v949_v1  ;;  %5502 = vmatpush1.bf16.msra.mxu1 %v5501_v41  ;;  %v5373_v42 = vpack.c.bf16 %v1430_v56, %v1424_v16  ;;  %v1438_v49 = vld [vmem:[#allocation10 + $0x618] sm:$0xff]  ;;  %v5377_v46 = vpack.c.bf16 %v1442_v20, %v1436_v29  ;;  %v1468_v29 = vld [vmem:[#allocation10 + $0x708] sm:$0xff] }
 0x33a   :  { %v1168_v21 = vadd.f32 %v1167_v28, %v1156_v45  ;;  %1190 = vrot.lane.b32.xlu1 %v1120_v61, %s6915_s26  ;;  %5504 = vmatprep.subr.bf16.mxu1 %v5503_v53  ;;  %s7842_s26 = sld [smem:[#allocation9 + $0x5]]  ;;  %v5511_v48 = vpack.c.bf16 %v1444_v4, %v1438_v49  ;;  %v1121_v61 = vmul.f32 %v7833_v36, %v7756_v7  ;;  %v1450_v16 = vld [vmem:[#allocation10 + $0x678] sm:$0xff] }
 0x33b   :  { %6544 = vrsqrt.f32 %v950_v3  ;;  %v885_v2 = vpop.xlane.xlu0 %884  ;;  %v874_v40 = vpop.xlane.xlu1 %873  ;;  %5372 = vmatpush1.bf16.msra.mxu0 %v5371_v39 }
 0x33c   :  { %v1169_v13 = vmul.f32 0.0057471264, %v1168_v21  ;;  %v886_v33 = vsel %vm847_vm2, %v885_v2, 0.0  ;;  %v875_v14 = vsel %vm847_vm2, %v874_v40, 0.0  ;;  %5374 = vmatprep.subr.bf16.mxu0 %v5373_v42  ;;  %v1435_v40 = vld [vmem:[#allocation10 + $0x600] sm:$0xff] }
 0x33d   :  { %v887_v31 = vrot.slane %v886_v33, 4  ;;  %v876_v55 = vrot.slane %v875_v14, 4  ;;  %5506 = vmatpush1.bf16.msra.mxu1 %v5505_v47  ;;  %v1441_v47 = vld [vmem:[#allocation10 + $0x630] sm:$0xff] }
 0x33e   :  { %v1170_v52 = vadd.f32 1e-05, %v1169_v13  ;;  %5508 = vmatprep.subr.bf16.mxu1 %v5507_v34  ;;  %v1437_v13 = vld [vmem:[#allocation10 + $0x610] sm:$0xff]  ;;  %v5379_v24 = vpack.c.bf16 %v1441_v47, %v1435_v40  ;;  %v1491_v47 = vld [vmem:[#allocation10 + $0x7c0] sm:$0xff] }
 0x33f   :  { %v888_v38 = vadd.f32 %v887_v31, %v886_v33  ;;  %v877_v27 = vadd.f32 %v876_v55, %v875_v14  ;;  %5376 = vmatpush1.bf16.msra.mxu0 %v5375_v5  ;;  %v1443_v33 = vld [vmem:[#allocation10 + $0x640] sm:$0xff]  ;;  %v1454_v14 = vld [vmem:[#allocation10 + $0x698] sm:$0xff]  ;;  %v1485_v40 = vld [vmem:[#allocation10 + $0x790] sm:$0xff] }
 0x340   :  { %6546 = vrsqrt.f32 %v1170_v52  ;;  %5378 = vmatprep.subr.bf16.mxu0 %v5377_v46  ;;  %v1173_v1 = vstv %s7842_s26  ;;  %v5513_v50 = vpack.c.bf16 %v1443_v33, %v1437_v13  ;;  %v1453_v52 = vld [vmem:[#allocation10 + $0x690] sm:$0xff]  ;;  %v1466_v5 = vld [vmem:[#allocation10 + $0x6f8] sm:$0xff] }
 0x341   :  { %v889_v35 = vrot.slane %v888_v38, 2  ;;  %v878_v59 = vrot.slane %v877_v27, 2  ;;  %5510 = vmatpush1.bf16.msra.mxu1 %v5509_v17  ;;  %v1462_v17 = vld [vmem:[#allocation10 + $0x6d8] sm:$0xff]  ;;  %v5383_v49 = vpack.c.bf16 %v1453_v52, %v1447_v58  ;;  %v1465_v46 = vld [vmem:[#allocation10 + $0x6f0] sm:$0xff]  ;;  %v1508_v58 = vld [vmem:[#allocation10 + $0x848] sm:$0xff] }
 0x342   :  { %5512 = vmatprep.subr.bf16.mxu1 %v5511_v48  ;;  %v5519_v48 = vpack.c.bf16 %v1468_v29, %v1462_v17  ;;  %v1502_v13 = vld [vmem:[#allocation10 + $0x818] sm:$0xff] }
 0x343   :  { %v890_v8 = vadd.f32 %v889_v35, %v888_v38  ;;  %v879_v25 = vadd.f32 %v878_v59, %v877_v27  ;;  %v1460_v38 = vld [vmem:[#allocation10 + $0x6c8] sm:$0xff]  ;;  %v5517_v35 = vpack.c.bf16 %v1455_v23, %v1449_v62  ;;  %v1459_v59 = vld [vmem:[#allocation10 + $0x6c0] sm:$0xff]  ;;  %v1498_v33 = vld [vmem:[#allocation10 + $0x7f8] sm:$0xff] }
 0x344   :  { %v5385_v4 = vpack.c.bf16 %v1466_v5, %v1460_v38  ;;  %v1514_v52 = vld [vmem:[#allocation10 + $0x878] sm:$0xff]  ;;  %v1507_v38 = vld [vmem:[#allocation10 + $0x840] sm:$0xff]  ;;  %v1513_v5 = vld [vmem:[#allocation10 + $0x870] sm:$0xff] }
 0x345   :  { %v6545_v9 = vpop.eup %6544  ;;  %v891_v19 = vrot.slane %v890_v8, 1  ;;  %v880_v6 = vrot.slane %v879_v25, 1  ;;  %v5401_v17 = vpack.c.bf16 %v1514_v52, %v1508_v58  ;;  %v1557_v58 = vld [vmem:[#allocation10 + $0x9d0] sm:$0xff]  ;;  %v1563_v52 = vld [vmem:[#allocation10 + $0xa00] sm:$0xff] }
 0x346   :  { %v954_v57 = vmul.f32 %v6545_v9, %v953_v43  ;;  %v1472_v43 = vld [vmem:[#allocation10 + $0x728] sm:$0xff]  ;;  %v1478_v9 = vld [vmem:[#allocation10 + $0x758] sm:$0xff] }
 0x347   :  { %v892_v10 = vadd.f32 %v891_v19, %v890_v8  ;;  %v881_v60 = vadd.f32 %v880_v6, %v879_v25  ;;  %v1461_v8 = vld [vmem:[#allocation10 + $0x6d0] sm:$0xff]  ;;  %v1467_v25 = vld [vmem:[#allocation10 + $0x700] sm:$0xff]  ;;  %v1474_v19 = vld [vmem:[#allocation10 + $0x738] sm:$0xff] }
 0x348   :  { %v955_v30 = vmul.f32 %v954_v57, %v7773_v51  ;;  %v1066_v51 = vmul.f32 %v7828_v54, %v7742_v0  ;;  %v956_v0 = vmul.f32 %v954_v57, %v7770_v37  ;;  %v1456_v37 = vld [vmem:[#allocation10 + $0x6a8] sm:$0xff] }
 0x349   :  { %v893_v41 = vadd.f32 %v892_v10, %v881_v60  ;;  %v5515_v63 = vpack.c.bf16 %v1456_v37, %v1450_v16  ;;  %v1480_v6 = vld [vmem:[#allocation10 + $0x768] sm:$0xff]  ;;  %v5387_v10 = vpack.c.bf16 %v1465_v46, %v1459_v59  ;;  %v5521_v60 = vpack.c.bf16 %v1467_v25, %v1461_v8  ;;  %v1495_v37 = vld [vmem:[#allocation10 + $0x7e0] sm:$0xff]  ;;  %v1526_v59 = vld [vmem:[#allocation10 + $0x8d8] sm:$0xff] }
 0x34a   :  { %v6547_v28 = vpop.eup %6546  ;;  %1178 = vrot.lane.b32.xlu1 %v955_v30, %s6937_s28  ;;  %v1471_v30 = vld [vmem:[#allocation10 + $0x720] sm:$0xff]  ;;  %v5529_v16 = vpack.c.bf16 %v1491_v47, %v1485_v40  ;;  %v1522_v46 = vld [vmem:[#allocation10 + $0x8b8] sm:$0xff] }
 0x34b   :  { %v894_v45 = vmul.f32 0.0057471264, %v893_v41  ;;  %v1174_v53 = vmul.f32 %v6547_v28, %v1173_v1  ;;  %v1477_v1 = vld [vmem:[#allocation10 + $0x750] sm:$0xff]  ;;  %v5389_v41 = vpack.c.bf16 %v1478_v9, %v1472_v43  ;;  %v5523_v28 = vpack.c.bf16 %v1480_v6, %v1474_v19  ;;  %v1519_v25 = vld [vmem:[#allocation10 + $0x8a0] sm:$0xff] }
 0x34c   :  { %v1525_v43 = vld [vmem:[#allocation10 + $0x8d0] sm:$0xff] }
 0x34d   :  { %v895_v26 = vadd.f32 1e-05, %v894_v45  ;;  %v1175_v3 = vmul.f32 %v1174_v53, %v7786_v32  ;;  %v1176_v32 = vmul.f32 %v1174_v53, %v7783_v11  ;;  %v1473_v45 = vld [vmem:[#allocation10 + $0x730] sm:$0xff]  ;;  %v1479_v53 = vld [vmem:[#allocation10 + $0x760] sm:$0xff] }
 0x34e   :  { %1206 = vrot.lane.b32.xlu1 %v1011_v44, %s6938_s29  ;;  %v1484_v44 = vld [vmem:[#allocation10 + $0x788] sm:$0xff]  ;;  %v1521_v6 = vld [vmem:[#allocation10 + $0x8b0] sm:$0xff] }
 0x34f   :  { %6548 = vrsqrt.f32 %v895_v26  ;;  %1194 = vrot.lane.b32.xlu0 %v1175_v3, %s6939_s14  ;;  %v1490_v3 = vld [vmem:[#allocation10 + $0x7b8] sm:$0xff] }
 0x353   :  { %1210 = vrot.lane.b32.xlu0 %v1066_v51, %s6940_s8  ;;  %v1486_v51 = vld [vmem:[#allocation10 + $0x798] sm:$0xff] }
 0x357   :  { %1214 = vrot.lane.b32.xlu0 %v1121_v61, %s6941_s0  ;;  %v1492_v61 = vld [vmem:[#allocation10 + $0x7c8] sm:$0xff] }
 0x359   :  { %v6549_v22 = vpop.eup %6548 }
 0x35a   :  { %v899_v39 = vmul.f32 %v6549_v22, %v898_v15 }
 0x35b   :  { %1218 = vrot.lane.b32.xlu0 %v1176_v32, %s6942_s19 }
 0x35c   :  { %v901_v21 = vmul.f32 %v899_v39, %v7795_v12  ;;  %v900_v11 = vmul.f32 %v899_v39, %v7798_v18  ;;  %v1448_v12 = vld [vmem:[#allocation10 + $0x668] sm:$0xff]  ;;  %v5391_v39 = vpack.c.bf16 %v1477_v1, %v1471_v30  ;;  %v1534_v30 = vld [vmem:[#allocation10 + $0x918] sm:$0xff] }
 0x35d   :  { %v5381_v34 = vpack.c.bf16 %v1454_v14, %v1448_v12  ;;  %v1504_v12 = vld [vmem:[#allocation10 + $0x828] sm:$0xff] }
 0x35e   :  { %1198 = vrot.lane.b32.xlu1 %v901_v21, %s6919_s30  ;;  %v5525_v21 = vpack.c.bf16 %v1479_v53, %v1473_v45  ;;  %v1540_v1 = vld [vmem:[#allocation10 + $0x948] sm:$0xff]  ;;  %v1531_v45 = vld [vmem:[#allocation10 + $0x900] sm:$0xff]  ;;  %v1537_v53 = vld [vmem:[#allocation10 + $0x930] sm:$0xff]  ;;  %s6948_s30 = smov [#allocation28]  }
 0x35f   :  { %s4965_s12 = sshll.u32 %s6948_s30, 4  ;;  %s4966_s12 = int_to_ptr.vmem [resolvable:$true] %s4965_s12 }
 0x360   :  { %s6870_s5 = scalar_lea.vmem %s4966_s12, 32  ;;  %p6875_p2 = scmp.lt.s32.totalorder %s4966_s12, %s4966_s12 }
 0x361   :  { %p6871_p1 = scmp.ne.s32.totalorder %s4966_s12, %s6870_s5  ;;  %p6876_p3 = scmp.lt.s32.totalorder %s6870_s5, %s6870_s5 }
 0x362   :  { %1202 = vrot.lane.b32.xlu1 %v956_v0, %s6943_s1  ;;  %v1483_v0 = vld [vmem:[#allocation10 + $0x780] sm:$0xff] }
 0x363   :  { %p6877_p4 = por %p6876_p3, %p6875_p2 }
 0x365   :  { %p6878_p5 = pnand %p6877_p4, %p6871_p1 }
 0x3a0   :  { %v1183_v54 = vpop.permute.xlu1 %1182 }
 0x3a5   :  { %v1187_v7 = vpop.permute.xlu0 %1186 }
 0x3a6   :  { %v1226_v56 = vsel %vm1225_vm3, %v1183_v54, %v1187_v7  ;;  %v5393_v7 = vpack.c.bf16 %v1490_v3, %v1484_v44  ;;  %v5543_v3 = vpack.c.bf16 %v1540_v1, %v1534_v30  ;;  %v1592_v30 = vld [vmem:[#allocation10 + $0xae8] sm:$0xff]  ;;  %v1598_v1 = vld [vmem:[#allocation10 + $0xb18] sm:$0xff]  ;;  %vm3533_vm3 = vcmask 523264  }
 0x3ac   :  { %v1191_v2 = vpop.permute.xlu1 %1190 }
 0x3ad   :  { %v1228_v55 = vsel %vm1227_vm5, %v1226_v56, %v1191_v2  ;;  %v1501_v56 = vld [vmem:[#allocation10 + $0x810] sm:$0xff]  ;;  %vm6947_vm5 = vmmov 0  }
 0x3ae   :  { %v5399_v62 = vpack.c.bf16 %v1501_v56, %v1495_v37 }
 0x3bc   :  { %v1179_v36 = vpop.permute.xlu1 %1178 }
 0x3bd   :  { %v1222_v31 = vsel %vm1221_vm4, %v900_v11, %v1179_v36  ;;  %v5527_v36 = vpack.c.bf16 %v1492_v61, %v1486_v51  ;;  %v1496_v11 = vld [vmem:[#allocation10 + $0x7e8] sm:$0xff]  ;;  %v1533_v51 = vld [vmem:[#allocation10 + $0x910] sm:$0xff]  ;;  %v1539_v61 = vld [vmem:[#allocation10 + $0x940] sm:$0xff]  ;;  %vm3761_vm4 = vcmask 130048  }
 0x3be   :  { %v7864_v27 = vsel %vm1223_vm7, %v1222_v31, %v1183_v54  ;;  %v1489_v54 = vld [vmem:[#allocation10 + $0x7b0] sm:$0xff]  ;;  %v5397_v31 = vpack.c.bf16 %v1502_v13, %v1496_v11  ;;  %v1551_v13 = vld [vmem:[#allocation10 + $0x9a0] sm:$0xff] }
 0x3bf   :  { %v5395_v14 = vpack.c.bf16 %v1489_v54, %v1483_v0  ;;  %v5411_v0 = vpack.c.bf16 %v1537_v53, %v1531_v45  ;;  %v5545_v54 = vpack.c.bf16 %v1539_v61, %v1533_v51  ;;  %v1545_v11 = vld [vmem:[#allocation10 + $0x970] sm:$0xff]  ;;  %v5429_v51 = vpack.c.bf16 %v1598_v1, %v1592_v30  ;;  %v2349_v1 = vld [vmem:[#allocation12 + $0x60] sm:$0xff] }
 0x3c0   :  { %v7870_v26 = vpop.permute.xlu1 %1206  ;;  %v5549_v56 = vpack.c.bf16 %v1551_v13, %v1545_v11 }
 0x3c1   :  { %v7859_v42 = vpop.permute.xlu0 %1194 }
 0x3c2   :  { %v7862_v18 = vsel %vm1229_vm6, %v1228_v55, %v7859_v42  ;;  %v5531_v55 = vpack.c.bf16 %v1504_v12, %v1498_v33  ;;  %v1556_v33 = vld [vmem:[#allocation10 + $0x9c8] sm:$0xff]  ;;  %v1562_v12 = vld [vmem:[#allocation10 + $0x9f8] sm:$0xff] }
 0x3c3   :  { %1756 = vmatprep.mubr.f32.mxu0 %v7862_v18  ;;  %1969 = vmatprep.mubr.f32.mxu1 %v7862_v18 }
 0x3c4   :  { %1757 = vmatmul.mubr.f32.vlgmr.msra.gmra.mrb[0].mxu0 %v7864_v27  ;;  %1970 = vmatmul.mubr.f32.vlgmr.msra.gmra.mrb[0].mxu1 %v7864_v27 }
 0x3c5   :  { %5380 = vmatpush1.bf16.msra.mxu0 %v5379_v24  ;;  %5514 = vmatpush1.bf16.msra.mxu1 %v5513_v50  ;;  %v1211_v20 = vpop.permute.xlu0 %1210  ;;  %v1497_v24 = vld [vmem:[#allocation10 + $0x7f0] sm:$0xff]  ;;  %v1503_v50 = vld [vmem:[#allocation10 + $0x820] sm:$0xff] }
 0x3c6   :  { %5382 = vmatprep.subr.bf16.mxu0 %v5381_v34  ;;  %5516 = vmatprep.subr.bf16.mxu1 %v5515_v63  ;;  %v1238_v15 = vsel %vm1237_vm8, %v7870_v26, %v1211_v20  ;;  %v1510_v34 = vld [vmem:[#allocation10 + $0x858] sm:$0xff]  ;;  %v1516_v63 = vld [vmem:[#allocation10 + $0x888] sm:$0xff]  ;;  %v5533_v23 = vpack.c.bf16 %v1503_v50, %v1497_v24  ;;  %v1509_v20 = vld [vmem:[#allocation10 + $0x850] sm:$0xff]  ;;  %v5417_v24 = vpack.c.bf16 %v1562_v12, %v1556_v33 }
 0x3c7   :  { %v5535_v29 = vpack.c.bf16 %v1516_v63, %v1510_v34  ;;  %v1568_v34 = vld [vmem:[#allocation10 + $0xa28] sm:$0xff]  ;;  %v1574_v63 = vld [vmem:[#allocation10 + $0xa58] sm:$0xff]  ;;  %v1605_v33 = vld [vmem:[#allocation10 + $0xb50] sm:$0xff] }
 0x3c8   :  { %v1611_v12 = vld [vmem:[#allocation10 + $0xb80] sm:$0xff] }
 0x3c9   :  { %5384 = vmatpush1.bf16.msra.mxu0 %v5383_v49  ;;  %5518 = vmatpush1.bf16.msra.mxu1 %v5517_v35  ;;  %v1215_v57 = vpop.permute.xlu0 %1214  ;;  %v1515_v49 = vld [vmem:[#allocation10 + $0x880] sm:$0xff]  ;;  %v1520_v35 = vld [vmem:[#allocation10 + $0x8a8] sm:$0xff] }
 0x3ca   :  { %5386 = vmatprep.subr.bf16.mxu0 %v5385_v4  ;;  %5520 = vmatprep.subr.bf16.mxu1 %v5519_v48  ;;  %v1240_v22 = vsel %vm1239_vm9, %v1238_v15, %v1215_v57  ;;  %v1528_v4 = vld [vmem:[#allocation10 + $0x8e8] sm:$0xff]  ;;  %v5403_v48 = vpack.c.bf16 %v1513_v5, %v1507_v38  ;;  %v5537_v8 = vpack.c.bf16 %v1515_v49, %v1509_v20  ;;  %v1527_v57 = vld [vmem:[#allocation10 + $0x8e0] sm:$0xff] }
 0x3cb   :  { %v5405_v9 = vpack.c.bf16 %v1526_v59, %v1520_v35  ;;  %v5539_v19 = vpack.c.bf16 %v1528_v4, %v1522_v46  ;;  %v1544_v15 = vld [vmem:[#allocation10 + $0x968] sm:$0xff]  ;;  %v5553_v5 = vpack.c.bf16 %v1563_v52, %v1557_v58  ;;  %v5421_v20 = vpack.c.bf16 %v1574_v63, %v1568_v34  ;;  %v1569_v35 = vld [vmem:[#allocation10 + $0xa30] sm:$0xff]  ;;  %v1575_v59 = vld [vmem:[#allocation10 + $0xa60] sm:$0xff] }
 0x3cc   :  { %v1580_v46 = vld [vmem:[#allocation10 + $0xa88] sm:$0xff]  ;;  %v1586_v4 = vld [vmem:[#allocation10 + $0xab8] sm:$0xff]  ;;  %v1621_v58 = vld [vmem:[#allocation10 + $0xbd0] sm:$0xff] }
 0x3cd   :  { %5388 = vmatpush1.bf16.msra.mxu0 %v5387_v10  ;;  %5522 = vmatpush1.bf16.msra.mxu1 %v5521_v60  ;;  %v7874_v32 = vpop.permute.xlu0 %1218  ;;  %v1532_v10 = vld [vmem:[#allocation10 + $0x908] sm:$0xff]  ;;  %v1538_v60 = vld [vmem:[#allocation10 + $0x938] sm:$0xff]  ;;  %v1617_v63 = vld [vmem:[#allocation10 + $0xbb0] sm:$0xff] }
 0x3ce   :  { %5390 = vmatprep.subr.bf16.mxu0 %v5389_v41  ;;  %v7877_v2 = vsel %vm1241_vm10, %v1240_v22, %v7874_v32  ;;  %5524 = vmatprep.subr.bf16.mxu1 %v5523_v28  ;;  %v5407_v41 = vpack.c.bf16 %v1525_v43, %v1519_v25  ;;  %v5541_v28 = vpack.c.bf16 %v1527_v57, %v1521_v6  ;;  %v1550_v22 = vld [vmem:[#allocation10 + $0x998] sm:$0xff] }
 0x3cf   :  { %1827 = vmatprep.mubr.f32.mxu0 %v7877_v2  ;;  %2040 = vmatprep.mubr.f32.mxu1 %v7877_v2  ;;  %v5409_v44 = vpack.c.bf16 %v1538_v60, %v1532_v10  ;;  %v5413_v40 = vpack.c.bf16 %v1550_v22, %v1544_v15  ;;  %v5557_v43 = vpack.c.bf16 %v1575_v59, %v1569_v35  ;;  %v1581_v10 = vld [vmem:[#allocation10 + $0xa90] sm:$0xff]  ;;  %v1587_v60 = vld [vmem:[#allocation10 + $0xac0] sm:$0xff] }
 0x3d0   :  { %v5425_v6 = vpack.c.bf16 %v1586_v4, %v1580_v46  ;;  %v5561_v53 = vpack.c.bf16 %v1587_v60, %v1581_v10  ;;  %v1593_v15 = vld [vmem:[#allocation10 + $0xaf0] sm:$0xff]  ;;  %v1599_v22 = vld [vmem:[#allocation10 + $0xb20] sm:$0xff]  ;;  %v1636_v10 = vld [vmem:[#allocation10 + $0xc48] sm:$0x3] }
 0x3d1   :  { %5392 = vmatpush1.bf16.msra.mxu0 %v5391_v39  ;;  %5526 = vmatpush1.bf16.msra.mxu1 %v5525_v21  ;;  %v1546_v39 = vld [vmem:[#allocation10 + $0x978] sm:$0xff]  ;;  %v1552_v21 = vld [vmem:[#allocation10 + $0x9a8] sm:$0xff]  ;;  %v2337_v35 = vld [vmem:[#allocation12] sm:$0xff] }
 0x3d2   :  { %5394 = vmatprep.subr.bf16.mxu0 %v5393_v7  ;;  %5528 = vmatprep.subr.bf16.mxu1 %v5527_v36  ;;  %v1543_v7 = vld [vmem:[#allocation10 + $0x960] sm:$0xff]  ;;  %v1549_v36 = vld [vmem:[#allocation10 + $0x990] sm:$0xff]  ;;  %v5547_v47 = vpack.c.bf16 %v1552_v21, %v1546_v39  ;;  %v1604_v39 = vld [vmem:[#allocation10 + $0xb48] sm:$0xff] }
 0x3d3   :  { %v5415_v37 = vpack.c.bf16 %v1549_v36, %v1543_v7  ;;  %v1610_v21 = vld [vmem:[#allocation10 + $0xb78] sm:$0xff]  ;;  %v5565_v36 = vpack.c.bf16 %v1599_v22, %v1593_v15  ;;  %v1627_v4 = vld [vmem:[#allocation10 + $0xc00] sm:$0xff]  ;;  %v2367_v22 = vld [vmem:[#allocation12 + $0xf0] sm:$0xff] }
 0x3d4   :  { %v5433_v11 = vpack.c.bf16 %v1610_v21, %v1604_v39  ;;  %v8371_v39 = vmov 0.0   ;;  %v1248_v21 = vld [vmem:[#allocation10 + $0x28] sm:$0xff] }
 0x3d5   :  { %5396 = vmatpush1.bf16.msra.mxu0 %v5395_v14  ;;  %5530 = vmatpush1.bf16.msra.mxu1 %v5529_v16  ;;  %v1558_v14 = vld [vmem:[#allocation10 + $0x9d8] sm:$0xff]  ;;  %v1564_v16 = vld [vmem:[#allocation10 + $0xa08] sm:$0xff] }
 0x3d6   :  { %5398 = vmatprep.subr.bf16.mxu0 %v5397_v31  ;;  %5532 = vmatprep.subr.bf16.mxu1 %v5531_v55  ;;  %v1555_v31 = vld [vmem:[#allocation10 + $0x9c0] sm:$0xff]  ;;  %v1561_v55 = vld [vmem:[#allocation10 + $0x9f0] sm:$0xff]  ;;  %v5551_v50 = vpack.c.bf16 %v1564_v16, %v1558_v14  ;;  %v1616_v14 = vld [vmem:[#allocation10 + $0xba8] sm:$0xff]  ;;  %v1199_v16 = vpop.permute.xlu1 %1198 }
 0x3d7   :  { %v5419_v38 = vpack.c.bf16 %v1561_v55, %v1555_v31  ;;  %v1624_v31 = vld [vmem:[#allocation10 + $0xbe8] sm:$0xff] }
 0x3d9   :  { %5400 = vmatpush1.bf16.msra.mxu0 %v5399_v62  ;;  %5534 = vmatpush1.bf16.msra.mxu1 %v5533_v23  ;;  %v1570_v62 = vld [vmem:[#allocation10 + $0xa38] sm:$0xff]  ;;  %v1576_v23 = vld [vmem:[#allocation10 + $0xa68] sm:$0xff] }
 0x3da   :  { %5402 = vmatprep.subr.bf16.mxu0 %v5401_v17  ;;  %5536 = vmatprep.subr.bf16.mxu1 %v5535_v29  ;;  %v1567_v17 = vld [vmem:[#allocation10 + $0xa20] sm:$0xff]  ;;  %v1573_v29 = vld [vmem:[#allocation10 + $0xa50] sm:$0xff]  ;;  %v5555_v49 = vpack.c.bf16 %v1576_v23, %v1570_v62  ;;  %v2338_v23 = vld [vmem:[#allocation12 + $0x8] sm:$0xff] }
 0x3db   :  { %v5423_v25 = vpack.c.bf16 %v1573_v29, %v1567_v17  ;;  %v1623_v62 = vld [vmem:[#allocation10 + $0xbe0] sm:$0xff]  ;;  %v2344_v17 = vld [vmem:[#allocation12 + $0x38] sm:$0xff]  ;;  %v1203_v29 = vpop.permute.xlu1 %1202 }
 0x3dc   :  { %v5715_v46 = vpack.c.bf16 %v2344_v17, %v2338_v23  ;;  %v1272_v23 = vld [vmem:[#allocation10 + $0xe8] sm:$0xff]  ;;  %v2404_v17 = vld [vmem:[#allocation12 + $0x218] sm:$0xff] }
 0x3dd   :  { %5404 = vmatpush1.bf16.msra.mxu0 %v5403_v48  ;;  %5538 = vmatpush1.bf16.msra.mxu1 %v5537_v8  ;;  %v1582_v48 = vld [vmem:[#allocation10 + $0xa98] sm:$0xff]  ;;  %v1588_v8 = vld [vmem:[#allocation10 + $0xac8] sm:$0xff] }
 0x3de   :  { %5406 = vmatprep.subr.bf16.mxu0 %v5405_v9  ;;  %5540 = vmatprep.subr.bf16.mxu1 %v5539_v19  ;;  %v1579_v9 = vld [vmem:[#allocation10 + $0xa80] sm:$0xff]  ;;  %v1585_v19 = vld [vmem:[#allocation10 + $0xab0] sm:$0xff]  ;;  %v5559_v57 = vpack.c.bf16 %v1588_v8, %v1582_v48 }
 0x3df   :  { %v5427_v45 = vpack.c.bf16 %v1585_v19, %v1579_v9  ;;  %v1633_v48 = vld [vmem:[#allocation10 + $0xc30] sm:$0x3]  ;;  %v2350_v9 = vld [vmem:[#allocation12 + $0x68] sm:$0xff]  ;;  %v2356_v19 = vld [vmem:[#allocation12 + $0x98] sm:$0xff] }
 0x3e0   :  { %v2343_v8 = vld [vmem:[#allocation12 + $0x30] sm:$0xff]  ;;  %v5444_v60 = vpack.c.bf16 %v1633_v48, %v1627_v4 }
 0x3e1   :  { %5408 = vmatpush1.bf16.msra.mxu0 %v5407_v41  ;;  %5542 = vmatpush1.bf16.msra.mxu1 %v5541_v28  ;;  %v1594_v41 = vld [vmem:[#allocation10 + $0xaf8] sm:$0xff]  ;;  %v1600_v28 = vld [vmem:[#allocation10 + $0xb28] sm:$0xff]  ;;  %v5717_v30 = vpack.c.bf16 %v2343_v8, %v2337_v35  ;;  %v1271_v35 = vld [vmem:[#allocation10 + $0xe0] sm:$0xff] }
 0x3e2   :  { %5410 = vmatprep.subr.bf16.mxu0 %v5409_v44  ;;  %5544 = vmatprep.subr.bf16.mxu1 %v5543_v3  ;;  %v1591_v44 = vld [vmem:[#allocation10 + $0xae0] sm:$0xff]  ;;  %v1597_v3 = vld [vmem:[#allocation10 + $0xb10] sm:$0xff]  ;;  %v5563_v61 = vpack.c.bf16 %v1600_v28, %v1594_v41  ;;  %v1284_v8 = vld [vmem:[#allocation10 + $0x148] sm:$0xff] }
 0x3e3   :  { %v5431_v7 = vpack.c.bf16 %v1597_v3, %v1591_v44  ;;  %v2355_v41 = vld [vmem:[#allocation12 + $0x90] sm:$0xff]  ;;  %v2368_v44 = vld [vmem:[#allocation12 + $0xf8] sm:$0xff] }
 0x3e4   :  { %v5721_v3 = vpack.c.bf16 %v2355_v41, %v2349_v1  ;;  %v2403_v48 = vld [vmem:[#allocation12 + $0x210] sm:$0xff] }
 0x3e5   :  { %5412 = vmatpush1.bf16.msra.mxu0 %v5411_v0  ;;  %5546 = vmatpush1.bf16.msra.mxu1 %v5545_v54  ;;  %v1606_v0 = vld [vmem:[#allocation10 + $0xb58] sm:$0xff]  ;;  %v1612_v54 = vld [vmem:[#allocation10 + $0xb88] sm:$0xff]  ;;  %v2415_v41 = vld [vmem:[#allocation12 + $0x270] sm:$0xff] }
 0x3e6   :  { %5414 = vmatprep.subr.bf16.mxu0 %v5413_v40  ;;  %5548 = vmatprep.subr.bf16.mxu1 %v5547_v47  ;;  %v1603_v40 = vld [vmem:[#allocation10 + $0xb40] sm:$0xff]  ;;  %v1609_v47 = vld [vmem:[#allocation10 + $0xb70] sm:$0xff]  ;;  %v5567_v13 = vpack.c.bf16 %v1612_v54, %v1606_v0  ;;  %v1254_v0 = vld [vmem:[#allocation10 + $0x58] sm:$0xff] }
 0x3e7   :  { %v5435_v55 = vpack.c.bf16 %v1609_v47, %v1603_v40  ;;  %v2374_v54 = vld [vmem:[#allocation12 + $0x128] sm:$0xff]  ;;  %v5581_v47 = vpack.c.bf16 %v1254_v0, %v1248_v21  ;;  %v2421_v21 = vld [vmem:[#allocation12 + $0x2a0] sm:$0xff] }
 0x3e9   :  { %5416 = vmatpush1.bf16.msra.mxu0 %v5415_v37  ;;  %5550 = vmatpush1.bf16.msra.mxu1 %v5549_v56  ;;  %v1622_v37 = vld [vmem:[#allocation10 + $0xbd8] sm:$0xff] }
 0x3ea   :  { %5418 = vmatprep.subr.bf16.mxu0 %v5417_v24  ;;  %5552 = vmatprep.subr.bf16.mxu1 %v5551_v50  ;;  %v1618_v56 = vld [vmem:[#allocation10 + $0xbb8] sm:$0xff]  ;;  %v5569_v24 = vpack.c.bf16 %v1611_v12, %v1605_v33  ;;  %v1615_v50 = vld [vmem:[#allocation10 + $0xba0] sm:$0xff]  ;;  %v5437_v52 = vpack.c.bf16 %v1622_v37, %v1616_v14  ;;  %v2379_v14 = vld [vmem:[#allocation12 + $0x150] sm:$0xff] }
 0x3eb   :  { %v5571_v34 = vpack.c.bf16 %v1624_v31, %v1618_v56  ;;  %v2373_v33 = vld [vmem:[#allocation12 + $0x120] sm:$0xff]  ;;  %v1266_v37 = vld [vmem:[#allocation10 + $0xb8] sm:$0xff]  ;;  %v2386_v56 = vld [vmem:[#allocation12 + $0x188] sm:$0xff] }
 0x3ec   :  { %v2392_v31 = vld [vmem:[#allocation12 + $0x1b8] sm:$0xff] }
 0x3ed   :  { %5420 = vmatpush1.bf16.msra.mxu0 %v5419_v38  ;;  %5554 = vmatpush1.bf16.msra.mxu1 %v5553_v5  ;;  %v1628_v38 = vld [vmem:[#allocation10 + $0xc08] sm:$0xff]  ;;  %v1634_v5 = vld [vmem:[#allocation10 + $0xc38] sm:$0x3] }
 0x3ee   :  { %5422 = vmatprep.subr.bf16.mxu0 %v5421_v20  ;;  %5556 = vmatprep.subr.bf16.mxu1 %v5555_v49  ;;  %v5439_v20 = vpack.c.bf16 %v1621_v58, %v1615_v50  ;;  %v5573_v49 = vpack.c.bf16 %v1623_v62, %v1617_v63  ;;  %v5441_v59 = vpack.c.bf16 %v1634_v5, %v1628_v38  ;;  %v1259_v58 = vld [vmem:[#allocation10 + $0x80] sm:$0xff]  ;;  %v2391_v62 = vld [vmem:[#allocation12 + $0x1b0] sm:$0xff]  ;;  %v1278_v38 = vld [vmem:[#allocation10 + $0x118] sm:$0xff] }
 0x3ef   :  { %v5731_v63 = vpack.c.bf16 %v2392_v31, %v2386_v56  ;;  %v2398_v5 = vld [vmem:[#allocation12 + $0x1e8] sm:$0xff]  ;;  %v2439_v56 = vld [vmem:[#allocation12 + $0x330] sm:$0xff] }
 0x3f0   :  { %v5735_v4 = vpack.c.bf16 %v2404_v17, %v2398_v5  ;;  %v1320_v31 = vld [vmem:[#allocation10 + $0x268] sm:$0xff]  ;;  %v2451_v5 = vld [vmem:[#allocation12 + $0x390] sm:$0xff] }
 0x3f1   :  { %5424 = vmatpush1.bf16.msra.mxu0 %v5423_v25  ;;  %5558 = vmatpush1.bf16.msra.mxu1 %v5557_v43  ;;  %v1232_v25 = vsel %vm1231_vm11, %v7859_v42, %v1199_v16  ;;  %v5719_v42 = vpack.c.bf16 %v2356_v19, %v2350_v9  ;;  %v1260_v16 = vld [vmem:[#allocation10 + $0x88] sm:$0xff]  ;;  %v2416_v19 = vld [vmem:[#allocation12 + $0x278] sm:$0xff] }
 0x3f2   :  { %5426 = vmatprep.subr.bf16.mxu0 %v5425_v6  ;;  %5560 = vmatprep.subr.bf16.mxu1 %v5559_v57  ;;  %v1234_v6 = vsel %vm1233_vm12, %v1232_v25, %v1203_v29  ;;  %v1630_v57 = vld [vmem:[#allocation10 + $0xc18] sm:$0xff]  ;;  %v5585_v50 = vpack.c.bf16 %v1266_v37, %v1260_v16  ;;  %v2410_v9 = vld [vmem:[#allocation12 + $0x248] sm:$0xff]  ;;  %v2433_v16 = vld [vmem:[#allocation12 + $0x300] sm:$0xff] }
 0x3f3   :  { %v7891_v28 = vsel %vm1235_vm15, %v1234_v6, %v7870_v26  ;;  %v2361_v26 = vld [vmem:[#allocation12 + $0xc0] sm:$0xff]  ;;  %v1290_v25 = vld [vmem:[#allocation10 + $0x178] sm:$0xff]  ;;  %v5739_v1 = vpack.c.bf16 %v2416_v19, %v2410_v9  ;;  %v1332_v17 = vld [vmem:[#allocation10 + $0x2c8] sm:$0xff] }
 0x3f4   :  { %v5725_v40 = vpack.c.bf16 %v2367_v22, %v2361_v26  ;;  %v1295_v26 = vld [vmem:[#allocation10 + $0x1a0] sm:$0xff]  ;;  %v1301_v22 = vld [vmem:[#allocation10 + $0x1d0] sm:$0xff]  ;;  %v1344_v19 = vld [vmem:[#allocation10 + $0x328] sm:$0xff] }
 0x3f5   :  { %5428 = vmatpush1.bf16.msra.mxu0 %v5427_v45  ;;  %5562 = vmatpush1.bf16.msra.mxu1 %v5561_v53  ;;  %v5575_v45 = vpack.c.bf16 %v1636_v10, %v1630_v57  ;;  %v2362_v53 = vld [vmem:[#allocation12 + $0xc8] sm:$0xff]  ;;  %v5593_v10 = vpack.c.bf16 %v1290_v25, %v1284_v8  ;;  %v2457_v8 = vld [vmem:[#allocation12 + $0x3c0] sm:$0xff]  ;;  %v2463_v9 = vld [vmem:[#allocation12 + $0x3f0] sm:$0xff] }
 0x3f6   :  { %5430 = vmatprep.subr.bf16.mxu0 %v5429_v51  ;;  %5564 = vmatprep.subr.bf16.mxu1 %v5563_v61  ;;  %v1629_v51 = vld [vmem:[#allocation10 + $0xc10] sm:$0xff]  ;;  %v1635_v61 = vld [vmem:[#allocation10 + $0xc40] sm:$0x3]  ;;  %v5723_v15 = vpack.c.bf16 %v2368_v44, %v2362_v53  ;;  %v1302_v53 = vld [vmem:[#allocation10 + $0x1d8] sm:$0xff] }
 0x3f7   :  { %v2422_v44 = vld [vmem:[#allocation12 + $0x2a8] sm:$0xff] }
 0x3f9   :  { %5432 = vmatpush1.bf16.msra.mxu0 %v5431_v7  ;;  %5566 = vmatpush1.bf16.msra.mxu1 %v5565_v36  ;;  %v2380_v7 = vld [vmem:[#allocation12 + $0x158] sm:$0xff]  ;;  %v5578_v36 = vpack.c.bf16 %v1635_v61, %v1629_v51 }
 0x3fa   :  { %5434 = vmatprep.subr.bf16.mxu0 %v5433_v11  ;;  %5568 = vmatprep.subr.bf16.mxu1 %v5567_v13  ;;  %v1247_v11 = vld [vmem:[#allocation10 + $0x20] sm:$0xff]  ;;  %v1253_v13 = vld [vmem:[#allocation10 + $0x50] sm:$0xff]  ;;  %v5727_v12 = vpack.c.bf16 %v2380_v7, %v2374_v54  ;;  %v1308_v7 = vld [vmem:[#allocation10 + $0x208] sm:$0xff] }
 0x3fb   :  { %v2427_v54 = vld [vmem:[#allocation12 + $0x2d0] sm:$0xff] }
 0x3fd   :  { %5436 = vmatpush1.bf16.msra.mxu0 %v5435_v55  ;;  %5570 = vmatpush1.bf16.msra.mxu1 %v5569_v24  ;;  %v5583_v55 = vpack.c.bf16 %v1253_v13, %v1247_v11  ;;  %v5729_v24 = vpack.c.bf16 %v2379_v14, %v2373_v33  ;;  %v5599_v11 = vpack.c.bf16 %v1301_v22, %v1295_v26  ;;  %v1313_v14 = vld [vmem:[#allocation10 + $0x230] sm:$0xff] }
 0x3fe   :  { %5438 = vmatprep.subr.bf16.mxu0 %v5437_v52  ;;  %5572 = vmatprep.subr.bf16.mxu1 %v5571_v34  ;;  %v1265_v52 = vld [vmem:[#allocation10 + $0xb0] sm:$0xff]  ;;  %v2385_v34 = vld [vmem:[#allocation12 + $0x180] sm:$0xff]  ;;  %v5745_v13 = vpack.c.bf16 %v2427_v54, %v2421_v21 }
 0x3ff   :  { %v5587_v29 = vpack.c.bf16 %v1265_v52, %v1259_v58  ;;  %v5749_v52 = vpack.c.bf16 %v2439_v56, %v2433_v16  ;;  %v1361_v54 = vld [vmem:[#allocation10 + $0x3b0] sm:$0xff] }
 0x400   :  { %v1373_v56 = vld [vmem:[#allocation10 + $0x410] sm:$0xff] }
 0x401   :  { %5440 = vmatpush1.bf16.msra.mxu0 %v5439_v20  ;;  %5574 = vmatpush1.bf16.msra.mxu1 %v5573_v49  ;;  %v5733_v20 = vpack.c.bf16 %v2391_v62, %v2385_v34  ;;  %v5589_v49 = vpack.c.bf16 %v1278_v38, %v1272_v23  ;;  %v1325_v62 = vld [vmem:[#allocation10 + $0x290] sm:$0xff]  ;;  %v2445_v23 = vld [vmem:[#allocation12 + $0x360] sm:$0xff] }
 0x402   :  { %5443 = vmatprep.subr.msk.bf16.mxu0 %vm7883_vm14, %v5441_v59  ;;  %5716 = vmatprep.subr.bf16.mxu1 %v5715_v46  ;;  %v1277_v59 = vld [vmem:[#allocation10 + $0x110] sm:$0xff]  ;;  %v2397_v46 = vld [vmem:[#allocation12 + $0x1e0] sm:$0xff] }
 0x403   :  { %v5591_v6 = vpack.c.bf16 %v1277_v59, %v1271_v35  ;;  %v5737_v57 = vpack.c.bf16 %v2403_v48, %v2397_v46  ;;  %v5753_v59 = vpack.c.bf16 %v2451_v5, %v2445_v23  ;;  %v1337_v48 = vld [vmem:[#allocation10 + $0x2f0] sm:$0xff] }
 0x404   :  { %1828 = vmatmul.mubr.f32.vlgmr.msra.gmra.mrb[0].mxu0 %v7891_v28  ;;  %2041 = vmatmul.mubr.f32.vlgmr.msra.gmra.mrb[0].mxu1 %v7891_v28  ;;  %v1385_v5 = vld [vmem:[#allocation10 + $0x470] sm:$0xff] }
 0x405   :  { %5446 = vmatpush1.bf16.msk.msra.mxu0 %vm7883_vm14, %v5444_v60  ;;  %5718 = vmatpush1.bf16.msra.mxu1 %v5717_v30  ;;  %v1283_v60 = vld [vmem:[#allocation10 + $0x140] sm:$0xff]  ;;  %v1289_v30 = vld [vmem:[#allocation10 + $0x170] sm:$0xff] }
 0x406   :  { %2815 = vmatprep.mubr.f32.mxu1 %v7862_v18  ;;  %5720 = vmatprep.subr.bf16.mxu1 %v5719_v42  ;;  %v2409_v42 = vld [vmem:[#allocation12 + $0x240] sm:$0xff]  ;;  %v5595_v51 = vpack.c.bf16 %v1289_v30, %v1283_v60  ;;  %v5757_v30 = vpack.c.bf16 %v2463_v9, %v2457_v8  ;;  %v1397_v9 = vld [vmem:[#allocation10 + $0x4d0] sm:$0xff] }
 0x407   :  { %1898 = vmatprep.mubr.f32.mxu0 %v8371_v39  ;;  %5577 = vmatprep.subr.msk.bf16.mxu0 %vm7883_vm14, %v5575_v45  ;;  %v1296_v45 = vld [vmem:[#allocation10 + $0x1a8] sm:$0xff]  ;;  %v5741_v61 = vpack.c.bf16 %v2415_v41, %v2409_v42  ;;  %v1349_v41 = vld [vmem:[#allocation10 + $0x350] sm:$0xff] }
 0x409   :  { %5722 = vmatpush1.bf16.msra.mxu1 %v5721_v3  ;;  %v2428_v3 = vld [vmem:[#allocation12 + $0x2d8] sm:$0xff] }
 0x40a   :  { %5724 = vmatprep.subr.bf16.mxu1 %v5723_v15  ;;  %v5597_v15 = vpack.c.bf16 %v1302_v53, %v1296_v45  ;;  %v5743_v0 = vpack.c.bf16 %v2428_v3, %v2422_v44  ;;  %v2469_v45 = vld [vmem:[#allocation12 + $0x420] sm:$0xff]  ;;  %v2475_v44 = vld [vmem:[#allocation12 + $0x450] sm:$0xff]  ;;  %v1356_v3 = vld [vmem:[#allocation10 + $0x388] sm:$0xff] }
 0x40b   :  { %v5761_v22 = vpack.c.bf16 %v2475_v44, %v2469_v45  ;;  %v1409_v44 = vld [vmem:[#allocation10 + $0x530] sm:$0xff] }
 0x40c   :  { %5023 = vmatmul.mubr.msk.f32.vlgmr.msra.gmra.mrb[0].mxu0 %vm1671_vm0, %v7874_v32 }
 0x40d   :  { %5580 = vmatpush1.bf16.msk.msra.mxu0 %vm7883_vm14, %v5578_v36  ;;  %5726 = vmatpush1.bf16.msra.mxu1 %v5725_v40  ;;  %v1314_v36 = vld [vmem:[#allocation10 + $0x238] sm:$0xff]  ;;  %v2434_v40 = vld [vmem:[#allocation12 + $0x308] sm:$0xff] }
 0x40e   :  { %2111 = vmatprep.mubr.f32.mxu0 %v8371_v39  ;;  %5582 = vmatprep.subr.bf16.mxu0 %v5581_v47  ;;  %v2440_v47 = vld [vmem:[#allocation12 + $0x338] sm:$0xff]  ;;  %v5601_v33 = vpack.c.bf16 %v1314_v36, %v1308_v7  ;;  %v2481_v7 = vld [vmem:[#allocation12 + $0x480] sm:$0xff] }
 0x40f   :  { %5728 = vmatprep.subr.bf16.mxu1 %v5727_v12  ;;  %v1307_v12 = vld [vmem:[#allocation10 + $0x200] sm:$0xff]  ;;  %v5747_v37 = vpack.c.bf16 %v2440_v47, %v2434_v40  ;;  %v2487_v40 = vld [vmem:[#allocation12 + $0x4b0] sm:$0xff]  ;;  %v1368_v47 = vld [vmem:[#allocation10 + $0x3e8] sm:$0xff] }
 0x410   :  { %5026 = vmatmul.mubr.msk.f32.vlgmr.msra.gmra.mrb[2].mxu0 %vm1671_vm0, %v7874_v32  ;;  %v5603_v58 = vpack.c.bf16 %v1313_v14, %v1307_v12  ;;  %v5765_v14 = vpack.c.bf16 %v2487_v40, %v2481_v7  ;;  %v1415_v7 = vld [vmem:[#allocation10 + $0x560] sm:$0xff] }
 0x411   :  { %5584 = vmatpush1.bf16.msra.mxu0 %v5583_v55  ;;  %2182 = vmatprep.mubr.f32.mxu0 %v7862_v18  ;;  %v1326_v55 = vld [vmem:[#allocation10 + $0x298] sm:$0xff]  ;;  %v2541_v40 = vld [vmem:[#allocation12 + $0x660] sm:$0xff] }
 0x412   :  { %5730 = vmatpush1.bf16.msra.mxu1 %v5729_v24  ;;  %5586 = vmatprep.subr.bf16.mxu0 %v5585_v50  ;;  %v2446_v24 = vld [vmem:[#allocation12 + $0x368] sm:$0xff]  ;;  %v2452_v50 = vld [vmem:[#allocation12 + $0x398] sm:$0xff]  ;;  %v5605_v34 = vpack.c.bf16 %v1326_v55, %v1320_v31  ;;  %v2493_v31 = vld [vmem:[#allocation12 + $0x4e0] sm:$0xff] }
 0x413   :  { %5732 = vmatprep.subr.bf16.mxu1 %v5731_v63  ;;  %v1319_v63 = vld [vmem:[#allocation10 + $0x260] sm:$0xff]  ;;  %v5751_v38 = vpack.c.bf16 %v2452_v50, %v2446_v24  ;;  %v2499_v24 = vld [vmem:[#allocation12 + $0x510] sm:$0xff]  ;;  %v1380_v50 = vld [vmem:[#allocation10 + $0x448] sm:$0xff] }
 0x414   :  { %v5607_v35 = vpack.c.bf16 %v1325_v62, %v1319_v63  ;;  %v5769_v62 = vpack.c.bf16 %v2499_v24, %v2493_v31  ;;  %v1433_v24 = vld [vmem:[#allocation10 + $0x5f0] sm:$0xff] }
 0x415   :  { %5588 = vmatpush1.bf16.msra.mxu0 %v5587_v29  ;;  %v1338_v29 = vld [vmem:[#allocation10 + $0x2f8] sm:$0xff] }
 0x416   :  { %5734 = vmatpush1.bf16.msra.mxu1 %v5733_v20  ;;  %5590 = vmatprep.subr.bf16.mxu0 %v5589_v49  ;;  %v2458_v20 = vld [vmem:[#allocation12 + $0x3c8] sm:$0xff]  ;;  %v2464_v49 = vld [vmem:[#allocation12 + $0x3f8] sm:$0xff]  ;;  %v5609_v46 = vpack.c.bf16 %v1338_v29, %v1332_v17  ;;  %v2505_v17 = vld [vmem:[#allocation12 + $0x540] sm:$0xff] }
 0x417   :  { %5736 = vmatprep.subr.bf16.mxu1 %v5735_v4  ;;  %v1331_v4 = vld [vmem:[#allocation10 + $0x2c0] sm:$0xff]  ;;  %v5755_v25 = vpack.c.bf16 %v2464_v49, %v2458_v20  ;;  %v2511_v20 = vld [vmem:[#allocation12 + $0x570] sm:$0xff]  ;;  %v1392_v49 = vld [vmem:[#allocation10 + $0x4a8] sm:$0xff] }
 0x418   :  { %v5611_v60 = vpack.c.bf16 %v1337_v48, %v1331_v4  ;;  %v5773_v48 = vpack.c.bf16 %v2511_v20, %v2505_v17  ;;  %v1445_v20 = vld [vmem:[#allocation10 + $0x650] sm:$0xff] }
 0x419   :  { %5592 = vmatpush1.bf16.msra.mxu0 %v5591_v6  ;;  %v1350_v6 = vld [vmem:[#allocation10 + $0x358] sm:$0xff] }
 0x41a   :  { %5738 = vmatpush1.bf16.msra.mxu1 %v5737_v57  ;;  %5594 = vmatprep.subr.bf16.mxu0 %v5593_v10  ;;  %v2470_v57 = vld [vmem:[#allocation12 + $0x428] sm:$0xff]  ;;  %v2476_v10 = vld [vmem:[#allocation12 + $0x458] sm:$0xff]  ;;  %v5613_v42 = vpack.c.bf16 %v1350_v6, %v1344_v19  ;;  %v2517_v19 = vld [vmem:[#allocation12 + $0x5a0] sm:$0xff] }
 0x41b   :  { %5740 = vmatprep.subr.bf16.mxu1 %v5739_v1  ;;  %v1343_v1 = vld [vmem:[#allocation10 + $0x320] sm:$0xff]  ;;  %v5759_v53 = vpack.c.bf16 %v2476_v10, %v2470_v57  ;;  %v2523_v57 = vld [vmem:[#allocation12 + $0x5d0] sm:$0xff]  ;;  %v1404_v10 = vld [vmem:[#allocation10 + $0x508] sm:$0xff] }
 0x41c   :  { %v5615_v26 = vpack.c.bf16 %v1349_v41, %v1343_v1  ;;  %v5777_v41 = vpack.c.bf16 %v2523_v57, %v2517_v19  ;;  %v1457_v57 = vld [vmem:[#allocation10 + $0x6b0] sm:$0xff] }
 0x41d   :  { %5596 = vmatpush1.bf16.msra.mxu0 %v5595_v51  ;;  %v1362_v51 = vld [vmem:[#allocation10 + $0x3b8] sm:$0xff] }
 0x41e   :  { %5742 = vmatpush1.bf16.msra.mxu1 %v5741_v61  ;;  %5598 = vmatprep.subr.bf16.mxu0 %v5597_v15  ;;  %v2482_v61 = vld [vmem:[#allocation12 + $0x488] sm:$0xff]  ;;  %v2488_v15 = vld [vmem:[#allocation12 + $0x4b8] sm:$0xff]  ;;  %v5617_v21 = vpack.c.bf16 %v1362_v51, %v1356_v3  ;;  %v2529_v51 = vld [vmem:[#allocation12 + $0x600] sm:$0xff] }
 0x41f   :  { %5744 = vmatprep.subr.bf16.mxu1 %v5743_v0  ;;  %v1355_v0 = vld [vmem:[#allocation10 + $0x380] sm:$0xff]  ;;  %v5763_v36 = vpack.c.bf16 %v2488_v15, %v2482_v61  ;;  %v2535_v61 = vld [vmem:[#allocation12 + $0x630] sm:$0xff]  ;;  %v1416_v15 = vld [vmem:[#allocation10 + $0x568] sm:$0xff] }
 0x420   :  { %v5619_v12 = vpack.c.bf16 %v1361_v54, %v1355_v0  ;;  %v5781_v54 = vpack.c.bf16 %v2535_v61, %v2529_v51  ;;  %v1463_v51 = vld [vmem:[#allocation10 + $0x6e0] sm:$0xff]  ;;  %v1469_v61 = vld [vmem:[#allocation10 + $0x710] sm:$0xff] }
 0x421   :  { %5600 = vmatpush1.bf16.msra.mxu0 %v5599_v11  ;;  %v1374_v11 = vld [vmem:[#allocation10 + $0x418] sm:$0xff] }
 0x422   :  { %5746 = vmatpush1.bf16.msra.mxu1 %v5745_v13  ;;  %5602 = vmatprep.subr.bf16.mxu0 %v5601_v33  ;;  %v2494_v13 = vld [vmem:[#allocation12 + $0x4e8] sm:$0xff]  ;;  %v2500_v33 = vld [vmem:[#allocation12 + $0x518] sm:$0xff]  ;;  %v5621_v16 = vpack.c.bf16 %v1374_v11, %v1368_v47 }
 0x423   :  { %5748 = vmatprep.subr.bf16.mxu1 %v5747_v37  ;;  %v1367_v37 = vld [vmem:[#allocation10 + $0x3e0] sm:$0xff]  ;;  %v5767_v55 = vpack.c.bf16 %v2500_v33, %v2494_v13  ;;  %v2547_v13 = vld [vmem:[#allocation12 + $0x690] sm:$0xff]  ;;  %v1428_v33 = vld [vmem:[#allocation10 + $0x5c8] sm:$0xff] }
 0x424   :  { %v5623_v63 = vpack.c.bf16 %v1373_v56, %v1367_v37  ;;  %v5785_v56 = vpack.c.bf16 %v2547_v13, %v2541_v40  ;;  %v1481_v13 = vld [vmem:[#allocation10 + $0x770] sm:$0xff] }
 0x425   :  { %5604 = vmatpush1.bf16.msra.mxu0 %v5603_v58  ;;  %v1386_v58 = vld [vmem:[#allocation10 + $0x478] sm:$0xff] }
 0x426   :  { %5750 = vmatpush1.bf16.msra.mxu1 %v5749_v52  ;;  %5606 = vmatprep.subr.bf16.mxu0 %v5605_v34  ;;  %v2506_v52 = vld [vmem:[#allocation12 + $0x548] sm:$0xff]  ;;  %v2512_v34 = vld [vmem:[#allocation12 + $0x578] sm:$0xff]  ;;  %v5625_v23 = vpack.c.bf16 %v1386_v58, %v1380_v50  ;;  %v2553_v50 = vld [vmem:[#allocation12 + $0x6c0] sm:$0xff] }
 0x427   :  { %5752 = vmatprep.subr.bf16.mxu1 %v5751_v38  ;;  %v1379_v38 = vld [vmem:[#allocation10 + $0x440] sm:$0xff]  ;;  %v5771_v29 = vpack.c.bf16 %v2512_v34, %v2506_v52  ;;  %v2559_v52 = vld [vmem:[#allocation12 + $0x6f0] sm:$0xff]  ;;  %v1440_v34 = vld [vmem:[#allocation10 + $0x628] sm:$0xff] }
 0x428   :  { %v5627_v4 = vpack.c.bf16 %v1385_v5, %v1379_v38  ;;  %v5789_v5 = vpack.c.bf16 %v2559_v52, %v2553_v50  ;;  %v1493_v52 = vld [vmem:[#allocation10 + $0x7d0] sm:$0xff] }
 0x429   :  { %5608 = vmatpush1.bf16.msra.mxu0 %v5607_v35  ;;  %v1398_v35 = vld [vmem:[#allocation10 + $0x4d8] sm:$0xff] }
 0x42a   :  { %5754 = vmatpush1.bf16.msra.mxu1 %v5753_v59  ;;  %5610 = vmatprep.subr.bf16.mxu0 %v5609_v46  ;;  %v2518_v59 = vld [vmem:[#allocation12 + $0x5a8] sm:$0xff]  ;;  %v2524_v46 = vld [vmem:[#allocation12 + $0x5d8] sm:$0xff]  ;;  %v5629_v8 = vpack.c.bf16 %v1398_v35, %v1392_v49  ;;  %v2565_v49 = vld [vmem:[#allocation12 + $0x720] sm:$0xff] }
 0x42b   :  { %5756 = vmatprep.subr.bf16.mxu1 %v5755_v25  ;;  %v1391_v25 = vld [vmem:[#allocation10 + $0x4a0] sm:$0xff]  ;;  %v5775_v6 = vpack.c.bf16 %v2524_v46, %v2518_v59  ;;  %v2571_v59 = vld [vmem:[#allocation12 + $0x750] sm:$0xff]  ;;  %v1452_v46 = vld [vmem:[#allocation10 + $0x688] sm:$0xff] }
 0x42c   :  { %v5631_v1 = vpack.c.bf16 %v1397_v9, %v1391_v25  ;;  %v5793_v9 = vpack.c.bf16 %v2571_v59, %v2565_v49  ;;  %v1505_v59 = vld [vmem:[#allocation10 + $0x830] sm:$0xff] }
 0x42d   :  { %5612 = vmatpush1.bf16.msra.mxu0 %v5611_v60  ;;  %v1410_v60 = vld [vmem:[#allocation10 + $0x538] sm:$0xff] }
 0x42e   :  { %5758 = vmatpush1.bf16.msra.mxu1 %v5757_v30  ;;  %5614 = vmatprep.subr.bf16.mxu0 %v5613_v42  ;;  %v2530_v30 = vld [vmem:[#allocation12 + $0x608] sm:$0xff]  ;;  %v2536_v42 = vld [vmem:[#allocation12 + $0x638] sm:$0xff]  ;;  %v5633_v45 = vpack.c.bf16 %v1410_v60, %v1404_v10  ;;  %v2577_v10 = vld [vmem:[#allocation12 + $0x780] sm:$0xff] }
 0x42f   :  { %5760 = vmatprep.subr.bf16.mxu1 %v5759_v53  ;;  %v1403_v53 = vld [vmem:[#allocation10 + $0x500] sm:$0xff]  ;;  %v5779_v3 = vpack.c.bf16 %v2536_v42, %v2530_v30  ;;  %v2583_v30 = vld [vmem:[#allocation12 + $0x7b0] sm:$0xff]  ;;  %v1464_v42 = vld [vmem:[#allocation10 + $0x6e8] sm:$0xff] }
 0x430   :  { %v5635_v0 = vpack.c.bf16 %v1409_v44, %v1403_v53  ;;  %v5797_v44 = vpack.c.bf16 %v2583_v30, %v2577_v10  ;;  %v1517_v30 = vld [vmem:[#allocation10 + $0x890] sm:$0xff] }
 0x431   :  { %5616 = vmatpush1.bf16.msra.mxu0 %v5615_v26  ;;  %v1422_v26 = vld [vmem:[#allocation10 + $0x598] sm:$0xff] }
 0x432   :  { %5762 = vmatpush1.bf16.msra.mxu1 %v5761_v22  ;;  %5618 = vmatprep.subr.bf16.mxu0 %v5617_v21  ;;  %v2542_v22 = vld [vmem:[#allocation12 + $0x668] sm:$0xff]  ;;  %v2548_v21 = vld [vmem:[#allocation12 + $0x698] sm:$0xff]  ;;  %v5637_v47 = vpack.c.bf16 %v1422_v26, %v1416_v15  ;;  %v2589_v15 = vld [vmem:[#allocation12 + $0x7e0] sm:$0xff] }
 0x433   :  { %5764 = vmatprep.subr.bf16.mxu1 %v5763_v36  ;;  %v1421_v36 = vld [vmem:[#allocation10 + $0x590] sm:$0xff]  ;;  %v5783_v11 = vpack.c.bf16 %v2548_v21, %v2542_v22  ;;  %v1476_v21 = vld [vmem:[#allocation10 + $0x748] sm:$0xff] }
 0x434   :  { %v5639_v37 = vpack.c.bf16 %v1421_v36, %v1415_v7  ;;  %v2595_v22 = vld [vmem:[#allocation12 + $0x810] sm:$0xff]  ;;  %v2608_v7 = vld [vmem:[#allocation12 + $0x878] sm:$0xff]  ;;  %v5655_v36 = vpack.c.bf16 %v1469_v61, %v1463_v51 }
 0x435   :  { %5620 = vmatpush1.bf16.msra.mxu0 %v5619_v12  ;;  %v1434_v12 = vld [vmem:[#allocation10 + $0x5f8] sm:$0xff]  ;;  %v5801_v40 = vpack.c.bf16 %v2595_v22, %v2589_v15  ;;  %v1529_v22 = vld [vmem:[#allocation10 + $0x8f0] sm:$0xff] }
 0x436   :  { %5766 = vmatpush1.bf16.msra.mxu1 %v5765_v14  ;;  %5622 = vmatprep.subr.bf16.mxu0 %v5621_v16  ;;  %v2554_v14 = vld [vmem:[#allocation12 + $0x6c8] sm:$0xff]  ;;  %v2560_v16 = vld [vmem:[#allocation12 + $0x6f8] sm:$0xff]  ;;  %v5641_v31 = vpack.c.bf16 %v1434_v12, %v1428_v33  ;;  %v2601_v33 = vld [vmem:[#allocation12 + $0x840] sm:$0xff] }
 0x437   :  { %5768 = vmatprep.subr.bf16.mxu1 %v5767_v55  ;;  %v1427_v55 = vld [vmem:[#allocation10 + $0x5c0] sm:$0xff]  ;;  %v5787_v58 = vpack.c.bf16 %v2560_v16, %v2554_v14  ;;  %v2607_v14 = vld [vmem:[#allocation12 + $0x870] sm:$0xff]  ;;  %v1488_v16 = vld [vmem:[#allocation10 + $0x7a8] sm:$0xff] }
 0x438   :  { %v5643_v38 = vpack.c.bf16 %v1433_v24, %v1427_v55  ;;  %v5805_v24 = vpack.c.bf16 %v2607_v14, %v2601_v33  ;;  %v1541_v14 = vld [vmem:[#allocation10 + $0x950] sm:$0xff] }
 0x439   :  { %5624 = vmatpush1.bf16.msra.mxu0 %v5623_v63  ;;  %v1446_v63 = vld [vmem:[#allocation10 + $0x658] sm:$0xff] }
 0x43a   :  { %5770 = vmatpush1.bf16.msra.mxu1 %v5769_v62  ;;  %5626 = vmatprep.subr.bf16.mxu0 %v5625_v23  ;;  %v2566_v62 = vld [vmem:[#allocation12 + $0x728] sm:$0xff]  ;;  %v2572_v23 = vld [vmem:[#allocation12 + $0x758] sm:$0xff]  ;;  %v5645_v17 = vpack.c.bf16 %v1446_v63, %v1440_v34  ;;  %v2613_v34 = vld [vmem:[#allocation12 + $0x8a0] sm:$0xff] }
 0x43b   :  { %5772 = vmatprep.subr.bf16.mxu1 %v5771_v29  ;;  %v1439_v29 = vld [vmem:[#allocation10 + $0x620] sm:$0xff]  ;;  %v5791_v35 = vpack.c.bf16 %v2572_v23, %v2566_v62  ;;  %v2619_v62 = vld [vmem:[#allocation12 + $0x8d0] sm:$0xff]  ;;  %v1500_v23 = vld [vmem:[#allocation10 + $0x808] sm:$0xff] }
 0x43c   :  { %v5647_v25 = vpack.c.bf16 %v1445_v20, %v1439_v29  ;;  %v5809_v20 = vpack.c.bf16 %v2619_v62, %v2613_v34  ;;  %v1553_v62 = vld [vmem:[#allocation10 + $0x9b0] sm:$0xff] }
 0x43d   :  { %5628 = vmatpush1.bf16.msra.mxu0 %v5627_v4  ;;  %v1458_v4 = vld [vmem:[#allocation10 + $0x6b8] sm:$0xff] }
 0x43e   :  { %5774 = vmatpush1.bf16.msra.mxu1 %v5773_v48  ;;  %5630 = vmatprep.subr.bf16.mxu0 %v5629_v8  ;;  %v2578_v48 = vld [vmem:[#allocation12 + $0x788] sm:$0xff]  ;;  %v2584_v8 = vld [vmem:[#allocation12 + $0x7b8] sm:$0xff]  ;;  %v5649_v19 = vpack.c.bf16 %v1458_v4, %v1452_v46  ;;  %v2625_v46 = vld [vmem:[#allocation12 + $0x900] sm:$0xff] }
 0x43f   :  { %5776 = vmatprep.subr.bf16.mxu1 %v5775_v6  ;;  %v1451_v6 = vld [vmem:[#allocation10 + $0x680] sm:$0xff]  ;;  %v5795_v60 = vpack.c.bf16 %v2584_v8, %v2578_v48  ;;  %v2631_v48 = vld [vmem:[#allocation12 + $0x930] sm:$0xff]  ;;  %v1512_v8 = vld [vmem:[#allocation10 + $0x868] sm:$0xff] }
 0x440   :  { %v5651_v53 = vpack.c.bf16 %v1457_v57, %v1451_v6  ;;  %v5813_v57 = vpack.c.bf16 %v2631_v48, %v2625_v46  ;;  %v1565_v48 = vld [vmem:[#allocation10 + $0xa10] sm:$0xff] }
 0x441   :  { %5632 = vmatpush1.bf16.msra.mxu0 %v5631_v1  ;;  %v1470_v1 = vld [vmem:[#allocation10 + $0x718] sm:$0xff] }
 0x442   :  { %5778 = vmatpush1.bf16.msra.mxu1 %v5777_v41  ;;  %5634 = vmatprep.subr.bf16.mxu0 %v5633_v45  ;;  %v2590_v41 = vld [vmem:[#allocation12 + $0x7e8] sm:$0xff]  ;;  %v2596_v45 = vld [vmem:[#allocation12 + $0x818] sm:$0xff] }
 0x443   :  { %5780 = vmatprep.subr.bf16.mxu1 %v5779_v3  ;;  %v5653_v3 = vpack.c.bf16 %v1470_v1, %v1464_v42  ;;  %v5799_v26 = vpack.c.bf16 %v2596_v45, %v2590_v41  ;;  %v2637_v42 = vld [vmem:[#allocation12 + $0x960] sm:$0xff]  ;;  %v2643_v41 = vld [vmem:[#allocation12 + $0x990] sm:$0xff]  ;;  %v1524_v45 = vld [vmem:[#allocation10 + $0x8c8] sm:$0xff] }
 0x444   :  { %v5817_v61 = vpack.c.bf16 %v2643_v41, %v2637_v42  ;;  %v1577_v41 = vld [vmem:[#allocation10 + $0xa70] sm:$0xff] }
 0x445   :  { %5636 = vmatpush1.bf16.msra.mxu0 %v5635_v0  ;;  %2816 = vmatmul.mubr.f32.vlgmr.msra.gmra.mrb[2].mxu1 %v7864_v27  ;;  %v1482_v0 = vld [vmem:[#allocation10 + $0x778] sm:$0xff] }
 0x446   :  { %5782 = vmatpush1.bf16.msra.mxu1 %v5781_v54  ;;  %2886 = vmatprep.mubr.f32.mxu1 %v7877_v2  ;;  %v2602_v54 = vld [vmem:[#allocation12 + $0x848] sm:$0xff] }
 0x447   :  { %5638 = vmatprep.subr.bf16.mxu0 %v5637_v47  ;;  %5784 = vmatprep.subr.bf16.mxu1 %v5783_v11  ;;  %v5657_v47 = vpack.c.bf16 %v1482_v0, %v1476_v21  ;;  %v1475_v11 = vld [vmem:[#allocation10 + $0x740] sm:$0xff]  ;;  %v5803_v12 = vpack.c.bf16 %v2608_v7, %v2602_v54  ;;  %v2655_v54 = vld [vmem:[#allocation12 + $0x9f0] sm:$0xff]  ;;  %v1536_v7 = vld [vmem:[#allocation10 + $0x928] sm:$0xff] }
 0x448   :  { %v5659_v55 = vpack.c.bf16 %v1481_v13, %v1475_v11  ;;  %v2649_v21 = vld [vmem:[#allocation12 + $0x9c0] sm:$0xff] }
 0x449   :  { %5640 = vmatpush1.bf16.msra.mxu0 %v5639_v37  ;;  %v1494_v37 = vld [vmem:[#allocation10 + $0x7d8] sm:$0xff]  ;;  %v5821_v13 = vpack.c.bf16 %v2655_v54, %v2649_v21  ;;  %v1589_v54 = vld [vmem:[#allocation10 + $0xad0] sm:$0xff] }
 0x44a   :  { %5786 = vmatpush1.bf16.msra.mxu1 %v5785_v56  ;;  %5642 = vmatprep.subr.bf16.mxu0 %v5641_v31  ;;  %v2614_v56 = vld [vmem:[#allocation12 + $0x8a8] sm:$0xff]  ;;  %v2620_v31 = vld [vmem:[#allocation12 + $0x8d8] sm:$0xff]  ;;  %v5661_v50 = vpack.c.bf16 %v1494_v37, %v1488_v16  ;;  %v2661_v16 = vld [vmem:[#allocation12 + $0xa20] sm:$0xff] }
 0x44b   :  { %5788 = vmatprep.subr.bf16.mxu1 %v5787_v58  ;;  %v1487_v58 = vld [vmem:[#allocation10 + $0x7a0] sm:$0xff]  ;;  %v5807_v63 = vpack.c.bf16 %v2620_v31, %v2614_v56  ;;  %v2667_v56 = vld [vmem:[#allocation12 + $0xa50] sm:$0xff]  ;;  %v1548_v31 = vld [vmem:[#allocation10 + $0x988] sm:$0xff] }
 0x44c   :  { %v5663_v29 = vpack.c.bf16 %v1493_v52, %v1487_v58  ;;  %v5825_v52 = vpack.c.bf16 %v2667_v56, %v2661_v16  ;;  %v1601_v56 = vld [vmem:[#allocation10 + $0xb30] sm:$0xff] }
 0x44d   :  { %5644 = vmatpush1.bf16.msra.mxu0 %v5643_v38  ;;  %v1506_v38 = vld [vmem:[#allocation10 + $0x838] sm:$0xff] }
 0x44e   :  { %5790 = vmatpush1.bf16.msra.mxu1 %v5789_v5  ;;  %5646 = vmatprep.subr.bf16.mxu0 %v5645_v17  ;;  %v2626_v5 = vld [vmem:[#allocation12 + $0x908] sm:$0xff]  ;;  %v2632_v17 = vld [vmem:[#allocation12 + $0x938] sm:$0xff]  ;;  %v5665_v49 = vpack.c.bf16 %v1506_v38, %v1500_v23  ;;  %v2673_v23 = vld [vmem:[#allocation12 + $0xa80] sm:$0xff] }
 0x44f   :  { %5792 = vmatprep.subr.bf16.mxu1 %v5791_v35  ;;  %v1499_v35 = vld [vmem:[#allocation10 + $0x800] sm:$0xff]  ;;  %v5811_v4 = vpack.c.bf16 %v2632_v17, %v2626_v5  ;;  %v2679_v5 = vld [vmem:[#allocation12 + $0xab0] sm:$0xff]  ;;  %v1560_v17 = vld [vmem:[#allocation10 + $0x9e8] sm:$0xff] }
 0x450   :  { %2183 = vmatmul.mubr.f32.vlgmr.msra.gmra.mrb[4].mxu0 %v7864_v27  ;;  %v5667_v6 = vpack.c.bf16 %v1505_v59, %v1499_v35  ;;  %v5829_v59 = vpack.c.bf16 %v2679_v5, %v2673_v23  ;;  %v1607_v23 = vld [vmem:[#allocation10 + $0xb60] sm:$0xff] }
 0x451   :  { %5648 = vmatpush1.bf16.msra.mxu0 %v5647_v25  ;;  %2253 = vmatprep.mubr.f32.mxu0 %v7877_v2  ;;  %v1518_v25 = vld [vmem:[#allocation10 + $0x898] sm:$0xff] }
 0x452   :  { %5794 = vmatpush1.bf16.msra.mxu1 %v5793_v9  ;;  %5650 = vmatprep.subr.bf16.mxu0 %v5649_v19  ;;  %v2638_v9 = vld [vmem:[#allocation12 + $0x968] sm:$0xff]  ;;  %v2644_v19 = vld [vmem:[#allocation12 + $0x998] sm:$0xff]  ;;  %v5669_v10 = vpack.c.bf16 %v1518_v25, %v1512_v8  ;;  %v2685_v8 = vld [vmem:[#allocation12 + $0xae0] sm:$0xff] }
 0x453   :  { %5796 = vmatprep.subr.bf16.mxu1 %v5795_v60  ;;  %v1511_v60 = vld [vmem:[#allocation10 + $0x860] sm:$0xff]  ;;  %v5815_v1 = vpack.c.bf16 %v2644_v19, %v2638_v9  ;;  %v2691_v9 = vld [vmem:[#allocation12 + $0xb10] sm:$0xff]  ;;  %v1572_v19 = vld [vmem:[#allocation10 + $0xa48] sm:$0xff] }
 0x454   :  { %v5671_v51 = vpack.c.bf16 %v1517_v30, %v1511_v60  ;;  %v5833_v30 = vpack.c.bf16 %v2691_v9, %v2685_v8  ;;  %v2354_v8 = vld [vmem:[#allocation12 + $0x88] sm:$0xff]  ;;  %v1638_v9 = vld [vmem:[#allocation10 + $0xc58] sm:$0x3] }
 0x455   :  { %5652 = vmatpush1.bf16.msra.mxu0 %v5651_v53  ;;  %v1530_v53 = vld [vmem:[#allocation10 + $0x8f8] sm:$0xff] }
 0x456   :  { %5798 = vmatpush1.bf16.msra.mxu1 %v5797_v44  ;;  %5654 = vmatprep.subr.bf16.mxu0 %v5653_v3  ;;  %v2650_v44 = vld [vmem:[#allocation12 + $0x9c8] sm:$0xff]  ;;  %v2656_v3 = vld [vmem:[#allocation12 + $0x9f8] sm:$0xff]  ;;  %v5673_v15 = vpack.c.bf16 %v1530_v53, %v1524_v45  ;;  %v2697_v45 = vld [vmem:[#allocation12 + $0xb40] sm:$0xff] }
 0x457   :  { %5800 = vmatprep.subr.bf16.mxu1 %v5799_v26  ;;  %v1523_v26 = vld [vmem:[#allocation10 + $0x8c0] sm:$0xff]  ;;  %v5819_v0 = vpack.c.bf16 %v2656_v3, %v2650_v44  ;;  %v2703_v44 = vld [vmem:[#allocation12 + $0xb70] sm:$0xff]  ;;  %v1584_v3 = vld [vmem:[#allocation10 + $0xaa8] sm:$0xff] }
 0x458   :  { %v5675_v11 = vpack.c.bf16 %v1529_v22, %v1523_v26  ;;  %v5837_v22 = vpack.c.bf16 %v2703_v44, %v2697_v45  ;;  %v2340_v45 = vld [vmem:[#allocation12 + $0x18] sm:$0xff]  ;;  %v2366_v44 = vld [vmem:[#allocation12 + $0xe8] sm:$0xff] }
 0x459   :  { %5656 = vmatpush1.bf16.msra.mxu0 %v5655_v36  ;;  %v1542_v36 = vld [vmem:[#allocation10 + $0x958] sm:$0xff] }
 0x45a   :  { %5802 = vmatpush1.bf16.msra.mxu1 %v5801_v40  ;;  %5658 = vmatprep.subr.bf16.mxu0 %v5657_v47  ;;  %v2662_v40 = vld [vmem:[#allocation12 + $0xa28] sm:$0xff]  ;;  %v2668_v47 = vld [vmem:[#allocation12 + $0xa58] sm:$0xff]  ;;  %v5677_v33 = vpack.c.bf16 %v1542_v36, %v1536_v7  ;;  %v2709_v7 = vld [vmem:[#allocation12 + $0xba0] sm:$0xff] }
 0x45b   :  { %5804 = vmatprep.subr.bf16.mxu1 %v5803_v12  ;;  %v1535_v12 = vld [vmem:[#allocation10 + $0x920] sm:$0xff]  ;;  %v5823_v37 = vpack.c.bf16 %v2668_v47, %v2662_v40  ;;  %v2715_v40 = vld [vmem:[#allocation12 + $0xbd0] sm:$0xff]  ;;  %v1596_v47 = vld [vmem:[#allocation10 + $0xb08] sm:$0xff] }
 0x45c   :  { %v5679_v58 = vpack.c.bf16 %v1541_v14, %v1535_v12  ;;  %v5841_v14 = vpack.c.bf16 %v2715_v40, %v2709_v7  ;;  %v2345_v40 = vld [vmem:[#allocation12 + $0x40] sm:$0xff] }
 0x45d   :  { %5660 = vmatpush1.bf16.msra.mxu0 %v5659_v55  ;;  %v1554_v55 = vld [vmem:[#allocation10 + $0x9b8] sm:$0xff] }
 0x45e   :  { %5806 = vmatpush1.bf16.msra.mxu1 %v5805_v24  ;;  %5662 = vmatprep.subr.bf16.mxu0 %v5661_v50  ;;  %v2674_v24 = vld [vmem:[#allocation12 + $0xa88] sm:$0xff]  ;;  %v2680_v50 = vld [vmem:[#allocation12 + $0xab8] sm:$0xff]  ;;  %v5681_v34 = vpack.c.bf16 %v1554_v55, %v1548_v31 }
 0x45f   :  { %5808 = vmatprep.subr.bf16.mxu1 %v5807_v63  ;;  %v1547_v63 = vld [vmem:[#allocation10 + $0x980] sm:$0xff]  ;;  %v5827_v38 = vpack.c.bf16 %v2680_v50, %v2674_v24  ;;  %v1608_v31 = vld [vmem:[#allocation10 + $0xb68] sm:$0xff]  ;;  %v1614_v55 = vld [vmem:[#allocation10 + $0xb98] sm:$0xff] }
 0x460   :  { %v5683_v35 = vpack.c.bf16 %v1553_v62, %v1547_v63  ;;  %v2721_v50 = vld [vmem:[#allocation12 + $0xc00] sm:$0xff]  ;;  %v5701_v62 = vpack.c.bf16 %v1614_v55, %v1608_v31  ;;  %v2351_v55 = vld [vmem:[#allocation12 + $0x70] sm:$0xff] }
 0x461   :  { %5664 = vmatpush1.bf16.msra.mxu0 %v5663_v29  ;;  %v1566_v29 = vld [vmem:[#allocation10 + $0xa18] sm:$0xff] }
 0x462   :  { %5810 = vmatpush1.bf16.msra.mxu1 %v5809_v20  ;;  %5666 = vmatprep.subr.bf16.mxu0 %v5665_v49  ;;  %v2686_v20 = vld [vmem:[#allocation12 + $0xae8] sm:$0xff]  ;;  %v2692_v49 = vld [vmem:[#allocation12 + $0xb18] sm:$0xff]  ;;  %v5685_v46 = vpack.c.bf16 %v1566_v29, %v1560_v17 }
 0x463   :  { %5812 = vmatprep.subr.bf16.mxu1 %v5811_v4  ;;  %v1559_v4 = vld [vmem:[#allocation10 + $0x9e0] sm:$0xff]  ;;  %v5831_v25 = vpack.c.bf16 %v2692_v49, %v2686_v20  ;;  %v1620_v17 = vld [vmem:[#allocation10 + $0xbc8] sm:$0xff]  ;;  %v1626_v29 = vld [vmem:[#allocation10 + $0xbf8] sm:$0xff] }
 0x464   :  { %v5687_v60 = vpack.c.bf16 %v1565_v48, %v1559_v4  ;;  %v2341_v4 = vld [vmem:[#allocation12 + $0x20] sm:$0xff]  ;;  %v2347_v48 = vld [vmem:[#allocation12 + $0x50] sm:$0xff] }
 0x465   :  { %5668 = vmatpush1.bf16.msra.mxu0 %v5667_v6  ;;  %v1578_v6 = vld [vmem:[#allocation10 + $0xa78] sm:$0xff] }
 0x466   :  { %5814 = vmatpush1.bf16.msra.mxu1 %v5813_v57  ;;  %5670 = vmatprep.subr.bf16.mxu0 %v5669_v10  ;;  %v2698_v57 = vld [vmem:[#allocation12 + $0xb48] sm:$0xff]  ;;  %v2704_v10 = vld [vmem:[#allocation12 + $0xb78] sm:$0xff]  ;;  %v5689_v42 = vpack.c.bf16 %v1578_v6, %v1572_v19 }
 0x467   :  { %5816 = vmatprep.subr.bf16.mxu1 %v5815_v1  ;;  %v1571_v1 = vld [vmem:[#allocation10 + $0xa40] sm:$0xff]  ;;  %v5835_v53 = vpack.c.bf16 %v2704_v10, %v2698_v57  ;;  %v2360_v19 = vld [vmem:[#allocation12 + $0xb8] sm:$0xff]  ;;  %v5985_v57 = vpack.c.bf16 %v2347_v48, %v2341_v4  ;;  %v2382_v4 = vld [vmem:[#allocation12 + $0x168] sm:$0xff] }
 0x468   :  { %v5691_v26 = vpack.c.bf16 %v1577_v41, %v1571_v1  ;;  %v1631_v10 = vld [vmem:[#allocation10 + $0xc20] sm:$0xff]  ;;  %v5987_v1 = vpack.c.bf16 %v2360_v19, %v2354_v8  ;;  %v2359_v41 = vld [vmem:[#allocation12 + $0xb0] sm:$0xff]  ;;  %v2414_v48 = vld [vmem:[#allocation12 + $0x268] sm:$0xff] }
 0x469   :  { %5672 = vmatpush1.bf16.msra.mxu0 %v5671_v51  ;;  %v1590_v51 = vld [vmem:[#allocation10 + $0xad8] sm:$0xff]  ;;  %v2375_v19 = vld [vmem:[#allocation12 + $0x130] sm:$0xff] }
 0x46a   :  { %5818 = vmatpush1.bf16.msra.mxu1 %v5817_v61  ;;  %5674 = vmatprep.subr.bf16.mxu0 %v5673_v15  ;;  %v2710_v61 = vld [vmem:[#allocation12 + $0xba8] sm:$0xff]  ;;  %v2716_v15 = vld [vmem:[#allocation12 + $0xbd8] sm:$0xff]  ;;  %v5693_v21 = vpack.c.bf16 %v1590_v51, %v1584_v3 }
 0x46b   :  { %5820 = vmatprep.subr.bf16.mxu1 %v5819_v0  ;;  %v1583_v0 = vld [vmem:[#allocation10 + $0xaa0] sm:$0xff]  ;;  %v5839_v36 = vpack.c.bf16 %v2716_v15, %v2710_v61  ;;  %v2372_v3 = vld [vmem:[#allocation12 + $0x118] sm:$0xff] }
 0x46c   :  { %v5695_v12 = vpack.c.bf16 %v1589_v54, %v1583_v0  ;;  %v2378_v0 = vld [vmem:[#allocation12 + $0x148] sm:$0xff]  ;;  %v2384_v54 = vld [vmem:[#allocation12 + $0x178] sm:$0xff] }
 0x46d   :  { %5676 = vmatpush1.bf16.msra.mxu0 %v5675_v11  ;;  %v1602_v11 = vld [vmem:[#allocation10 + $0xb38] sm:$0xff] }
 0x46e   :  { %5822 = vmatpush1.bf16.msra.mxu1 %v5821_v13  ;;  %5678 = vmatprep.subr.bf16.mxu0 %v5677_v33  ;;  %v2722_v13 = vld [vmem:[#allocation12 + $0xc08] sm:$0xff]  ;;  %v2728_v33 = vld [vmem:[#allocation12 + $0xc38] sm:$0x3]  ;;  %v5697_v16 = vpack.c.bf16 %v1602_v11, %v1596_v47  ;;  %v2377_v47 = vld [vmem:[#allocation12 + $0x140] sm:$0xff]  ;;  %v5995_v11 = vpack.c.bf16 %v2384_v54, %v2378_v0 }
 0x46f   :  { %5824 = vmatprep.subr.bf16.mxu1 %v5823_v37  ;;  %v1595_v37 = vld [vmem:[#allocation10 + $0xb00] sm:$0xff]  ;;  %v5843_v24 = vpack.c.bf16 %v2728_v33, %v2722_v13  ;;  %v2383_v13 = vld [vmem:[#allocation12 + $0x170] sm:$0xff]  ;;  %v2352_v33 = vld [vmem:[#allocation12 + $0x78] sm:$0xff] }
 0x470   :  { %v5699_v63 = vpack.c.bf16 %v1601_v56, %v1595_v37  ;;  %v5997_v56 = vpack.c.bf16 %v2383_v13, %v2377_v47  ;;  %v2420_v8 = vld [vmem:[#allocation12 + $0x298] sm:$0xff]  ;;  %v2438_v0 = vld [vmem:[#allocation12 + $0x328] sm:$0xff]  ;;  %v2399_v47 = vld [vmem:[#allocation12 + $0x1f0] sm:$0xff] }
 0x471   :  { %5680 = vmatpush1.bf16.msra.mxu0 %v5679_v58  ;;  %v2727_v58 = vld [vmem:[#allocation12 + $0xc30] sm:$0x3]  ;;  %v2444_v54 = vld [vmem:[#allocation12 + $0x358] sm:$0xff]  ;;  %v2437_v13 = vld [vmem:[#allocation12 + $0x320] sm:$0xff] }
 0x472   :  { %5826 = vmatpush1.bf16.msra.mxu1 %v5825_v52  ;;  %5682 = vmatprep.subr.bf16.mxu0 %v5681_v34  ;;  %v2342_v52 = vld [vmem:[#allocation12 + $0x28] sm:$0xff]  ;;  %v2348_v34 = vld [vmem:[#allocation12 + $0x58] sm:$0xff]  ;;  %v5846_v5 = vpack.c.bf16 %v2727_v58, %v2721_v50  ;;  %v2389_v50 = vld [vmem:[#allocation12 + $0x1a0] sm:$0xff] }
 0x473   :  { %5828 = vmatprep.subr.bf16.mxu1 %v5827_v38  ;;  %v1613_v38 = vld [vmem:[#allocation10 + $0xb90] sm:$0xff]  ;;  %v5983_v20 = vpack.c.bf16 %v2348_v34, %v2342_v52  ;;  %v2364_v34 = vld [vmem:[#allocation12 + $0xd8] sm:$0xff] }
 0x474   :  { %v5703_v49 = vpack.c.bf16 %v1613_v38, %v1607_v23  ;;  %v2395_v52 = vld [vmem:[#allocation12 + $0x1d0] sm:$0xff]  ;;  %v2408_v23 = vld [vmem:[#allocation12 + $0x238] sm:$0xff] }
 0x475   :  { %5684 = vmatpush1.bf16.msra.mxu0 %v5683_v35  ;;  %v5705_v35 = vpack.c.bf16 %v1626_v29, %v1620_v17  ;;  %v2363_v29 = vld [vmem:[#allocation12 + $0xd0] sm:$0xff] }
 0x476   :  { %5830 = vmatpush1.bf16.msra.mxu1 %v5829_v59  ;;  %5686 = vmatprep.subr.bf16.mxu0 %v5685_v46  ;;  %v1619_v59 = vld [vmem:[#allocation10 + $0xbc0] sm:$0xff]  ;;  %v1625_v46 = vld [vmem:[#allocation10 + $0xbf0] sm:$0xff] }
 0x477   :  { %5832 = vmatprep.subr.bf16.mxu1 %v5831_v25  ;;  %v1632_v25 = vld [vmem:[#allocation10 + $0xc28] sm:$0xff]  ;;  %v5707_v6 = vpack.c.bf16 %v1625_v46, %v1619_v59  ;;  %v2407_v59 = vld [vmem:[#allocation12 + $0x230] sm:$0xff]  ;;  %v2376_v46 = vld [vmem:[#allocation12 + $0x138] sm:$0xff] }
 0x479   :  { %5688 = vmatpush1.bf16.msra.mxu0 %v5687_v60  ;;  %v1637_v60 = vld [vmem:[#allocation10 + $0xc50] sm:$0x3] }
 0x47a   :  { %5834 = vmatpush1.bf16.msra.mxu1 %v5833_v30  ;;  %5690 = vmatprep.subr.bf16.mxu0 %v5689_v42  ;;  %v2353_v30 = vld [vmem:[#allocation12 + $0x80] sm:$0xff]  ;;  %v5709_v42 = vpack.c.bf16 %v1638_v9, %v1632_v25  ;;  %v5712_v51 = vpack.c.bf16 %v1637_v60, %v1631_v10  ;;  %v5861_v9 = vpack.c.bf16 %v2382_v4, %v2376_v46  ;;  %v2419_v60 = vld [vmem:[#allocation12 + $0x290] sm:$0xff] }
 0x47b   :  { %5836 = vmatprep.subr.bf16.mxu1 %v5835_v53  ;;  %v2346_v53 = vld [vmem:[#allocation12 + $0x48] sm:$0xff]  ;;  %v5989_v61 = vpack.c.bf16 %v2359_v41, %v2353_v30  ;;  %v6007_v10 = vpack.c.bf16 %v2420_v8, %v2414_v48  ;;  %v2388_v30 = vld [vmem:[#allocation12 + $0x198] sm:$0xff]  ;;  %v2467_v4 = vld [vmem:[#allocation12 + $0x410] sm:$0xff] }
 0x47c   :  { %v5849_v15 = vpack.c.bf16 %v2346_v53, %v2340_v45  ;;  %v2432_v41 = vld [vmem:[#allocation12 + $0x2f8] sm:$0xff]  ;;  %v2442_v8 = vld [vmem:[#allocation12 + $0x348] sm:$0xff] }
 0x47d   :  { %5692 = vmatpush1.bf16.msra.mxu0 %v5691_v26  ;;  %v5991_v26 = vpack.c.bf16 %v2372_v3, %v2366_v44  ;;  %v2387_v3 = vld [vmem:[#allocation12 + $0x190] sm:$0xff]  ;;  %v2436_v48 = vld [vmem:[#allocation12 + $0x318] sm:$0xff] }
 0x47e   :  { %5838 = vmatpush1.bf16.msra.mxu1 %v5837_v22  ;;  %5694 = vmatprep.subr.bf16.mxu0 %v5693_v21  ;;  %v2365_v22 = vld [vmem:[#allocation12 + $0xe0] sm:$0xff]  ;;  %v2371_v21 = vld [vmem:[#allocation12 + $0x110] sm:$0xff] }
 0x47f   :  { %5840 = vmatprep.subr.bf16.mxu1 %v5839_v36  ;;  %v5993_v7 = vpack.c.bf16 %v2371_v21, %v2365_v22  ;;  %v2339_v36 = vld [vmem:[#allocation12 + $0x10] sm:$0xff]  ;;  %v2400_v22 = vld [vmem:[#allocation12 + $0x1f8] sm:$0xff]  ;;  %v2406_v21 = vld [vmem:[#allocation12 + $0x228] sm:$0xff] }
 0x480   :  { %v5851_v37 = vpack.c.bf16 %v2345_v40, %v2339_v36  ;;  %v5869_v40 = vpack.c.bf16 %v2406_v21, %v2400_v22  ;;  %v2491_v21 = vld [vmem:[#allocation12 + $0x4d0] sm:$0xff] }
 0x481   :  { %5696 = vmatpush1.bf16.msra.mxu0 %v5695_v12  ;;  %v2358_v12 = vld [vmem:[#allocation12 + $0xa8] sm:$0xff] }
 0x482   :  { %5842 = vmatpush1.bf16.msra.mxu1 %v5841_v14  ;;  %5698 = vmatprep.subr.bf16.mxu0 %v5697_v16  ;;  %v2390_v14 = vld [vmem:[#allocation12 + $0x1a8] sm:$0xff]  ;;  %v2396_v16 = vld [vmem:[#allocation12 + $0x1d8] sm:$0xff]  ;;  %v5853_v31 = vpack.c.bf16 %v2358_v12, %v2352_v33  ;;  %v6015_v33 = vpack.c.bf16 %v2444_v54, %v2438_v0  ;;  %v2443_v12 = vld [vmem:[#allocation12 + $0x350] sm:$0xff] }
 0x483   :  { %5845 = vmatprep.subr.msk.bf16.mxu1 %vm7883_vm14, %v5843_v24  ;;  %v2357_v24 = vld [vmem:[#allocation12 + $0xa0] sm:$0xff]  ;;  %v5999_v58 = vpack.c.bf16 %v2396_v16, %v2390_v14  ;;  %v2412_v14 = vld [vmem:[#allocation12 + $0x258] sm:$0xff]  ;;  %v2418_v16 = vld [vmem:[#allocation12 + $0x288] sm:$0xff] }
 0x484   :  { %v5855_v38 = vpack.c.bf16 %v2357_v24, %v2351_v55  ;;  %v6017_v55 = vpack.c.bf16 %v2443_v12, %v2437_v13  ;;  %v5873_v24 = vpack.c.bf16 %v2418_v16, %v2412_v14  ;;  %v2460_v0 = vld [vmem:[#allocation12 + $0x3d8] sm:$0xff]  ;;  %v2466_v54 = vld [vmem:[#allocation12 + $0x408] sm:$0xff]  ;;  %v2459_v13 = vld [vmem:[#allocation12 + $0x3d0] sm:$0xff] }
 0x485   :  { %5700 = vmatpush1.bf16.msra.mxu0 %v5699_v63  ;;  %2887 = vmatmul.mubr.f32.vlgmr.msra.gmra.mrb[2].mxu1 %v7891_v28  ;;  %v2370_v63 = vld [vmem:[#allocation12 + $0x108] sm:$0xff]  ;;  %v2497_v12 = vld [vmem:[#allocation12 + $0x500] sm:$0xff]  ;;  %v2503_v16 = vld [vmem:[#allocation12 + $0x530] sm:$0xff] }
 0x486   :  { %5702 = vmatprep.subr.bf16.mxu0 %v5701_v62  ;;  %5848 = vmatpush1.bf16.msk.msra.mxu1 %vm7883_vm14, %v5846_v5  ;;  %v2402_v62 = vld [vmem:[#allocation12 + $0x208] sm:$0xff]  ;;  %v6001_v5 = vpack.c.bf16 %v2395_v52, %v2389_v50  ;;  %v5857_v17 = vpack.c.bf16 %v2370_v63, %v2364_v34  ;;  %v2411_v50 = vld [vmem:[#allocation12 + $0x250] sm:$0xff]  ;;  %v2449_v52 = vld [vmem:[#allocation12 + $0x380] sm:$0xff] }
 0x487   :  { %2957 = vmatprep.mubr.f32.mxu1 %v8371_v39  ;;  %5984 = vmatprep.subr.bf16.mxu1 %v5983_v20  ;;  %v2369_v20 = vld [vmem:[#allocation12 + $0x100] sm:$0xff]  ;;  %v2455_v63 = vld [vmem:[#allocation12 + $0x3b0] sm:$0xff] }
 0x488   :  { %v5859_v25 = vpack.c.bf16 %v2369_v20, %v2363_v29  ;;  %v6021_v29 = vpack.c.bf16 %v2455_v63, %v2449_v52  ;;  %v2471_v52 = vld [vmem:[#allocation12 + $0x430] sm:$0xff]  ;;  %v2509_v63 = vld [vmem:[#allocation12 + $0x560] sm:$0xff] }
 0x489   :  { %5704 = vmatpush1.bf16.msra.mxu0 %v5703_v49  ;;  %v2401_v49 = vld [vmem:[#allocation12 + $0x200] sm:$0xff] }
 0x48a   :  { %5706 = vmatprep.subr.bf16.mxu0 %v5705_v35  ;;  %v6003_v35 = vpack.c.bf16 %v2408_v23, %v2402_v62  ;;  %v2424_v62 = vld [vmem:[#allocation12 + $0x2b8] sm:$0xff]  ;;  %v2430_v23 = vld [vmem:[#allocation12 + $0x2e8] sm:$0xff] }
 0x48b   :  { %v5877_v20 = vpack.c.bf16 %v2430_v23, %v2424_v62  ;;  %v2515_v23 = vld [vmem:[#allocation12 + $0x590] sm:$0xff] }
 0x48d   :  { %5708 = vmatpush1.bf16.msra.mxu0 %v5707_v6  ;;  %5032 = vmatmul.mubr.msk.f32.vlgmr.msra.gmra.mrb[2].mxu1 %vm1671_vm0, %v7874_v32  ;;  %v2381_v6 = vld [vmem:[#allocation12 + $0x160] sm:$0xff] }
 0x48e   :  { %5986 = vmatpush1.bf16.msra.mxu1 %v5985_v57  ;;  %3241 = vmatprep.mubr.f32.mxu1 %v7862_v18  ;;  %v2413_v57 = vld [vmem:[#allocation12 + $0x260] sm:$0xff]  ;;  %v5863_v45 = vpack.c.bf16 %v2381_v6, %v2375_v19  ;;  %v5881_v6 = vpack.c.bf16 %v2442_v8, %v2436_v48  ;;  %v2527_v8 = vld [vmem:[#allocation12 + $0x5f0] sm:$0xff] }
 0x48f   :  { %5711 = vmatprep.subr.msk.bf16.mxu0 %vm7883_vm14, %v5709_v42  ;;  %5988 = vmatprep.subr.bf16.mxu1 %v5987_v1  ;;  %v2394_v42 = vld [vmem:[#allocation12 + $0x1c8] sm:$0xff]  ;;  %v6009_v53 = vpack.c.bf16 %v2419_v60, %v2413_v57  ;;  %v2435_v57 = vld [vmem:[#allocation12 + $0x310] sm:$0xff]  ;;  %v2473_v60 = vld [vmem:[#allocation12 + $0x440] sm:$0xff] }
 0x490   :  { %2254 = vmatmul.mubr.f32.vlgmr.msra.gmra.mrb[4].mxu0 %v7891_v28  ;;  %v2426_v1 = vld [vmem:[#allocation12 + $0x2c8] sm:$0xff]  ;;  %v5865_v44 = vpack.c.bf16 %v2394_v42, %v2388_v30  ;;  %v2479_v42 = vld [vmem:[#allocation12 + $0x470] sm:$0xff] }
 0x491   :  { %5714 = vmatpush1.bf16.msk.msra.mxu0 %vm7883_vm14, %v5712_v51  ;;  %2324 = vmatprep.mubr.f32.mxu0 %v8371_v39  ;;  %v2393_v51 = vld [vmem:[#allocation12 + $0x1c0] sm:$0xff] }
 0x492   :  { %5990 = vmatpush1.bf16.msra.mxu1 %v5989_v61  ;;  %5850 = vmatprep.subr.bf16.mxu0 %v5849_v15  ;;  %v2425_v61 = vld [vmem:[#allocation12 + $0x2c0] sm:$0xff]  ;;  %v6011_v15 = vpack.c.bf16 %v2432_v41, %v2426_v1  ;;  %v2448_v1 = vld [vmem:[#allocation12 + $0x378] sm:$0xff]  ;;  %v2454_v41 = vld [vmem:[#allocation12 + $0x3a8] sm:$0xff] }
 0x493   :  { %5992 = vmatprep.subr.bf16.mxu1 %v5991_v26  ;;  %v2431_v26 = vld [vmem:[#allocation12 + $0x2f0] sm:$0xff] }
 0x494   :  { %v6013_v36 = vpack.c.bf16 %v2431_v26, %v2425_v61  ;;  %v2447_v61 = vld [vmem:[#allocation12 + $0x370] sm:$0xff]  ;;  %v2485_v26 = vld [vmem:[#allocation12 + $0x4a0] sm:$0xff] }
 0x496   :  { %5994 = vmatpush1.bf16.msra.mxu1 %v5993_v7  ;;  %v5867_v7 = vpack.c.bf16 %v2393_v51, %v2387_v3  ;;  %v6029_v3 = vpack.c.bf16 %v2479_v42, %v2473_v60  ;;  %v5885_v51 = vpack.c.bf16 %v2454_v41, %v2448_v1  ;;  %v2495_v60 = vld [vmem:[#allocation12 + $0x4f0] sm:$0xff]  ;;  %v2533_v1 = vld [vmem:[#allocation12 + $0x620] sm:$0xff] }
 0x497   :  { %5996 = vmatprep.subr.bf16.mxu1 %v5995_v11  ;;  %v2405_v11 = vld [vmem:[#allocation12 + $0x220] sm:$0xff]  ;;  %v2539_v41 = vld [vmem:[#allocation12 + $0x650] sm:$0xff] }
 0x498   :  { %5029 = vmatmul.mubr.msk.f32.vlgmr.msra.gmra.mrb[4].mxu0 %vm1671_vm0, %v7874_v32 }
 0x499   :  { %5852 = vmatpush1.bf16.msra.mxu0 %v5851_v37  ;;  %3028 = vmatprep.mubr.f32.mxu0 %v7862_v18  ;;  %v6005_v18 = vpack.c.bf16 %v2407_v59, %v2401_v49  ;;  %v2450_v37 = vld [vmem:[#allocation12 + $0x388] sm:$0xff]  ;;  %v2423_v49 = vld [vmem:[#allocation12 + $0x2b0] sm:$0xff]  ;;  %v2461_v59 = vld [vmem:[#allocation12 + $0x3e0] sm:$0xff] }
 0x49a   :  { %5998 = vmatpush1.bf16.msra.mxu1 %v5997_v56  ;;  %5854 = vmatprep.subr.bf16.mxu0 %v5853_v31  ;;  %v2456_v56 = vld [vmem:[#allocation12 + $0x3b8] sm:$0xff]  ;;  %v5871_v31 = vpack.c.bf16 %v2405_v11, %v2399_v47  ;;  %v6025_v19 = vpack.c.bf16 %v2467_v4, %v2461_v59  ;;  %v6033_v47 = vpack.c.bf16 %v2491_v21, %v2485_v26  ;;  %v2483_v59 = vld [vmem:[#allocation12 + $0x490] sm:$0xff]  ;;  %v2521_v4 = vld [vmem:[#allocation12 + $0x5c0] sm:$0xff] }
 0x49b   :  { %6000 = vmatprep.subr.bf16.mxu1 %v5999_v58  ;;  %v2417_v58 = vld [vmem:[#allocation12 + $0x280] sm:$0xff]  ;;  %v6019_v34 = vpack.c.bf16 %v2456_v56, %v2450_v37  ;;  %v5889_v11 = vpack.c.bf16 %v2466_v54, %v2460_v0  ;;  %v2472_v37 = vld [vmem:[#allocation12 + $0x438] sm:$0xff]  ;;  %v2478_v56 = vld [vmem:[#allocation12 + $0x468] sm:$0xff] }
 0x49c   :  { %v2513_v26 = vld [vmem:[#allocation12 + $0x580] sm:$0xff]  ;;  %v2551_v54 = vld [vmem:[#allocation12 + $0x6b0] sm:$0xff] }
 0x49d   :  { %5856 = vmatpush1.bf16.msra.mxu0 %v5855_v38  ;;  %v2462_v38 = vld [vmem:[#allocation12 + $0x3e8] sm:$0xff] }
 0x49e   :  { %6002 = vmatpush1.bf16.msra.mxu1 %v6001_v5  ;;  %5858 = vmatprep.subr.bf16.mxu0 %v5857_v17  ;;  %v2468_v5 = vld [vmem:[#allocation12 + $0x418] sm:$0xff]  ;;  %v5875_v17 = vpack.c.bf16 %v2417_v58, %v2411_v50  ;;  %v6037_v50 = vpack.c.bf16 %v2503_v16, %v2497_v12  ;;  %v5893_v58 = vpack.c.bf16 %v2478_v56, %v2472_v37  ;;  %v2519_v12 = vld [vmem:[#allocation12 + $0x5b0] sm:$0xff]  ;;  %v2557_v16 = vld [vmem:[#allocation12 + $0x6e0] sm:$0xff] }
 0x49f   :  { %6004 = vmatprep.subr.bf16.mxu1 %v6003_v35  ;;  %v2429_v35 = vld [vmem:[#allocation12 + $0x2e0] sm:$0xff]  ;;  %v6023_v46 = vpack.c.bf16 %v2468_v5, %v2462_v38  ;;  %v2484_v38 = vld [vmem:[#allocation12 + $0x498] sm:$0xff]  ;;  %v2490_v5 = vld [vmem:[#allocation12 + $0x4c8] sm:$0xff] }
 0x4a0   :  { %v2563_v56 = vld [vmem:[#allocation12 + $0x710] sm:$0xff] }
 0x4a1   :  { %5860 = vmatpush1.bf16.msra.mxu0 %v5859_v25  ;;  %v2474_v25 = vld [vmem:[#allocation12 + $0x448] sm:$0xff] }
 0x4a2   :  { %6006 = vmatpush1.bf16.msra.mxu1 %v6005_v18  ;;  %5862 = vmatprep.subr.bf16.mxu0 %v5861_v9  ;;  %v2480_v18 = vld [vmem:[#allocation12 + $0x478] sm:$0xff]  ;;  %v5879_v9 = vpack.c.bf16 %v2429_v35, %v2423_v49  ;;  %v6041_v49 = vpack.c.bf16 %v2515_v23, %v2509_v63  ;;  %v5897_v35 = vpack.c.bf16 %v2490_v5, %v2484_v38  ;;  %v1641_v63 = vlaneseq  ;;  %v2537_v23 = vld [vmem:[#allocation12 + $0x640] sm:$0xff] }
 0x4a3   :  { %6008 = vmatprep.subr.bf16.mxu1 %v6007_v10  ;;  %v2441_v10 = vld [vmem:[#allocation12 + $0x340] sm:$0xff]  ;;  %v6027_v30 = vpack.c.bf16 %v2480_v18, %v2474_v25  ;;  %v2496_v25 = vld [vmem:[#allocation12 + $0x4f8] sm:$0xff]  ;;  %v2502_v18 = vld [vmem:[#allocation12 + $0x528] sm:$0xff] }
 0x4a4   :  { %v2569_v38 = vld [vmem:[#allocation12 + $0x740] sm:$0xff] }
 0x4a5   :  { %5864 = vmatpush1.bf16.msra.mxu0 %v5863_v45  ;;  %v2486_v45 = vld [vmem:[#allocation12 + $0x4a8] sm:$0xff] }
 0x4a6   :  { %6010 = vmatpush1.bf16.msra.mxu1 %v6009_v53  ;;  %5866 = vmatprep.subr.bf16.mxu0 %v5865_v44  ;;  %v2492_v53 = vld [vmem:[#allocation12 + $0x4d8] sm:$0xff]  ;;  %v5883_v44 = vpack.c.bf16 %v2441_v10, %v2435_v57  ;;  %v6045_v57 = vpack.c.bf16 %v2527_v8, %v2521_v4  ;;  %v5901_v10 = vpack.c.bf16 %v2502_v18, %v2496_v25  ;;  %v2543_v8 = vld [vmem:[#allocation12 + $0x670] sm:$0xff]  ;;  %v2549_v25 = vld [vmem:[#allocation12 + $0x6a0] sm:$0xff] }
 0x4a7   :  { %6012 = vmatprep.subr.bf16.mxu1 %v6011_v15  ;;  %v2453_v15 = vld [vmem:[#allocation12 + $0x3a0] sm:$0xff]  ;;  %v6031_v22 = vpack.c.bf16 %v2492_v53, %v2486_v45  ;;  %v2508_v45 = vld [vmem:[#allocation12 + $0x558] sm:$0xff]  ;;  %v2514_v53 = vld [vmem:[#allocation12 + $0x588] sm:$0xff] }
 0x4a8   :  { %v5905_v21 = vpack.c.bf16 %v2514_v53, %v2508_v45  ;;  %v2581_v18 = vld [vmem:[#allocation12 + $0x7a0] sm:$0xff] }
 0x4a9   :  { %5868 = vmatpush1.bf16.msra.mxu0 %v5867_v7  ;;  %v2498_v7 = vld [vmem:[#allocation12 + $0x508] sm:$0xff] }
 0x4aa   :  { %6014 = vmatpush1.bf16.msra.mxu1 %v6013_v36  ;;  %5870 = vmatprep.subr.bf16.mxu0 %v5869_v40  ;;  %v2504_v36 = vld [vmem:[#allocation12 + $0x538] sm:$0xff]  ;;  %v5887_v40 = vpack.c.bf16 %v2453_v15, %v2447_v61  ;;  %v6049_v61 = vpack.c.bf16 %v2539_v41, %v2533_v1  ;;  %v2507_v15 = vld [vmem:[#allocation12 + $0x550] sm:$0xff]  ;;  %v7936_v1 = vld [vmem:[#allocation13] sm:$0x3f]  ;;  %v5919_v41 = vpack.c.bf16 %v2549_v25, %v2543_v8 }
 0x4ab   :  { %6016 = vmatprep.subr.bf16.mxu1 %v6015_v33  ;;  %v2465_v33 = vld [vmem:[#allocation12 + $0x400] sm:$0xff]  ;;  %v6035_v14 = vpack.c.bf16 %v2504_v36, %v2498_v7  ;;  %v2520_v7 = vld [vmem:[#allocation12 + $0x5b8] sm:$0xff]  ;;  %v2526_v36 = vld [vmem:[#allocation12 + $0x5e8] sm:$0xff] }
 0x4ad   :  { %5872 = vmatpush1.bf16.msra.mxu0 %v5871_v31  ;;  %v2510_v31 = vld [vmem:[#allocation12 + $0x568] sm:$0xff] }
 0x4ae   :  { %6018 = vmatpush1.bf16.msra.mxu1 %v6017_v55  ;;  %5874 = vmatprep.subr.bf16.mxu0 %v5873_v24  ;;  %v2516_v55 = vld [vmem:[#allocation12 + $0x598] sm:$0xff]  ;;  %v5891_v24 = vpack.c.bf16 %v2465_v33, %v2459_v13  ;;  %v5909_v33 = vpack.c.bf16 %v2526_v36, %v2520_v7 }
 0x4af   :  { %6020 = vmatprep.subr.bf16.mxu1 %v6019_v34  ;;  %v2477_v34 = vld [vmem:[#allocation12 + $0x460] sm:$0xff]  ;;  %v6039_v62 = vpack.c.bf16 %v2516_v55, %v2510_v31  ;;  %v2532_v31 = vld [vmem:[#allocation12 + $0x618] sm:$0xff]  ;;  %v2538_v55 = vld [vmem:[#allocation12 + $0x648] sm:$0xff] }
 0x4b1   :  { %5876 = vmatpush1.bf16.msra.mxu0 %v5875_v17  ;;  %v2522_v17 = vld [vmem:[#allocation12 + $0x5c8] sm:$0xff] }
 0x4b2   :  { %6022 = vmatpush1.bf16.msra.mxu1 %v6021_v29  ;;  %5878 = vmatprep.subr.bf16.mxu0 %v5877_v20  ;;  %v2528_v29 = vld [vmem:[#allocation12 + $0x5f8] sm:$0xff]  ;;  %v5895_v20 = vpack.c.bf16 %v2477_v34, %v2471_v52  ;;  %v6057_v52 = vpack.c.bf16 %v2563_v56, %v2557_v16  ;;  %v5913_v34 = vpack.c.bf16 %v2538_v55, %v2532_v31  ;;  %v2611_v16 = vld [vmem:[#allocation12 + $0x890] sm:$0xff]  ;;  %v2586_v56 = vld [vmem:[#allocation12 + $0x7c8] sm:$0xff] }
 0x4b3   :  { %6024 = vmatprep.subr.bf16.mxu1 %v6023_v46  ;;  %v2489_v46 = vld [vmem:[#allocation12 + $0x4c0] sm:$0xff]  ;;  %v6043_v48 = vpack.c.bf16 %v2528_v29, %v2522_v17  ;;  %v2575_v17 = vld [vmem:[#allocation12 + $0x770] sm:$0xff]  ;;  %v2544_v29 = vld [vmem:[#allocation12 + $0x678] sm:$0xff] }
 0x4b4   :  { %v6061_v4 = vpack.c.bf16 %v2575_v17, %v2569_v38  ;;  %v2618_v55 = vld [vmem:[#allocation12 + $0x8c8] sm:$0xff] }
 0x4b5   :  { %5880 = vmatpush1.bf16.msra.mxu0 %v5879_v9  ;;  %v2534_v9 = vld [vmem:[#allocation12 + $0x628] sm:$0xff] }
 0x4b6   :  { %6026 = vmatpush1.bf16.msra.mxu1 %v6025_v19  ;;  %5882 = vmatprep.subr.bf16.mxu0 %v5881_v6  ;;  %v2540_v19 = vld [vmem:[#allocation12 + $0x658] sm:$0xff]  ;;  %v5899_v6 = vpack.c.bf16 %v2489_v46, %v2483_v59  ;;  %v7933_v46 = vshrl.u32 %v1641_v63, 7  ;;  %v2579_v63 = vld [vmem:[#allocation12 + $0x790] sm:$0xff] }
 0x4b7   :  { %6028 = vmatprep.subr.bf16.mxu1 %v6027_v30  ;;  %v2501_v30 = vld [vmem:[#allocation12 + $0x520] sm:$0xff]  ;;  %v6047_v42 = vpack.c.bf16 %v2540_v19, %v2534_v9 }
 0x4b8   :  { %v1651_v45 = vsub.s32 2, %v7933_v46 }
 0x4b9   :  { %5884 = vmatpush1.bf16.msra.mxu0 %v5883_v44  ;;  %v2546_v44 = vld [vmem:[#allocation12 + $0x688] sm:$0xff] }
 0x4ba   :  { %6030 = vmatpush1.bf16.msra.mxu1 %v6029_v3  ;;  %5886 = vmatprep.subr.bf16.mxu0 %v5885_v51  ;;  %v2552_v3 = vld [vmem:[#allocation12 + $0x6b8] sm:$0xff]  ;;  %v5903_v51 = vpack.c.bf16 %v2501_v30, %v2495_v60  ;;  %v2594_v30 = vld [vmem:[#allocation12 + $0x808] sm:$0xff]  ;;  %v7942_v7 = vrot.slane %v7936_v1, %v1651_v45 }
 0x4bb   :  { %6032 = vmatprep.subr.bf16.mxu1 %v6031_v22  ;;  %v2545_v22 = vld [vmem:[#allocation12 + $0x680] sm:$0xff]  ;;  %v6051_v0 = vpack.c.bf16 %v2552_v3, %v2546_v44  ;;  %v2555_v3 = vld [vmem:[#allocation12 + $0x6d0] sm:$0xff]  ;;  %v2648_v45 = vld [vmem:[#allocation12 + $0x9b8] sm:$0xff] }
 0x4bc   :  { %v6053_v13 = vpack.c.bf16 %v2551_v54, %v2545_v22  ;;  %v2568_v22 = vld [vmem:[#allocation12 + $0x738] sm:$0xff] }
 0x4bd   :  { %5888 = vmatpush1.bf16.msra.mxu0 %v5887_v40  ;;  %v2558_v40 = vld [vmem:[#allocation12 + $0x6e8] sm:$0xff]  ;;  %v2612_v54 = vld [vmem:[#allocation12 + $0x898] sm:$0xff] }
 0x4be   :  { %6034 = vmatpush1.bf16.msra.mxu1 %v6033_v47  ;;  %5890 = vmatprep.subr.bf16.mxu0 %v5889_v11  ;;  %v2564_v47 = vld [vmem:[#allocation12 + $0x718] sm:$0xff]  ;;  %v5907_v11 = vpack.c.bf16 %v2513_v26, %v2507_v15  ;;  %v2599_v26 = vld [vmem:[#allocation12 + $0x830] sm:$0xff] }
 0x4bf   :  { %6036 = vmatprep.subr.bf16.mxu1 %v6035_v14  ;;  %v2525_v14 = vld [vmem:[#allocation12 + $0x5e0] sm:$0xff]  ;;  %v6055_v37 = vpack.c.bf16 %v2564_v47, %v2558_v40  ;;  %v2567_v47 = vld [vmem:[#allocation12 + $0x730] sm:$0xff] }
 0x4c1   :  { %5892 = vmatpush1.bf16.msra.mxu0 %v5891_v24  ;;  %v2570_v24 = vld [vmem:[#allocation12 + $0x748] sm:$0xff] }
 0x4c2   :  { %6038 = vmatpush1.bf16.msra.mxu1 %v6037_v50  ;;  %5894 = vmatprep.subr.bf16.mxu0 %v5893_v58  ;;  %v2576_v50 = vld [vmem:[#allocation12 + $0x778] sm:$0xff]  ;;  %v5911_v58 = vpack.c.bf16 %v2525_v14, %v2519_v12 }
 0x4c3   :  { %6040 = vmatprep.subr.bf16.mxu1 %v6039_v62  ;;  %v2531_v62 = vld [vmem:[#allocation12 + $0x610] sm:$0xff]  ;;  %v6059_v5 = vpack.c.bf16 %v2576_v50, %v2570_v24  ;;  %v2624_v24 = vld [vmem:[#allocation12 + $0x8f8] sm:$0xff] }
 0x4c4   :  { %v5915_v59 = vpack.c.bf16 %v2537_v23, %v2531_v62  ;;  %v2585_v62 = vld [vmem:[#allocation12 + $0x7c0] sm:$0xff]  ;;  %v6075_v17 = vpack.c.bf16 %v2624_v24, %v2618_v55  ;;  %v2666_v55 = vld [vmem:[#allocation12 + $0xa48] sm:$0xff]  ;;  %v2672_v24 = vld [vmem:[#allocation12 + $0xa78] sm:$0xff] }
 0x4c5   :  { %5896 = vmatpush1.bf16.msra.mxu0 %v5895_v20  ;;  %v2550_v20 = vld [vmem:[#allocation12 + $0x6a8] sm:$0xff]  ;;  %v2617_v23 = vld [vmem:[#allocation12 + $0x8c0] sm:$0xff]  ;;  %v5931_v25 = vpack.c.bf16 %v2585_v62, %v2579_v63 }
 0x4c6   :  { %6042 = vmatpush1.bf16.msra.mxu1 %v6041_v49  ;;  %5898 = vmatprep.subr.bf16.mxu0 %v5897_v35  ;;  %v2582_v49 = vld [vmem:[#allocation12 + $0x7a8] sm:$0xff]  ;;  %v2588_v35 = vld [vmem:[#allocation12 + $0x7d8] sm:$0xff]  ;;  %v2633_v63 = vld [vmem:[#allocation12 + $0x940] sm:$0xff] }
 0x4c7   :  { %6044 = vmatprep.subr.bf16.mxu1 %v6043_v48  ;;  %v5917_v48 = vpack.c.bf16 %v2550_v20, %v2544_v29  ;;  %v6063_v19 = vpack.c.bf16 %v2588_v35, %v2582_v49  ;;  %v2623_v29 = vld [vmem:[#allocation12 + $0x8f0] sm:$0xff]  ;;  %v2592_v20 = vld [vmem:[#allocation12 + $0x7f8] sm:$0xff]  ;;  %v2598_v49 = vld [vmem:[#allocation12 + $0x828] sm:$0xff] }
 0x4c8   :  { %v2665_v62 = vld [vmem:[#allocation12 + $0xa40] sm:$0xff] }
 0x4c9   :  { %5900 = vmatpush1.bf16.msra.mxu0 %v5899_v6  ;;  %v2587_v6 = vld [vmem:[#allocation12 + $0x7d0] sm:$0xff] }
 0x4ca   :  { %6046 = vmatpush1.bf16.msra.mxu1 %v6045_v57  ;;  %5902 = vmatprep.subr.bf16.mxu0 %v5901_v10  ;;  %v2556_v57 = vld [vmem:[#allocation12 + $0x6d8] sm:$0xff]  ;;  %v2562_v10 = vld [vmem:[#allocation12 + $0x708] sm:$0xff]  ;;  %v6065_v53 = vpack.c.bf16 %v2587_v6, %v2581_v18  ;;  %v6077_v18 = vpack.c.bf16 %v2623_v29, %v2617_v23  ;;  %v2597_v6 = vld [vmem:[#allocation12 + $0x820] sm:$0xff]  ;;  %v6091_v23 = vpack.c.bf16 %v2672_v24, %v2666_v55 }
 0x4cb   :  { %6048 = vmatprep.subr.bf16.mxu1 %v6047_v42  ;;  %v2600_v42 = vld [vmem:[#allocation12 + $0x838] sm:$0xff]  ;;  %v5921_v44 = vpack.c.bf16 %v2562_v10, %v2556_v57  ;;  %v2629_v57 = vld [vmem:[#allocation12 + $0x920] sm:$0xff]  ;;  %v2678_v29 = vld [vmem:[#allocation12 + $0xaa8] sm:$0xff] }
 0x4cc   :  { %v6067_v15 = vpack.c.bf16 %v2600_v42, %v2594_v30  ;;  %v2604_v30 = vld [vmem:[#allocation12 + $0x858] sm:$0xff]  ;;  %v2610_v42 = vld [vmem:[#allocation12 + $0x888] sm:$0xff]  ;;  %v2675_v24 = vld [vmem:[#allocation12 + $0xa90] sm:$0xff] }
 0x4cd   :  { %5904 = vmatpush1.bf16.msra.mxu0 %v5903_v51  ;;  %3242 = vmatmul.mubr.f32.vlgmr.msra.gmra.mrb[4].mxu1 %v7864_v27  ;;  %v2561_v51 = vld [vmem:[#allocation12 + $0x700] sm:$0xff] }
 0x4ce   :  { %6050 = vmatpush1.bf16.msra.mxu1 %v6049_v61  ;;  %3312 = vmatprep.mubr.f32.mxu1 %v7877_v2  ;;  %v2593_v61 = vld [vmem:[#allocation12 + $0x800] sm:$0xff] }
 0x4cf   :  { %5906 = vmatprep.subr.bf16.mxu0 %v5905_v21  ;;  %6052 = vmatprep.subr.bf16.mxu1 %v6051_v0  ;;  %v2574_v21 = vld [vmem:[#allocation12 + $0x768] sm:$0xff]  ;;  %v6069_v36 = vpack.c.bf16 %v2599_v26, %v2593_v61  ;;  %v2609_v61 = vld [vmem:[#allocation12 + $0x880] sm:$0xff]  ;;  %v2647_v26 = vld [vmem:[#allocation12 + $0x9b0] sm:$0xff] }
 0x4d0   :  { %v2606_v0 = vld [vmem:[#allocation12 + $0x868] sm:$0xff]  ;;  %v5925_v40 = vpack.c.bf16 %v2574_v21, %v2568_v22  ;;  %v2616_v22 = vld [vmem:[#allocation12 + $0x8b8] sm:$0xff] }
 0x4d1   :  { %5908 = vmatpush1.bf16.msra.mxu0 %v5907_v11  ;;  %v2573_v11 = vld [vmem:[#allocation12 + $0x760] sm:$0xff]  ;;  %v6071_v14 = vpack.c.bf16 %v2612_v54, %v2606_v0  ;;  %v2622_v21 = vld [vmem:[#allocation12 + $0x8e8] sm:$0xff]  ;;  %v2660_v54 = vld [vmem:[#allocation12 + $0xa18] sm:$0xff] }
 0x4d2   :  { %6054 = vmatpush1.bf16.msra.mxu1 %v6053_v13  ;;  %5910 = vmatprep.subr.bf16.mxu0 %v5909_v33  ;;  %v2605_v13 = vld [vmem:[#allocation12 + $0x860] sm:$0xff]  ;;  %v5927_v50 = vpack.c.bf16 %v2573_v11, %v2567_v47  ;;  %v2654_v0 = vld [vmem:[#allocation12 + $0x9e8] sm:$0xff]  ;;  %v2615_v47 = vld [vmem:[#allocation12 + $0x8b0] sm:$0xff] }
 0x4d3   :  { %6056 = vmatprep.subr.bf16.mxu1 %v6055_v37  ;;  %v2580_v37 = vld [vmem:[#allocation12 + $0x798] sm:$0xff]  ;;  %v2621_v11 = vld [vmem:[#allocation12 + $0x8e0] sm:$0xff] }
 0x4d5   :  { %5912 = vmatpush1.bf16.msra.mxu0 %v5911_v58 }
 0x4d6   :  { %6058 = vmatpush1.bf16.msra.mxu1 %v6057_v52  ;;  %5914 = vmatprep.subr.bf16.mxu0 %v5913_v34  ;;  %v6073_v52 = vpack.c.bf16 %v2611_v16, %v2605_v13  ;;  %v5929_v34 = vpack.c.bf16 %v2586_v56, %v2580_v37  ;;  %v2653_v13 = vld [vmem:[#allocation12 + $0x9e0] sm:$0xff]  ;;  %v2659_v16 = vld [vmem:[#allocation12 + $0xa10] sm:$0xff]  ;;  %v2628_v37 = vld [vmem:[#allocation12 + $0x918] sm:$0xff] }
 0x4d7   :  { %v2042_v9 = vpop.f32.mrb[0].mxu1  ;;  %6060 = vmatprep.subr.bf16.mxu1 %v6059_v5  ;;  %v2634_v56 = vld [vmem:[#allocation12 + $0x948] sm:$0xff] }
 0x4d8   :  { %3029 = vmatmul.mubr.f32.vlgmr.msra.gmra.mrb[6].mxu0 %v7864_v27  ;;  %v2044_v60 = vpop.f32.mrb[1].mxu1  ;;  %v1655_v27 = vsub.s32 3, %v7933_v46  ;;  %v6467_v58 = vadd.f32 %v2042_v9, %v7942_v7  ;;  %v5933_v9 = vpack.c.bf16 %v2598_v49, %v2592_v20  ;;  %v2684_v20 = vld [vmem:[#allocation12 + $0xad8] sm:$0xff] }
 0x4d9   :  { %5916 = vmatpush1.bf16.msra.mxu0 %v5915_v59  ;;  %3099 = vmatprep.mubr.f32.mxu0 %v7877_v2  ;;  %v5923_v2 = vpack.c.bf16 %v2561_v51, %v2555_v3  ;;  %v5937_v3 = vpack.c.bf16 %v2610_v42, %v2604_v30  ;;  %v2603_v51 = vld [vmem:[#allocation12 + $0x850] sm:$0xff] }
 0x4da   :  { %6062 = vmatpush1.bf16.msra.mxu1 %v6061_v4  ;;  %5918 = vmatprep.subr.bf16.mxu0 %v5917_v48  ;;  %v7945_v33 = vrot.slane %v7936_v1, %v1655_v27  ;;  %v2630_v4 = vld [vmem:[#allocation12 + $0x928] sm:$0xff]  ;;  %v2636_v48 = vld [vmem:[#allocation12 + $0x958] sm:$0xff]  ;;  %v2641_v27 = vld [vmem:[#allocation12 + $0x980] sm:$0xff] }
 0x4db   :  { %6064 = vmatprep.subr.bf16.mxu1 %v6063_v19  ;;  %v2591_v19 = vld [vmem:[#allocation12 + $0x7f0] sm:$0xff]  ;;  %v6079_v10 = vpack.c.bf16 %v2636_v48, %v2630_v4 }
 0x4dc   :  { %v6469_v38 = vadd.f32 %v2044_v60, %v7945_v33  ;;  %v2635_v60 = vld [vmem:[#allocation12 + $0x950] sm:$0xff] }
 0x4dd   :  { %5920 = vmatpush1.bf16.msra.mxu0 %v5919_v41  ;;  %v2642_v41 = vld [vmem:[#allocation12 + $0x988] sm:$0xff]  ;;  %v2639_v48 = vld [vmem:[#allocation12 + $0x970] sm:$0xff] }
 0x4de   :  { %6066 = vmatpush1.bf16.msra.mxu1 %v6065_v53  ;;  %5922 = vmatprep.subr.bf16.mxu0 %v5921_v44  ;;  %v5935_v53 = vpack.c.bf16 %v2597_v6, %v2591_v19  ;;  %v6081_v44 = vpack.c.bf16 %v2635_v60, %v2629_v57  ;;  %v2683_v19 = vld [vmem:[#allocation12 + $0xad0] sm:$0xff]  ;;  %v2652_v6 = vld [vmem:[#allocation12 + $0x9d8] sm:$0xff]  ;;  %v2658_v57 = vld [vmem:[#allocation12 + $0xa08] sm:$0xff] }
 0x4df   :  { %v7947_v12 = vpop.f32.mrb[0].mxu0  ;;  %6068 = vmatprep.subr.bf16.mxu1 %v6067_v15  ;;  %v6083_v15 = vpack.c.bf16 %v2648_v45, %v2642_v41  ;;  %v2696_v60 = vld [vmem:[#allocation12 + $0xb38] sm:$0xff]  ;;  %v5953_v41 = vpack.c.bf16 %v2658_v57, %v2652_v6  ;;  %v2651_v45 = vld [vmem:[#allocation12 + $0x9d0] sm:$0xff]  ;;  %v2705_v57 = vld [vmem:[#allocation12 + $0xb80] sm:$0xff] }
 0x4e0   :  { %v7949_v31 = vpop.f32.mrb[1].mxu0  ;;  %v2699_v6 = vld [vmem:[#allocation12 + $0xb50] sm:$0xff] }
 0x4e1   :  { %5924 = vmatpush1.bf16.msra.mxu0 %v5923_v2  ;;  %v5939_v2 = vpack.c.bf16 %v2609_v61, %v2603_v51  ;;  %v2695_v51 = vld [vmem:[#allocation12 + $0xb30] sm:$0xff]  ;;  %v2664_v61 = vld [vmem:[#allocation12 + $0xa38] sm:$0xff] }
 0x4e2   :  { %6070 = vmatpush1.bf16.msra.mxu1 %v6069_v36  ;;  %5926 = vmatprep.subr.bf16.mxu0 %v5925_v40  ;;  %v6085_v36 = vpack.c.bf16 %v2647_v26, %v2641_v27  ;;  %v5941_v40 = vpack.c.bf16 %v2622_v21, %v2616_v22  ;;  %v2670_v27 = vld [vmem:[#allocation12 + $0xa68] sm:$0xff]  ;;  %v2708_v26 = vld [vmem:[#allocation12 + $0xb98] sm:$0xff] }
 0x4e3   :  { %v2113_v5 = vpop.f32.mrb[2].mxu0  ;;  %6072 = vmatprep.subr.bf16.mxu1 %v6071_v14  ;;  %v6087_v14 = vpack.c.bf16 %v2660_v54, %v2654_v0  ;;  %v5957_v0 = vpack.c.bf16 %v2670_v27, %v2664_v61  ;;  %v2663_v54 = vld [vmem:[#allocation12 + $0xa30] sm:$0xff] }
 0x4e4   :  { %v7953_v35 = vadd.f32 %v6467_v58, %v2113_v5  ;;  %v2115_v59 = vpop.f32.mrb[3].mxu0  ;;  %v6089_v58 = vpack.c.bf16 %v2659_v16, %v2653_v13  ;;  %v2640_v5 = vld [vmem:[#allocation12 + $0x978] sm:$0xff]  ;;  %v2682_v13 = vld [vmem:[#allocation12 + $0xac8] sm:$0xff]  ;;  %v2723_v27 = vld [vmem:[#allocation12 + $0xc10] sm:$0xff] }
 0x4e5   :  { %5928 = vmatpush1.bf16.msra.mxu0 %v5927_v50  ;;  %v7955_v8 = vadd.f32 %v6469_v38, %v2115_v59  ;;  %v5943_v50 = vpack.c.bf16 %v2621_v11, %v2615_v47  ;;  %v2671_v38 = vld [vmem:[#allocation12 + $0xa70] sm:$0xff]  ;;  %v2676_v11 = vld [vmem:[#allocation12 + $0xa98] sm:$0xff] }
 0x4e6   :  { %6074 = vmatpush1.bf16.msra.mxu1 %v6073_v52  ;;  %5930 = vmatprep.subr.bf16.mxu0 %v5929_v34  ;;  %v5945_v52 = vpack.c.bf16 %v2634_v56, %v2628_v37  ;;  %v2627_v34 = vld [vmem:[#allocation12 + $0x910] sm:$0xff]  ;;  %v6093_v59 = vpack.c.bf16 %v2671_v38, %v2665_v62  ;;  %v2720_v16 = vld [vmem:[#allocation12 + $0xbf8] sm:$0xff]  ;;  %v5961_v55 = vpack.c.bf16 %v2682_v13, %v2676_v11  ;;  %v2694_v62 = vld [vmem:[#allocation12 + $0xb28] sm:$0xff] }
 0x4e7   :  { %6076 = vmatprep.subr.bf16.mxu1 %v6075_v17  ;;  %v2646_v17 = vld [vmem:[#allocation12 + $0x9a8] sm:$0xff]  ;;  %v5947_v49 = vpack.c.bf16 %v2633_v63, %v2627_v34  ;;  %v2707_v47 = vld [vmem:[#allocation12 + $0xb90] sm:$0xff]  ;;  %v2688_v63 = vld [vmem:[#allocation12 + $0xaf8] sm:$0xff] }
 0x4e8   :  { %v5949_v4 = vpack.c.bf16 %v2646_v17, %v2640_v5  ;;  %v2719_v34 = vld [vmem:[#allocation12 + $0xbf0] sm:$0xff]  ;;  %v2732_v38 = vld [vmem:[#allocation12 + $0xc58] sm:$0x3] }
 0x4e9   :  { %5932 = vmatpush1.bf16.msra.mxu0 %v5931_v25  ;;  %v2645_v25 = vld [vmem:[#allocation12 + $0x9a0] sm:$0xff]  ;;  %v3447_v13 = vld [vmem:[#allocation16 + $0x10] sm:$0xff] }
 0x4ea   :  { %6078 = vmatpush1.bf16.msra.mxu1 %v6077_v18  ;;  %5934 = vmatprep.subr.bf16.mxu0 %v5933_v9  ;;  %v2677_v18 = vld [vmem:[#allocation12 + $0xaa0] sm:$0xff]  ;;  %v6095_v9 = vpack.c.bf16 %v2684_v20, %v2678_v29  ;;  %v5951_v30 = vpack.c.bf16 %v2645_v25, %v2639_v48  ;;  %v5965_v29 = vpack.c.bf16 %v2694_v62, %v2688_v63  ;;  %v2687_v20 = vld [vmem:[#allocation12 + $0xaf0] sm:$0xff]  ;;  %v3469_v63 = vld [vmem:[#allocation16 + $0xc0] sm:$0xff] }
 0x4eb   :  { %6080 = vmatprep.subr.bf16.mxu1 %v6079_v10  ;;  %v2690_v10 = vld [vmem:[#allocation12 + $0xb08] sm:$0xff]  ;;  %v6097_v42 = vpack.c.bf16 %v2683_v19, %v2677_v18  ;;  %v2725_v25 = vld [vmem:[#allocation12 + $0xc20] sm:$0xff]  ;;  %v2731_v18 = vld [vmem:[#allocation12 + $0xc50] sm:$0x3] }
 0x4ec   :  { %v3470_v62 = vld [vmem:[#allocation16 + $0xc8] sm:$0xff] }
 0x4ed   :  { %5936 = vmatpush1.bf16.msra.mxu0 %v5935_v53  ;;  %v2657_v53 = vld [vmem:[#allocation12 + $0xa00] sm:$0xff] }
 0x4ee   :  { %6082 = vmatpush1.bf16.msra.mxu1 %v6081_v44  ;;  %5938 = vmatprep.subr.bf16.mxu0 %v5937_v3  ;;  %v2689_v44 = vld [vmem:[#allocation12 + $0xb00] sm:$0xff]  ;;  %v6099_v3 = vpack.c.bf16 %v2696_v60, %v2690_v10  ;;  %v5955_v22 = vpack.c.bf16 %v2657_v53, %v2651_v45  ;;  %v6114_v10 = vpack.c.bf16 %v2731_v18, %v2725_v25  ;;  %v2712_v60 = vld [vmem:[#allocation12 + $0xbb8] sm:$0xff]  ;;  %v2711_v45 = vld [vmem:[#allocation12 + $0xbb0] sm:$0xff] }
 0x4ef   :  { %6084 = vmatprep.subr.bf16.mxu1 %v6083_v15  ;;  %v2702_v15 = vld [vmem:[#allocation12 + $0xb68] sm:$0xff]  ;;  %v6101_v21 = vpack.c.bf16 %v2695_v51, %v2689_v44  ;;  %v2717_v53 = vld [vmem:[#allocation12 + $0xbe0] sm:$0xff]  ;;  %v2724_v44 = vld [vmem:[#allocation12 + $0xc18] sm:$0xff] }
 0x4f0   :  { %v5975_v51 = vpack.c.bf16 %v2717_v53, %v2711_v45  ;;  %v3473_v25 = vld [vmem:[#allocation16 + $0xe0] sm:$0xff]  ;;  %v3474_v18 = vld [vmem:[#allocation16 + $0xe8] sm:$0xff]  ;;  %v3460_v45 = vld [vmem:[#allocation16 + $0x78] sm:$0xff] }
 0x4f1   :  { %5940 = vmatpush1.bf16.msra.mxu0 %v5939_v2  ;;  %v2669_v2 = vld [vmem:[#allocation12 + $0xa60] sm:$0xff] }
 0x4f2   :  { %6086 = vmatpush1.bf16.msra.mxu1 %v6085_v36  ;;  %5942 = vmatprep.subr.bf16.mxu0 %v5941_v40  ;;  %v2701_v36 = vld [vmem:[#allocation12 + $0xb60] sm:$0xff]  ;;  %v6103_v40 = vpack.c.bf16 %v2708_v26, %v2702_v15  ;;  %v5959_v37 = vpack.c.bf16 %v2669_v2, %v2663_v54  ;;  %v3461_v26 = vld [vmem:[#allocation16 + $0x80] sm:$0xff]  ;;  %v3446_v2 = vld [vmem:[#allocation16 + $0x8] sm:$0xff] }
 0x4f3   :  { %6088 = vmatprep.subr.bf16.mxu1 %v6087_v14  ;;  %v2714_v14 = vld [vmem:[#allocation12 + $0xbc8] sm:$0xff]  ;;  %v6105_v56 = vpack.c.bf16 %v2707_v47, %v2701_v36  ;;  %v2729_v15 = vld [vmem:[#allocation12 + $0xc40] sm:$0x3]  ;;  %v3463_v36 = vld [vmem:[#allocation16 + $0x90] sm:$0xff] }
 0x4f4   :  { %v3445_v54 = vld [vmem:[#allocation16] sm:$0xff] }
 0x4f5   :  { %5944 = vmatpush1.bf16.msra.mxu0 %v5943_v50  ;;  %v2681_v50 = vld [vmem:[#allocation12 + $0xac0] sm:$0xff]  ;;  %v7974_v47 = vpack.c.bf16 %v3446_v2, %v3445_v54 }
 0x4f6   :  { %6090 = vmatpush1.bf16.msra.mxu1 %v6089_v58  ;;  %5946 = vmatprep.subr.bf16.mxu0 %v5945_v52  ;;  %v2713_v58 = vld [vmem:[#allocation12 + $0xbc0] sm:$0xff]  ;;  %v6107_v52 = vpack.c.bf16 %v2720_v16, %v2714_v14  ;;  %v5963_v5 = vpack.c.bf16 %v2681_v50, %v2675_v24  ;;  %v3465_v16 = vld [vmem:[#allocation16 + $0xa0] sm:$0xff]  ;;  %v3467_v24 = vld [vmem:[#allocation16 + $0xb0] sm:$0xff] }
 0x4f7   :  { %6092 = vmatprep.subr.bf16.mxu1 %v6091_v23  ;;  %v2726_v23 = vld [vmem:[#allocation12 + $0xc28] sm:$0xff]  ;;  %v6109_v17 = vpack.c.bf16 %v2719_v34, %v2713_v58  ;;  %v3448_v14 = vld [vmem:[#allocation16 + $0x18] sm:$0xff] }
 0x4f8   :  { %v6111_v48 = vpack.c.bf16 %v2732_v38, %v2726_v23  ;;  %v7981_v43 = vpack.c.bf16 %v3448_v14, %v3447_v13  ;;  %v3468_v50 = vld [vmem:[#allocation16 + $0xb8] sm:$0xff]  ;;  %v7996_v38 = vpack.c.bf16 %v3470_v62, %v3469_v63 }
 0x4f9   :  { %5948 = vmatpush1.bf16.msra.mxu0 %v5947_v49  ;;  %v2693_v49 = vld [vmem:[#allocation12 + $0xb20] sm:$0xff] }
 0x4fa   :  { %6094 = vmatpush1.bf16.msra.mxu1 %v6093_v59  ;;  %5950 = vmatprep.subr.bf16.mxu0 %v5949_v4  ;;  %v2700_v59 = vld [vmem:[#allocation12 + $0xb58] sm:$0xff]  ;;  %v2706_v4 = vld [vmem:[#allocation12 + $0xb88] sm:$0xff]  ;;  %v3452_v34 = vld [vmem:[#allocation16 + $0x38] sm:$0xff] }
 0x4fb   :  { %6096 = vmatprep.subr.bf16.mxu1 %v6095_v9  ;;  %v5967_v9 = vpack.c.bf16 %v2693_v49, %v2687_v20  ;;  %v5969_v19 = vpack.c.bf16 %v2706_v4, %v2700_v59  ;;  %v3472_v20 = vld [vmem:[#allocation16 + $0xd8] sm:$0xff]  ;;  %v3455_v4 = vld [vmem:[#allocation16 + $0x50] sm:$0xff] }
 0x4fd   :  { %5952 = vmatpush1.bf16.msra.mxu0 %v5951_v30  ;;  %v2718_v30 = vld [vmem:[#allocation12 + $0xbe8] sm:$0xff] }
 0x4fe   :  { %6098 = vmatpush1.bf16.msra.mxu1 %v6097_v42  ;;  %5954 = vmatprep.subr.bf16.mxu0 %v5953_v41  ;;  %v5971_v42 = vpack.c.bf16 %v2705_v57, %v2699_v6  ;;  %v5973_v41 = vpack.c.bf16 %v2718_v30, %v2712_v60  ;;  %v3457_v6 = vld [vmem:[#allocation16 + $0x60] sm:$0xff]  ;;  %v3458_v57 = vld [vmem:[#allocation16 + $0x68] sm:$0xff]  ;;  %v3476_v60 = vld [vmem:[#allocation16 + $0xf8] sm:$0xff] }
 0x4ff   :  { %6100 = vmatprep.subr.bf16.mxu1 %v6099_v3  ;;  %v2730_v3 = vld [vmem:[#allocation12 + $0xc48] sm:$0x3]  ;;  %v8011_v30 = vpack.c.bf16 %v3458_v57, %v3457_v6 }
 0x500   :  { %v5977_v61 = vpack.c.bf16 %v2730_v3, %v2724_v44  ;;  %v8378_v44 = vmov 0.0|0.0   ;;  %v8023_v3 = vsub.s32 0, %v7933_v46 }
 0x501   :  { %5956 = vmatpush1.bf16.msra.mxu0 %v5955_v22  ;;  %v3462_v22 = vld [vmem:[#allocation16 + $0x88] sm:$0xff] }
 0x502   :  { %6102 = vmatpush1.bf16.msra.mxu1 %v6101_v21  ;;  %5958 = vmatprep.subr.bf16.mxu0 %v5957_v0  ;;  %v5980_v21 = vpack.c.bf16 %v2729_v15, %v2723_v27  ;;  %v7967_v0 = vpack.c.bf16 %v3462_v22, %v3461_v26 }
 0x503   :  { %6104 = vmatprep.subr.bf16.mxu1 %v6103_v40  ;;  %v3464_v40 = vld [vmem:[#allocation16 + $0x98] sm:$0xff] }
 0x504   :  { %v7976_v11 = vpack.c.bf16 %v3464_v40, %v3463_v36 }
 0x505   :  { %5960 = vmatpush1.bf16.msra.mxu0 %v5959_v37  ;;  %v3466_v37 = vld [vmem:[#allocation16 + $0xa8] sm:$0xff] }
 0x506   :  { %6106 = vmatpush1.bf16.msra.mxu1 %v6105_v56  ;;  %5962 = vmatprep.subr.bf16.mxu0 %v5961_v55  ;;  %v3449_v56 = vld [vmem:[#allocation16 + $0x20] sm:$0xff]  ;;  %v3450_v55 = vld [vmem:[#allocation16 + $0x28] sm:$0xff] }
 0x507   :  { %6108 = vmatprep.subr.bf16.mxu1 %v6107_v52  ;;  %v7987_v58 = vpack.c.bf16 %v3450_v55, %v3449_v56  ;;  %v7990_v52 = vpack.c.bf16 %v3468_v50, %v3467_v24  ;;  %v3493_v56 = vld [vmem:[#allocation16 + $0x180] sm:$0xff]  ;;  %v3494_v55 = vld [vmem:[#allocation16 + $0x188] sm:$0xff] }
 0x508   :  { %v3478_v50 = vld [vmem:[#allocation16 + $0x108] sm:$0xff] }
 0x509   :  { %5964 = vmatpush1.bf16.msra.mxu0 %v5963_v5  ;;  %v3453_v5 = vld [vmem:[#allocation16 + $0x40] sm:$0xff] }
 0x50a   :  { %6110 = vmatpush1.bf16.msra.mxu1 %v6109_v17  ;;  %5966 = vmatprep.subr.bf16.mxu0 %v5965_v29  ;;  %v3454_v17 = vld [vmem:[#allocation16 + $0x48] sm:$0xff]  ;;  %v3471_v29 = vld [vmem:[#allocation16 + $0xd0] sm:$0xff] }
 0x50b   :  { %6113 = vmatprep.subr.msk.bf16.mxu1 %vm7883_vm14, %v6111_v48  ;;  %v7999_v49 = vpack.c.bf16 %v3454_v17, %v3453_v5  ;;  %v8002_v59 = vpack.c.bf16 %v3472_v20, %v3471_v29  ;;  %v3456_v48 = vld [vmem:[#allocation16 + $0x58] sm:$0xff]  ;;  %v3495_v17 = vld [vmem:[#allocation16 + $0x190] sm:$0xff] }
 0x50c   :  { %v3496_v29 = vld [vmem:[#allocation16 + $0x198] sm:$0xff] }
 0x50d   :  { %5968 = vmatpush1.bf16.msra.mxu0 %v5967_v9  ;;  %3313 = vmatmul.mubr.f32.vlgmr.msra.gmra.mrb[4].mxu1 %v7891_v28  ;;  %v8005_v9 = vpack.c.bf16 %v3456_v48, %v3455_v4  ;;  %v8047_v48 = vpack.c.bf16 %v3496_v29, %v3495_v17  ;;  %v3502_v17 = vld [vmem:[#allocation16 + $0x1c8] sm:$0xff] }
 0x50e   :  { %5970 = vmatprep.subr.bf16.mxu0 %v5969_v19  ;;  %6116 = vmatpush1.bf16.msk.msra.mxu1 %vm7883_vm14, %v6114_v10  ;;  %v8008_v19 = vpack.c.bf16 %v3474_v18, %v3473_v25  ;;  %v3475_v10 = vld [vmem:[#allocation16 + $0xf0] sm:$0xff]  ;;  %v3480_v18 = vld [vmem:[#allocation16 + $0x118] sm:$0xff] }
 0x50f   :  { %3383 = vmatprep.mubr.f32.mxu1 %v8371_v39  ;;  %v3479_v25 = vld [vmem:[#allocation16 + $0x110] sm:$0xff] }
 0x511   :  { %5972 = vmatpush1.bf16.msra.mxu0 %v5971_v42  ;;  %v8014_v42 = vpack.c.bf16 %v3476_v60, %v3475_v10  ;;  %v8051_v10 = vpack.c.bf16 %v3480_v18, %v3479_v25  ;;  %v3485_v25 = vld [vmem:[#allocation16 + $0x140] sm:$0xff]  ;;  %v3486_v18 = vld [vmem:[#allocation16 + $0x148] sm:$0xff] }
 0x512   :  { %5974 = vmatprep.subr.bf16.mxu0 %v5973_v41  ;;  %v3459_v41 = vld [vmem:[#allocation16 + $0x70] sm:$0xff] }
 0x513   :  { %v8017_v53 = vpack.c.bf16 %v3460_v45, %v3459_v41  ;;  %v3497_v45 = vld [vmem:[#allocation16 + $0x1a0] sm:$0xff] }
 0x515   :  { %5976 = vmatpush1.bf16.msra.mxu0 %v5975_v51  ;;  %5038 = vmatmul.mubr.msk.f32.vlgmr.msra.gmra.mrb[4].mxu1 %vm1671_vm0, %v7874_v32  ;;  %v1647_v51 = vsub.s32 1, %v7933_v46 }
 0x516   :  { %5979 = vmatprep.subr.msk.bf16.mxu0 %vm7883_vm14, %v5977_v61  ;;  %v1644_v61 = vrot.slane %v7936_v1, %v8023_v3 }
 0x517   :  { %v1648_v27 = vrot.slane %v7936_v1, %v1647_v51  ;;  %v3498_v51 = vld [vmem:[#allocation16 + $0x1a8] sm:$0xff] }
 0x518   :  { %3100 = vmatmul.mubr.f32.vlgmr.msra.gmra.mrb[6].mxu0 %v7891_v28  ;;  %v7984_v28 = vpack.c.bf16 %v3466_v37, %v3465_v16  ;;  %v6465_v15 = vadd.f32 %v7947_v12, %v1644_v61  ;;  %v8037_v12 = vpack.c.bf16 %v3494_v55, %v3493_v56 }
 0x519   :  { %5982 = vmatpush1.bf16.msk.msra.mxu0 %vm7883_vm14, %v5980_v21  ;;  %3170 = vmatprep.mubr.f32.mxu0 %v8371_v39  ;;  %v6466_v26 = vadd.f32 %v7949_v31, %v1648_v27  ;;  %v3477_v31 = vld [vmem:[#allocation16 + $0x100] sm:$0xff] }
 0x51a   :  { %6118 = vmatprep.subr.bf16.mxu0 %v7967_v0  ;;  %v2331_v36 = vmax.f32 %v6465_v15, 0.0  ;;  %v8041_v63 = vpack.c.bf16 %v3478_v50, %v3477_v31  ;;  %6150 = vmatprep.subr.bf16.mxu1 %v8037_v12  ;;  %v3481_v15 = vld [vmem:[#allocation16 + $0x120] sm:$0xff]  ;;  %v3484_v31 = vld [vmem:[#allocation16 + $0x138] sm:$0xff] }
 0x51b   :  { %v2332_v13 = vmax.f32 %v6466_v26, 0.0  ;;  %v3482_v26 = vld [vmem:[#allocation16 + $0x128] sm:$0xff] }
 0x51c   :  { %6152 = vmatpush3.bf16.msra.mxu1 %v8041_v63 }
 0x51d   :  { %6154 = vmatprep.subr.bf16.mxu1 %v8047_v48 }
 0x520   :  { %5035 = vmatmul.mubr.msk.f32.vlgmr.msra.gmra.mrb[6].mxu0 %vm1671_vm0, %v7874_v32  ;;  %v3451_v32 = vld [vmem:[#allocation16 + $0x30] sm:$0xff]  ;;  %6156 = vmatpush3.bf16.msra.mxu1 %v8051_v10 }
 0x521   :  { %6120 = vmatpush3.bf16.msra.mxu0 %v7974_v47  ;;  %v7993_v23 = vpack.c.bf16 %v3452_v34, %v3451_v32 }
 0x522   :  { %6122 = vmatprep.subr.bf16.mxu0 %v7976_v11 }
 0x525   :  { %6124 = vmatpush3.bf16.msra.mxu0 %v7981_v43 }
 0x526   :  { %6126 = vmatprep.subr.bf16.mxu0 %v7984_v28 }
 0x529   :  { %6128 = vmatpush3.bf16.msra.mxu0 %v7987_v58 }
 0x52a   :  { %6130 = vmatprep.subr.bf16.mxu0 %v7990_v52 }
 0x52d   :  { %6132 = vmatpush3.bf16.msra.mxu0 %v7993_v23 }
 0x52e   :  { %6134 = vmatprep.subr.bf16.mxu0 %v7996_v38 }
 0x531   :  { %6136 = vmatpush3.bf16.msra.mxu0 %v7999_v49 }
 0x532   :  { %6138 = vmatprep.subr.bf16.mxu0 %v8002_v59 }
 0x535   :  { %6140 = vmatpush3.bf16.msra.mxu0 %v8005_v9 }
 0x536   :  { %6142 = vmatprep.subr.bf16.mxu0 %v8008_v19 }
 0x539   :  { %6144 = vmatpush3.bf16.msra.mxu0 %v8011_v30 }
 0x53a   :  { %6146 = vmatprep.subr.bf16.mxu0 %v8014_v42 }
 0x53d   :  { %6148 = vmatpush3.bf16.msra.mxu0 %v8017_v53 }
 0x53e   :  { %6181 = vmatprep.subr.bf16.mxu0 %v8378_v44 }
 0x560   :  { %v2959_v22 = vpop.f32.mrb[2].mxu1 }
 0x561   :  { %v6473_v21 = vadd.f32 %v2959_v22, %v1644_v61  ;;  %v2961_v54 = vpop.f32.mrb[3].mxu1 }
 0x562   :  { %v6474_v2 = vadd.f32 %v2961_v54, %v1648_v27  ;;  %v8055_v27 = vpack.c.bf16 %v3498_v51, %v3497_v45  ;;  %v3510_v54 = vld [vmem:[#allocation16 + $0x208] sm:$0xff]  ;;  %v3503_v45 = vld [vmem:[#allocation16 + $0x1d0] sm:$0xff]  ;;  %v3504_v51 = vld [vmem:[#allocation16 + $0x1d8] sm:$0xff] }
 0x563   :  { %v3390_v40 = vmax.f32 %v6473_v21, 0.0  ;;  %v3509_v21 = vld [vmem:[#allocation16 + $0x200] sm:$0xff] }
 0x564   :  { %v3391_v14 = vmax.f32 %v6474_v2, 0.0  ;;  %v8057_v2 = vpack.c.bf16 %v3482_v26, %v3481_v15  ;;  %6158 = vmatprep.subr.bf16.mxu1 %v8055_v27  ;;  %v8061_v56 = vpack.c.bf16 %v3510_v54, %v3509_v21  ;;  %v8082_v15 = vpack.c.bf16 %v3504_v51, %v3503_v45  ;;  %v3487_v26 = vld [vmem:[#allocation16 + $0x150] sm:$0xff]  ;;  %v3516_v54 = vld [vmem:[#allocation16 + $0x238] sm:$0xff] }
 0x565   :  { %v8031_v16 = vmax.f32 %v2331_v36, %v3390_v40  ;;  %v3499_v40 = vld [vmem:[#allocation16 + $0x1b0] sm:$0xff] }
 0x566   :  { %v8033_v37 = vmax.f32 %v2332_v13, %v3391_v14  ;;  %6160 = vmatpush3.bf16.msra.mxu1 %v8057_v2  ;;  %v3500_v13 = vld [vmem:[#allocation16 + $0x1b8] sm:$0xff]  ;;  %8391 = vst [vmem:[#allocation41_spill] sm:$0xff] %v8082_v15  ;;  %v3515_v21 = vld [vmem:[#allocation16 + $0x230] sm:$0xff] }
 0x567   :  { %v3402_v24 = vsel %vm847_vm2, %v8031_v16, 0.0  ;;  %v8063_v55 = vpack.c.bf16 %v3500_v13, %v3499_v40  ;;  %v3505_v40 = vld [vmem:[#allocation16 + $0x1e0] sm:$0xff]  ;;  %v3506_v13 = vld [vmem:[#allocation16 + $0x1e8] sm:$0xff] }
 0x568   :  { %v3403_v32 = vrot.slane %v3402_v24, 4  ;;  %v3409_v34 = vsel %vm847_vm2, %v8033_v37, 0.0 }
 0x569   :  { %v3410_v62 = vrot.slane %v3409_v34, 4  ;;  %6162 = vmatprep.subr.bf16.mxu1 %v8063_v55 }
 0x56a   :  { %v3404_v5 = vadd.f32 %v3403_v32, %v3402_v24  ;;  %v3483_v24 = vld [vmem:[#allocation16 + $0x130] sm:$0xff] }
 0x56b   :  { %v3411_v20 = vadd.f32 %v3410_v62, %v3409_v34  ;;  %v8045_v4 = vpop.f32.mrb[4].mxu0  ;;  %v3511_v32 = vld [vmem:[#allocation16 + $0x210] sm:$0xff]  ;;  %v3512_v34 = vld [vmem:[#allocation16 + $0x218] sm:$0xff]  ;;  %v8065_v62 = vpack.c.bf16 %v3484_v31, %v3483_v24  ;;  %v8092_v24 = vpack.c.bf16 %v3506_v13, %v3505_v40  ;;  %v3489_v31 = vld [vmem:[#allocation16 + $0x160] sm:$0xff] }
 0x56c   :  { %v3405_v6 = vrot.slane %v3404_v5, 2  ;;  %v8049_v57 = vpop.f32.mrb[5].mxu0  ;;  %v8070_v29 = vpack.c.bf16 %v3512_v34, %v3511_v32  ;;  %v3517_v32 = vld [vmem:[#allocation16 + $0x240] sm:$0xff]  ;;  %v3518_v34 = vld [vmem:[#allocation16 + $0x248] sm:$0xff] }
 0x56d   :  { %v3412_v60 = vrot.slane %v3411_v20, 2  ;;  %6164 = vmatpush3.bf16.msra.mxu1 %v8065_v62  ;;  %8393 = vst [vmem:[#allocation43_spill] sm:$0xff] %v8092_v24  ;;  %v8102_v45 = vpack.c.bf16 %v3518_v34, %v3517_v32  ;;  %v3522_v40 = vld [vmem:[#allocation16 + $0x268] sm:$0xff]  ;;  %v3525_v34 = vld [vmem:[#allocation16 + $0x280] sm:$0xff] }
 0x56e   :  { %v3406_v41 = vadd.f32 %v3405_v6, %v3404_v5  ;;  %v3501_v5 = vld [vmem:[#allocation16 + $0x1c0] sm:$0xff] }
 0x56f   :  { %v3413_v61 = vadd.f32 %v3412_v60, %v3411_v20  ;;  %v8072_v20 = vpack.c.bf16 %v3502_v17, %v3501_v5  ;;  %v3513_v6 = vld [vmem:[#allocation16 + $0x220] sm:$0xff]  ;;  %v3514_v60 = vld [vmem:[#allocation16 + $0x228] sm:$0xff]  ;;  %v3507_v17 = vld [vmem:[#allocation16 + $0x1f0] sm:$0xff] }
 0x570   :  { %v3407_v22 = vrot.slane %v3406_v41, 1 }
 0x571   :  { %v3414_v36 = vrot.slane %v3413_v61, 1  ;;  %8389 = vst [vmem:[#allocation39_spill] sm:$0xff] %v8072_v20  ;;  %6166 = vmatprep.subr.bf16.mxu1 %v8072_v20 }
 0x572   :  { %v3408_v50 = vadd.f32 %v3407_v22, %v3406_v41  ;;  %v8075_v41 = vpack.c.bf16 %v3486_v18, %v3485_v25  ;;  %v3488_v22 = vld [vmem:[#allocation16 + $0x158] sm:$0xff]  ;;  %v3491_v18 = vld [vmem:[#allocation16 + $0x170] sm:$0xff] }
 0x573   :  { %v3415_v14 = vadd.f32 %v3414_v36, %v3413_v61  ;;  %v8080_v61 = vpack.c.bf16 %v3514_v60, %v3513_v6  ;;  %v8085_v36 = vpack.c.bf16 %v3488_v22, %v3487_v26  ;;  %v3508_v25 = vld [vmem:[#allocation16 + $0x1f8] sm:$0xff]  ;;  %v3519_v26 = vld [vmem:[#allocation16 + $0x250] sm:$0xff] }
 0x574   :  { %8390 = vst [vmem:[#allocation40_spill] sm:$0xff] %v8075_v41  ;;  %6168 = vmatpush3.bf16.msra.mxu1 %v8075_v41  ;;  %v8099_v6 = vpack.c.bf16 %v3508_v25, %v3507_v17  ;;  %v3492_v60 = vld [vmem:[#allocation16 + $0x178] sm:$0xff]  ;;  %v3526_v17 = vld [vmem:[#allocation16 + $0x288] sm:$0xff] }
 0x575   :  { %3601 = vmatprep.mubr.f32.mxu0 %v3415_v14  ;;  %8392 = vst [vmem:[#allocation42_spill] sm:$0xff] %v8085_v36  ;;  %6170 = vmatprep.subr.bf16.mxu1 %v8082_v15  ;;  %v8090_v14 = vpack.c.bf16 %v3516_v54, %v3515_v21  ;;  %v8104_v51 = vpack.c.bf16 %v3492_v60, %v3491_v18  ;;  %v3520_v22 = vld [vmem:[#allocation16 + $0x258] sm:$0xff]  ;;  %v3521_v54 = vld [vmem:[#allocation16 + $0x260] sm:$0xff]  ;;  %v3527_v18 = vld [vmem:[#allocation16 + $0x290] sm:$0xff] }
 0x576   :  { %3602 = vmatmul.mubr.f32.vlgmr.msra.gmra.mrb[8].mxu0 %v3408_v50  ;;  %v3490_v50 = vld [vmem:[#allocation16 + $0x168] sm:$0xff]  ;;  %8395 = vst [vmem:[#allocation45_spill] sm:$0xff] %v8099_v6  ;;  %v8110_v21 = vpack.c.bf16 %v3520_v22, %v3519_v26  ;;  %v8114_v13 = vpack.c.bf16 %v3522_v40, %v3521_v54  ;;  %v8122_v25 = vpack.c.bf16 %v3526_v17, %v3525_v34  ;;  %v3528_v60 = vld [vmem:[#allocation16 + $0x298] sm:$0xff]  ;;  %v3529_v22 = vld [vmem:[#allocation16 + $0x2a0] sm:$0xff]  ;;  %v1659_v17 = vsub.s32 4, %v7933_v46 }
 0x577   :  { %6183 = vmatpush1.bf16.msra.mxu0 %v8061_v56  ;;  %v8095_v5 = vpack.c.bf16 %v3490_v50, %v3489_v31  ;;  %8396 = vst [vmem:[#allocation46_spill] sm:$0xff] %v8104_v51  ;;  %v3523_v31 = vld [vmem:[#allocation16 + $0x270] sm:$0xff]  ;;  %v3524_v50 = vld [vmem:[#allocation16 + $0x278] sm:$0xff]  ;;  %v8126_v26 = vpack.c.bf16 %v3528_v60, %v3527_v18  ;;  %v3530_v54 = vld [vmem:[#allocation16 + $0x2a8] sm:$0xff]  ;;  %v1663_v18 = vsub.s32 5, %v7933_v46 }
 0x578   :  { %6184 = vmatprep.subr.bf16.mxu0 %v8378_v44  ;;  %6172 = vmatpush3.bf16.msra.mxu1 %v8085_v36  ;;  %v8118_v32 = vpack.c.bf16 %v3524_v50, %v3523_v31  ;;  %v8130_v40 = vpack.c.bf16 %v3530_v54, %v3529_v22  ;;  %v3531_v31 = vld [vmem:[#allocation16 + $0x2b0] sm:$0xff]  ;;  %v3532_v50 = vld [vmem:[#allocation16 + $0x2b8] sm:$0xff]  ;;  %v1660_v60 = vrot.slane %v7936_v1, %v1659_v17 }
 0x579   :  { %8394 = vst [vmem:[#allocation44_spill] sm:$0xff] %v8095_v5  ;;  %6174 = vmatprep.subr.bf16.mxu1 %v8092_v24  ;;  %v8134_v34 = vpack.c.bf16 %v3532_v50, %v3531_v31  ;;  %v1664_v22 = vrot.slane %v7936_v1, %v1663_v18 }
 0x57a   :  { %v6471_v54 = vadd.f32 %v8045_v4, %v1660_v60 }
 0x57b   :  { %6186 = vmatpush1.bf16.msra.mxu0 %v8070_v29  ;;  %v6472_v39 = vadd.f32 %v8049_v57, %v1664_v22 }
 0x57c   :  { %6187 = vmatprep.subr.bf16.mxu0 %v8378_v44  ;;  %6176 = vmatpush3.bf16.msra.mxu1 %v8095_v5  ;;  %v2335_v5 = vmax.f32 %v6471_v54, 0.0 }
 0x57d   :  { %6178 = vmatprep.subr.bf16.mxu1 %v8099_v6  ;;  %v2336_v36 = vmax.f32 %v6472_v39, 0.0 }
 0x57f   :  { %6189 = vmatpush1.bf16.msra.mxu0 %v8080_v61 }
 0x580   :  { %6190 = vmatprep.subr.bf16.mxu0 %v8378_v44  ;;  %6180 = vmatpush3.bf16.msra.mxu1 %v8104_v51 }
 0x583   :  { %6192 = vmatpush1.bf16.msra.mxu0 %v8090_v14 }
 0x584   :  { %6193 = vmatprep.subr.bf16.mxu0 %v8378_v44 }
 0x587   :  { %6195 = vmatpush1.bf16.msra.mxu0 %v8102_v45 }
 0x588   :  { %6196 = vmatprep.subr.bf16.mxu0 %v8378_v44 }
 0x58b   :  { %6198 = vmatpush1.bf16.msra.mxu0 %v8110_v21 }
 0x58c   :  { %6199 = vmatprep.subr.bf16.mxu0 %v8378_v44 }
 0x58f   :  { %6201 = vmatpush1.bf16.msra.mxu0 %v8114_v13 }
 0x590   :  { %6202 = vmatprep.subr.bf16.mxu0 %v8378_v44 }
 0x593   :  { %6204 = vmatpush1.bf16.msra.mxu0 %v8118_v32 }
 0x594   :  { %6205 = vmatprep.subr.bf16.mxu0 %v8378_v44 }
 0x597   :  { %6207 = vmatpush1.bf16.msra.mxu0 %v8122_v25 }
 0x598   :  { %6208 = vmatprep.subr.bf16.mxu0 %v8378_v44 }
 0x59b   :  { %6210 = vmatpush1.bf16.msra.mxu0 %v8126_v26 }
 0x59c   :  { %6211 = vmatprep.subr.bf16.mxu0 %v8378_v44 }
 0x59f   :  { %6213 = vmatpush1.bf16.msra.mxu0 %v8130_v40 }
 0x5a0   :  { %6214 = vmatprep.subr.bf16.mxu0 %v8378_v44 }
 0x5a3   :  { %6216 = vmatpush1.bf16.msra.mxu0 %v8134_v34 }
 0x5a4   :  { %6293 = vmatprep.subr.bf16.mxu0 %v8378_v44 }
 0x5e8   :  { %v3385_v31 = vpop.f32.mrb[4].mxu1 }
 0x5e9   :  { %v6477_v50 = vadd.f32 %v3385_v31, %v1660_v60  ;;  %v3387_v51 = vpop.f32.mrb[5].mxu1  ;;  %v2334_v31 = vmax.f32 %v7955_v8, 0.0 }
 0x5ea   :  { %v6478_v6 = vadd.f32 %v3387_v51, %v1664_v22 }
 0x5eb   :  { %v3394_v24 = vmax.f32 %v6477_v50, 0.0 }
 0x5ec   :  { %v3395_v44 = vmax.f32 %v6478_v6, 0.0 }
 0x5ed   :  { %v8145_v15 = vmax.f32 %v2335_v5, %v3394_v24 }
 0x5ee   :  { %v8147_v46 = vmax.f32 %v2336_v36, %v3395_v44  ;;  %v2333_v44 = vmax.f32 %v7953_v35, 0.0 }
 0x5ef   :  { %v3430_v1 = vsel %vm847_vm2, %v8145_v15, 0.0 }
 0x5f0   :  { %v3431_v17 = vrot.slane %v3430_v1, 4  ;;  %v3438_v4 = vsel %vm3437_vm1, %v8147_v46, 0.0 }
 0x5f1   :  { %v3439_v57 = vrot.slane %v3438_v4, 4 }
 0x5f2   :  { %v3432_v18 = vadd.f32 %v3431_v17, %v3430_v1 }
 0x5f3   :  { %v3440_v60 = vadd.f32 %v3439_v57, %v3438_v4  ;;  %v3172_v51 = vpop.f32.mrb[6].mxu0 }
 0x5f4   :  { %v3433_v22 = vrot.slane %v3432_v18, 2  ;;  %v6475_v39 = vadd.f32 %v3172_v51, %v7942_v7  ;;  %v3174_v6 = vpop.f32.mrb[7].mxu0 }
 0x5f5   :  { %v3441_v24 = vrot.slane %v3440_v60, 2  ;;  %v6476_v5 = vadd.f32 %v3174_v6, %v7945_v33 }
 0x5f6   :  { %v3434_v36 = vadd.f32 %v3433_v22, %v3432_v18  ;;  %v3392_v54 = vmax.f32 %v6475_v39, 0.0  ;;  %v8397_v39 = vmov 0.0|0.0  }
 0x5f7   :  { %v3442_v50 = vadd.f32 %v3441_v24, %v3440_v60  ;;  %v3393_v41 = vmax.f32 %v6476_v5, 0.0 }
 0x5f8   :  { %v8157_v20 = vmax.f32 %v2333_v44, %v3392_v54  ;;  %v3435_v1 = vrot.slane %v3434_v36, 1 }
 0x5f9   :  { %v8159_v17 = vmax.f32 %v2334_v31, %v3393_v41  ;;  %v3443_v4 = vrot.slane %v3442_v50, 1 }
 0x5fa   :  { %v3416_v7 = vsel %vm847_vm2, %v8157_v20, 0.0  ;;  %v3436_v51 = vadd.f32 %v3435_v1, %v3434_v36 }
 0x5fb   :  { %v3417_v57 = vrot.slane %v3416_v7, 4  ;;  %v3423_v33 = vsel %vm847_vm2, %v8159_v17, 0.0  ;;  %v3444_v35 = vadd.f32 %v3443_v4, %v3442_v50 }
 0x5fc   :  { %v3424_v18 = vrot.slane %v3423_v33, 4 }
 0x5fd   :  { %v3418_v8 = vadd.f32 %v3417_v57, %v3416_v7  ;;  %5039 = vmatprep.mubr.msk.f32.mxu0 %vm3533_vm3, %v3444_v35  ;;  %v3751_v35 = vld [vmem:[#allocation18 + $0x10] sm:$0xff] }
 0x5fe   :  { %v3425_v60 = vadd.f32 %v3424_v18, %v3423_v33  ;;  %3742 = vmatmul.mubr.f32.vlgmr.msra.gmra.mrb[10].mxu0 %v3436_v51  ;;  %v3757_v18 = vld [vmem:[#allocation18 + $0x40] sm:$0xff]  ;;  %v3754_v51 = vld [vmem:[#allocation18 + $0x28] sm:$0xff] }
 0x5ff   :  { %v3419_v22 = vrot.slane %v3418_v8, 2  ;;  %6295 = vmatpush1.bf16.msra.mxu0 %v8061_v56  ;;  %v8398_v56 = vmov 0.0  }
 0x600   :  { %v3426_v41 = vrot.slane %v3425_v60, 2  ;;  %6296 = vmatprep.subr.bf16.mxu0 %v8397_v39 }
 0x601   :  { %v3420_v6 = vadd.f32 %v3419_v22, %v3418_v8  ;;  %v3760_v8 = vld [vmem:[#allocation18 + $0x58] sm:$0xff]  ;;  %v8199_v22 = vpack.c.bf16 %v3757_v18, %v3751_v35 }
 0x602   :  { %v3427_v24 = vadd.f32 %v3426_v41, %v3425_v60 }
 0x603   :  { %v3421_v5 = vrot.slane %v3420_v6, 1  ;;  %6298 = vmatpush1.bf16.msra.mxu0 %v8070_v29 }
 0x604   :  { %v3428_v44 = vrot.slane %v3427_v24, 1  ;;  %6299 = vmatprep.subr.bf16.mxu0 %v8397_v39 }
 0x605   :  { %v3422_v54 = vadd.f32 %v3421_v5, %v3420_v6  ;;  %v8201_v6 = vpack.c.bf16 %v3760_v8, %v3754_v51  ;;  %v3759_v5 = vld [vmem:[#allocation18 + $0x50] sm:$0xff] }
 0x606   :  { %v3429_v36 = vadd.f32 %v3428_v44, %v3427_v24  ;;  %v3753_v24 = vld [vmem:[#allocation18 + $0x20] sm:$0xff] }
 0x607   :  { %6301 = vmatpush1.bf16.msra.mxu0 %v8080_v61  ;;  %v8206_v44 = vpack.c.bf16 %v3759_v5, %v3753_v24 }
 0x608   :  { %3671 = vmatprep.mubr.f32.mxu1 %v3429_v36  ;;  %6302 = vmatprep.subr.bf16.mxu0 %v8397_v39 }
 0x609   :  { %3672 = vmatmul.mubr.f32.vlgmr.msra.gmra.mrb[6].mxu1 %v3422_v54 }
 0x60a   :  { %3829 = vmatprep.mubr.f32.mxu1 %v8398_v56 }
 0x60b   :  { %6304 = vmatpush1.bf16.msra.mxu0 %v8090_v14 }
 0x60c   :  { %6305 = vmatprep.subr.bf16.mxu0 %v8397_v39 }
 0x60f   :  { %6307 = vmatpush1.bf16.msra.mxu0 %v8102_v45  ;;  %v3750_v45 = vld [vmem:[#allocation18 + $0x8] sm:$0xff] }
 0x610   :  { %6308 = vmatprep.subr.bf16.mxu0 %v8397_v39 }
 0x613   :  { %6310 = vmatpush1.bf16.msra.mxu0 %v8110_v21  ;;  %v3756_v21 = vld [vmem:[#allocation18 + $0x38] sm:$0xff] }
 0x614   :  { %6311 = vmatprep.subr.bf16.mxu0 %v8397_v39 }
 0x617   :  { %6313 = vmatpush1.bf16.msra.mxu0 %v8114_v13  ;;  %v8190_v13 = vpack.c.bf16 %v3756_v21, %v3750_v45 }
 0x618   :  { %6314 = vmatprep.subr.bf16.mxu0 %v8397_v39 }
 0x619   :  { %6218 = vmatprep.subr.bf16.mxu1 %v8190_v13 }
 0x61b   :  { %6316 = vmatpush1.bf16.msra.mxu0 %v8118_v32  ;;  %v3749_v32 = vld [vmem:[#allocation18] sm:$0xff] }
 0x61c   :  { %6317 = vmatprep.subr.bf16.mxu0 %v8397_v39 }
 0x61f   :  { %6319 = vmatpush1.bf16.msra.mxu0 %v8122_v25  ;;  %v3755_v25 = vld [vmem:[#allocation18 + $0x30] sm:$0xff] }
 0x620   :  { %6320 = vmatprep.subr.bf16.mxu0 %v8397_v39  ;;  %v8192_v31 = vpack.c.bf16 %v3755_v25, %v3749_v32 }
 0x622   :  { %6220 = vmatpush1.bf16.msra.mxu1 %v8192_v31 }
 0x623   :  { %6322 = vmatpush1.bf16.msra.mxu0 %v8126_v26  ;;  %v3752_v26 = vld [vmem:[#allocation18 + $0x18] sm:$0xff] }
 0x624   :  { %6323 = vmatprep.subr.bf16.mxu0 %v8397_v39 }
 0x627   :  { %6325 = vmatpush1.bf16.msra.mxu0 %v8130_v40  ;;  %v3758_v40 = vld [vmem:[#allocation18 + $0x48] sm:$0xff] }
 0x628   :  { %6326 = vmatprep.subr.bf16.mxu0 %v8397_v39  ;;  %v8196_v50 = vpack.c.bf16 %v3758_v40, %v3752_v26 }
 0x62a   :  { %6222 = vmatprep.subr.bf16.mxu1 %v8196_v50 }
 0x62b   :  { %6328 = vmatpush1.bf16.msra.mxu0 %v8134_v34 }
 0x649   :  { %v5083_v29 = vpop.f32.mrb[8].mxu0 }
 0x64a   :  { %v5084_v61 = vpop.f32.mrb[9].mxu0 }
 0x64b   :  { %v5085_v14 = vadd.f32 %v5084_v61, %v5083_v29 }
 0x6d1   :  { %v3743_v34 = vpop.f32.mrb[10].mxu0 }
 0x6d2   :  { %v3745_v1 = vpop.f32.mrb[11].mxu0 }
 0x6dc   :  { %v5118_v4 = vpop.f32.mrb[6].mxu1 }
 0x6dd   :  { %v5119_v7 = vpop.f32.mrb[7].mxu1 }
 0x6de   :  { %v5120_v57 = vadd.f32 %v5119_v7, %v5118_v4 }
 0x6e0   :  { %v3674_v33 = vadd.f32 %v5120_v57, %v5085_v14 }
 0x6e2   :  { %v3744_v60 = vadd.f32 %v3743_v34, %v3674_v33 }
 0x6e4   :  { %v3748_v41 = vmul.f32 0.0121951215, %v3744_v60 }
 0x6e6   :  { %5040 = vmatmul.mubr.msk.f32.vlgmr.msra.gmra.mrb[8].mxu1 %vm3761_vm4, %v3748_v41 }
 0x6e7   :  { %6224 = vmatpush1.bf16.msra.mxu1 %v8199_v22  ;;  %3900 = vmatprep.mubr.f32.mxu1 %v8398_v56 }
 0x6e8   :  { %6226 = vmatprep.subr.bf16.mxu1 %v8201_v6 }
 0x6ea   :  { %5041 = vmatmul.mubr.msk.f32.vlgmr.msra.gmra.mrb[10].mxu1 %vm3761_vm4, %v3748_v41 }
 0x6eb   :  { %6228 = vmatpush1.bf16.msra.mxu1 %v8206_v44  ;;  %3971 = vmatprep.mubr.f32.mxu1 %v8398_v56 }
 0x6ec   :  { %6230 = vmatprep.subr.bf16.mxu1 %v7967_v0 }
 0x6ee   :  { %5042 = vmatmul.mubr.msk.f32.vlgmr.msra.gmra.mrb[12].mxu1 %vm3761_vm4, %v3748_v41 }
 0x6ef   :  { %6232 = vmatpush3.bf16.msra.mxu1 %v7974_v47 }
 0x6f0   :  { %6234 = vmatprep.subr.bf16.mxu1 %v7976_v11 }
 0x6f3   :  { %6236 = vmatpush3.bf16.msra.mxu1 %v7981_v43 }
 0x6f4   :  { %6238 = vmatprep.subr.bf16.mxu1 %v7984_v28 }
 0x6f7   :  { %6240 = vmatpush3.bf16.msra.mxu1 %v7987_v58 }
 0x6f8   :  { %6242 = vmatprep.subr.bf16.mxu1 %v7990_v52 }
 0x6fb   :  { %6244 = vmatpush3.bf16.msra.mxu1 %v7993_v23 }
 0x6fc   :  { %6246 = vmatprep.subr.bf16.mxu1 %v7996_v38 }
 0x6ff   :  { %6248 = vmatpush3.bf16.msra.mxu1 %v7999_v49 }
 0x700   :  { %6250 = vmatprep.subr.bf16.mxu1 %v8002_v59 }
 0x703   :  { %6252 = vmatpush3.bf16.msra.mxu1 %v8005_v9 }
 0x704   :  { %6254 = vmatprep.subr.bf16.mxu1 %v8008_v19 }
 0x707   :  { %6256 = vmatpush3.bf16.msra.mxu1 %v8011_v30 }
 0x708   :  { %6258 = vmatprep.subr.bf16.mxu1 %v8014_v42 }
 0x70b   :  { %6260 = vmatpush3.bf16.msra.mxu1 %v8017_v53 }
 0x70c   :  { %6262 = vmatprep.subr.bf16.mxu1 %v8037_v12 }
 0x7b9   :  { %v3831_v0 = vpop.f32.mrb[8].mxu1 }
 0x7ba   :  { %v3981_v47 = vrot.slane %v3831_v0, %v8023_v3  ;;  %v3833_v11 = vpop.f32.mrb[9].mxu1 }
 0x7bb   :  { %v3985_v43 = vrot.slane %v3833_v11, %v8023_v3 }
 0x7bc   :  { %v8233_v28 = vsub.f32 %v8031_v16, %v3981_v47 }
 0x7bd   :  { %v8236_v58 = vsub.f32 %v8033_v37, %v3985_v43  ;;  %v3902_v52 = vpop.f32.mrb[10].mxu1 }
 0x7be   :  { %v4008_v23 = vmul.f32 %v8233_v28, %v8233_v28  ;;  %v3904_v38 = vpop.f32.mrb[11].mxu1 }
 0x7bf   :  { %v4009_v49 = vmul.f32 %v8236_v58, %v8236_v58  ;;  %v3993_v59 = vrot.slane %v3904_v38, %v8023_v3 }
 0x7c0   :  { %v4014_v9 = vsel %vm847_vm2, %v4008_v23, 0.0 }
 0x7c1   :  { %v4015_v19 = vrot.slane %v4014_v9, 4  ;;  %v4021_v30 = vsel %vm847_vm2, %v4009_v49, 0.0  ;;  %v8246_v42 = vsub.f32 %v8159_v17, %v3993_v59  ;;  %v3973_v53 = vpop.f32.mrb[12].mxu1 }
 0x7c2   :  { %v4022_v16 = vrot.slane %v4021_v30, 4  ;;  %v3997_v37 = vrot.slane %v3973_v53, %v8023_v3  ;;  %v3975_v12 = vpop.f32.mrb[13].mxu1  ;;  %v8399_v53 = vld [vmem:[#allocation39_spill] sm:$0xff] }
 0x7c3   :  { %v4016_v36 = vadd.f32 %v4015_v19, %v4014_v9  ;;  %v4011_v54 = vmul.f32 %v8246_v42, %v8246_v42  ;;  %v4001_v29 = vrot.slane %v3975_v12, %v8023_v3  ;;  %v8403_v12 = vld [vmem:[#allocation43_spill] sm:$0xff] }
 0x7c4   :  { %v4023_v61 = vadd.f32 %v4022_v16, %v4021_v30  ;;  %v8253_v14 = vsub.f32 %v8145_v15, %v3997_v37  ;;  %v8402_v37 = vld [vmem:[#allocation42_spill] sm:$0xff] }
 0x7c5   :  { %v4017_v45 = vrot.slane %v4016_v36, 2  ;;  %v4035_v21 = vsel %vm847_vm2, %v4011_v54, 0.0  ;;  %v8257_v17 = vsub.f32 %v8147_v46, %v4001_v29  ;;  %v3989_v46 = vrot.slane %v3902_v52, %v8023_v3  ;;  %v8404_v54 = vld [vmem:[#allocation44_spill] sm:$0xff]  ;;  %v8406_v29 = vld [vmem:[#allocation46_spill] sm:$0xff] }
 0x7c6   :  { %v4036_v32 = vrot.slane %v4035_v21, 4  ;;  %v4012_v25 = vmul.f32 %v8253_v14, %v8253_v14  ;;  %v4024_v26 = vrot.slane %v4023_v61, 2 }
 0x7c7   :  { %v4013_v40 = vmul.f32 %v8257_v17, %v8257_v17  ;;  %v4018_v34 = vadd.f32 %v4017_v45, %v4016_v36  ;;  %v8267_v47 = vsub.f32 %v8157_v20, %v3989_v46  ;;  %v4569_v45 = vld [vmem:[#allocation19 + $0x188] sm:$0xff] }
 0x7c8   :  { %v4037_v1 = vadd.f32 %v4036_v32, %v4035_v21  ;;  %v4042_v4 = vsel %vm847_vm2, %v4012_v25, 0.0  ;;  %v4025_v15 = vadd.f32 %v4024_v26, %v4023_v61  ;;  %v4568_v61 = vld [vmem:[#allocation19 + $0x180] sm:$0xff]  ;;  %v4553_v25 = vld [vmem:[#allocation19 + $0x108] sm:$0xff] }
 0x7c9   :  { %v4043_v7 = vrot.slane %v4042_v4, 4  ;;  %v4049_v57 = vsel %vm3437_vm1, %v4013_v40, 0.0  ;;  %v4019_v33 = vrot.slane %v4018_v34, 1  ;;  %v4010_v59 = vmul.f32 %v8267_v47, %v8267_v47  ;;  %v4552_v21 = vld [vmem:[#allocation19 + $0x100] sm:$0xff]  ;;  %v4570_v40 = vld [vmem:[#allocation19 + $0x190] sm:$0xff] }
 0x7ca   :  { %v4050_v35 = vrot.slane %v4049_v57, 4  ;;  %v4026_v18 = vrot.slane %v4025_v15, 1  ;;  %v4038_v51 = vrot.slane %v4037_v1, 2  ;;  %v6373_v32 = vpack.c.bf16 %v4569_v45, %v4568_v61  ;;  %v4521_v61 = vld [vmem:[#allocation19 + $0x8] sm:$0xff]  ;;  %v4538_v45 = vld [vmem:[#allocation19 + $0x90] sm:$0xff] }
 0x7cb   :  { %v4044_v8 = vadd.f32 %v4043_v7, %v4042_v4  ;;  %v4020_v0 = vadd.f32 %v4019_v33, %v4018_v34  ;;  %v4028_v30 = vsel %vm847_vm2, %v4010_v59, 0.0  ;;  %v6375_v26 = vpack.c.bf16 %v4553_v25, %v4552_v21  ;;  %v4571_v34 = vld [vmem:[#allocation19 + $0x198] sm:$0xff]  ;;  %v4573_v7 = vld [vmem:[#allocation19 + $0x1a8] sm:$0xff] }
 0x7cc   :  { %v4051_v60 = vadd.f32 %v4050_v35, %v4049_v57  ;;  %v4027_v41 = vadd.f32 %v4026_v18, %v4025_v15  ;;  %v4039_v24 = vadd.f32 %v4038_v51, %v4037_v1  ;;  %6374 = vmatprep.subr.bf16.mxu0 %v6373_v32  ;;  %v4554_v1 = vld [vmem:[#allocation19 + $0x110] sm:$0xff]  ;;  %v6377_v4 = vpack.c.bf16 %v4571_v34, %v4570_v40  ;;  %v4556_v57 = vld [vmem:[#allocation19 + $0x120] sm:$0xff]  ;;  %v4557_v33 = vld [vmem:[#allocation19 + $0x128] sm:$0xff] }
 0x7cd   :  { %v4045_v5 = vrot.slane %v4044_v8, 2  ;;  %v6383_v46 = vpack.c.bf16 %v4557_v33, %v4556_v57  ;;  %v4574_v35 = vld [vmem:[#allocation19 + $0x1b0] sm:$0xff]  ;;  %v4575_v18 = vld [vmem:[#allocation19 + $0x1b8] sm:$0xff]  ;;  %v4540_v40 = vld [vmem:[#allocation19 + $0xa0] sm:$0xff] }
 0x7ce   :  { %v4052_v11 = vrot.slane %v4051_v60, 2  ;;  %4123 = vmatprep.mubr.f32.mxu1 %v4027_v41  ;;  %v4040_v43 = vrot.slane %v4039_v24, 1  ;;  %v4558_v51 = vld [vmem:[#allocation19 + $0x130] sm:$0xff]  ;;  %v4539_v21 = vld [vmem:[#allocation19 + $0x98] sm:$0xff]  ;;  %v4541_v34 = vld [vmem:[#allocation19 + $0xa8] sm:$0xff] }
 0x7cf   :  { %4124 = vmatmul.mubr.f32.vlgmr.msra.gmra.mrb[14].mxu1 %v4020_v0  ;;  %v4046_v23 = vadd.f32 %v4045_v5, %v4044_v8  ;;  %v6385_v8 = vpack.c.bf16 %v4575_v18, %v4574_v35  ;;  %v4577_v5 = vld [vmem:[#allocation19 + $0x1c8] sm:$0xff]  ;;  %v4560_v0 = vld [vmem:[#allocation19 + $0x140] sm:$0xff]  ;;  %v6345_v25 = vpack.c.bf16 %v4539_v21, %v4538_v45  ;;  %v4526_v57 = vld [vmem:[#allocation19 + $0x30] sm:$0xff] }
 0x7d0   :  { %6264 = vmatpush3.bf16.msra.mxu1 %v8041_v63  ;;  %v4041_v52 = vadd.f32 %v4040_v43, %v4039_v24  ;;  %v4053_v38 = vadd.f32 %v4052_v11, %v4051_v60  ;;  %v4029_v63 = vrot.slane %v4028_v30, 4  ;;  %v4559_v60 = vld [vmem:[#allocation19 + $0x138] sm:$0xff]  ;;  %v4576_v24 = vld [vmem:[#allocation19 + $0x1c0] sm:$0xff]  ;;  %v4561_v43 = vld [vmem:[#allocation19 + $0x148] sm:$0xff] }
 0x7d1   :  { %6266 = vmatprep.subr.bf16.mxu1 %v8047_v48  ;;  %v4047_v49 = vrot.slane %v4046_v23, 1  ;;  %v6387_v41 = vpack.c.bf16 %v4559_v60, %v4558_v51  ;;  %v6389_v11 = vpack.c.bf16 %v4577_v5, %v4576_v24  ;;  %v4544_v33 = vld [vmem:[#allocation19 + $0xc0] sm:$0xff]  ;;  %v4546_v60 = vld [vmem:[#allocation19 + $0xd0] sm:$0xff]  ;;  %v4567_v21 = vld [vmem:[#allocation19 + $0x178] sm:$0xff] }
 0x7d2   :  { %4193 = vmatprep.mubr.f32.mxu1 %v4041_v52  ;;  %v4054_v9 = vrot.slane %v4053_v38, 1  ;;  %v4030_v48 = vadd.f32 %v4029_v63, %v4028_v30  ;;  %v4578_v52 = vld [vmem:[#allocation19 + $0x1d0] sm:$0xff]  ;;  %v4528_v51 = vld [vmem:[#allocation19 + $0x40] sm:$0xff] }
 0x7d3   :  { %v4048_v19 = vadd.f32 %v4047_v49, %v4046_v23  ;;  %v6391_v23 = vpack.c.bf16 %v4561_v43, %v4560_v0  ;;  %v4530_v0 = vld [vmem:[#allocation19 + $0x50] sm:$0xff]  ;;  %v4548_v43 = vld [vmem:[#allocation19 + $0xe0] sm:$0xff] }
 0x7d4   :  { %6268 = vmatpush3.bf16.msra.mxu1 %v8051_v10  ;;  %v4055_v20 = vadd.f32 %v4054_v9, %v4053_v38  ;;  %v8400_v10 = vld [vmem:[#allocation40_spill] sm:$0xff]  ;;  %v4031_v16 = vrot.slane %v4030_v48, 2 }
 0x7d5   :  { %6270 = vmatprep.subr.bf16.mxu1 %v8055_v27  ;;  %v8401_v27 = vld [vmem:[#allocation41_spill] sm:$0xff]  ;;  %v4566_v45 = vld [vmem:[#allocation19 + $0x170] sm:$0xff] }
 0x7d6   :  { %5043 = vmatprep.mubr.msk.f32.mxu0 %vm3533_vm3, %v4055_v20  ;;  %v4032_v36 = vadd.f32 %v4031_v16, %v4030_v48  ;;  %v4579_v38 = vld [vmem:[#allocation19 + $0x1d8] sm:$0xff] }
 0x7d7   :  { %4264 = vmatmul.mubr.f32.vlgmr.msra.gmra.mrb[12].mxu0 %v4048_v19  ;;  %v6393_v49 = vpack.c.bf16 %v4579_v38, %v4578_v52 }
 0x7d8   :  { %6272 = vmatpush3.bf16.msra.mxu1 %v8057_v2  ;;  %v8405_v2 = vld [vmem:[#allocation45_spill] sm:$0xff]  ;;  %6376 = vmatpush3.bf16.msra.mxu0 %v6375_v26  ;;  %v4522_v26 = vld [vmem:[#allocation19 + $0x10] sm:$0xff] }
 0x7d9   :  { %6274 = vmatprep.subr.bf16.mxu1 %v8063_v55  ;;  %v4033_v55 = vrot.slane %v4032_v36, 1  ;;  %6378 = vmatprep.subr.bf16.mxu0 %v6377_v4  ;;  %v4524_v4 = vld [vmem:[#allocation19 + $0x20] sm:$0xff] }
 0x7dc   :  { %6276 = vmatpush3.bf16.msra.mxu1 %v8065_v62  ;;  %v4034_v62 = vadd.f32 %v4033_v55, %v4032_v36  ;;  %v4537_v55 = vld [vmem:[#allocation19 + $0x88] sm:$0xff] }
 0x7dd   :  { %6278 = vmatprep.subr.bf16.mxu1 %v8399_v53 }
 0x7e0   :  { %6280 = vmatpush3.bf16.msra.mxu1 %v8400_v10 }
 0x7e1   :  { %6282 = vmatprep.subr.bf16.mxu1 %v8401_v27 }
 0x7e4   :  { %6284 = vmatpush3.bf16.msra.mxu1 %v8402_v37 }
 0x7e5   :  { %6286 = vmatprep.subr.bf16.mxu1 %v8403_v12  ;;  %v4269_v12 = vld [vmem:[#allocation15] sm:$0x1] }
 0x7e8   :  { %6288 = vmatpush3.bf16.msra.mxu1 %v8404_v54 }
 0x7e9   :  { %6290 = vmatprep.subr.bf16.mxu1 %v8405_v2  ;;  %v4536_v2 = vld [vmem:[#allocation19 + $0x80] sm:$0xff] }
 0x7ec   :  { %6292 = vmatpush3.bf16.msra.mxu1 %v8406_v29  ;;  %v6341_v29 = vpack.c.bf16 %v4537_v55, %v4536_v2 }
 0x7ed   :  { %6330 = vmatprep.subr.bf16.mxu1 %v8190_v13  ;;  %v4555_v13 = vld [vmem:[#allocation19 + $0x118] sm:$0xff] }
 0x7ee   :  { %v6379_v15 = vpack.c.bf16 %v4555_v13, %v4554_v1  ;;  %v6349_v1 = vpack.c.bf16 %v4541_v34, %v4540_v40  ;;  %v4525_v13 = vld [vmem:[#allocation19 + $0x28] sm:$0xff]  ;;  %v4584_v40 = vld [vmem:[#allocation19 + $0x200] sm:$0xff] }
 0x7ef   :  { %4194 = vmatmul.mubr.f32.vlgmr.msra.gmra.mrb[16].mxu1 %v4034_v62  ;;  %v4520_v62 = vld [vmem:[#allocation19] sm:$0xff]  ;;  %v4585_v34 = vld [vmem:[#allocation19 + $0x208] sm:$0xff] }
 0x7f0   :  { %6332 = vmatpush1.bf16.msra.mxu1 %v8192_v31  ;;  %4341 = vmatprep.mubr.f32.mxu1 %v8398_v56  ;;  %v4572_v31 = vld [vmem:[#allocation19 + $0x1a0] sm:$0xff]  ;;  %v6343_v32 = vpack.c.bf16 %v4521_v61, %v4520_v62  ;;  %v4583_v62 = vld [vmem:[#allocation19 + $0x1f8] sm:$0xff] }
 0x7f1   :  { %6334 = vmatprep.subr.bf16.mxu1 %v8196_v50  ;;  %6380 = vmatpush3.bf16.msra.mxu0 %v6379_v15  ;;  %v6381_v50 = vpack.c.bf16 %v4573_v7, %v4572_v31  ;;  %v4542_v15 = vld [vmem:[#allocation19 + $0xb0] sm:$0xff]  ;;  %v4543_v31 = vld [vmem:[#allocation19 + $0xb8] sm:$0xff] }
 0x7f2   :  { %v6353_v7 = vpack.c.bf16 %v4543_v31, %v4542_v15 }
 0x7f3   :  { %6382 = vmatprep.subr.bf16.mxu0 %v6381_v50  ;;  %v4527_v50 = vld [vmem:[#allocation19 + $0x38] sm:$0xff] }
 0x7f4   :  { %v6355_v35 = vpack.c.bf16 %v4527_v50, %v4526_v57  ;;  %v4587_v57 = vld [vmem:[#allocation19 + $0x218] sm:$0xff] }
 0x7f5   :  { %6384 = vmatpush3.bf16.msra.mxu0 %v6383_v46  ;;  %v4545_v46 = vld [vmem:[#allocation19 + $0xc8] sm:$0xff] }
 0x7f6   :  { %6386 = vmatprep.subr.bf16.mxu0 %v6385_v8  ;;  %v6357_v18 = vpack.c.bf16 %v4545_v46, %v4544_v33  ;;  %v4529_v8 = vld [vmem:[#allocation19 + $0x48] sm:$0xff] }
 0x7f7   :  { %v6359_v24 = vpack.c.bf16 %v4529_v8, %v4528_v51  ;;  %v4589_v51 = vld [vmem:[#allocation19 + $0x228] sm:$0xff] }
 0x7f9   :  { %6388 = vmatpush3.bf16.msra.mxu0 %v6387_v41  ;;  %v4547_v41 = vld [vmem:[#allocation19 + $0xd8] sm:$0xff] }
 0x7fa   :  { %6390 = vmatprep.subr.bf16.mxu0 %v6389_v11  ;;  %v6361_v5 = vpack.c.bf16 %v4547_v41, %v4546_v60  ;;  %v4531_v11 = vld [vmem:[#allocation19 + $0x58] sm:$0xff] }
 0x7fb   :  { %v6363_v52 = vpack.c.bf16 %v4531_v11, %v4530_v0  ;;  %v4593_v0 = vld [vmem:[#allocation19 + $0x248] sm:$0xff] }
 0x7fd   :  { %6392 = vmatpush3.bf16.msra.mxu0 %v6391_v23  ;;  %v4549_v23 = vld [vmem:[#allocation19 + $0xe8] sm:$0xff] }
 0x7fe   :  { %6394 = vmatprep.subr.bf16.mxu0 %v6393_v49  ;;  %v6365_v38 = vpack.c.bf16 %v4549_v23, %v4548_v43  ;;  %v4532_v49 = vld [vmem:[#allocation19 + $0x60] sm:$0xff]  ;;  %v4594_v43 = vld [vmem:[#allocation19 + $0x250] sm:$0xff] }
 0x8a2   :  { %v5153_v59 = vpop.f32.mrb[14].mxu1 }
 0x8a3   :  { %v5154_v9 = vpop.f32.mrb[15].mxu1 }
 0x8a4   :  { %v5155_v20 = vadd.f32 %v5154_v9, %v5153_v59  ;;  %v4533_v59 = vld [vmem:[#allocation19 + $0x68] sm:$0xff] }
 0x8a5   :  { %v6367_v9 = vpack.c.bf16 %v4533_v59, %v4532_v49  ;;  %v4598_v59 = vld [vmem:[#allocation19 + $0x270] sm:$0xff] }
 0x8aa   :  { %v4265_v19 = vpop.f32.mrb[12].mxu0 }
 0x8ab   :  { %v4267_v30 = vpop.f32.mrb[13].mxu0 }
 0x8c2   :  { %v5188_v63 = vpop.f32.mrb[16].mxu1 }
 0x8c3   :  { %v5189_v48 = vpop.f32.mrb[17].mxu1 }
 0x8c4   :  { %v5190_v53 = vadd.f32 %v5189_v48, %v5188_v63  ;;  %v4550_v63 = vld [vmem:[#allocation19 + $0xf0] sm:$0xff]  ;;  %v4551_v48 = vld [vmem:[#allocation19 + $0xf8] sm:$0xff] }
 0x8c6   :  { %v4196_v10 = vadd.f32 %v5190_v53, %v5155_v20  ;;  %v4562_v20 = vld [vmem:[#allocation19 + $0x150] sm:$0xff]  ;;  %v6369_v53 = vpack.c.bf16 %v4551_v48, %v4550_v63 }
 0x8c7   :  { %v4602_v48 = vld [vmem:[#allocation19 + $0x290] sm:$0xff] }
 0x8c8   :  { %v4266_v16 = vadd.f32 %v4265_v19, %v4196_v10  ;;  %v4563_v19 = vld [vmem:[#allocation19 + $0x158] sm:$0xff]  ;;  %v4534_v10 = vld [vmem:[#allocation19 + $0x70] sm:$0xff] }
 0x8c9   :  { %v6395_v30 = vpack.c.bf16 %v4563_v19, %v4562_v20  ;;  %v4600_v19 = vld [vmem:[#allocation19 + $0x280] sm:$0xff] }
 0x8ca   :  { %v4270_v27 = vmul.f32 0.0121951215, %v4266_v16  ;;  %v4535_v16 = vld [vmem:[#allocation19 + $0x78] sm:$0xff] }
 0x8cb   :  { %6396 = vmatpush3.bf16.msra.mxu0 %v6395_v30  ;;  %v4601_v30 = vld [vmem:[#allocation19 + $0x288] sm:$0xff] }
 0x8cc   :  { %v4271_v37 = vadd.f32 1e-05, %v4270_v27  ;;  %v4580_v27 = vld [vmem:[#allocation19 + $0x1e0] sm:$0xff]  ;;  %v6430_v63 = vpack.c.bf16 %v4601_v30, %v4600_v19 }
 0x8ce   :  { %6550 = vrsqrt.f32 %v4271_v37  ;;  %v6371_v37 = vpack.c.bf16 %v4535_v16, %v4534_v10  ;;  %v4604_v16 = vld [vmem:[#allocation19 + $0x2a0] sm:$0xff] }
 0x8d8   :  { %v6551_v36 = vpop.eup %6550 }
 0x8d9   :  { %v4273_v54 = vmul.f32 %v6551_v36, %v4269_v12  ;;  %v4581_v12 = vld [vmem:[#allocation19 + $0x1e8] sm:$0xff]  ;;  %v4564_v36 = vld [vmem:[#allocation19 + $0x160] sm:$0xff] }
 0x8da   :  { %v6397_v2 = vpack.c.bf16 %v4581_v12, %v4580_v27  ;;  %v4605_v27 = vld [vmem:[#allocation19 + $0x2a8] sm:$0xff]  ;;  %v4606_v12 = vld [vmem:[#allocation19 + $0x2b0] sm:$0xff] }
 0x8db   :  { %5044 = vmatmul.mubr.msk.f32.vlgmr.msra.gmra.mrb[18].mxu1 %vm3761_vm4, %v4273_v54 }
 0x8dc   :  { %6336 = vmatpush1.bf16.msra.mxu1 %v8199_v22  ;;  %4412 = vmatprep.mubr.f32.mxu1 %v8398_v56  ;;  %v4523_v22 = vld [vmem:[#allocation19 + $0x18] sm:$0xff] }
 0x8dd   :  { %6338 = vmatprep.subr.bf16.mxu1 %v8201_v6  ;;  %v6347_v6 = vpack.c.bf16 %v4523_v22, %v4522_v26  ;;  %6398 = vmatprep.subr.bf16.mxu0 %v6397_v2 }
 0x8df   :  { %5045 = vmatmul.mubr.msk.f32.vlgmr.msra.gmra.mrb[20].mxu1 %vm3761_vm4, %v4273_v54 }
 0x8e0   :  { %6340 = vmatpush1.bf16.msra.mxu1 %v8206_v44  ;;  %4483 = vmatprep.mubr.f32.mxu1 %v8398_v56  ;;  %v6351_v44 = vpack.c.bf16 %v4525_v13, %v4524_v4  ;;  %v6406_v13 = vpack.c.bf16 %v4585_v34, %v4584_v40  ;;  %v4872_v40 = vld [vmem:[#allocation25 + $0x38] sm:$0xff] }
 0x8e1   :  { %6342 = vmatprep.subr.bf16.mxu1 %v6341_v29  ;;  %v4582_v29 = vld [vmem:[#allocation19 + $0x1f0] sm:$0xff] }
 0x8e2   :  { %v6401_v61 = vpack.c.bf16 %v4583_v62, %v4582_v29  ;;  %v4865_v29 = vld [vmem:[#allocation25] sm:$0xff]  ;;  %v4866_v62 = vld [vmem:[#allocation25 + $0x8] sm:$0xff] }
 0x8e3   :  { %5046 = vmatmul.mubr.msk.f32.vlgmr.msra.gmra.mrb[22].mxu1 %vm3761_vm4, %v4273_v54  ;;  %v4565_v54 = vld [vmem:[#allocation19 + $0x168] sm:$0xff] }
 0x8e4   :  { %6344 = vmatpush3.bf16.msra.mxu1 %v6343_v32  ;;  %v6399_v55 = vpack.c.bf16 %v4565_v54, %v4564_v36  ;;  %v6403_v32 = vpack.c.bf16 %v4567_v21, %v4566_v45  ;;  %v4607_v36 = vld [vmem:[#allocation19 + $0x2b8] sm:$0xff] }
 0x8e5   :  { %6346 = vmatprep.subr.bf16.mxu1 %v6345_v25  ;;  %v6439_v54 = vpack.c.bf16 %v4607_v36, %v4606_v12  ;;  %v4867_v45 = vld [vmem:[#allocation25 + $0x10] sm:$0xff]  ;;  %v4868_v21 = vld [vmem:[#allocation25 + $0x18] sm:$0xff] }
 0x8e6   :  { %6400 = vmatpush3.bf16.msra.mxu0 %v6399_v55 }
 0x8e7   :  { %6402 = vmatprep.subr.bf16.mxu0 %v6401_v61  ;;  %v6442_v61 = vpack.c.bf16 %v4866_v62, %v4865_v29  ;;  %v5050_v29 = vld [vmem:[#allocation27] ss:$0 sm:$0xff] }
 0x8e8   :  { %6348 = vmatpush3.bf16.msra.mxu1 %v6347_v6 }
 0x8e9   :  { %6350 = vmatprep.subr.bf16.mxu1 %v6349_v1 }
 0x8ea   :  { %6404 = vmatpush3.bf16.msra.mxu0 %v6403_v32  ;;  %v6445_v32 = vpack.c.bf16 %v4868_v21, %v4867_v45 }
 0x8eb   :  { %6441 = vmatprep.subr.bf16.mxu0 %v8397_v39 }
 0x8ec   :  { %6352 = vmatpush3.bf16.msra.mxu1 %v6351_v44 }
 0x8ed   :  { %6354 = vmatprep.subr.bf16.mxu1 %v6353_v7  ;;  %v4586_v7 = vld [vmem:[#allocation19 + $0x210] sm:$0xff] }
 0x8f0   :  { %6356 = vmatpush3.bf16.msra.mxu1 %v6355_v35  ;;  %v6409_v35 = vpack.c.bf16 %v4587_v57, %v4586_v7  ;;  %v4878_v7 = vld [vmem:[#allocation25 + $0x68] sm:$0xff] }
 0x8f1   :  { %6358 = vmatprep.subr.bf16.mxu1 %v6357_v18 }
 0x8f4   :  { %6360 = vmatpush3.bf16.msra.mxu1 %v6359_v24  ;;  %v4591_v24 = vld [vmem:[#allocation19 + $0x238] sm:$0xff] }
 0x8f5   :  { %6362 = vmatprep.subr.bf16.mxu1 %v6361_v5  ;;  %v4592_v5 = vld [vmem:[#allocation19 + $0x240] sm:$0xff] }
 0x8f6   :  { %v6418_v11 = vpack.c.bf16 %v4593_v0, %v4592_v5 }
 0x8f8   :  { %6364 = vmatpush3.bf16.msra.mxu1 %v6363_v52  ;;  %v4596_v52 = vld [vmem:[#allocation19 + $0x260] sm:$0xff] }
 0x8f9   :  { %6366 = vmatprep.subr.bf16.mxu1 %v6365_v38  ;;  %v4597_v38 = vld [vmem:[#allocation19 + $0x268] sm:$0xff] }
 0x8fa   :  { %v6424_v49 = vpack.c.bf16 %v4597_v38, %v4596_v52 }
 0x8fc   :  { %6368 = vmatpush3.bf16.msra.mxu1 %v6367_v9  ;;  %v4599_v9 = vld [vmem:[#allocation19 + $0x278] sm:$0xff] }
 0x8fd   :  { %6370 = vmatprep.subr.bf16.mxu1 %v6369_v53  ;;  %v6427_v20 = vpack.c.bf16 %v4599_v9, %v4598_v59  ;;  %v4603_v53 = vld [vmem:[#allocation19 + $0x298] sm:$0xff] }
 0x8fe   :  { %v6433_v10 = vpack.c.bf16 %v4603_v53, %v4602_v48 }
 0x900   :  { %6372 = vmatpush3.bf16.msra.mxu1 %v6371_v37  ;;  %v6436_v37 = vpack.c.bf16 %v4605_v27, %v4604_v16  ;;  %v4850_v27 = vld [vmem:[#allocation22] sm:$0x1] }
 0x901   :  { %6405 = vmatprep.subr.bf16.mxu1 %v8397_v39 }
 0x9ae   :  { %v4343_v25 = vpop.f32.mrb[18].mxu1 }
 0x9af   :  { %v4493_v26 = vrot.slane %v4343_v25, %v8023_v3  ;;  %v4345_v22 = vpop.f32.mrb[19].mxu1  ;;  %v4869_v25 = vld [vmem:[#allocation25 + $0x20] sm:$0xff] }
 0x9b0   :  { %v4497_v6 = vrot.slane %v4345_v22, %v8023_v3 }
 0x9b1   :  { %v4514_v15 = vmul.f32 %v4493_v26, %v8233_v28  ;;  %v4588_v28 = vld [vmem:[#allocation19 + $0x220] sm:$0xff]  ;;  %v4870_v26 = vld [vmem:[#allocation25 + $0x28] sm:$0xff] }
 0x9b2   :  { %v4515_v1 = vmul.f32 %v4497_v6, %v8236_v58  ;;  %v4414_v4 = vpop.f32.mrb[20].mxu1  ;;  %v6412_v41 = vpack.c.bf16 %v4589_v51, %v4588_v28  ;;  %v6448_v22 = vpack.c.bf16 %v4870_v26, %v4869_v25  ;;  %v4873_v6 = vld [vmem:[#allocation25 + $0x40] sm:$0xff]  ;;  %v5047_v28 = vld [vmem:[#allocation21] ss:$0 sm:$0xff] }
 0x9b3   :  { %v4501_v31 = vrot.slane %v4414_v4, %v8023_v3  ;;  %v4416_v44 = vpop.f32.mrb[21].mxu1 }
 0x9b4   :  { %v4505_v50 = vrot.slane %v4416_v44, %v8023_v3  ;;  %4682 = vmatprep.mubr.f32.mxu1 %v4515_v1  ;;  %v4874_v1 = vld [vmem:[#allocation25 + $0x48] sm:$0xff]  ;;  %v4877_v44 = vld [vmem:[#allocation25 + $0x60] sm:$0xff] }
 0x9b5   :  { %4683 = vmatmul.mubr.f32.vlgmr.msra.gmra.mrb[24].mxu1 %v4514_v15  ;;  %v4516_v58 = vmul.f32 %v4501_v31, %v8267_v47  ;;  %v6454_v4 = vpack.c.bf16 %v4874_v1, %v4873_v6  ;;  %v4876_v15 = vld [vmem:[#allocation25 + $0x58] sm:$0xff]  ;;  %v6460_v57 = vpack.c.bf16 %v4878_v7, %v4877_v44 }
 0x9b6   :  { %v4517_v33 = vmul.f32 %v4505_v50, %v8246_v42  ;;  %6407 = vmatpush1.bf16.msra.mxu1 %v6406_v13  ;;  %v8309_v46 = vpop.f32.mrb[22].mxu1  ;;  %v4590_v42 = vld [vmem:[#allocation19 + $0x230] sm:$0xff] }
 0x9b7   :  { %v4487_v18 = vpop.f32.mrb[23].mxu1  ;;  %6408 = vmatprep.subr.bf16.mxu1 %v8397_v39  ;;  %v6415_v47 = vpack.c.bf16 %v4591_v24, %v4590_v42  ;;  %v4509_v2 = vrot.slane %v8309_v46, %v8023_v3  ;;  %v4875_v13 = vld [vmem:[#allocation25 + $0x50] sm:$0xff] }
 0x9b8   :  { %v4513_v8 = vrot.slane %v4487_v18, %v8023_v3  ;;  %4752 = vmatprep.mubr.f32.mxu0 %v4517_v33  ;;  %v6457_v31 = vpack.c.bf16 %v4876_v15, %v4875_v13  ;;  %v4879_v50 = vld [vmem:[#allocation25 + $0x70] sm:$0xff]  ;;  %v4880_v33 = vld [vmem:[#allocation25 + $0x78] sm:$0xff] }
 0x9b9   :  { %4753 = vmatmul.mubr.f32.vlgmr.msra.gmra.mrb[14].mxu0 %v4516_v58  ;;  %v4518_v55 = vmul.f32 %v4509_v2, %v8253_v14  ;;  %v4871_v14 = vld [vmem:[#allocation25 + $0x30] sm:$0xff]  ;;  %v6463_v46 = vpack.c.bf16 %v4880_v33, %v4879_v50 }
 0x9ba   :  { %v4519_v60 = vmul.f32 %v4513_v8, %v8257_v17  ;;  %6410 = vmatpush1.bf16.msra.mxu1 %v6409_v35  ;;  %v4595_v17 = vld [vmem:[#allocation19 + $0x258] sm:$0xff]  ;;  %6443 = vmatpush3.bf16.msra.mxu0 %v6442_v61  ;;  %v6451_v34 = vpack.c.bf16 %v4872_v40, %v4871_v14 }
 0x9bb   :  { %6411 = vmatprep.subr.bf16.mxu1 %v8397_v39  ;;  %v6421_v23 = vpack.c.bf16 %v4595_v17, %v4594_v43  ;;  %6444 = vmatprep.subr.bf16.mxu0 %v8397_v39 }
 0x9bc   :  { %5048 = vmatprep.mubr.msk.f32.mxu1 %vm3533_vm3, %v4519_v60  ;;  %5310 = vmatprep.mubr.msk.f32.mxu0 %vm6947_vm5, %v8398_v56 }
 0x9be   :  { %6413 = vmatpush1.bf16.msra.mxu1 %v6412_v41  ;;  %6446 = vmatpush3.bf16.msra.mxu0 %v6445_v32 }
 0x9bf   :  { %6414 = vmatprep.subr.bf16.mxu1 %v8397_v39  ;;  %6447 = vmatprep.subr.bf16.mxu0 %v8397_v39 }
 0x9c2   :  { %6416 = vmatpush1.bf16.msra.mxu1 %v6415_v47  ;;  %6449 = vmatpush3.bf16.msra.mxu0 %v6448_v22 }
 0x9c3   :  { %6417 = vmatprep.subr.bf16.mxu1 %v8397_v39  ;;  %6450 = vmatprep.subr.bf16.mxu0 %v8397_v39 }
 0x9c6   :  { %6419 = vmatpush1.bf16.msra.mxu1 %v6418_v11  ;;  %6452 = vmatpush3.bf16.msra.mxu0 %v6451_v34 }
 0x9c7   :  { %6420 = vmatprep.subr.bf16.mxu1 %v8397_v39  ;;  %6453 = vmatprep.subr.bf16.mxu0 %v8397_v39 }
 0x9ca   :  { %6422 = vmatpush1.bf16.msra.mxu1 %v6421_v23  ;;  %6455 = vmatpush3.bf16.msra.mxu0 %v6454_v4 }
 0x9cb   :  { %6423 = vmatprep.subr.bf16.mxu1 %v8397_v39  ;;  %6456 = vmatprep.subr.bf16.mxu0 %v8397_v39 }
 0x9ce   :  { %6425 = vmatpush1.bf16.msra.mxu1 %v6424_v49  ;;  %6458 = vmatpush3.bf16.msra.mxu0 %v6457_v31 }
 0x9cf   :  { %6426 = vmatprep.subr.bf16.mxu1 %v8397_v39  ;;  %6459 = vmatprep.subr.bf16.mxu0 %v8397_v39 }
 0x9d2   :  { %6428 = vmatpush1.bf16.msra.mxu1 %v6427_v20  ;;  %6461 = vmatpush3.bf16.msra.mxu0 %v6460_v57 }
 0x9d3   :  { %6429 = vmatprep.subr.bf16.mxu1 %v8397_v39  ;;  %6462 = vmatprep.subr.bf16.mxu0 %v8397_v39 }
 0x9d6   :  { %6431 = vmatpush1.bf16.msra.mxu1 %v6430_v63  ;;  %6464 = vmatpush3.bf16.msra.mxu0 %v6463_v46 }
 0x9d7   :  { %6432 = vmatprep.subr.bf16.mxu1 %v8397_v39 }
 0x9da   :  { %6434 = vmatpush1.bf16.msra.mxu1 %v6433_v10 }
 0x9db   :  { %6435 = vmatprep.subr.bf16.mxu1 %v8397_v39 }
 0x9de   :  { %6437 = vmatpush1.bf16.msra.mxu1 %v6436_v37 }
 0x9df   :  { %6438 = vmatprep.subr.bf16.mxu1 %v8397_v39 }
 0x9e2   :  { %6440 = vmatpush1.bf16.msra.mxu1 %v6439_v54  ;;  %v5049_v54 = vld [vmem:[#allocation24] ss:$0 sm:$0xff] }
 0x9e5   :  { %4823 = vmatmul.mubr.f32.vlgmr.msra.gmra.mrb[26].mxu1 %v4518_v55 }
 0xa88   :  { %v5223_v35 = vpop.f32.mrb[24].mxu1 }
 0xa89   :  { %v5224_v58 = vpop.f32.mrb[25].mxu1 }
 0xa8a   :  { %v5225_v18 = vadd.f32 %v5224_v58, %v5223_v35 }
 0xa8c   :  { %v5258_v51 = vpop.f32.mrb[14].mxu0  ;;  %v4685_v60 = vadd.f32 %v5225_v18, %v5047_v28 }
 0xa8d   :  { %v5259_v8 = vpop.f32.mrb[15].mxu0 }
 0xa8e   :  { %v5260_v41 = vadd.f32 %v5259_v8, %v5258_v51 }
 0xa90   :  { %v4755_v42 = vadd.f32 %v5260_v41, %v4685_v60 }
 0xab8   :  { %v4824_v24 = vpop.f32.mrb[26].mxu1 }
 0xab9   :  { %v4825_v47 = vadd.f32 %v4824_v24, %v4755_v42  ;;  %v4826_v5 = vpop.f32.mrb[27].mxu1 }
 0xabb   :  { %v4828_v39 = vmax.f32 %v4825_v47, 0.0 }
 0xabd   :  { %v4829_v0 = vsel %vm847_vm2, %v4828_v39, 0.0 }
 0xabe   :  { %v4830_v11 = vrot.slane %v4829_v0, 4 }
 0xac0   :  { %v4831_v43 = vadd.f32 %v4830_v11, %v4829_v0 }
 0xac2   :  { %v4832_v17 = vrot.slane %v4831_v43, 2 }
 0xac4   :  { %v4833_v23 = vadd.f32 %v4832_v17, %v4831_v43 }
 0xac6   :  { %v4834_v56 = vrot.slane %v4833_v23, 1 }
 0xac8   :  { %v4835_v52 = vadd.f32 %v4834_v56, %v4833_v23 }
 0xaca   :  { %v4837_v38 = vmul.f32 0.5, %v4835_v52 }
 0xacc   :  { %v4838_v49 = vsub.f32 %v4828_v39, %v4837_v38 }
 0xace   :  { %v4839_v59 = vmul.f32 %v4838_v49, %v4838_v49 }
 0xad0   :  { %v4840_v9 = vsel %vm847_vm2, %v4839_v59, 0.0 }
 0xad1   :  { %v4841_v20 = vrot.slane %v4840_v9, 4 }
 0xad3   :  { %v4842_v19 = vadd.f32 %v4841_v20, %v4840_v9 }
 0xad5   :  { %v4843_v30 = vrot.slane %v4842_v19, 2 }
 0xad7   :  { %v4844_v63 = vadd.f32 %v4843_v30, %v4842_v19 }
 0xad9   :  { %v4845_v48 = vrot.slane %v4844_v63, 1 }
 0xadb   :  { %v4846_v53 = vadd.f32 %v4845_v48, %v4844_v63 }
 0xadd   :  { %v4847_v10 = vmul.f32 0.5, %v4846_v53 }
 0xadf   :  { %v4848_v16 = vadd.f32 1e-05, %v4847_v10 }
 0xae1   :  { %6552 = vrsqrt.f32 %v4848_v16 }
 0xaeb   :  { %v6553_v37 = vpop.eup %6552 }
 0xaec   :  { %v4851_v12 = vmul.f32 %v6553_v37, %v4850_v27 }
 0xaee   :  { %v4855_v36 = vrot.slane %v4851_v12, %v8023_v3 }
 0xaf0   :  { %v4856_v2 = vmul.f32 %v4855_v36, %v4838_v49 }
 0xaf2   :  { %v4864_v55 = vadd.f32 %v5049_v54, %v4856_v2 }
 0xaf4   :  { %5311 = vmatmul.mubr.f32.vlgmr.msra.gmra.mrb[16].mxu0 %v4864_v55 }
 0xbc7   :  { %v4954_v62 = vpop.f32.mrb[16].mxu0 }
 0xbc8   :  { %v4955_v61 = vadd.f32 %v5050_v29, %v4954_v62  ;;  %v5312_v45 = vpop.f32.mrb[17].mxu0 }
 0xbca   :  { %4958 = vst [vmem:[#allocation28] sm:$0x3] %v4955_v61 }
 0xbcb   :  { %6881 = shalt.err (!%p6878_p5)
}
 0xbcc   :  { %s6882_s9 = scalar_lea.hbm %s8368_s16, 32 }
 0xbcd   :  { %p6883_p6 = scmp.ne.s32.totalorder %s8368_s16, %s6882_s9  ;;  %p6886_p7 = scmp.lt.u32.totalorder %s6882_s9, %s8368_s16 }
 0xbcf   :  { %p6888_p8 = pnand %p6886_p7, %p6883_p6 }
 0xbd1   :  { %6891 = shalt.err (!%p6888_p8)
}
 0xbd2   :  { %4968 = dma.vmem_to_hbm [thread:$0]  %s4966_s12, 32, %s8368_s16, [#allocation4]  }
 0xbd3   :  { %6910 = dma.done.wait [#allocation4], 32  }
 0xbd4   :  { %6911 = vsyncadd [#allocation4], 4294967264 }
 0xbd5   :  { %4972 = vsyncpa [#allocation3], 1 }
 0xbd6   :  { %4973 = vsyncpa [#allocation11], 1 }
 0xbd7   :  { %4974 = vsyncpa [#allocation14], 1 }
 0xbd8   :  { %4975 = vsyncpa [#allocation17], 1 }
 0xbd9   :  { %4976 = vsyncpa [#allocation20], 1 }
 0xbda   :  { %4977 = vsyncpa [#allocation23], 1 }
 0xbdb   :  { %4978 = vsyncpa [#allocation26], 1 }
 0xbdc   :  { %4979 = vsyncpa [#allocation4], 1 }
 0xbdd   :  { %4980 = vsyncpa [#allocation5], 1 }
 0xbde   :  { %4981 = vsyncpa [#allocation8], 1 }

</bundles_post_ra>
